<compile_context>
chip_gen: v6e
topology: v6e:2x2x1
jax: 0.10.0
libtpu: 0.0.40
codegen_flags: <defaults>
</compile_context>

<pallas_src>
import functools
import math
from typing import NamedTuple, Tuple

import numpy as np
import jax
import jax.numpy as jnp
from jax.experimental import pallas as pl
from jax.experimental.pallas import tpu as pltpu

LEAKY_SLOPE = 0.1
BN_EPS = 1e-5
EXPANSION = 4
NUM_CLASSES = 10
BLOCK_CFG = ((30, 1), (60, 2), (96, 2))   # (planes, stride) for layer1/2/3
LANE = 128
WIDTH_PAD = 128                            # bottleneck width padded to full lanes

_VMEM = pl.BlockSpec(memory_space=pltpu.MemorySpace.VMEM)


def _ceil_to(x, m):
    return (x + m - 1) // m * m


def _lrelu(v):
    return jnp.maximum(v, LEAKY_SLOPE * v)


class _BlockCfg(NamedTuple):
    h: int        # spatial height of the block input
    w: int        # spatial width of the block input
    stride: int
    m1: int       # n*h*w rows entering conv2
    m2: int       # n*oh*ow rows leaving the block
    pad_top: int  # 8-aligned top border inside the shared conv2 slab buffer


class _NetCfg(NamedTuple):
    pool_rows: int                      # n*ph*pw rows per maxpool group
    blocks: Tuple[_BlockCfg, ...]


# ------------------------------ Pallas kernel -------------------------------

def _resnet_kernel(*refs, cfg):
    """Whole ResNet forward in one kernel.  All matmuls hit the MXU with f32
    accumulation; the only VMEM scratch is one shared bf16 slab buffer used by
    the 3x3 convs (single dense store + 9 shifted, mask-multiplied reads)."""
    f32, bf16 = jnp.float32, jnp.bfloat16
    it = iter(refs)
    patches_ref, stem_w_ref, stem_b_ref = next(it), next(it), next(it)
    blk_refs = []
    for bc in cfg.blocks:
        blk_refs.append([next(it) for _ in range(10 if bc.stride > 1 else 9)])
    pool_ref, fcw_ref, fcb_ref = next(it), next(it), next(it)
    out_ref = next(it)
    slab_ref = next(it)

    # ---- stem: 4x4 conv (im2col matmul) + folded BN + LeakyReLU + 2x2 maxpool ----
    # Patch rows are grouped by pool-window position, so the maxpool reduces to
    # three elementwise maxima over contiguous, 8-aligned row groups.
    y0 = jnp.dot(patches_ref[...], stem_w_ref[...],
                 preferred_element_type=f32) + stem_b_ref[...]
    y0 = _lrelu(y0)
    g = cfg.pool_rows
    x_cur = jnp.maximum(jnp.maximum(y0[0 * g:1 * g], y0[1 * g:2 * g]),
                        jnp.maximum(y0[2 * g:3 * g], y0[3 * g:4 * g])).astype(bf16)

    # Zero the shared slab once so masked-out (border / stale) rows stay finite.
    slab_ref[...] = jnp.zeros(slab_ref.shape, slab_ref.dtype)

    feat = None
    for bc, brefs in zip(cfg.blocks, blk_refs):
        if bc.stride > 1:
            (w1_ref, b1_ref, w2_ref, b2_ref, w3_ref, b3_ref,
             wd_ref, bd_ref, tm_ref, sel_ref) = brefs
        else:
            (w1_ref, b1_ref, w2_ref, b2_ref, w3_ref, b3_ref,
             wd_ref, bd_ref, tm_ref) = brefs
            sel_ref = None

        # conv1 (1x1) + folded BN + LeakyReLU -> ONE dense, 8-aligned slab store.
        y1 = jnp.dot(x_cur, w1_ref[...], preferred_element_type=f32) + b1_ref[...]
        slab_ref[pl.ds(bc.pad_top, bc.m1), :] = _lrelu(y1).astype(bf16)

        # conv2 (3x3, pad=1): 9 shifted slab reads, boundary-masked (VPU multiply
        # by a precomputed {0,1} mask), accumulated on the MXU in f32.
        acc = jnp.zeros((bc.m1, LANE), f32)
        for t in range(9):
            di, dj = t // 3, t % 3
            off = bc.pad_top + (di - 1) * bc.w + (dj - 1)
            lhs = slab_ref[pl.ds(off, bc.m1), :] * tm_ref[t]
            acc = acc + jnp.dot(lhs, w2_ref[t], preferred_element_type=f32)

        # Conv stride = one-hot row-selection matmul (commutes with the
        # elementwise bias + LeakyReLU).  Identity (skipped) for stride == 1.
        if sel_ref is not None:
            acc = jnp.dot(sel_ref[...], acc, preferred_element_type=f32)
        y2 = _lrelu(acc + b2_ref[...]).astype(bf16)

        # conv3 (1x1) + folded BN, 1x1 downsample on the block input, residual.
        main = jnp.dot(y2, w3_ref[...], preferred_element_type=f32) + b3_ref[...]
        idn = jnp.dot(x_cur, wd_ref[...], preferred_element_type=f32) + bd_ref[...]
        if sel_ref is not None:
            idn = jnp.dot(sel_ref[...], idn, preferred_element_type=f32)
        feat = _lrelu(main + idn)
        x_cur = feat.astype(bf16)

    # ---- head: global avg-pool (tiny pooling matmul) then the FC layer ----
    pooled = jnp.dot(pool_ref[...], feat, preferred_element_type=f32)
    out_ref[...] = jnp.dot(pooled, fcw_ref[...],
                           preferred_element_type=f32) + fcb_ref[...]


# --------------------- static (trace-time) constant builders ----------------

def _tap_masks(n, h, w):
    """(9, n*h*w, LANE) bf16 {0,1} masks: in-bounds rows for each 3x3 tap (pad=1)."""
    r = np.arange(n * h * w)
    i = (r % (h * w)) // w
    j = r % w
    masks = np.zeros((9, n * h * w, LANE), np.float32)
    for t in range(9):
        di, dj = t // 3, t % 3
        ok = ((i + di - 1 >= 0) & (i + di - 1 < h) &
              (j + dj - 1 >= 0) & (j + dj - 1 < w))
        masks[t] = ok[:, None].astype(np.float32)
    return jnp.asarray(masks, dtype=jnp.bfloat16)


def _sel_matrix(n, h, w, stride):
    """(m2, m1) f32 one-hot row-selection matrix implementing the conv stride."""
    oh, ow = (h - 1) // stride + 1, (w - 1) // stride + 1
    sel = np.zeros((n * oh * ow, n * h * w), np.float32)
    for k in range(n * oh * ow):
        nn, rem = divmod(k, oh * ow)
        oi, oj = divmod(rem, ow)
        sel[k, nn * h * w + oi * stride * w + oj * stride] = 1.0
    return jnp.asarray(sel)


def _pool_matrix(n, pool, nrows):
    """(nrows, n*pool) f32 per-sample average-pooling matrix (rows >= n are zero)."""
    p = np.zeros((nrows, n * pool), np.float32)
    for k in range(n):
        p[k, k * pool:(k + 1) * pool] = 1.0 / pool
    return jnp.asarray(p)


# ------------------------------ model forward -------------------------------

def resnet_forward(x_nchw, params):
    n, _, h, w = x_nchw.shape
    xh = jnp.transpose(x_nchw, (0, 2, 3, 1)).astype(jnp.float32)     # NCHW -> NHWC

    # stem geometry: conv 4x4 / s1 -> (h-3, w-3); maxpool 2x2 / s2 -> (ph, pw)
    ph, pw = (h - 3) // 2, (w - 3) // 2

    # im2col for the stem conv, restricted to the pixels that survive the
    # maxpool and grouped by pool-window position (a, b); K padded 48 -> 128.
    groups = []
    for a in range(2):
        for b in range(2):
            taps = [xh[:, a + ki:a + ki + 2 * ph:2, b + kj:b + kj + 2 * pw:2, :]
                    for ki in range(4) for kj in range(4)]
            groups.append(jnp.concatenate(taps, axis=-1).reshape(n * ph * pw, 48))
    patches = jnp.concatenate(groups, axis=0)
    patches = jnp.pad(patches, ((0, 0), (0, LANE - patches.shape[1])))
    patches = patches.astype(jnp.bfloat16)

    # static per-block geometry
    blocks_cfg, hh, ww = [], ph, pw
    for _planes, stride in BLOCK_CFG:
        oh, ow = (hh - 1) // stride + 1, (ww - 1) // stride + 1
        blocks_cfg.append(_BlockCfg(h=hh, w=ww, stride=stride,
                                    m1=n * hh * ww, m2=n * oh * ow,
                                    pad_top=_ceil_to(ww + 1, 8)))
        hh, ww = oh, ow
    cfg = _NetCfg(pool_rows=n * ph * pw, blocks=tuple(blocks_cfg))
    slab_rows = _ceil_to(max(bc.pad_top + bc.m1 + bc.w + 1 for bc in cfg.blocks), 8)
    nrows = _ceil_to(n, 8)

    args = [patches, params['stem_w'], params['stem_b']]
    for bc, blk in zip(cfg.blocks, params['blocks']):
        args += [blk['w1'], blk['b1'], blk['w2'], blk['b2'],
                 blk['w3'], blk['b3'], blk['wd'], blk['bd'],
                 _tap_masks(n, bc.h, bc.w)]
        if bc.stride > 1:
            args.append(_sel_matrix(n, bc.h, bc.w, bc.stride))
    args += [_pool_matrix(n, hh * ww, nrows), params['fc_w'], params['fc_b']]

    out = pl.pallas_call(
        functools.partial(_resnet_kernel, cfg=cfg),
        out_shape=jax.ShapeDtypeStruct((nrows, LANE), jnp.float32),
        in_specs=[_VMEM] * len(args),
        out_specs=_VMEM,
        scratch_shapes=[pltpu.VMEM((slab_rows, LANE), jnp.bfloat16)],
    )(*args)
    return out[:n, :NUM_CLASSES]


# -------------------------------- parameters --------------------------------

def make_params(key):
    keys = iter(jax.random.split(key, 16))
    bn_s = 1.0 / math.sqrt(1.0 + BN_EPS)   # inference-mode BN: mean=0, var=1, gamma=1
    gain = math.sqrt(2.0)                  # kaiming_normal_(a=0, 'leaky_relu')

    def conv_w(kh, kw, cin, cout):
        std = gain / math.sqrt(kh * kw * cout)               # mode='fan_out'
        return std * jax.random.normal(next(keys), (kh, kw, cin, cout), jnp.float32)

    def pad2(m, rows, cols):
        return jnp.pad(m, ((0, rows - m.shape[0]), (0, cols - m.shape[1])))

    params = {}
    # stem Conv2d(3, 64, k=4, s=1, bias=False) + folded BN; K and cout padded to 128
    stem = conv_w(4, 4, 3, 64).reshape(48, 64) * bn_s
    params['stem_w'] = pad2(stem, LANE, LANE).astype(jnp.bfloat16)
    params['stem_b'] = jnp.zeros((1, LANE), jnp.float32)

    blocks = []
    cin_real, cin_pad = 64, LANE
    for planes, _stride in BLOCK_CFG:
        width = planes                       # groups=1, base_width=64
        cout_real = planes * EXPANSION
        cout_pad = _ceil_to(cout_real, LANE)
        blk = {}
        w1 = conv_w(1, 1, cin_real, width).reshape(cin_real, width) * bn_s
        blk['w1'] = pad2(w1, cin_pad, WIDTH_PAD).astype(jnp.bfloat16)
        blk['b1'] = jnp.zeros((1, WIDTH_PAD), jnp.float32)
        w2 = conv_w(3, 3, width, width).reshape(9, width, width) * bn_s
        w2 = jnp.pad(w2, ((0, 0), (0, WIDTH_PAD - width), (0, WIDTH_PAD - width)))
        blk['w2'] = w2.astype(jnp.bfloat16)
        blk['b2'] = jnp.zeros((1, WIDTH_PAD), jnp.float32)
        w3 = conv_w(1, 1, width, cout_real).reshape(width, cout_real) * bn_s
        blk['w3'] = pad2(w3, WIDTH_PAD, cout_pad).astype(jnp.bfloat16)
        blk['b3'] = jnp.zeros((1, cout_pad), jnp.float32)
        wd = conv_w(1, 1, cin_real, cout_real).reshape(cin_real, cout_real) * bn_s
        blk['wd'] = pad2(wd, cin_pad, cout_pad).astype(jnp.bfloat16)
        blk['bd'] = jnp.zeros((1, cout_pad), jnp.float32)
        blocks.append(blk)
        cin_real, cin_pad = cout_real, cout_pad
    params['blocks'] = blocks

    # Linear(384, 10); output columns padded to 128 for a lane-dense store
    fc_in = 96 * EXPANSION
    bound = 1.0 / math.sqrt(fc_in)
    fc_w = jax.random.uniform(next(keys), (fc_in, NUM_CLASSES), jnp.float32, -bound, bound)
    fc_b = jax.random.uniform(next(keys), (NUM_CLASSES,), jnp.float32, -bound, bound)
    params['fc_w'] = pad2(fc_w, cin_pad, LANE)
    params['fc_b'] = jnp.pad(fc_b, (0, LANE - NUM_CLASSES)).reshape(1, LANE)
    return params


# ----------------------------------- main ------------------------------------

if __name__ == "__main__":
    key = jax.random.PRNGKey(0)
    pkey, xkey = jax.random.split(key)
    params = make_params(pkey)
    # PyTorch-style NCHW input: batch=2, channels=3, spatial=16
    x = jax.random.normal(xkey, (2, 3, 16, 16), jnp.float32)

    out = jax.jit(resnet_forward)(x, params)
    out = jax.block_until_ready(out)
    assert out.shape == (2, NUM_CLASSES), out.shape
    assert bool(jnp.all(jnp.isfinite(out)))
    print("KERNEL_OK")
</pallas_src>

<mosaic_0001>
module attributes {stable_mosaic.version = 11 : i64} {
  func.func @_resnet_kernel(%arg0: memref<288x128xbf16, #tpu.memory_space<vmem>>, %arg1: memref<128x128xbf16, #tpu.memory_space<vmem>>, %arg2: memref<1x128xf32, #tpu.memory_space<vmem>>, %arg3: memref<128x128xbf16, #tpu.memory_space<vmem>>, %arg4: memref<1x128xf32, #tpu.memory_space<vmem>>, %arg5: memref<9x128x128xbf16, #tpu.memory_space<vmem>>, %arg6: memref<1x128xf32, #tpu.memory_space<vmem>>, %arg7: memref<128x128xbf16, #tpu.memory_space<vmem>>, %arg8: memref<1x128xf32, #tpu.memory_space<vmem>>, %arg9: memref<128x128xbf16, #tpu.memory_space<vmem>>, %arg10: memref<1x128xf32, #tpu.memory_space<vmem>>, %arg11: memref<9x72x128xbf16, #tpu.memory_space<vmem>>, %arg12: memref<128x128xbf16, #tpu.memory_space<vmem>>, %arg13: memref<1x128xf32, #tpu.memory_space<vmem>>, %arg14: memref<9x128x128xbf16, #tpu.memory_space<vmem>>, %arg15: memref<1x128xf32, #tpu.memory_space<vmem>>, %arg16: memref<128x256xbf16, #tpu.memory_space<vmem>>, %arg17: memref<1x256xf32, #tpu.memory_space<vmem>>, %arg18: memref<128x256xbf16, #tpu.memory_space<vmem>>, %arg19: memref<1x256xf32, #tpu.memory_space<vmem>>, %arg20: memref<9x72x128xbf16, #tpu.memory_space<vmem>>, %arg21: memref<18x72xf32, #tpu.memory_space<vmem>>, %arg22: memref<256x128xbf16, #tpu.memory_space<vmem>>, %arg23: memref<1x128xf32, #tpu.memory_space<vmem>>, %arg24: memref<9x128x128xbf16, #tpu.memory_space<vmem>>, %arg25: memref<1x128xf32, #tpu.memory_space<vmem>>, %arg26: memref<128x384xbf16, #tpu.memory_space<vmem>>, %arg27: memref<1x384xf32, #tpu.memory_space<vmem>>, %arg28: memref<256x384xbf16, #tpu.memory_space<vmem>>, %arg29: memref<1x384xf32, #tpu.memory_space<vmem>>, %arg30: memref<9x18x128xbf16, #tpu.memory_space<vmem>>, %arg31: memref<8x18xf32, #tpu.memory_space<vmem>>, %arg32: memref<8x8xf32, #tpu.memory_space<vmem>>, %arg33: memref<384x128xf32, #tpu.memory_space<vmem>>, %arg34: memref<1x128xf32, #tpu.memory_space<vmem>>, %arg35: memref<8x128xf32, #tpu.memory_space<vmem>>, %arg36: memref<88x128xbf16, #tpu.memory_space<vmem>>) attributes {dimension_semantics = [], scalar_prefetch = 0 : i64, scratch_operands = 1 : i64, tpu.core_type = #tpu.core_type<tc>} {
    %c0 = arith.constant 0 : index
    %c0_0 = arith.constant 0 : index
    %0 = vector.load %arg0[%c0, %c0_0] : memref<288x128xbf16, #tpu.memory_space<vmem>>, vector<288x128xbf16>
    %c0_1 = arith.constant 0 : index
    %c0_2 = arith.constant 0 : index
    %1 = vector.load %arg1[%c0_1, %c0_2] : memref<128x128xbf16, #tpu.memory_space<vmem>>, vector<128x128xbf16>
    %cst = arith.constant dense<0.000000e+00> : vector<288x128xf32>
    %2 = tpu.matmul %0, %1, %cst {dimension_numbers = #tpu.dot_dimension_numbers<[1], [0], [0], [1], [0, 0, 1, 1], [], []>} : vector<288x128xbf16>, vector<128x128xbf16>, vector<288x128xf32> -> vector<288x128xf32>
    %c0_3 = arith.constant 0 : index
    %c0_4 = arith.constant 0 : index
    %3 = vector.load %arg2[%c0_3, %c0_4] : memref<1x128xf32, #tpu.memory_space<vmem>>, vector<1x128xf32>
    %4 = vector.broadcast %3 : vector<1x128xf32> to vector<288x128xf32>
    %5 = arith.addf %2, %4 : vector<288x128xf32>
    %cst_5 = arith.constant 1.000000e-01 : f32
    %6 = vector.broadcast %cst_5 : f32 to vector<288x128xf32>
    %7 = arith.mulf %6, %5 : vector<288x128xf32>
    %8 = arith.maximumf %5, %7 : vector<288x128xf32>
    %9 = vector.extract_strided_slice %8 {offsets = [0, 0], sizes = [72, 128], strides = [1, 1]} : vector<288x128xf32> to vector<72x128xf32>
    %10 = vector.extract_strided_slice %8 {offsets = [72, 0], sizes = [72, 128], strides = [1, 1]} : vector<288x128xf32> to vector<72x128xf32>
    %11 = arith.maximumf %9, %10 : vector<72x128xf32>
    %12 = vector.extract_strided_slice %8 {offsets = [144, 0], sizes = [72, 128], strides = [1, 1]} : vector<288x128xf32> to vector<72x128xf32>
    %13 = vector.extract_strided_slice %8 {offsets = [216, 0], sizes = [72, 128], strides = [1, 1]} : vector<288x128xf32> to vector<72x128xf32>
    %14 = arith.maximumf %12, %13 : vector<72x128xf32>
    %15 = arith.maximumf %11, %14 : vector<72x128xf32>
    %16 = arith.truncf %15 : vector<72x128xf32> to vector<72x128xbf16>
    %cst_6 = arith.constant 0.000000e+00 : bf16
    %17 = vector.broadcast %cst_6 : bf16 to vector<88x128xbf16>
    %c0_7 = arith.constant 0 : index
    %c0_8 = arith.constant 0 : index
    %18 = vector.load %arg36[%c0_7, %c0_8] : memref<88x128xbf16, #tpu.memory_space<vmem>>, vector<88x128xbf16>
    tpu.vector_store %arg36[%c0_7, %c0_8], %17 {strides = array<i32>} : memref<88x128xbf16, #tpu.memory_space<vmem>>, vector<88x128xbf16>,
    %c0_9 = arith.constant 0 : index
    %c0_10 = arith.constant 0 : index
    %19 = vector.load %arg3[%c0_9, %c0_10] : memref<128x128xbf16, #tpu.memory_space<vmem>>, vector<128x128xbf16>
    %cst_11 = arith.constant dense<0.000000e+00> : vector<72x128xf32>
    %20 = tpu.matmul %16, %19, %cst_11 {dimension_numbers = #tpu.dot_dimension_numbers<[1], [0], [0], [1], [0, 0, 1, 1], [], []>} : vector<72x128xbf16>, vector<128x128xbf16>, vector<72x128xf32> -> vector<72x128xf32>
    %c0_12 = arith.constant 0 : index
    %c0_13 = arith.constant 0 : index
    %21 = vector.load %arg4[%c0_12, %c0_13] : memref<1x128xf32, #tpu.memory_space<vmem>>, vector<1x128xf32>
    %22 = vector.broadcast %21 : vector<1x128xf32> to vector<72x128xf32>
    %23 = arith.addf %20, %22 : vector<72x128xf32>
    %cst_14 = arith.constant 1.000000e-01 : f32
    %24 = vector.broadcast %cst_14 : f32 to vector<72x128xf32>
    %25 = arith.mulf %24, %23 : vector<72x128xf32>
    %26 = arith.maximumf %23, %25 : vector<72x128xf32>
    %27 = arith.truncf %26 : vector<72x128xf32> to vector<72x128xbf16>
    %c8 = arith.constant 8 : index
    %c0_15 = arith.constant 0 : index
    %28 = vector.load %arg36[%c8, %c0_15] : memref<88x128xbf16, #tpu.memory_space<vmem>>, vector<72x128xbf16>
    tpu.vector_store %arg36[%c8, %c0_15], %27 {strides = array<i32>} : memref<88x128xbf16, #tpu.memory_space<vmem>>, vector<72x128xbf16>,
    %cst_16 = arith.constant 0.000000e+00 : f32
    %29 = vector.broadcast %cst_16 : f32 to vector<72x128xf32>
    %c1 = arith.constant 1 : index
    %c0_17 = arith.constant 0 : index
    %30 = vector.load %arg36[%c1, %c0_17] : memref<88x128xbf16, #tpu.memory_space<vmem>>, vector<72x128xbf16>
    %c0_18 = arith.constant 0 : index
    %c0_19 = arith.constant 0 : index
    %c0_20 = arith.constant 0 : index
    %31 = vector.load %arg11[%c0_18, %c0_19, %c0_20] : memref<9x72x128xbf16, #tpu.memory_space<vmem>>, vector<1x72x128xbf16>
    %32 = vector.shape_cast %31 : vector<1x72x128xbf16> to vector<72x128xbf16>
    %33 = arith.mulf %30, %32 : vector<72x128xbf16>
    %c0_21 = arith.constant 0 : index
    %c0_22 = arith.constant 0 : index
    %c0_23 = arith.constant 0 : index
    %34 = vector.load %arg5[%c0_21, %c0_22, %c0_23] : memref<9x128x128xbf16, #tpu.memory_space<vmem>>, vector<1x128x128xbf16>
    %35 = vector.shape_cast %34 : vector<1x128x128xbf16> to vector<128x128xbf16>
    %cst_24 = arith.constant dense<0.000000e+00> : vector<72x128xf32>
    %36 = tpu.matmul %33, %35, %cst_24 {dimension_numbers = #tpu.dot_dimension_numbers<[1], [0], [0], [1], [0, 0, 1, 1], [], []>} : vector<72x128xbf16>, vector<128x128xbf16>, vector<72x128xf32> -> vector<72x128xf32>
    %37 = arith.addf %29, %36 : vector<72x128xf32>
    %c2 = arith.constant 2 : index
    %c0_25 = arith.constant 0 : index
    %38 = vector.load %arg36[%c2, %c0_25] : memref<88x128xbf16, #tpu.memory_space<vmem>>, vector<72x128xbf16>
    %c1_26 = arith.constant 1 : index
    %c0_27 = arith.constant 0 : index
    %c0_28 = arith.constant 0 : index
    %39 = vector.load %arg11[%c1_26, %c0_27, %c0_28] : memref<9x72x128xbf16, #tpu.memory_space<vmem>>, vector<1x72x128xbf16>
    %40 = vector.shape_cast %39 : vector<1x72x128xbf16> to vector<72x128xbf16>
    %41 = arith.mulf %38, %40 : vector<72x128xbf16>
    %c1_29 = arith.constant 1 : index
    %c0_30 = arith.constant 0 : index
    %c0_31 = arith.constant 0 : index
    %42 = vector.load %arg5[%c1_29, %c0_30, %c0_31] : memref<9x128x128xbf16, #tpu.memory_space<vmem>>, vector<1x128x128xbf16>
    %43 = vector.shape_cast %42 : vector<1x128x128xbf16> to vector<128x128xbf16>
    %cst_32 = arith.constant dense<0.000000e+00> : vector<72x128xf32>
    %44 = tpu.matmul %41, %43, %cst_32 {dimension_numbers = #tpu.dot_dimension_numbers<[1], [0], [0], [1], [0, 0, 1, 1], [], []>} : vector<72x128xbf16>, vector<128x128xbf16>, vector<72x128xf32> -> vector<72x128xf32>
    %45 = arith.addf %37, %44 : vector<72x128xf32>
    %c3 = arith.constant 3 : index
    %c0_33 = arith.constant 0 : index
    %46 = vector.load %arg36[%c3, %c0_33] : memref<88x128xbf16, #tpu.memory_space<vmem>>, vector<72x128xbf16>
    %c2_34 = arith.constant 2 : index
    %c0_35 = arith.constant 0 : index
    %c0_36 = arith.constant 0 : index
    %47 = vector.load %arg11[%c2_34, %c0_35, %c0_36] : memref<9x72x128xbf16, #tpu.memory_space<vmem>>, vector<1x72x128xbf16>
    %48 = vector.shape_cast %47 : vector<1x72x128xbf16> to vector<72x128xbf16>
    %49 = arith.mulf %46, %48 : vector<72x128xbf16>
    %c2_37 = arith.constant 2 : index
    %c0_38 = arith.constant 0 : index
    %c0_39 = arith.constant 0 : index
    %50 = vector.load %arg5[%c2_37, %c0_38, %c0_39] : memref<9x128x128xbf16, #tpu.memory_space<vmem>>, vector<1x128x128xbf16>
    %51 = vector.shape_cast %50 : vector<1x128x128xbf16> to vector<128x128xbf16>
    %cst_40 = arith.constant dense<0.000000e+00> : vector<72x128xf32>
    %52 = tpu.matmul %49, %51, %cst_40 {dimension_numbers = #tpu.dot_dimension_numbers<[1], [0], [0], [1], [0, 0, 1, 1], [], []>} : vector<72x128xbf16>, vector<128x128xbf16>, vector<72x128xf32> -> vector<72x128xf32>
    %53 = arith.addf %45, %52 : vector<72x128xf32>
    %c7 = arith.constant 7 : index
    %c0_41 = arith.constant 0 : index
    %54 = vector.load %arg36[%c7, %c0_41] : memref<88x128xbf16, #tpu.memory_space<vmem>>, vector<72x128xbf16>
    %c3_42 = arith.constant 3 : index
    %c0_43 = arith.constant 0 : index
    %c0_44 = arith.constant 0 : index
    %55 = vector.load %arg11[%c3_42, %c0_43, %c0_44] : memref<9x72x128xbf16, #tpu.memory_space<vmem>>, vector<1x72x128xbf16>
    %56 = vector.shape_cast %55 : vector<1x72x128xbf16> to vector<72x128xbf16>
    %57 = arith.mulf %54, %56 : vector<72x128xbf16>
    %c3_45 = arith.constant 3 : index
    %c0_46 = arith.constant 0 : index
    %c0_47 = arith.constant 0 : index
    %58 = vector.load %arg5[%c3_45, %c0_46, %c0_47] : memref<9x128x128xbf16, #tpu.memory_space<vmem>>, vector<1x128x128xbf16>
    %59 = vector.shape_cast %58 : vector<1x128x128xbf16> to vector<128x128xbf16>
    %cst_48 = arith.constant dense<0.000000e+00> : vector<72x128xf32>
    %60 = tpu.matmul %57, %59, %cst_48 {dimension_numbers = #tpu.dot_dimension_numbers<[1], [0], [0], [1], [0, 0, 1, 1], [], []>} : vector<72x128xbf16>, vector<128x128xbf16>, vector<72x128xf32> -> vector<72x128xf32>
    %61 = arith.addf %53, %60 : vector<72x128xf32>
    %c8_49 = arith.constant 8 : index
    %c0_50 = arith.constant 0 : index
    %62 = vector.load %arg36[%c8_49, %c0_50] : memref<88x128xbf16, #tpu.memory_space<vmem>>, vector<72x128xbf16>
    %c4 = arith.constant 4 : index
    %c0_51 = arith.constant 0 : index
    %c0_52 = arith.constant 0 : index
    %63 = vector.load %arg11[%c4, %c0_51, %c0_52] : memref<9x72x128xbf16, #tpu.memory_space<vmem>>, vector<1x72x128xbf16>
    %64 = vector.shape_cast %63 : vector<1x72x128xbf16> to vector<72x128xbf16>
    %65 = arith.mulf %62, %64 : vector<72x128xbf16>
    %c4_53 = arith.constant 4 : index
    %c0_54 = arith.constant 0 : index
    %c0_55 = arith.constant 0 : index
    %66 = vector.load %arg5[%c4_53, %c0_54, %c0_55] : memref<9x128x128xbf16, #tpu.memory_space<vmem>>, vector<1x128x128xbf16>
    %67 = vector.shape_cast %66 : vector<1x128x128xbf16> to vector<128x128xbf16>
    %cst_56 = arith.constant dense<0.000000e+00> : vector<72x128xf32>
    %68 = tpu.matmul %65, %67, %cst_56 {dimension_numbers = #tpu.dot_dimension_numbers<[1], [0], [0], [1], [0, 0, 1, 1], [], []>} : vector<72x128xbf16>, vector<128x128xbf16>, vector<72x128xf32> -> vector<72x128xf32>
    %69 = arith.addf %61, %68 : vector<72x128xf32>
    %c9 = arith.constant 9 : index
    %c0_57 = arith.constant 0 : index
    %70 = vector.load %arg36[%c9, %c0_57] : memref<88x128xbf16, #tpu.memory_space<vmem>>, vector<72x128xbf16>
    %c5 = arith.constant 5 : index
    %c0_58 = arith.constant 0 : index
    %c0_59 = arith.constant 0 : index
    %71 = vector.load %arg11[%c5, %c0_58, %c0_59] : memref<9x72x128xbf16, #tpu.memory_space<vmem>>, vector<1x72x128xbf16>
    %72 = vector.shape_cast %71 : vector<1x72x128xbf16> to vector<72x128xbf16>
    %73 = arith.mulf %70, %72 : vector<72x128xbf16>
    %c5_60 = arith.constant 5 : index
    %c0_61 = arith.constant 0 : index
    %c0_62 = arith.constant 0 : index
    %74 = vector.load %arg5[%c5_60, %c0_61, %c0_62] : memref<9x128x128xbf16, #tpu.memory_space<vmem>>, vector<1x128x128xbf16>
    %75 = vector.shape_cast %74 : vector<1x128x128xbf16> to vector<128x128xbf16>
    %cst_63 = arith.constant dense<0.000000e+00> : vector<72x128xf32>
    %76 = tpu.matmul %73, %75, %cst_63 {dimension_numbers = #tpu.dot_dimension_numbers<[1], [0], [0], [1], [0, 0, 1, 1], [], []>} : vector<72x128xbf16>, vector<128x128xbf16>, vector<72x128xf32> -> vector<72x128xf32>
    %77 = arith.addf %69, %76 : vector<72x128xf32>
    %c13 = arith.constant 13 : index
    %c0_64 = arith.constant 0 : index
    %78 = vector.load %arg36[%c13, %c0_64] : memref<88x128xbf16, #tpu.memory_space<vmem>>, vector<72x128xbf16>
    %c6 = arith.constant 6 : index
    %c0_65 = arith.constant 0 : index
    %c0_66 = arith.constant 0 : index
    %79 = vector.load %arg11[%c6, %c0_65, %c0_66] : memref<9x72x128xbf16, #tpu.memory_space<vmem>>, vector<1x72x128xbf16>
    %80 = vector.shape_cast %79 : vector<1x72x128xbf16> to vector<72x128xbf16>
    %81 = arith.mulf %78, %80 : vector<72x128xbf16>
    %c6_67 = arith.constant 6 : index
    %c0_68 = arith.constant 0 : index
    %c0_69 = arith.constant 0 : index
    %82 = vector.load %arg5[%c6_67, %c0_68, %c0_69] : memref<9x128x128xbf16, #tpu.memory_space<vmem>>, vector<1x128x128xbf16>
    %83 = vector.shape_cast %82 : vector<1x128x128xbf16> to vector<128x128xbf16>
    %cst_70 = arith.constant dense<0.000000e+00> : vector<72x128xf32>
    %84 = tpu.matmul %81, %83, %cst_70 {dimension_numbers = #tpu.dot_dimension_numbers<[1], [0], [0], [1], [0, 0, 1, 1], [], []>} : vector<72x128xbf16>, vector<128x128xbf16>, vector<72x128xf32> -> vector<72x128xf32>
    %85 = arith.addf %77, %84 : vector<72x128xf32>
    %c14 = arith.constant 14 : index
    %c0_71 = arith.constant 0 : index
    %86 = vector.load %arg36[%c14, %c0_71] : memref<88x128xbf16, #tpu.memory_space<vmem>>, vector<72x128xbf16>
    %c7_72 = arith.constant 7 : index
    %c0_73 = arith.constant 0 : index
    %c0_74 = arith.constant 0 : index
    %87 = vector.load %arg11[%c7_72, %c0_73, %c0_74] : memref<9x72x128xbf16, #tpu.memory_space<vmem>>, vector<1x72x128xbf16>
    %88 = vector.shape_cast %87 : vector<1x72x128xbf16> to vector<72x128xbf16>
    %89 = arith.mulf %86, %88 : vector<72x128xbf16>
    %c7_75 = arith.constant 7 : index
    %c0_76 = arith.constant 0 : index
    %c0_77 = arith.constant 0 : index
    %90 = vector.load %arg5[%c7_75, %c0_76, %c0_77] : memref<9x128x128xbf16, #tpu.memory_space<vmem>>, vector<1x128x128xbf16>
    %91 = vector.shape_cast %90 : vector<1x128x128xbf16> to vector<128x128xbf16>
    %cst_78 = arith.constant dense<0.000000e+00> : vector<72x128xf32>
    %92 = tpu.matmul %89, %91, %cst_78 {dimension_numbers = #tpu.dot_dimension_numbers<[1], [0], [0], [1], [0, 0, 1, 1], [], []>} : vector<72x128xbf16>, vector<128x128xbf16>, vector<72x128xf32> -> vector<72x128xf32>
    %93 = arith.addf %85, %92 : vector<72x128xf32>
    %c15 = arith.constant 15 : index
    %c0_79 = arith.constant 0 : index
    %94 = vector.load %arg36[%c15, %c0_79] : memref<88x128xbf16, #tpu.memory_space<vmem>>, vector<72x128xbf16>
    %c8_80 = arith.constant 8 : index
    %c0_81 = arith.constant 0 : index
    %c0_82 = arith.constant 0 : index
    %95 = vector.load %arg11[%c8_80, %c0_81, %c0_82] : memref<9x72x128xbf16, #tpu.memory_space<vmem>>, vector<1x72x128xbf16>
    %96 = vector.shape_cast %95 : vector<1x72x128xbf16> to vector<72x128xbf16>
    %97 = arith.mulf %94, %96 : vector<72x128xbf16>
    %c8_83 = arith.constant 8 : index
    %c0_84 = arith.constant 0 : index
    %c0_85 = arith.constant 0 : index
    %98 = vector.load %arg5[%c8_83, %c0_84, %c0_85] : memref<9x128x128xbf16, #tpu.memory_space<vmem>>, vector<1x128x128xbf16>
    %99 = vector.shape_cast %98 : vector<1x128x128xbf16> to vector<128x128xbf16>
    %cst_86 = arith.constant dense<0.000000e+00> : vector<72x128xf32>
    %100 = tpu.matmul %97, %99, %cst_86 {dimension_numbers = #tpu.dot_dimension_numbers<[1], [0], [0], [1], [0, 0, 1, 1], [], []>} : vector<72x128xbf16>, vector<128x128xbf16>, vector<72x128xf32> -> vector<72x128xf32>
    %101 = arith.addf %93, %100 : vector<72x128xf32>
    %c0_87 = arith.constant 0 : index
    %c0_88 = arith.constant 0 : index
    %102 = vector.load %arg6[%c0_87, %c0_88] : memref<1x128xf32, #tpu.memory_space<vmem>>, vector<1x128xf32>
    %103 = vector.broadcast %102 : vector<1x128xf32> to vector<72x128xf32>
    %104 = arith.addf %101, %103 : vector<72x128xf32>
    %cst_89 = arith.constant 1.000000e-01 : f32
    %105 = vector.broadcast %cst_89 : f32 to vector<72x128xf32>
    %106 = arith.mulf %105, %104 : vector<72x128xf32>
    %107 = arith.maximumf %104, %106 : vector<72x128xf32>
    %108 = arith.truncf %107 : vector<72x128xf32> to vector<72x128xbf16>
    %c0_90 = arith.constant 0 : index
    %c0_91 = arith.constant 0 : index
    %109 = vector.load %arg7[%c0_90, %c0_91] : memref<128x128xbf16, #tpu.memory_space<vmem>>, vector<128x128xbf16>
    %cst_92 = arith.constant dense<0.000000e+00> : vector<72x128xf32>
    %110 = tpu.matmul %108, %109, %cst_92 {dimension_numbers = #tpu.dot_dimension_numbers<[1], [0], [0], [1], [0, 0, 1, 1], [], []>} : vector<72x128xbf16>, vector<128x128xbf16>, vector<72x128xf32> -> vector<72x128xf32>
    %c0_93 = arith.constant 0 : index
    %c0_94 = arith.constant 0 : index
    %111 = vector.load %arg8[%c0_93, %c0_94] : memref<1x128xf32, #tpu.memory_space<vmem>>, vector<1x128xf32>
    %112 = vector.broadcast %111 : vector<1x128xf32> to vector<72x128xf32>
    %113 = arith.addf %110, %112 : vector<72x128xf32>
    %c0_95 = arith.constant 0 : index
    %c0_96 = arith.constant 0 : index
    %114 = vector.load %arg9[%c0_95, %c0_96] : memref<128x128xbf16, #tpu.memory_space<vmem>>, vector<128x128xbf16>
    %cst_97 = arith.constant dense<0.000000e+00> : vector<72x128xf32>
    %115 = tpu.matmul %16, %114, %cst_97 {dimension_numbers = #tpu.dot_dimension_numbers<[1], [0], [0], [1], [0, 0, 1, 1], [], []>} : vector<72x128xbf16>, vector<128x128xbf16>, vector<72x128xf32> -> vector<72x128xf32>
    %c0_98 = arith.constant 0 : index
    %c0_99 = arith.constant 0 : index
    %116 = vector.load %arg10[%c0_98, %c0_99] : memref<1x128xf32, #tpu.memory_space<vmem>>, vector<1x128xf32>
    %117 = vector.broadcast %116 : vector<1x128xf32> to vector<72x128xf32>
    %118 = arith.addf %115, %117 : vector<72x128xf32>
    %119 = arith.addf %113, %118 : vector<72x128xf32>
    %cst_100 = arith.constant 1.000000e-01 : f32
    %120 = vector.broadcast %cst_100 : f32 to vector<72x128xf32>
    %121 = arith.mulf %120, %119 : vector<72x128xf32>
    %122 = arith.maximumf %119, %121 : vector<72x128xf32>
    %123 = arith.truncf %122 : vector<72x128xf32> to vector<72x128xbf16>
    %c0_101 = arith.constant 0 : index
    %c0_102 = arith.constant 0 : index
    %124 = vector.load %arg12[%c0_101, %c0_102] : memref<128x128xbf16, #tpu.memory_space<vmem>>, vector<128x128xbf16>
    %cst_103 = arith.constant dense<0.000000e+00> : vector<72x128xf32>
    %125 = tpu.matmul %123, %124, %cst_103 {dimension_numbers = #tpu.dot_dimension_numbers<[1], [0], [0], [1], [0, 0, 1, 1], [], []>} : vector<72x128xbf16>, vector<128x128xbf16>, vector<72x128xf32> -> vector<72x128xf32>
    %c0_104 = arith.constant 0 : index
    %c0_105 = arith.constant 0 : index
    %126 = vector.load %arg13[%c0_104, %c0_105] : memref<1x128xf32, #tpu.memory_space<vmem>>, vector<1x128xf32>
    %127 = vector.broadcast %126 : vector<1x128xf32> to vector<72x128xf32>
    %128 = arith.addf %125, %127 : vector<72x128xf32>
    %cst_106 = arith.constant 1.000000e-01 : f32
    %129 = vector.broadcast %cst_106 : f32 to vector<72x128xf32>
    %130 = arith.mulf %129, %128 : vector<72x128xf32>
    %131 = arith.maximumf %128, %130 : vector<72x128xf32>
    %132 = arith.truncf %131 : vector<72x128xf32> to vector<72x128xbf16>
    %c8_107 = arith.constant 8 : index
    %c0_108 = arith.constant 0 : index
    %133 = vector.load %arg36[%c8_107, %c0_108] : memref<88x128xbf16, #tpu.memory_space<vmem>>, vector<72x128xbf16>
    tpu.vector_store %arg36[%c8_107, %c0_108], %132 {strides = array<i32>} : memref<88x128xbf16, #tpu.memory_space<vmem>>, vector<72x128xbf16>,
    %cst_109 = arith.constant 0.000000e+00 : f32
    %134 = vector.broadcast %cst_109 : f32 to vector<72x128xf32>
    %c1_110 = arith.constant 1 : index
    %c0_111 = arith.constant 0 : index
    %135 = vector.load %arg36[%c1_110, %c0_111] : memref<88x128xbf16, #tpu.memory_space<vmem>>, vector<72x128xbf16>
    %c0_112 = arith.constant 0 : index
    %c0_113 = arith.constant 0 : index
    %c0_114 = arith.constant 0 : index
    %136 = vector.load %arg20[%c0_112, %c0_113, %c0_114] : memref<9x72x128xbf16, #tpu.memory_space<vmem>>, vector<1x72x128xbf16>
    %137 = vector.shape_cast %136 : vector<1x72x128xbf16> to vector<72x128xbf16>
    %138 = arith.mulf %135, %137 : vector<72x128xbf16>
    %c0_115 = arith.constant 0 : index
    %c0_116 = arith.constant 0 : index
    %c0_117 = arith.constant 0 : index
    %139 = vector.load %arg14[%c0_115, %c0_116, %c0_117] : memref<9x128x128xbf16, #tpu.memory_space<vmem>>, vector<1x128x128xbf16>
    %140 = vector.shape_cast %139 : vector<1x128x128xbf16> to vector<128x128xbf16>
    %cst_118 = arith.constant dense<0.000000e+00> : vector<72x128xf32>
    %141 = tpu.matmul %138, %140, %cst_118 {dimension_numbers = #tpu.dot_dimension_numbers<[1], [0], [0], [1], [0, 0, 1, 1], [], []>} : vector<72x128xbf16>, vector<128x128xbf16>, vector<72x128xf32> -> vector<72x128xf32>
    %142 = arith.addf %134, %141 : vector<72x128xf32>
    %c2_119 = arith.constant 2 : index
    %c0_120 = arith.constant 0 : index
    %143 = vector.load %arg36[%c2_119, %c0_120] : memref<88x128xbf16, #tpu.memory_space<vmem>>, vector<72x128xbf16>
    %c1_121 = arith.constant 1 : index
    %c0_122 = arith.constant 0 : index
    %c0_123 = arith.constant 0 : index
    %144 = vector.load %arg20[%c1_121, %c0_122, %c0_123] : memref<9x72x128xbf16, #tpu.memory_space<vmem>>, vector<1x72x128xbf16>
    %145 = vector.shape_cast %144 : vector<1x72x128xbf16> to vector<72x128xbf16>
    %146 = arith.mulf %143, %145 : vector<72x128xbf16>
    %c1_124 = arith.constant 1 : index
    %c0_125 = arith.constant 0 : index
    %c0_126 = arith.constant 0 : index
    %147 = vector.load %arg14[%c1_124, %c0_125, %c0_126] : memref<9x128x128xbf16, #tpu.memory_space<vmem>>, vector<1x128x128xbf16>
    %148 = vector.shape_cast %147 : vector<1x128x128xbf16> to vector<128x128xbf16>
    %cst_127 = arith.constant dense<0.000000e+00> : vector<72x128xf32>
    %149 = tpu.matmul %146, %148, %cst_127 {dimension_numbers = #tpu.dot_dimension_numbers<[1], [0], [0], [1], [0, 0, 1, 1], [], []>} : vector<72x128xbf16>, vector<128x128xbf16>, vector<72x128xf32> -> vector<72x128xf32>
    %150 = arith.addf %142, %149 : vector<72x128xf32>
    %c3_128 = arith.constant 3 : index
    %c0_129 = arith.constant 0 : index
    %151 = vector.load %arg36[%c3_128, %c0_129] : memref<88x128xbf16, #tpu.memory_space<vmem>>, vector<72x128xbf16>
    %c2_130 = arith.constant 2 : index
    %c0_131 = arith.constant 0 : index
    %c0_132 = arith.constant 0 : index
    %152 = vector.load %arg20[%c2_130, %c0_131, %c0_132] : memref<9x72x128xbf16, #tpu.memory_space<vmem>>, vector<1x72x128xbf16>
    %153 = vector.shape_cast %152 : vector<1x72x128xbf16> to vector<72x128xbf16>
    %154 = arith.mulf %151, %153 : vector<72x128xbf16>
    %c2_133 = arith.constant 2 : index
    %c0_134 = arith.constant 0 : index
    %c0_135 = arith.constant 0 : index
    %155 = vector.load %arg14[%c2_133, %c0_134, %c0_135] : memref<9x128x128xbf16, #tpu.memory_space<vmem>>, vector<1x128x128xbf16>
    %156 = vector.shape_cast %155 : vector<1x128x128xbf16> to vector<128x128xbf16>
    %cst_136 = arith.constant dense<0.000000e+00> : vector<72x128xf32>
    %157 = tpu.matmul %154, %156, %cst_136 {dimension_numbers = #tpu.dot_dimension_numbers<[1], [0], [0], [1], [0, 0, 1, 1], [], []>} : vector<72x128xbf16>, vector<128x128xbf16>, vector<72x128xf32> -> vector<72x128xf32>
    %158 = arith.addf %150, %157 : vector<72x128xf32>
    %c7_137 = arith.constant 7 : index
    %c0_138 = arith.constant 0 : index
    %159 = vector.load %arg36[%c7_137, %c0_138] : memref<88x128xbf16, #tpu.memory_space<vmem>>, vector<72x128xbf16>
    %c3_139 = arith.constant 3 : index
    %c0_140 = arith.constant 0 : index
    %c0_141 = arith.constant 0 : index
    %160 = vector.load %arg20[%c3_139, %c0_140, %c0_141] : memref<9x72x128xbf16, #tpu.memory_space<vmem>>, vector<1x72x128xbf16>
    %161 = vector.shape_cast %160 : vector<1x72x128xbf16> to vector<72x128xbf16>
    %162 = arith.mulf %159, %161 : vector<72x128xbf16>
    %c3_142 = arith.constant 3 : index
    %c0_143 = arith.constant 0 : index
    %c0_144 = arith.constant 0 : index
    %163 = vector.load %arg14[%c3_142, %c0_143, %c0_144] : memref<9x128x128xbf16, #tpu.memory_space<vmem>>, vector<1x128x128xbf16>
    %164 = vector.shape_cast %163 : vector<1x128x128xbf16> to vector<128x128xbf16>
    %cst_145 = arith.constant dense<0.000000e+00> : vector<72x128xf32>
    %165 = tpu.matmul %162, %164, %cst_145 {dimension_numbers = #tpu.dot_dimension_numbers<[1], [0], [0], [1], [0, 0, 1, 1], [], []>} : vector<72x128xbf16>, vector<128x128xbf16>, vector<72x128xf32> -> vector<72x128xf32>
    %166 = arith.addf %158, %165 : vector<72x128xf32>
    %c8_146 = arith.constant 8 : index
    %c0_147 = arith.constant 0 : index
    %167 = vector.load %arg36[%c8_146, %c0_147] : memref<88x128xbf16, #tpu.memory_space<vmem>>, vector<72x128xbf16>
    %c4_148 = arith.constant 4 : index
    %c0_149 = arith.constant 0 : index
    %c0_150 = arith.constant 0 : index
    %168 = vector.load %arg20[%c4_148, %c0_149, %c0_150] : memref<9x72x128xbf16, #tpu.memory_space<vmem>>, vector<1x72x128xbf16>
    %169 = vector.shape_cast %168 : vector<1x72x128xbf16> to vector<72x128xbf16>
    %170 = arith.mulf %167, %169 : vector<72x128xbf16>
    %c4_151 = arith.constant 4 : index
    %c0_152 = arith.constant 0 : index
    %c0_153 = arith.constant 0 : index
    %171 = vector.load %arg14[%c4_151, %c0_152, %c0_153] : memref<9x128x128xbf16, #tpu.memory_space<vmem>>, vector<1x128x128xbf16>
    %172 = vector.shape_cast %171 : vector<1x128x128xbf16> to vector<128x128xbf16>
    %cst_154 = arith.constant dense<0.000000e+00> : vector<72x128xf32>
    %173 = tpu.matmul %170, %172, %cst_154 {dimension_numbers = #tpu.dot_dimension_numbers<[1], [0], [0], [1], [0, 0, 1, 1], [], []>} : vector<72x128xbf16>, vector<128x128xbf16>, vector<72x128xf32> -> vector<72x128xf32>
    %174 = arith.addf %166, %173 : vector<72x128xf32>
    %c9_155 = arith.constant 9 : index
    %c0_156 = arith.constant 0 : index
    %175 = vector.load %arg36[%c9_155, %c0_156] : memref<88x128xbf16, #tpu.memory_space<vmem>>, vector<72x128xbf16>
    %c5_157 = arith.constant 5 : index
    %c0_158 = arith.constant 0 : index
    %c0_159 = arith.constant 0 : index
    %176 = vector.load %arg20[%c5_157, %c0_158, %c0_159] : memref<9x72x128xbf16, #tpu.memory_space<vmem>>, vector<1x72x128xbf16>
    %177 = vector.shape_cast %176 : vector<1x72x128xbf16> to vector<72x128xbf16>
    %178 = arith.mulf %175, %177 : vector<72x128xbf16>
    %c5_160 = arith.constant 5 : index
    %c0_161 = arith.constant 0 : index
    %c0_162 = arith.constant 0 : index
    %179 = vector.load %arg14[%c5_160, %c0_161, %c0_162] : memref<9x128x128xbf16, #tpu.memory_space<vmem>>, vector<1x128x128xbf16>
    %180 = vector.shape_cast %179 : vector<1x128x128xbf16> to vector<128x128xbf16>
    %cst_163 = arith.constant dense<0.000000e+00> : vector<72x128xf32>
    %181 = tpu.matmul %178, %180, %cst_163 {dimension_numbers = #tpu.dot_dimension_numbers<[1], [0], [0], [1], [0, 0, 1, 1], [], []>} : vector<72x128xbf16>, vector<128x128xbf16>, vector<72x128xf32> -> vector<72x128xf32>
    %182 = arith.addf %174, %181 : vector<72x128xf32>
    %c13_164 = arith.constant 13 : index
    %c0_165 = arith.constant 0 : index
    %183 = vector.load %arg36[%c13_164, %c0_165] : memref<88x128xbf16, #tpu.memory_space<vmem>>, vector<72x128xbf16>
    %c6_166 = arith.constant 6 : index
    %c0_167 = arith.constant 0 : index
    %c0_168 = arith.constant 0 : index
    %184 = vector.load %arg20[%c6_166, %c0_167, %c0_168] : memref<9x72x128xbf16, #tpu.memory_space<vmem>>, vector<1x72x128xbf16>
    %185 = vector.shape_cast %184 : vector<1x72x128xbf16> to vector<72x128xbf16>
    %186 = arith.mulf %183, %185 : vector<72x128xbf16>
    %c6_169 = arith.constant 6 : index
    %c0_170 = arith.constant 0 : index
    %c0_171 = arith.constant 0 : index
    %187 = vector.load %arg14[%c6_169, %c0_170, %c0_171] : memref<9x128x128xbf16, #tpu.memory_space<vmem>>, vector<1x128x128xbf16>
    %188 = vector.shape_cast %187 : vector<1x128x128xbf16> to vector<128x128xbf16>
    %cst_172 = arith.constant dense<0.000000e+00> : vector<72x128xf32>
    %189 = tpu.matmul %186, %188, %cst_172 {dimension_numbers = #tpu.dot_dimension_numbers<[1], [0], [0], [1], [0, 0, 1, 1], [], []>} : vector<72x128xbf16>, vector<128x128xbf16>, vector<72x128xf32> -> vector<72x128xf32>
    %190 = arith.addf %182, %189 : vector<72x128xf32>
    %c14_173 = arith.constant 14 : index
    %c0_174 = arith.constant 0 : index
    %191 = vector.load %arg36[%c14_173, %c0_174] : memref<88x128xbf16, #tpu.memory_space<vmem>>, vector<72x128xbf16>
    %c7_175 = arith.constant 7 : index
    %c0_176 = arith.constant 0 : index
    %c0_177 = arith.constant 0 : index
    %192 = vector.load %arg20[%c7_175, %c0_176, %c0_177] : memref<9x72x128xbf16, #tpu.memory_space<vmem>>, vector<1x72x128xbf16>
    %193 = vector.shape_cast %192 : vector<1x72x128xbf16> to vector<72x128xbf16>
    %194 = arith.mulf %191, %193 : vector<72x128xbf16>
    %c7_178 = arith.constant 7 : index
    %c0_179 = arith.constant 0 : index
    %c0_180 = arith.constant 0 : index
    %195 = vector.load %arg14[%c7_178, %c0_179, %c0_180] : memref<9x128x128xbf16, #tpu.memory_space<vmem>>, vector<1x128x128xbf16>
    %196 = vector.shape_cast %195 : vector<1x128x128xbf16> to vector<128x128xbf16>
    %cst_181 = arith.constant dense<0.000000e+00> : vector<72x128xf32>
    %197 = tpu.matmul %194, %196, %cst_181 {dimension_numbers = #tpu.dot_dimension_numbers<[1], [0], [0], [1], [0, 0, 1, 1], [], []>} : vector<72x128xbf16>, vector<128x128xbf16>, vector<72x128xf32> -> vector<72x128xf32>
    %198 = arith.addf %190, %197 : vector<72x128xf32>
    %c15_182 = arith.constant 15 : index
    %c0_183 = arith.constant 0 : index
    %199 = vector.load %arg36[%c15_182, %c0_183] : memref<88x128xbf16, #tpu.memory_space<vmem>>, vector<72x128xbf16>
    %c8_184 = arith.constant 8 : index
    %c0_185 = arith.constant 0 : index
    %c0_186 = arith.constant 0 : index
    %200 = vector.load %arg20[%c8_184, %c0_185, %c0_186] : memref<9x72x128xbf16, #tpu.memory_space<vmem>>, vector<1x72x128xbf16>
    %201 = vector.shape_cast %200 : vector<1x72x128xbf16> to vector<72x128xbf16>
    %202 = arith.mulf %199, %201 : vector<72x128xbf16>
    %c8_187 = arith.constant 8 : index
    %c0_188 = arith.constant 0 : index
    %c0_189 = arith.constant 0 : index
    %203 = vector.load %arg14[%c8_187, %c0_188, %c0_189] : memref<9x128x128xbf16, #tpu.memory_space<vmem>>, vector<1x128x128xbf16>
    %204 = vector.shape_cast %203 : vector<1x128x128xbf16> to vector<128x128xbf16>
    %cst_190 = arith.constant dense<0.000000e+00> : vector<72x128xf32>
    %205 = tpu.matmul %202, %204, %cst_190 {dimension_numbers = #tpu.dot_dimension_numbers<[1], [0], [0], [1], [0, 0, 1, 1], [], []>} : vector<72x128xbf16>, vector<128x128xbf16>, vector<72x128xf32> -> vector<72x128xf32>
    %206 = arith.addf %198, %205 : vector<72x128xf32>
    %c0_191 = arith.constant 0 : index
    %c0_192 = arith.constant 0 : index
    %207 = vector.load %arg21[%c0_191, %c0_192] : memref<18x72xf32, #tpu.memory_space<vmem>>, vector<18x72xf32>
    %cst_193 = arith.constant dense<0.000000e+00> : vector<18x128xf32>
    %208 = tpu.matmul %207, %206, %cst_193 {dimension_numbers = #tpu.dot_dimension_numbers<[1], [0], [0], [1], [0, 0, 1, 1], [], []>} : vector<18x72xf32>, vector<72x128xf32>, vector<18x128xf32> -> vector<18x128xf32>
    %c0_194 = arith.constant 0 : index
    %c0_195 = arith.constant 0 : index
    %209 = vector.load %arg15[%c0_194, %c0_195] : memref<1x128xf32, #tpu.memory_space<vmem>>, vector<1x128xf32>
    %210 = vector.broadcast %209 : vector<1x128xf32> to vector<18x128xf32>
    %211 = arith.addf %208, %210 : vector<18x128xf32>
    %cst_196 = arith.constant 1.000000e-01 : f32
    %212 = vector.broadcast %cst_196 : f32 to vector<18x128xf32>
    %213 = arith.mulf %212, %211 : vector<18x128xf32>
    %214 = arith.maximumf %211, %213 : vector<18x128xf32>
    %215 = arith.truncf %214 : vector<18x128xf32> to vector<18x128xbf16>
    %c0_197 = arith.constant 0 : index
    %c0_198 = arith.constant 0 : index
    %216 = vector.load %arg16[%c0_197, %c0_198] : memref<128x256xbf16, #tpu.memory_space<vmem>>, vector<128x256xbf16>
    %cst_199 = arith.constant dense<0.000000e+00> : vector<18x256xf32>
    %217 = tpu.matmul %215, %216, %cst_199 {dimension_numbers = #tpu.dot_dimension_numbers<[1], [0], [0], [1], [0, 0, 1, 1], [], []>} : vector<18x128xbf16>, vector<128x256xbf16>, vector<18x256xf32> -> vector<18x256xf32>
    %c0_200 = arith.constant 0 : index
    %c0_201 = arith.constant 0 : index
    %218 = vector.load %arg17[%c0_200, %c0_201] : memref<1x256xf32, #tpu.memory_space<vmem>>, vector<1x256xf32>
    %219 = vector.broadcast %218 : vector<1x256xf32> to vector<18x256xf32>
    %220 = arith.addf %217, %219 : vector<18x256xf32>
    %c0_202 = arith.constant 0 : index
    %c0_203 = arith.constant 0 : index
    %221 = vector.load %arg18[%c0_202, %c0_203] : memref<128x256xbf16, #tpu.memory_space<vmem>>, vector<128x256xbf16>
    %cst_204 = arith.constant dense<0.000000e+00> : vector<72x256xf32>
    %222 = tpu.matmul %123, %221, %cst_204 {dimension_numbers = #tpu.dot_dimension_numbers<[1], [0], [0], [1], [0, 0, 1, 1], [], []>} : vector<72x128xbf16>, vector<128x256xbf16>, vector<72x256xf32> -> vector<72x256xf32>
    %c0_205 = arith.constant 0 : index
    %c0_206 = arith.constant 0 : index
    %223 = vector.load %arg19[%c0_205, %c0_206] : memref<1x256xf32, #tpu.memory_space<vmem>>, vector<1x256xf32>
    %224 = vector.broadcast %223 : vector<1x256xf32> to vector<72x256xf32>
    %225 = arith.addf %222, %224 : vector<72x256xf32>
    %c0_207 = arith.constant 0 : index
    %c0_208 = arith.constant 0 : index
    %226 = vector.load %arg21[%c0_207, %c0_208] : memref<18x72xf32, #tpu.memory_space<vmem>>, vector<18x72xf32>
    %cst_209 = arith.constant dense<0.000000e+00> : vector<18x256xf32>
    %227 = tpu.matmul %226, %225, %cst_209 {dimension_numbers = #tpu.dot_dimension_numbers<[1], [0], [0], [1], [0, 0, 1, 1], [], []>} : vector<18x72xf32>, vector<72x256xf32>, vector<18x256xf32> -> vector<18x256xf32>
    %228 = arith.addf %220, %227 : vector<18x256xf32>
    %cst_210 = arith.constant 1.000000e-01 : f32
    %229 = vector.broadcast %cst_210 : f32 to vector<18x256xf32>
    %230 = arith.mulf %229, %228 : vector<18x256xf32>
    %231 = arith.maximumf %228, %230 : vector<18x256xf32>
    %232 = arith.truncf %231 : vector<18x256xf32> to vector<18x256xbf16>
    %c0_211 = arith.constant 0 : index
    %c0_212 = arith.constant 0 : index
    %233 = vector.load %arg22[%c0_211, %c0_212] : memref<256x128xbf16, #tpu.memory_space<vmem>>, vector<256x128xbf16>
    %cst_213 = arith.constant dense<0.000000e+00> : vector<18x128xf32>
    %234 = tpu.matmul %232, %233, %cst_213 {dimension_numbers = #tpu.dot_dimension_numbers<[1], [0], [0], [1], [0, 0, 1, 1], [], []>} : vector<18x256xbf16>, vector<256x128xbf16>, vector<18x128xf32> -> vector<18x128xf32>
    %c0_214 = arith.constant 0 : index
    %c0_215 = arith.constant 0 : index
    %235 = vector.load %arg23[%c0_214, %c0_215] : memref<1x128xf32, #tpu.memory_space<vmem>>, vector<1x128xf32>
    %236 = vector.broadcast %235 : vector<1x128xf32> to vector<18x128xf32>
    %237 = arith.addf %234, %236 : vector<18x128xf32>
    %cst_216 = arith.constant 1.000000e-01 : f32
    %238 = vector.broadcast %cst_216 : f32 to vector<18x128xf32>
    %239 = arith.mulf %238, %237 : vector<18x128xf32>
    %240 = arith.maximumf %237, %239 : vector<18x128xf32>
    %241 = arith.truncf %240 : vector<18x128xf32> to vector<18x128xbf16>
    %c8_217 = arith.constant 8 : index
    %c0_218 = arith.constant 0 : index
    %242 = vector.load %arg36[%c8_217, %c0_218] : memref<88x128xbf16, #tpu.memory_space<vmem>>, vector<18x128xbf16>
    tpu.vector_store %arg36[%c8_217, %c0_218], %241 {strides = array<i32>} : memref<88x128xbf16, #tpu.memory_space<vmem>>, vector<18x128xbf16>,
    %cst_219 = arith.constant 0.000000e+00 : f32
    %243 = vector.broadcast %cst_219 : f32 to vector<18x128xf32>
    %c4_220 = arith.constant 4 : index
    %c0_221 = arith.constant 0 : index
    %244 = vector.load %arg36[%c4_220, %c0_221] : memref<88x128xbf16, #tpu.memory_space<vmem>>, vector<18x128xbf16>
    %c0_222 = arith.constant 0 : index
    %c0_223 = arith.constant 0 : index
    %c0_224 = arith.constant 0 : index
    %245 = vector.load %arg30[%c0_222, %c0_223, %c0_224] : memref<9x18x128xbf16, #tpu.memory_space<vmem>>, vector<1x18x128xbf16>
    %246 = vector.shape_cast %245 : vector<1x18x128xbf16> to vector<18x128xbf16>
    %247 = arith.mulf %244, %246 : vector<18x128xbf16>
    %c0_225 = arith.constant 0 : index
    %c0_226 = arith.constant 0 : index
    %c0_227 = arith.constant 0 : index
    %248 = vector.load %arg24[%c0_225, %c0_226, %c0_227] : memref<9x128x128xbf16, #tpu.memory_space<vmem>>, vector<1x128x128xbf16>
    %249 = vector.shape_cast %248 : vector<1x128x128xbf16> to vector<128x128xbf16>
    %cst_228 = arith.constant dense<0.000000e+00> : vector<18x128xf32>
    %250 = tpu.matmul %247, %249, %cst_228 {dimension_numbers = #tpu.dot_dimension_numbers<[1], [0], [0], [1], [0, 0, 1, 1], [], []>} : vector<18x128xbf16>, vector<128x128xbf16>, vector<18x128xf32> -> vector<18x128xf32>
    %251 = arith.addf %243, %250 : vector<18x128xf32>
    %c5_229 = arith.constant 5 : index
    %c0_230 = arith.constant 0 : index
    %252 = vector.load %arg36[%c5_229, %c0_230] : memref<88x128xbf16, #tpu.memory_space<vmem>>, vector<18x128xbf16>
    %c1_231 = arith.constant 1 : index
    %c0_232 = arith.constant 0 : index
    %c0_233 = arith.constant 0 : index
    %253 = vector.load %arg30[%c1_231, %c0_232, %c0_233] : memref<9x18x128xbf16, #tpu.memory_space<vmem>>, vector<1x18x128xbf16>
    %254 = vector.shape_cast %253 : vector<1x18x128xbf16> to vector<18x128xbf16>
    %255 = arith.mulf %252, %254 : vector<18x128xbf16>
    %c1_234 = arith.constant 1 : index
    %c0_235 = arith.constant 0 : index
    %c0_236 = arith.constant 0 : index
    %256 = vector.load %arg24[%c1_234, %c0_235, %c0_236] : memref<9x128x128xbf16, #tpu.memory_space<vmem>>, vector<1x128x128xbf16>
    %257 = vector.shape_cast %256 : vector<1x128x128xbf16> to vector<128x128xbf16>
    %cst_237 = arith.constant dense<0.000000e+00> : vector<18x128xf32>
    %258 = tpu.matmul %255, %257, %cst_237 {dimension_numbers = #tpu.dot_dimension_numbers<[1], [0], [0], [1], [0, 0, 1, 1], [], []>} : vector<18x128xbf16>, vector<128x128xbf16>, vector<18x128xf32> -> vector<18x128xf32>
    %259 = arith.addf %251, %258 : vector<18x128xf32>
    %c6_238 = arith.constant 6 : index
    %c0_239 = arith.constant 0 : index
    %260 = vector.load %arg36[%c6_238, %c0_239] : memref<88x128xbf16, #tpu.memory_space<vmem>>, vector<18x128xbf16>
    %c2_240 = arith.constant 2 : index
    %c0_241 = arith.constant 0 : index
    %c0_242 = arith.constant 0 : index
    %261 = vector.load %arg30[%c2_240, %c0_241, %c0_242] : memref<9x18x128xbf16, #tpu.memory_space<vmem>>, vector<1x18x128xbf16>
    %262 = vector.shape_cast %261 : vector<1x18x128xbf16> to vector<18x128xbf16>
    %263 = arith.mulf %260, %262 : vector<18x128xbf16>
    %c2_243 = arith.constant 2 : index
    %c0_244 = arith.constant 0 : index
    %c0_245 = arith.constant 0 : index
    %264 = vector.load %arg24[%c2_243, %c0_244, %c0_245] : memref<9x128x128xbf16, #tpu.memory_space<vmem>>, vector<1x128x128xbf16>
    %265 = vector.shape_cast %264 : vector<1x128x128xbf16> to vector<128x128xbf16>
    %cst_246 = arith.constant dense<0.000000e+00> : vector<18x128xf32>
    %266 = tpu.matmul %263, %265, %cst_246 {dimension_numbers = #tpu.dot_dimension_numbers<[1], [0], [0], [1], [0, 0, 1, 1], [], []>} : vector<18x128xbf16>, vector<128x128xbf16>, vector<18x128xf32> -> vector<18x128xf32>
    %267 = arith.addf %259, %266 : vector<18x128xf32>
    %c7_247 = arith.constant 7 : index
    %c0_248 = arith.constant 0 : index
    %268 = vector.load %arg36[%c7_247, %c0_248] : memref<88x128xbf16, #tpu.memory_space<vmem>>, vector<18x128xbf16>
    %c3_249 = arith.constant 3 : index
    %c0_250 = arith.constant 0 : index
    %c0_251 = arith.constant 0 : index
    %269 = vector.load %arg30[%c3_249, %c0_250, %c0_251] : memref<9x18x128xbf16, #tpu.memory_space<vmem>>, vector<1x18x128xbf16>
    %270 = vector.shape_cast %269 : vector<1x18x128xbf16> to vector<18x128xbf16>
    %271 = arith.mulf %268, %270 : vector<18x128xbf16>
    %c3_252 = arith.constant 3 : index
    %c0_253 = arith.constant 0 : index
    %c0_254 = arith.constant 0 : index
    %272 = vector.load %arg24[%c3_252, %c0_253, %c0_254] : memref<9x128x128xbf16, #tpu.memory_space<vmem>>, vector<1x128x128xbf16>
    %273 = vector.shape_cast %272 : vector<1x128x128xbf16> to vector<128x128xbf16>
    %cst_255 = arith.constant dense<0.000000e+00> : vector<18x128xf32>
    %274 = tpu.matmul %271, %273, %cst_255 {dimension_numbers = #tpu.dot_dimension_numbers<[1], [0], [0], [1], [0, 0, 1, 1], [], []>} : vector<18x128xbf16>, vector<128x128xbf16>, vector<18x128xf32> -> vector<18x128xf32>
    %275 = arith.addf %267, %274 : vector<18x128xf32>
    %c8_256 = arith.constant 8 : index
    %c0_257 = arith.constant 0 : index
    %276 = vector.load %arg36[%c8_256, %c0_257] : memref<88x128xbf16, #tpu.memory_space<vmem>>, vector<18x128xbf16>
    %c4_258 = arith.constant 4 : index
    %c0_259 = arith.constant 0 : index
    %c0_260 = arith.constant 0 : index
    %277 = vector.load %arg30[%c4_258, %c0_259, %c0_260] : memref<9x18x128xbf16, #tpu.memory_space<vmem>>, vector<1x18x128xbf16>
    %278 = vector.shape_cast %277 : vector<1x18x128xbf16> to vector<18x128xbf16>
    %279 = arith.mulf %276, %278 : vector<18x128xbf16>
    %c4_261 = arith.constant 4 : index
    %c0_262 = arith.constant 0 : index
    %c0_263 = arith.constant 0 : index
    %280 = vector.load %arg24[%c4_261, %c0_262, %c0_263] : memref<9x128x128xbf16, #tpu.memory_space<vmem>>, vector<1x128x128xbf16>
    %281 = vector.shape_cast %280 : vector<1x128x128xbf16> to vector<128x128xbf16>
    %cst_264 = arith.constant dense<0.000000e+00> : vector<18x128xf32>
    %282 = tpu.matmul %279, %281, %cst_264 {dimension_numbers = #tpu.dot_dimension_numbers<[1], [0], [0], [1], [0, 0, 1, 1], [], []>} : vector<18x128xbf16>, vector<128x128xbf16>, vector<18x128xf32> -> vector<18x128xf32>
    %283 = arith.addf %275, %282 : vector<18x128xf32>
    %c9_265 = arith.constant 9 : index
    %c0_266 = arith.constant 0 : index
    %284 = vector.load %arg36[%c9_265, %c0_266] : memref<88x128xbf16, #tpu.memory_space<vmem>>, vector<18x128xbf16>
    %c5_267 = arith.constant 5 : index
    %c0_268 = arith.constant 0 : index
    %c0_269 = arith.constant 0 : index
    %285 = vector.load %arg30[%c5_267, %c0_268, %c0_269] : memref<9x18x128xbf16, #tpu.memory_space<vmem>>, vector<1x18x128xbf16>
    %286 = vector.shape_cast %285 : vector<1x18x128xbf16> to vector<18x128xbf16>
    %287 = arith.mulf %284, %286 : vector<18x128xbf16>
    %c5_270 = arith.constant 5 : index
    %c0_271 = arith.constant 0 : index
    %c0_272 = arith.constant 0 : index
    %288 = vector.load %arg24[%c5_270, %c0_271, %c0_272] : memref<9x128x128xbf16, #tpu.memory_space<vmem>>, vector<1x128x128xbf16>
    %289 = vector.shape_cast %288 : vector<1x128x128xbf16> to vector<128x128xbf16>
    %cst_273 = arith.constant dense<0.000000e+00> : vector<18x128xf32>
    %290 = tpu.matmul %287, %289, %cst_273 {dimension_numbers = #tpu.dot_dimension_numbers<[1], [0], [0], [1], [0, 0, 1, 1], [], []>} : vector<18x128xbf16>, vector<128x128xbf16>, vector<18x128xf32> -> vector<18x128xf32>
    %291 = arith.addf %283, %290 : vector<18x128xf32>
    %c10 = arith.constant 10 : index
    %c0_274 = arith.constant 0 : index
    %292 = vector.load %arg36[%c10, %c0_274] : memref<88x128xbf16, #tpu.memory_space<vmem>>, vector<18x128xbf16>
    %c6_275 = arith.constant 6 : index
    %c0_276 = arith.constant 0 : index
    %c0_277 = arith.constant 0 : index
    %293 = vector.load %arg30[%c6_275, %c0_276, %c0_277] : memref<9x18x128xbf16, #tpu.memory_space<vmem>>, vector<1x18x128xbf16>
    %294 = vector.shape_cast %293 : vector<1x18x128xbf16> to vector<18x128xbf16>
    %295 = arith.mulf %292, %294 : vector<18x128xbf16>
    %c6_278 = arith.constant 6 : index
    %c0_279 = arith.constant 0 : index
    %c0_280 = arith.constant 0 : index
    %296 = vector.load %arg24[%c6_278, %c0_279, %c0_280] : memref<9x128x128xbf16, #tpu.memory_space<vmem>>, vector<1x128x128xbf16>
    %297 = vector.shape_cast %296 : vector<1x128x128xbf16> to vector<128x128xbf16>
    %cst_281 = arith.constant dense<0.000000e+00> : vector<18x128xf32>
    %298 = tpu.matmul %295, %297, %cst_281 {dimension_numbers = #tpu.dot_dimension_numbers<[1], [0], [0], [1], [0, 0, 1, 1], [], []>} : vector<18x128xbf16>, vector<128x128xbf16>, vector<18x128xf32> -> vector<18x128xf32>
    %299 = arith.addf %291, %298 : vector<18x128xf32>
    %c11 = arith.constant 11 : index
    %c0_282 = arith.constant 0 : index
    %300 = vector.load %arg36[%c11, %c0_282] : memref<88x128xbf16, #tpu.memory_space<vmem>>, vector<18x128xbf16>
    %c7_283 = arith.constant 7 : index
    %c0_284 = arith.constant 0 : index
    %c0_285 = arith.constant 0 : index
    %301 = vector.load %arg30[%c7_283, %c0_284, %c0_285] : memref<9x18x128xbf16, #tpu.memory_space<vmem>>, vector<1x18x128xbf16>
    %302 = vector.shape_cast %301 : vector<1x18x128xbf16> to vector<18x128xbf16>
    %303 = arith.mulf %300, %302 : vector<18x128xbf16>
    %c7_286 = arith.constant 7 : index
    %c0_287 = arith.constant 0 : index
    %c0_288 = arith.constant 0 : index
    %304 = vector.load %arg24[%c7_286, %c0_287, %c0_288] : memref<9x128x128xbf16, #tpu.memory_space<vmem>>, vector<1x128x128xbf16>
    %305 = vector.shape_cast %304 : vector<1x128x128xbf16> to vector<128x128xbf16>
    %cst_289 = arith.constant dense<0.000000e+00> : vector<18x128xf32>
    %306 = tpu.matmul %303, %305, %cst_289 {dimension_numbers = #tpu.dot_dimension_numbers<[1], [0], [0], [1], [0, 0, 1, 1], [], []>} : vector<18x128xbf16>, vector<128x128xbf16>, vector<18x128xf32> -> vector<18x128xf32>
    %307 = arith.addf %299, %306 : vector<18x128xf32>
    %c12 = arith.constant 12 : index
    %c0_290 = arith.constant 0 : index
    %308 = vector.load %arg36[%c12, %c0_290] : memref<88x128xbf16, #tpu.memory_space<vmem>>, vector<18x128xbf16>
    %c8_291 = arith.constant 8 : index
    %c0_292 = arith.constant 0 : index
    %c0_293 = arith.constant 0 : index
    %309 = vector.load %arg30[%c8_291, %c0_292, %c0_293] : memref<9x18x128xbf16, #tpu.memory_space<vmem>>, vector<1x18x128xbf16>
    %310 = vector.shape_cast %309 : vector<1x18x128xbf16> to vector<18x128xbf16>
    %311 = arith.mulf %308, %310 : vector<18x128xbf16>
    %c8_294 = arith.constant 8 : index
    %c0_295 = arith.constant 0 : index
    %c0_296 = arith.constant 0 : index
    %312 = vector.load %arg24[%c8_294, %c0_295, %c0_296] : memref<9x128x128xbf16, #tpu.memory_space<vmem>>, vector<1x128x128xbf16>
    %313 = vector.shape_cast %312 : vector<1x128x128xbf16> to vector<128x128xbf16>
    %cst_297 = arith.constant dense<0.000000e+00> : vector<18x128xf32>
    %314 = tpu.matmul %311, %313, %cst_297 {dimension_numbers = #tpu.dot_dimension_numbers<[1], [0], [0], [1], [0, 0, 1, 1], [], []>} : vector<18x128xbf16>, vector<128x128xbf16>, vector<18x128xf32> -> vector<18x128xf32>
    %315 = arith.addf %307, %314 : vector<18x128xf32>
    %c0_298 = arith.constant 0 : index
    %c0_299 = arith.constant 0 : index
    %316 = vector.load %arg31[%c0_298, %c0_299] : memref<8x18xf32, #tpu.memory_space<vmem>>, vector<8x18xf32>
    %cst_300 = arith.constant dense<0.000000e+00> : vector<8x128xf32>
    %317 = tpu.matmul %316, %315, %cst_300 {dimension_numbers = #tpu.dot_dimension_numbers<[1], [0], [0], [1], [0, 0, 1, 1], [], []>} : vector<8x18xf32>, vector<18x128xf32>, vector<8x128xf32> -> vector<8x128xf32>
    %c0_301 = arith.constant 0 : index
    %c0_302 = arith.constant 0 : index
    %318 = vector.load %arg25[%c0_301, %c0_302] : memref<1x128xf32, #tpu.memory_space<vmem>>, vector<1x128xf32>
    %319 = vector.broadcast %318 : vector<1x128xf32> to vector<8x128xf32>
    %320 = arith.addf %317, %319 : vector<8x128xf32>
    %cst_303 = arith.constant 1.000000e-01 : f32
    %321 = vector.broadcast %cst_303 : f32 to vector<8x128xf32>
    %322 = arith.mulf %321, %320 : vector<8x128xf32>
    %323 = arith.maximumf %320, %322 : vector<8x128xf32>
    %324 = arith.truncf %323 : vector<8x128xf32> to vector<8x128xbf16>
    %c0_304 = arith.constant 0 : index
    %c0_305 = arith.constant 0 : index
    %325 = vector.load %arg26[%c0_304, %c0_305] : memref<128x384xbf16, #tpu.memory_space<vmem>>, vector<128x384xbf16>
    %cst_306 = arith.constant dense<0.000000e+00> : vector<8x384xf32>
    %326 = tpu.matmul %324, %325, %cst_306 {dimension_numbers = #tpu.dot_dimension_numbers<[1], [0], [0], [1], [0, 0, 1, 1], [], []>} : vector<8x128xbf16>, vector<128x384xbf16>, vector<8x384xf32> -> vector<8x384xf32>
    %c0_307 = arith.constant 0 : index
    %c0_308 = arith.constant 0 : index
    %327 = vector.load %arg27[%c0_307, %c0_308] : memref<1x384xf32, #tpu.memory_space<vmem>>, vector<1x384xf32>
    %328 = vector.broadcast %327 : vector<1x384xf32> to vector<8x384xf32>
    %329 = arith.addf %326, %328 : vector<8x384xf32>
    %c0_309 = arith.constant 0 : index
    %c0_310 = arith.constant 0 : index
    %330 = vector.load %arg28[%c0_309, %c0_310] : memref<256x384xbf16, #tpu.memory_space<vmem>>, vector<256x384xbf16>
    %cst_311 = arith.constant dense<0.000000e+00> : vector<18x384xf32>
    %331 = tpu.matmul %232, %330, %cst_311 {dimension_numbers = #tpu.dot_dimension_numbers<[1], [0], [0], [1], [0, 0, 1, 1], [], []>} : vector<18x256xbf16>, vector<256x384xbf16>, vector<18x384xf32> -> vector<18x384xf32>
    %c0_312 = arith.constant 0 : index
    %c0_313 = arith.constant 0 : index
    %332 = vector.load %arg29[%c0_312, %c0_313] : memref<1x384xf32, #tpu.memory_space<vmem>>, vector<1x384xf32>
    %333 = vector.broadcast %332 : vector<1x384xf32> to vector<18x384xf32>
    %334 = arith.addf %331, %333 : vector<18x384xf32>
    %c0_314 = arith.constant 0 : index
    %c0_315 = arith.constant 0 : index
    %335 = vector.load %arg31[%c0_314, %c0_315] : memref<8x18xf32, #tpu.memory_space<vmem>>, vector<8x18xf32>
    %cst_316 = arith.constant dense<0.000000e+00> : vector<8x384xf32>
    %336 = tpu.matmul %335, %334, %cst_316 {dimension_numbers = #tpu.dot_dimension_numbers<[1], [0], [0], [1], [0, 0, 1, 1], [], []>} : vector<8x18xf32>, vector<18x384xf32>, vector<8x384xf32> -> vector<8x384xf32>
    %337 = arith.addf %329, %336 : vector<8x384xf32>
    %cst_317 = arith.constant 1.000000e-01 : f32
    %338 = vector.broadcast %cst_317 : f32 to vector<8x384xf32>
    %339 = arith.mulf %338, %337 : vector<8x384xf32>
    %340 = arith.maximumf %337, %339 : vector<8x384xf32>
    %c0_318 = arith.constant 0 : index
    %c0_319 = arith.constant 0 : index
    %341 = vector.load %arg32[%c0_318, %c0_319] : memref<8x8xf32, #tpu.memory_space<vmem>>, vector<8x8xf32>
    %cst_320 = arith.constant dense<0.000000e+00> : vector<8x384xf32>
    %342 = tpu.matmul %341, %340, %cst_320 {dimension_numbers = #tpu.dot_dimension_numbers<[1], [0], [0], [1], [0, 0, 1, 1], [], []>} : vector<8x8xf32>, vector<8x384xf32>, vector<8x384xf32> -> vector<8x384xf32>
    %c0_321 = arith.constant 0 : index
    %c0_322 = arith.constant 0 : index
    %343 = vector.load %arg33[%c0_321, %c0_322] : memref<384x128xf32, #tpu.memory_space<vmem>>, vector<384x128xf32>
    %cst_323 = arith.constant dense<0.000000e+00> : vector<8x128xf32>
    %344 = tpu.matmul %342, %343, %cst_323 {dimension_numbers = #tpu.dot_dimension_numbers<[1], [0], [0], [1], [0, 0, 1, 1], [], []>} : vector<8x384xf32>, vector<384x128xf32>, vector<8x128xf32> -> vector<8x128xf32>
    %c0_324 = arith.constant 0 : index
    %c0_325 = arith.constant 0 : index
    %345 = vector.load %arg34[%c0_324, %c0_325] : memref<1x128xf32, #tpu.memory_space<vmem>>, vector<1x128xf32>
    %346 = vector.broadcast %345 : vector<1x128xf32> to vector<8x128xf32>
    %347 = arith.addf %344, %346 : vector<8x128xf32>
    %c0_326 = arith.constant 0 : index
    %c0_327 = arith.constant 0 : index
    %348 = vector.load %arg35[%c0_326, %c0_327] : memref<8x128xf32, #tpu.memory_space<vmem>>, vector<8x128xf32>
    tpu.vector_store %arg35[%c0_326, %c0_327], %347 {strides = array<i32>} : memref<8x128xf32, #tpu.memory_space<vmem>>, vector<8x128xf32>,
    return
  }
}

</mosaic_0001>

<bundles_post_ra>
// kernel: resnet_forward.1
= control target key start
LH: loop header
LB: loop body
LE: loop exit
PB: predicated region body
PF: predicated region fallthrough
CT: control target
= control target key end

     0   :  { %s13730_s3 = smov 1   ;;  %s13731_s10 = smov 3   ;;  %v17342_v27 = vmov 0.0   ;;  %vm13733_vm0 = vmmov 0   ;;  %v17340_v35 = vmov 0   ;;  %vm1019_vm1 = vcmask 1040384   ;;  %s17339_s0 = inlined_call_operand.smem [shape: u32[36], index: -1, kind: input, shape index: {}] }
   0x1   :  { %s10378_s6 = sld [smem:[%s17339_s0 + %s13730_s3]]   ;;  %12176 = vmatprep.subr.bf16.mxu1 %v17342_v27  ;;  %12192 = vmatprep.mubr.msk.bf16.mxu1 %vm13733_vm0, %v17342_v27  ;;  %644 = vst [vmem:[#allocation2 + $0x4] sm:$0xf] %v17340_v35  ;;  %643 = vst [vmem:[#allocation2] sm:$0xf] %v17340_v35  ;;  %s13735_s14 = smov 2   ;;  %vm1020_vm2 = vcmask 1044484  }
   0x2   :  { %s13779_s9 = sld [smem:[%s17339_s0]]   ;;  %645 = vst [vmem:[#allocation2 + $0x8] sm:$0xf] %v17340_v35  ;;  %646 = vst [vmem:[#allocation2 + $0xc] sm:$0xf] %v17340_v35  ;;  %s13736_s18 = smov 5   ;;  %vm1110_vm12 = vcmask 1046528  }
   0x3   :  { %s10380_s13 = sld [smem:[%s17339_s0 + %s13731_s10]]   ;;  %647 = vst [vmem:[#allocation2 + $0x10] sm:$0xf] %v17340_v35  ;;  %648 = vst [vmem:[#allocation2 + $0x14] sm:$0xf] %v17340_v35  ;;  %s13737_s22 = smov 11  }
   0x4   :  { %649 = vst [vmem:[#allocation2 + $0x18] sm:$0xf] %v17340_v35  ;;  %650 = vst [vmem:[#allocation2 + $0x1c] sm:$0xf] %v17340_v35  ;;  %s10379_s17 = sld [smem:[%s17339_s0 + %s13735_s14]]   ;;  %vm880_vm3 = vsmask.f32 256 }
   0x5   :  { %651 = vst [vmem:[#allocation2 + $0x20] sm:$0xf] %v17340_v35  ;;  %652 = vst [vmem:[#allocation2 + $0x24] sm:$0xf] %v17340_v35  ;;  %s13982_s21 = sld [smem:[%s17339_s0 + %s13736_s18]]   ;;  %vm881_vm4 = vsmask.f32 4368 }
   0x6   :  { %653 = vst [vmem:[#allocation2 + $0x28] sm:$0xf] %v17340_v35  ;;  %s14019_s25 = sld [smem:[%s17339_s0 + %s13737_s22]]   ;;  %s13738_s26 = smov 4   ;;  %vm14048_vm5 = vmor %vm1019_vm1, %vm1020_vm2  ;;  %vm1446_vm7 = vsmask.f32 1280 }
   0x7   :  { %v13291_v0 = vld [vmem:[%s10378_s6 + $0x38] sm:$0xff]   ;;  %v13292_v1 = vld [vmem:[%s10378_s6 + $0x30] sm:$0xff]   ;;  %v13293_v2 = vld [vmem:[%s10378_s6 + $0x28] sm:$0xff]   ;;  %s14040_s29 = sld [smem:[%s17339_s0 + %s13738_s26]]   ;;  %vm1447_vm8 = vsmask.f32 5392  ;;  %s13739_s30 = smov 9  }
   0x8   :  { %12124 = vmatprep.subr.bf16.mxu0 %v13291_v0  ;;  %v13294_v3 = vld [vmem:[%s10378_s6 + $0x20] sm:$0xff]   ;;  %v13295_v5 = vld [vmem:[%s10378_s6 + $0x18] sm:$0xff]   ;;  %v13296_v6 = vld [vmem:[%s10378_s6 + $0x10] sm:$0xff]   ;;  %vm1791_vm10 = vsmask.f32 3328  ;;  %s14591_s3 = sld [smem:[%s17339_s0 + %s13739_s30]]   ;;  %s13740_s4 = smov 7  }
   0x9   :  { %12125 = vmatpush3.bf16.msra.mxu0 %v13291_v0  ;;  %v13299_v4 = vld [vmem:[%s13779_s9] sm:$0xff]   ;;  %v13297_v7 = vld [vmem:[%s10378_s6 + $0x8] sm:$0xff]   ;;  %v13301_v10 = vld [vmem:[%s13779_s9 + $0x10] sm:$0xff]   ;;  %vm1792_vm11 = vsmask.f32 7440  ;;  %s15153_s7 = sld [smem:[%s17339_s0 + %s13740_s4]]   ;;  %s13741_s8 = smov 12  }
   0xa   :  { %12126 = vmatprep.subr.bf16.mxu0 %v13292_v1  ;;  %12140 = vmatprep.mubr.bf16.mxu0 %v13299_v4  ;;  %v13298_v8 = vld [vmem:[%s10378_s6] sm:$0xff]   ;;  %v13300_v9 = vld [vmem:[%s13779_s9 + $0x8] sm:$0xff]   ;;  %v13302_v11 = vld [vmem:[%s13779_s9 + $0x18] sm:$0xff]   ;;  %vm1270_vm13 = vsmask.f32 7424  ;;  %s15219_s11 = sld [smem:[%s17339_s0 + %s13741_s8]]   ;;  %s13742_s12 = smov 6  }
   0xb   :  { %v13303_v12 = vld [vmem:[%s13779_s9 + $0x20] sm:$0xff]   ;;  %v13304_v13 = vld [vmem:[%s13779_s9 + $0x28] sm:$0xff]   ;;  %v13305_v14 = vld [vmem:[%s13779_s9 + $0x30] sm:$0xff]   ;;  %vm1600_vm15 = vsmask.f32 6400  ;;  %s10383_s15 = sld [smem:[%s17339_s0 + %s13742_s12]]   ;;  %s13743_s16 = smov 10  }
   0xc   :  { %v13306_v15 = vld [vmem:[%s13779_s9 + $0x38] sm:$0xff]   ;;  %v13307_v16 = vld [vmem:[%s13779_s9 + $0x40] sm:$0xff]   ;;  %v13308_v17 = vld [vmem:[%s13779_s9 + $0x48] sm:$0xff]   ;;  %vm1945_vm1 = vsmask.f32 4352  ;;  %s10387_s19 = sld [smem:[%s17339_s0 + %s13743_s16]]   ;;  %s13744_s20 = smov 8  }
   0xd   :  { %12127 = vmatpush3.bf16.msra.mxu0 %v13292_v1  ;;  %v13309_v18 = vld [vmem:[%s13779_s9 + $0x50] sm:$0xff]   ;;  %v13310_v19 = vld [vmem:[%s13779_s9 + $0x58] sm:$0xff]   ;;  %v13311_v20 = vld [vmem:[%s13779_s9 + $0x60] sm:$0xff]   ;;  %vm2664_vm2 = vsmask.f32 2304  ;;  %s10385_s23 = sld [smem:[%s17339_s0 + %s13744_s20]]   ;;  %s13745_s24 = smov 14  }
   0xe   :  { %12128 = vmatprep.subr.bf16.mxu0 %v13293_v2  ;;  %v13312_v21 = vld [vmem:[%s13779_s9 + $0x68] sm:$0xff]   ;;  %v13313_v22 = vld [vmem:[%s13779_s9 + $0x70] sm:$0xff]   ;;  %v13314_v23 = vld [vmem:[%s13779_s9 + $0x78] sm:$0xff]   ;;  %s15363_s27 = sld [smem:[%s17339_s0 + %s13745_s24]]   ;;  %s13746_s28 = smov 20  }
   0xf   :  { %v13315_v24 = vld [vmem:[%s13779_s9 + $0x80] sm:$0xff]   ;;  %v13316_v25 = vld [vmem:[%s13779_s9 + $0x88] sm:$0xff]   ;;  %v13317_v26 = vld [vmem:[%s10380_s13 + $0x38] sm:$0xff]   ;;  %s15400_s1 = sld [smem:[%s17339_s0 + %s13746_s28]]   ;;  %s13747_s2 = smov 13  }
  0x10   :  { %12177 = vmatpush3.bf16.msra.mxu1 %v13317_v26  ;;  %v13318_v28 = vld [vmem:[%s10380_s13 + $0x30] sm:$0xff]   ;;  %v13319_v29 = vld [vmem:[%s10380_s13 + $0x28] sm:$0xff]   ;;  %v13320_v30 = vld [vmem:[%s10380_s13 + $0x20] sm:$0xff]   ;;  %s15509_s5 = sld [smem:[%s17339_s0 + %s13747_s2]]   ;;  %s13748_s6 = smov 18  }
  0x11   :  { %12129 = vmatpush3.bf16.msra.mxu0 %v13293_v2  ;;  %12178 = vmatprep.subr.bf16.mxu1 %v17342_v27  ;;  %v13321_v31 = vld [vmem:[%s10380_s13 + $0x18] sm:$0xff]   ;;  %v13322_v32 = vld [vmem:[%s10380_s13 + $0x10] sm:$0xff]   ;;  %v13323_v33 = vld [vmem:[%s10380_s13 + $0x8] sm:$0xff]   ;;  %s16670_s9 = sld [smem:[%s17339_s0 + %s13748_s6]]   ;;  %s13749_s10 = smov 16  }
  0x12   :  { %12130 = vmatprep.subr.bf16.mxu0 %v13294_v3  ;;  %v13324_v34 = vld [vmem:[%s10380_s13] sm:$0xff]   ;;  %vm14075_vm6 = vmor %vm880_vm3, %vm881_vm4  ;;  %vm3017_vm3 = vcmask 1042432   ;;  %vm2665_vm4 = vsmask.f32 6416  ;;  %s16701_s13 = sld [smem:[%s17339_s0 + %s13749_s10]]   ;;  %s13750_s14 = smov 21  }
  0x13   :  { %v13844_v58 = vld [vmem:[%s10379_s17] ss:$0 sm:$0xff]  ;;  %vm14179_vm9 = vmor %vm1446_vm7, %vm1447_vm8  ;;  %vm3018_vm7 = vcmask 1046532   ;;  %s16730_s17 = sld [smem:[%s17339_s0 + %s13750_s14]]   ;;  %s13751_s18 = smov 15  }
  0x14   :  { %12179 = vmatpush3.bf16.msra.mxu1 %v13318_v28  ;;  %vm14236_vm14 = vmor %vm1791_vm10, %vm1792_vm11  ;;  %vm3108_vm11 = vcmask 1044480   ;;  %s13752_s22 = smov 19   ;;  %s13753_s26 = smov 22  }
  0x15   :  { %12131 = vmatpush3.bf16.msra.mxu0 %v13294_v3  ;;  %12180 = vmatprep.subr.bf16.mxu1 %v17342_v27  ;;  %vm14818_vm8 = vmor %vm2664_vm2, %vm2665_vm4  ;;  %vm2818_vm2 = vsmask.f32 5376  ;;  %s13754_s30 = smov 17   ;;  %s13755_s4 = smov 24   ;;  %vm7638_vm4 = vcmask 1041408  }
  0x16   :  { %12132 = vmatprep.subr.bf16.mxu0 %v13295_v5  ;;  %vm14844_vm10 = vmor %vm3017_vm3, %vm3018_vm7  ;;  %vm6873_vm3 = vcmask 588800   ;;  %s13756_s8 = smov 30   ;;  %s13757_s12 = smov 23   ;;  %vm7639_vm7 = vcmask 1045508  }
  0x17   :  { %s13758_s16 = smov 26   ;;  %s13759_s20 = smov 31  }
  0x18   :  { %12181 = vmatpush3.bf16.msra.mxu1 %v13319_v29  ;;  %s13760_s24 = smov 28   ;;  %s13761_s28 = smov 25  }
  0x19   :  { %12133 = vmatpush3.bf16.msra.mxu0 %v13295_v5  ;;  %12182 = vmatprep.subr.bf16.mxu1 %v17342_v27  ;;  %s13762_s2 = smov 27   ;;  %s13763_s6 = smov 29  }
  0x1a   :  { %12134 = vmatprep.subr.bf16.mxu0 %v13296_v6  ;;  %s13764_s10 = smov 33   ;;  %s13765_s14 = smov 32  }
  0x1c   :  { %12183 = vmatpush3.bf16.msra.mxu1 %v13320_v30 }
  0x1d   :  { %12135 = vmatpush3.bf16.msra.mxu0 %v13296_v6  ;;  %12184 = vmatprep.subr.bf16.mxu1 %v17342_v27 }
  0x1e   :  { %12136 = vmatprep.subr.bf16.mxu0 %v13297_v7 }
  0x20   :  { %12185 = vmatpush3.bf16.msra.mxu1 %v13321_v31 }
  0x21   :  { %12137 = vmatpush3.bf16.msra.mxu0 %v13297_v7  ;;  %12186 = vmatprep.subr.bf16.mxu1 %v17342_v27 }
  0x22   :  { %12138 = vmatprep.subr.bf16.mxu0 %v13298_v8 }
  0x24   :  { %12187 = vmatpush3.bf16.msra.mxu1 %v13322_v32 }
  0x25   :  { %12139 = vmatpush3.bf16.msra.mxu0 %v13298_v8  ;;  %12188 = vmatprep.subr.bf16.mxu1 %v17342_v27 }
  0x26   :  { %12248 = vmatprep.subr.bf16.mxu0 %v17342_v27 }
  0x28   :  { %12141 = vmatmul.mubr.bf16.vlgmr.msra.gmra.mxu0 %v13300_v9  ;;  %12189 = vmatpush3.bf16.msra.mxu1 %v13323_v33 }
  0x29   :  { %12144 = vmatprep.mubr.bf16.mxu0 %v13301_v10  ;;  %12190 = vmatprep.subr.bf16.mxu1 %v17342_v27 }
  0x2c   :  { %12191 = vmatpush3.bf16.msra.mxu1 %v13324_v34 }
  0x2d   :  { %12212 = vmatprep.subr.bf16.mxu1 %v17342_v27 }
  0x30   :  { %12145 = vmatmul.mubr.bf16.gmra.mxu0 %v13302_v11 }
  0x31   :  { %12148 = vmatprep.mubr.bf16.mxu0 %v13303_v12 }
  0x38   :  { %12149 = vmatmul.mubr.bf16.gmra.mxu0 %v13304_v13 }
  0x39   :  { %12152 = vmatprep.mubr.bf16.mxu0 %v13305_v14 }
  0x40   :  { %12153 = vmatmul.mubr.bf16.gmra.mxu0 %v13306_v15 }
  0x41   :  { %12156 = vmatprep.mubr.bf16.mxu0 %v13307_v16 }
  0x48   :  { %12157 = vmatmul.mubr.bf16.gmra.mxu0 %v13308_v17 }
  0x49   :  { %12160 = vmatprep.mubr.bf16.mxu0 %v13309_v18 }
  0x50   :  { %12161 = vmatmul.mubr.bf16.gmra.mxu0 %v13310_v19 }
  0x51   :  { %12164 = vmatprep.mubr.bf16.mxu0 %v13311_v20 }
  0x58   :  { %12165 = vmatmul.mubr.bf16.gmra.mxu0 %v13312_v21 }
  0x59   :  { %12168 = vmatprep.mubr.bf16.mxu0 %v13313_v22 }
  0x60   :  { %12169 = vmatmul.mubr.bf16.gmra.mxu0 %v13314_v23 }
  0x61   :  { %12172 = vmatprep.mubr.bf16.mxu0 %v13315_v24 }
  0x68   :  { %12173 = vmatmul.mubr.bf16.gmra.mxu0 %v13316_v25 }
  0x69   :  { %12264 = vmatprep.mubr.msk.bf16.mxu0 %vm13733_vm0, %v17342_v27 }
  0xe8   :  { %v12142_v36 = vpop.f32.mrf.mxu0 }
  0xe9   :  { %v405_v61 = vadd.f32 %v12142_v36, %v13844_v58 }
  0xea   :  { %v396_v37 = vpop.f32.mrf.mxu0 }
  0xeb   :  { %v397_v62 = vadd.f32 %v13844_v58, %v396_v37  ;;  %v541_v6 = vmul.f32 0.1, %v405_v61 }
  0xec   :  { %v12143_v38 = vpop.f32.mrf.mxu0 }
  0xed   :  { %v13851_v63 = vadd.f32 %v12143_v38, %v13844_v58  ;;  %v539_v8 = vmul.f32 0.1, %v397_v62  ;;  %v577_v19 = vmax.f32 %v405_v61, %v541_v6 }
  0xee   :  { %v399_v39 = vpop.f32.mrf.mxu0 }
  0xef   :  { %v400_v1 = vadd.f32 %v13844_v58, %v399_v39  ;;  %v13865_v9 = vmul.f32 0.1, %v13851_v63  ;;  %v575_v23 = vmax.f32 %v397_v62, %v539_v8 }
  0xf0   :  { %v12146_v40 = vpop.f32.mrf.mxu0 }
  0xf1   :  { %v13859_v4 = vadd.f32 %v12146_v40, %v13844_v58  ;;  %v540_v11 = vmul.f32 0.1, %v400_v1  ;;  %v578_v29 = vmax.f32 %v13851_v63, %v13865_v9 }
  0xf2   :  { %v412_v41 = vpop.f32.mrf.mxu0 }
  0xf3   :  { %v13869_v15 = vmul.f32 0.1, %v13859_v4  ;;  %v13872_v16 = vadd.f32 %v13844_v58, %v412_v41  ;;  %v576_v30 = vmax.f32 %v400_v1, %v540_v11 }
  0xf4   :  { %v12147_v42 = vpop.f32.mrf.mxu0 }
  0xf5   :  { %v13876_v20 = vadd.f32 %v12147_v42, %v13844_v58  ;;  %v581_v33 = vmax.f32 %v13859_v4, %v13869_v15  ;;  %v13890_v34 = vmul.f32 0.1, %v13872_v16 }
  0xf6   :  { %v415_v43 = vpop.f32.mrf.mxu0 }
  0xf7   :  { %v13880_v24 = vadd.f32 %v13844_v58, %v415_v43  ;;  %v13894_v39 = vmul.f32 0.1, %v13876_v20 }
  0xf8   :  { %v12150_v44 = vpop.f32.mrf.mxu0 }
  0xf9   :  { %v437_v2 = vadd.f32 %v12150_v44, %v13844_v58  ;;  %v13898_v43 = vmul.f32 0.1, %v13880_v24  ;;  %v582_v63 = vmax.f32 %v13876_v20, %v13894_v39 }
  0xfa   :  { %v13827_v45 = vpop.f32.mrf.mxu0 }
  0xfb   :  { %v549_v12 = vmul.f32 0.1, %v437_v2 }
  0xfc   :  { %v12151_v46 = vpop.f32.mrf.mxu0 }
  0xfd   :  { %v440_v3 = vadd.f32 %v12151_v46, %v13844_v58  ;;  %v585_v31 = vmax.f32 %v437_v2, %v549_v12 }
  0xfe   :  { %v431_v47 = vpop.f32.mrf.mxu0 }
  0xff   :  { %v432_v7 = vadd.f32 %v13844_v58, %v431_v47  ;;  %v550_v13 = vmul.f32 0.1, %v440_v3 }
 0x100   :  { %v13829_v48 = vpop.f32.mrf.mxu0 }
 0x101   :  { %v548_v21 = vmul.f32 0.1, %v432_v7  ;;  %v586_v32 = vmax.f32 %v440_v3, %v550_v13 }
 0x102   :  { %v444_v49 = vpop.f32.mrf.mxu0 }
 0x103   :  { %v13883_v25 = vadd.f32 %v13844_v58, %v444_v49  ;;  %v584_v40 = vmax.f32 %v432_v7, %v548_v21 }
 0x104   :  { %v13831_v50 = vpop.f32.mrf.mxu0 }
 0x105   :  { %v551_v44 = vmul.f32 0.1, %v13883_v25  ;;  %v13910_v62 = vadd.f32 %v13831_v50, %v13844_v58  ;;  %v611_v7 = vmax.f32 %v575_v23, %v584_v40 }
 0x106   :  { %v13833_v51 = vpop.f32.mrf.mxu0 }
 0x107   :  { %v587_v12 = vmax.f32 %v13883_v25, %v551_v44  ;;  %v554_v23 = vmul.f32 0.1, %v13910_v62 }
 0x108   :  { %v12158_v52 = vpop.f32.mrf.mxu0 }
 0x109   :  { %v469_v17 = vadd.f32 %v12158_v52, %v13844_v58  ;;  %v612_v52 = vmax.f32 %v576_v30, %v585_v31 }
 0x10a   :  { %v13835_v53 = vpop.f32.mrf.mxu0 }
 0x10b   :  { %v557_v36 = vmul.f32 0.1, %v469_v17 }
 0x10c   :  { %v12159_v54 = vpop.f32.mrf.mxu0 }
 0x10d   :  { %v472_v22 = vadd.f32 %v12159_v54, %v13844_v58  ;;  %v13902_v54 = vmax.f32 %v577_v19, %v586_v32  ;;  %v593_v1 = vmax.f32 %v469_v17, %v557_v36 }
 0x10e   :  { %v13840_v55 = vpop.f32.mrf.mxu0 }
 0x10f   :  { %v558_v41 = vmul.f32 0.1, %v472_v22 }
 0x110   :  { %v13842_v56 = vpop.f32.mrf.mxu0 }
 0x111   :  { %v594_v8 = vmax.f32 %v472_v22, %v558_v41 }
 0x112   :  { %v476_v57 = vpop.f32.mrf.mxu0 }
 0x113   :  { %v477_v37 = vadd.f32 %v13844_v58, %v476_v57  ;;  %v13906_v57 = vadd.f32 %v13829_v48, %v13844_v58  ;;  %v461_v48 = vadd.f32 %v13844_v58, %v13835_v53 }
 0x114   :  { %v13846_v59 = vpop.f32.mrf.mxu0 }
 0x115   :  { %v559_v2 = vmul.f32 0.1, %v477_v37 }
 0x116   :  { %v479_v60 = vpop.f32.mrf.mxu0 }
 0x117   :  { %v480_v3 = vadd.f32 %v13844_v58, %v479_v60  ;;  %v595_v22 = vmax.f32 %v477_v37, %v559_v2  ;;  %v448_v37 = vadd.f32 %v13844_v58, %v13833_v51  ;;  %v614_v51 = vmax.f32 %v578_v29, %v587_v12 }
 0x118   :  { %v13853_v0 = vpop.f32.mrf.mxu0 }
 0x11a   :  { %v13861_v5 = vpop.f32.mrf.mxu0 }
 0x11b   :  { %v493_v53 = vadd.f32 %v13844_v58, %v13861_v5 }
 0x11c   :  { %v12167_v10 = vpop.f32.mrf.mxu0 }
 0x11d   :  { %v504_v14 = vadd.f32 %v12167_v10, %v13844_v58 }
 0x11e   :  { %v495_v18 = vpop.f32.mrf.mxu0 }
 0x11f   :  { %v566_v26 = vmul.f32 0.1, %v504_v14  ;;  %v496_v50 = vadd.f32 %v13844_v58, %v495_v18 }
 0x120   :  { %v12170_v28 = vpop.f32.mrf.mxu0 }
 0x121   :  { %v602_v46 = vmax.f32 %v504_v14, %v566_v26  ;;  %v517_v47 = vadd.f32 %v12170_v28, %v13844_v58  ;;  %v488_v26 = vadd.f32 %v13846_v59, %v13844_v58  ;;  %v560_v28 = vmul.f32 0.1, %v480_v3 }
 0x122   :  { %v508_v38 = vpop.f32.mrf.mxu0  ;;  %v485_v59 = vadd.f32 %v13842_v56, %v13844_v58  ;;  %v564_v44 = vmul.f32 0.1, %v496_v50 }
 0x123   :  { %v509_v42 = vadd.f32 %v13844_v58, %v508_v38  ;;  %v620_v13 = vmax.f32 %v593_v1, %v602_v46  ;;  %v569_v14 = vmul.f32 0.1, %v517_v47  ;;  %v596_v46 = vmax.f32 %v480_v3, %v560_v28 }
 0x124   :  { %v12171_v49 = vpop.f32.mrf.mxu0  ;;  %v590_v3 = vmax.f32 %v13910_v62, %v554_v23  ;;  %v580_v23 = vmax.f32 %v13880_v24, %v13898_v43  ;;  %v464_v43 = vadd.f32 %v13844_v58, %v13840_v55 }
 0x125   :  { %v567_v61 = vmul.f32 0.1, %v509_v42  ;;  %v605_v18 = vmax.f32 %v517_v47, %v569_v14  ;;  %v520_v36 = vadd.f32 %v12171_v49, %v13844_v58  ;;  %v629_v40 = vmax.f32 %v611_v7, %v620_v13 }
 0x126   :  { %v511_v6 = vpop.f32.mrf.mxu0  ;;  %v553_v47 = vmul.f32 0.1, %v13906_v57  ;;  %v563_v49 = vmul.f32 0.1, %v493_v53  ;;  %v562_v7 = vmul.f32 0.1, %v488_v26 }
 0x127   :  { %v603_v10 = vmax.f32 %v509_v42, %v567_v61  ;;  %v512_v11 = vadd.f32 %v13844_v58, %v511_v6  ;;  %v555_v42 = vmul.f32 0.1, %v461_v48  ;;  %v570_v56 = vmul.f32 0.1, %v520_v36 }
 0x128   :  { %v12174_v19 = vpop.f32.mrf.mxu0  ;;  %v552_v14 = vmul.f32 0.1, %v448_v37  ;;  %v599_v9 = vmax.f32 %v493_v53, %v563_v49  ;;  %v598_v62 = vmax.f32 %v488_v26, %v562_v7  ;;  %v13329_v49 = vld [vmem:[%s13982_s21 + $0x68] sm:$0xff]   ;;  %v13333_v7 = vld [vmem:[%s13982_s21 + $0x58] sm:$0xff]  }
 0x129   :  { %v621_v17 = vmax.f32 %v594_v8, %v603_v10  ;;  %v568_v21 = vmul.f32 0.1, %v512_v11  ;;  %v533_v60 = vadd.f32 %v12174_v19, %v13844_v58  ;;  %v623_v8 = vmax.f32 %v596_v46, %v605_v18 }
 0x12a   :  { %v524_v25 = vpop.f32.mrf.mxu0  ;;  %v591_v10 = vmax.f32 %v461_v48, %v555_v42  ;;  %v561_v19 = vmul.f32 0.1, %v485_v59  ;;  %v606_v48 = vmax.f32 %v520_v36, %v570_v56  ;;  %v501_v18 = vadd.f32 %v13853_v0, %v13844_v58  ;;  %v13335_v56 = vld [vmem:[%s13982_s21 + $0x50] sm:$0xff]  }
 0x12b   :  { %v604_v30 = vmax.f32 %v512_v11, %v568_v21  ;;  %v573_v31 = vmul.f32 0.1, %v533_v60  ;;  %v525_v32 = vadd.f32 %v13844_v58, %v524_v25  ;;  %v630_v41 = vmax.f32 %v612_v52, %v621_v17 }
 0x12c   :  { %v12175_v38 = vpop.f32.mrf.mxu0  ;;  %v600_v11 = vmax.f32 %v496_v50, %v564_v44  ;;  %v632_v50 = vmax.f32 %v614_v51, %v623_v8  ;;  %v618_v28 = vmax.f32 %v582_v63, %v591_v10  ;;  %v588_v25 = vmax.f32 %v448_v37, %v552_v14  ;;  %v13332_v51 = vld [vmem:[%s13982_s21 + $0x20] sm:$0xff]   ;;  %v13334_v8 = vld [vmem:[%s13982_s21 + $0x18] sm:$0xff]   ;;  %v13337_v10 = vld [vmem:[%s13982_s21 + $0x48] sm:$0xff]  }
 0x12d   :  { %v622_v5 = vmax.f32 %v595_v22, %v604_v30  ;;  %v571_v61 = vmul.f32 0.1, %v525_v32  ;;  %v13930_v2 = vpack.c.bf16 %v630_v41, %v629_v40  ;;  %v609_v6 = vmax.f32 %v533_v60, %v573_v31  ;;  %v13340_v14 = vld [vmem:[%s13982_s21] sm:$0xff]  }
 0x12e   :  { %v527_v1 = vpop.f32.mrf.mxu0  ;;  %v589_v60 = vmax.f32 %v13906_v57, %v553_v47  ;;  %v617_v22 = vmax.f32 %v581_v33, %v590_v3  ;;  %v597_v30 = vmax.f32 %v485_v59, %v561_v19  ;;  %v579_v57 = vmax.f32 %v13872_v16, %v13890_v34  ;;  %v13328_v47 = vld [vmem:[%s13982_s21 + $0x30] sm:$0xff]   ;;  %v10509_v19 = vld [vmem:[%s14019_s25 + $0x48] sm:$0xf]  ;;  %v10458_v63 = vld [vmem:[%s14019_s25 + $0x24] sm:$0xf] }
 0x12f   :  { %v528_v52 = vadd.f32 %v13844_v58, %v527_v1  ;;  %12193 = vmatmul.mubr.bf16.vlgmr.msra.gmra.mxu1 %v13930_v2  ;;  %v607_v17 = vmax.f32 %v525_v32, %v571_v61  ;;  %v631_v21 = vmax.f32 %v13902_v54, %v622_v5  ;;  %v627_v29 = vmax.f32 %v600_v11, %v609_v6  ;;  %v13325_v5 = vld [vmem:[%s13982_s21 + $0x78] sm:$0xff]   ;;  %v13327_v1 = vld [vmem:[%s13982_s21 + $0x70] sm:$0xff]   ;;  %v13330_v6 = vld [vmem:[%s13982_s21 + $0x28] sm:$0xff]  }
 0x130   :  { %12196 = vmatprep.mubr.msk.bf16.mxu1 %vm13733_vm0, %v17342_v27  ;;  %v616_v26 = vmax.f32 %v580_v23, %v589_v60  ;;  %v624_v32 = vmax.f32 %v597_v30, %v606_v48  ;;  %v615_v15 = vmax.f32 %v579_v57, %v588_v25  ;;  %v536_v24 = vadd.f32 %v12175_v38, %v13844_v58  ;;  %v13326_v61 = vld [vmem:[%s13982_s21 + $0x38] sm:$0xff]   ;;  %v13336_v3 = vld [vmem:[%s13982_s21 + $0x10] sm:$0xff]   ;;  %v13338_v11 = vld [vmem:[%s13982_s21 + $0x8] sm:$0xff]  }
 0x131   :  { %v572_v13 = vmul.f32 0.1, %v528_v52  ;;  %v625_v20 = vmax.f32 %v598_v62, %v607_v17  ;;  %v13950_v39 = vpack.c.bf16 %v632_v50, %v631_v21  ;;  %v636_v31 = vmax.f32 %v618_v28, %v627_v29  ;;  %12213 = vmatpush3.bf16.msra.mxu1 %v13325_v5  ;;  %12249 = vmatpush3.bf16.msra.mxu0 %v13326_v61  ;;  %v10459_v48 = vld [vmem:[%s14019_s25 + $0x28] sm:$0xf]  ;;  %v872_v50 = vld [vmem:[%s14019_s25 + $0x4] sm:$0xf] }
 0x132   :  { %v633_v16 = vmax.f32 %v615_v15, %v624_v32  ;;  %v429_v34 = vadd.f32 %v13844_v58, %v13827_v45  ;;  %v574_v36 = vmul.f32 0.1, %v536_v24  ;;  %v556_v41 = vmul.f32 0.1, %v464_v43  ;;  %12214 = vmatprep.subr.bf16.mxu1 %v17342_v27  ;;  %12250 = vmatprep.subr.bf16.mxu0 %v17342_v27  ;;  %v873_v23 = vld [vmem:[%s14019_s25 + $0x8] sm:$0xf] }
 0x133   :  { %v608_v12 = vmax.f32 %v528_v52, %v572_v13  ;;  %v634_v33 = vmax.f32 %v616_v26, %v625_v20  ;;  %v565_v37 = vmul.f32 0.1, %v501_v18  ;;  %v13331_v52 = vld [vmem:[%s13982_s21 + $0x60] sm:$0xff]   ;;  %v1450_v17 = vshrl.u32 %v10509_v19, 16  ;;  %v10460_v28 = vld [vmem:[%s14019_s25 + $0x2c] sm:$0xf] }
 0x134   :  { %v547_v38 = vmul.f32 0.1, %v429_v34  ;;  %v610_v42 = vmax.f32 %v536_v24, %v574_v36  ;;  %v592_v55 = vmax.f32 %v464_v43, %v556_v41  ;;  %v13339_v13 = vld [vmem:[%s13982_s21 + $0x40] sm:$0xff]   ;;  %v1453_v21 = vshll.u32 %v10509_v19, 16  ;;  %v14032_v20 = vld [vmem:[%s14019_s25 + $0x10] sm:$0xf] }
 0x135   :  { %v626_v54 = vmax.f32 %v599_v9, %v608_v12  ;;  %v13966_v40 = vpack.c.bf16 %v634_v33, %v633_v16  ;;  %v601_v59 = vmax.f32 %v501_v18, %v565_v37  ;;  %12215 = vmatpush3.bf16.msra.mxu1 %v13327_v1  ;;  %12251 = vmatpush3.bf16.msra.mxu0 %v13328_v47  ;;  %v871_v9 = vld [vmem:[%s14019_s25] sm:$0xf]  ;;  %v1022_v29 = vrot.slane %v10458_v63, 7  ;;  %v10461_v15 = vld [vmem:[%s14019_s25 + $0x30] sm:$0xf] }
 0x136   :  { %v583_v44 = vmax.f32 %v429_v34, %v547_v38  ;;  %12216 = vmatprep.subr.bf16.mxu1 %v17342_v27  ;;  %12252 = vmatprep.subr.bf16.mxu0 %v17342_v27  ;;  %v1452_v12 = vrot.slane %v1450_v17, 6  ;;  %v1455_v60 = vrot.slane %v1453_v21, 7  ;;  %v884_v62 = vshrl.u32 %v871_v9, 16  ;;  %v876_v33 = vld [vmem:[%s14019_s25 + $0x14] sm:$0xf] }
 0x137   :  { %v635_v53 = vmax.f32 %v617_v22, %v626_v54  ;;  %12197 = vmatmul.mubr.bf16.gmra.mxu1 %v13950_v39  ;;  %17366 = vst [vmem:[#allocation4_spill] sm:$0xff] %v13966_v40  ;;  %v628_v0 = vmax.f32 %v601_v59, %v610_v42  ;;  %v874_v22 = vld [vmem:[%s14019_s25 + $0xc] sm:$0xf]  ;;  %v901_v54 = vshrl.u32 %v873_v23, 16  ;;  %v1023_v26 = vrot.slane %v1022_v29, 4 }
 0x138   :  { %12200 = vmatprep.mubr.msk.bf16.mxu1 %vm13733_vm0, %v17342_v27  ;;  %v619_v46 = vmax.f32 %v583_v44, %v592_v55  ;;  %v14029_v25 = vor.u32 %v1455_v60, %v1452_v12  ;;  %v886_v30 = vrot.slane %v884_v62, 7  ;;  %v910_v57 = vshrl.u32 %v874_v22, 16  ;;  %v10462_v41 = vld [vmem:[%s14019_s25 + $0x34] sm:$0xf]  ;;  %v14044_v37 = vld [vmem:[#allocation2] sm:$0xe] }
 0x139   :  { %v13957_v4 = vpack.c.bf16 %v636_v31, %v635_v53  ;;  %12217 = vmatpush3.bf16.msra.mxu1 %v13329_v49  ;;  %12253 = vmatpush3.bf16.msra.mxu0 %v13330_v6  ;;  %v1024_v53 = vrot.slane %v10459_v48, 7  ;;  %v892_v31 = vshrl.u32 %v872_v50, 16  ;;  %v1027_v32 = vrot.slane %v10460_v28, 7  ;;  %v14092_v48 = vld [vmem:[%s14040_s29] ss:$0 sm:$0xff]  ;;  %s16820_s29 = sld [smem:[%s17339_s0 + %s13753_s26]]  }
 0x13a   :  { %v637_v45 = vmax.f32 %v619_v46, %v628_v0  ;;  %12218 = vmatprep.subr.bf16.mxu1 %v17342_v27  ;;  %12254 = vmatprep.subr.bf16.mxu0 %v17342_v27  ;;  %v903_v24 = vrot.slane %v901_v54, 7  ;;  %v919_v43 = vshrl.u32 %v14032_v20, 16  ;;  %v1457_v18 = vrot.slane %v14029_v25, 4 }
 0x13b   :  { %17365 = vst [vmem:[#allocation3_spill] sm:$0xff] %v13957_v4  ;;  %v887_v16 = vshll.u32 %v871_v9, 16  ;;  %v890_v34 = vrot.slane %v886_v30, 4  ;;  %v895_v36 = vshll.u32 %v872_v50, 16  ;;  %v17368_v38 = vmov 0 }
 0x13c   :  { %v13974_v58 = vpack.c.bf16 %v637_v45, %v637_v45  ;;  %v17369_v38 = vsel %vm14048_vm5, 4294967295, %v17368_v38  ;;  %v894_v42 = vrot.slane %v892_v31, 7  ;;  %v904_v55 = vshll.u32 %v873_v23, 16  ;;  %v879_v31 = vld [vmem:[%s14019_s25 + $0x20] sm:$0xf] }
 0x13d   :  { %12219 = vmatpush3.bf16.msra.mxu1 %v13331_v52  ;;  %12255 = vmatpush3.bf16.msra.mxu0 %v13332_v51  ;;  %17370 = vst [vmem:[#allocation6_spill] sm:$0xff] %v17369_v38  ;;  %v14052_v59 = vrot.slane %v910_v57, 7  ;;  %v913_v44 = vshll.u32 %v874_v22, 16  ;;  %v1026_v0 = vrot.slane %v1024_v53, 4  ;;  %v1029_v46 = vrot.slane %v1027_v32, 4 }
 0x13e   :  { %17367 = vst [vmem:[#allocation5_spill] sm:$0xff] %v13974_v58  ;;  %12220 = vmatprep.subr.bf16.mxu1 %v17342_v27  ;;  %12256 = vmatprep.subr.bf16.mxu0 %v17342_v27  ;;  %v1030_v45 = vrot.slane %v10461_v15, 7  ;;  %v928_v5 = vshrl.u32 %v876_v33, 16  ;;  %v899_v61 = vrot.slane %v894_v42, 4  ;;  %v908_v1 = vrot.slane %v903_v24, 4 }
 0x13f   :  { %12201 = vmatmul.mubr.bf16.gmra.mxu1 %v13966_v40  ;;  %v1033_v47 = vrot.slane %v10462_v41, 7  ;;  %v921_v49 = vrot.slane %v919_v43, 7  ;;  %v14056_v6 = vsel %vm14048_vm5, %v1023_v26, %v1024_v53  ;;  %v14059_v52 = vmul.bf16 %v1022_v29, %v14044_v37  ;;  %v10463_v51 = vld [vmem:[%s14019_s25 + $0x38] sm:$0xf] }
 0x140   :  { %12204 = vmatprep.mubr.msk.bf16.mxu1 %vm13733_vm0, %v17342_v27  ;;  %v17371_v19 = vmov 0  ;;  %v915_v17 = vor.u32 %v913_v44, %v14052_v59  ;;  %v922_v21 = vshll.u32 %v14032_v20, 16  ;;  %v14081_v63 = vrot.slane %v928_v5, 7  ;;  %v10511_v5 = vld [vmem:[%s14019_s25 + $0x50] sm:$0xf] }
 0x141   :  { %12221 = vmatpush3.bf16.msra.mxu1 %v13333_v7  ;;  %12257 = vmatpush3.bf16.msra.mxu0 %v13334_v8  ;;  %v877_v7 = vld [vmem:[%s14019_s25 + $0x18] sm:$0xf]  ;;  %v878_v8 = vld [vmem:[%s14019_s25 + $0x1c] sm:$0xf]  ;;  %v17372_v19 = vsel %vm14075_vm6, 4294967295, %v17371_v19  ;;  %v931_v9 = vshll.u32 %v876_v33, 16  ;;  %v14085_v29 = vsel %vm14048_vm5, %v1026_v0, %v1027_v32  ;;  %v14089_v12 = vsel %vm14048_vm5, %v1029_v46, %v1030_v45 }
 0x142   :  { %12222 = vmatprep.subr.bf16.mxu1 %v17342_v27  ;;  %12258 = vmatprep.subr.bf16.mxu0 %v17342_v27  ;;  %17373 = vst [vmem:[#allocation7_spill] sm:$0xff] %v17372_v19  ;;  %v937_v60 = vshrl.u32 %v877_v7, 16  ;;  %v946_v62 = vshrl.u32 %v878_v8, 16  ;;  %v1032_v50 = vrot.slane %v1030_v45, 4  ;;  %v1035_v23 = vrot.slane %v1033_v47, 4 }
 0x143   :  { %v1036_v22 = vrot.slane %v10463_v51, 7  ;;  %v917_v20 = vrot.slane %v14052_v59, 4  ;;  %v926_v53 = vrot.slane %v921_v49, 4  ;;  %v14109_v26 = vsel %vm14075_vm6, %v908_v1, %v915_v17  ;;  %v10510_v33 = vld [vmem:[%s14019_s25 + $0x4c] sm:$0xf] }
 0x144   :  { %v924_v32 = vor.u32 %v922_v21, %v921_v49  ;;  %v933_v15 = vor.u32 %v931_v9, %v14081_v63  ;;  %v939_v43 = vrot.slane %v937_v60, 7  ;;  %v955_v44 = vshrl.u32 %v879_v31, 16  ;;  %v10512_v21 = vld [vmem:[%s14019_s25 + $0x54] sm:$0xf] }
 0x145   :  { %12223 = vmatpush3.bf16.msra.mxu1 %v13335_v56  ;;  %12259 = vmatpush3.bf16.msra.mxu0 %v13336_v3  ;;  %v14066_v3 = vor.u32 %v887_v16, %v886_v30  ;;  %v940_v16 = vshll.u32 %v877_v7, 16  ;;  %v14123_v46 = vsel %vm14048_vm5, %v1035_v23, %v1036_v22  ;;  %v935_v51 = vrot.slane %v14081_v63, 4  ;;  %v10466_v7 = vld [vmem:[%s14019_s25 + $0x44] sm:$0xf] }
 0x146   :  { %12224 = vmatprep.subr.bf16.mxu1 %v17342_v27  ;;  %12260 = vmatprep.subr.bf16.mxu0 %v17342_v27  ;;  %v14128_v49 = vsel %vm14075_vm6, %v917_v20, %v924_v32  ;;  %v14138_v60 = vrot.slane %v955_v44, 7  ;;  %v1472_v23 = vshll.u32 %v10511_v5, 16  ;;  %v10547_v44 = vld [vmem:[%s14019_s25 + $0x6c] sm:$0xf] }
 0x147   :  { %12205 = vmatmul.mubr.bf16.gmra.mxu1 %v13957_v4 }
 0x148   :  { %12208 = vmatprep.mubr.msk.bf16.mxu1 %vm13733_vm0, %v17342_v27 }
 0x149   :  { %12225 = vmatpush3.bf16.msra.mxu1 %v13337_v10  ;;  %12261 = vmatpush3.bf16.msra.mxu0 %v13338_v11  ;;  %v897_v10 = vor.u32 %v895_v36, %v894_v42  ;;  %v906_v11 = vor.u32 %v904_v55, %v903_v24  ;;  %v10465_v24 = vld [vmem:[%s14019_s25 + $0x40] sm:$0xf]  ;;  %v949_v36 = vshll.u32 %v878_v8, 16  ;;  %v14118_v42 = vsel %vm14048_vm5, %v1032_v50, %v1033_v47 }
 0x14a   :  { %12226 = vmatprep.subr.bf16.mxu1 %v17342_v27  ;;  %12262 = vmatprep.subr.bf16.mxu0 %v17342_v27  ;;  %v1038_v55 = vrot.slane %v1036_v22, 4  ;;  %v1042_v45 = vrot.slane %v10465_v24, 7  ;;  %v14132_v47 = vsel %vm14075_vm6, %v926_v53, %v933_v15  ;;  %v1462_v8 = vshll.u32 %v10510_v33, 16 }
 0x14b   :  { %v14097_v54 = vsel %vm14075_vm6, %v890_v34, %v897_v10  ;;  %v14105_v57 = vsel %vm14075_vm6, %v899_v61, %v906_v11  ;;  %v14114_v34 = vrot.slane %v946_v62, 7  ;;  %v1459_v61 = vshrl.u32 %v10510_v33, 16 }
 0x14c   :  { %v942_v11 = vor.u32 %v940_v16, %v939_v43  ;;  %v958_v62 = vshll.u32 %v879_v31, 16  ;;  %v1469_v50 = vshrl.u32 %v10511_v5, 16  ;;  %v1045_v53 = vrot.slane %v10466_v7, 7  ;;  %v10548_v7 = vld [vmem:[%s14019_s25 + $0x70] sm:$0xf] }
 0x14d   :  { %12227 = vmatpush3.bf16.msra.mxu1 %v13339_v13  ;;  %12263 = vmatpush3.bf16.msra.mxu0 %v13340_v14  ;;  %v14069_v13 = vld [vmem:[%s14019_s25 + $0x3c] sm:$0xf]  ;;  %v14071_v14 = vld [vmem:[#allocation2] sm:$0xf]  ;;  %v951_v17 = vor.u32 %v949_v36, %v14114_v34  ;;  %v1461_v63 = vrot.slane %v1459_v61, 6  ;;  %v1044_v15 = vrot.slane %v1042_v45, 4 }
 0x14e   :  { %12284 = vmatprep.subr.bf16.mxu1 %v17342_v27  ;;  %12320 = vmatprep.subr.bf16.mxu0 %v17342_v27  ;;  %v1039_v28 = vrot.slane %v14069_v13, 7  ;;  %v973_v30 = vmul.bf16 %v14066_v3, %v14071_v14  ;;  %v944_v13 = vrot.slane %v939_v43, 4  ;;  %v953_v24 = vrot.slane %v14114_v34, 4 }
 0x14f   :  { %12209 = vmatmul.mubr.bf16.gmra.mxu1 %v13974_v58  ;;  %v1464_v33 = vrot.slane %v1462_v8, 7  ;;  %v1479_v43 = vshrl.u32 %v10512_v21, 16  ;;  %v960_v5 = vor.u32 %v958_v62, %v14138_v60  ;;  %v1471_v61 = vrot.slane %v1469_v50, 6 }
 0x150   :  { %12228 = vmatprep.mubr.msk.bf16.mxu1 %vm13733_vm0, %v17342_v27  ;;  %v1041_v59 = vrot.slane %v1039_v28, 4  ;;  %v14144_v36 = vsel %vm14048_vm5, %v1038_v55, %v1039_v28  ;;  %v14157_v34 = vsel %vm14075_vm6, %v944_v13, %v951_v17  ;;  %v1474_v28 = vrot.slane %v1472_v23, 7 }
 0x151   :  { %v1795_v8 = vshll.u32 %v10547_v44, 16  ;;  %v14167_v13 = vsel %vm14048_vm5, %v1044_v15, %v1045_v53  ;;  %v1482_v17 = vshll.u32 %v10512_v21, 16  ;;  %v1808_v62 = vshrl.u32 %v10548_v7, 16  ;;  %v14184_v21 = vld [vmem:[%s14019_s25 + $0x78] sm:$0xf] }
 0x152   :  { %v14148_v31 = vsel %vm14048_vm5, %v1041_v59, %v1042_v45  ;;  %v14172_v23 = vsel %vm14075_vm6, %v953_v24, %v960_v5  ;;  %v1804_v15 = vshll.u32 %v10548_v7, 16  ;;  %v1824_v7 = vshll.u32 %v14184_v21, 16 }
 0x153   :  { %v14186_v24 = vrot.slane %v1795_v8, 5 }
 0x1ef   :  { %v759_v41 = vpop.f32.mrf.mxu1 }
 0x1f0   :  { %v760_v0 = vadd.f32 %v14092_v48, %v759_v41  ;;  %v14152_v41 = vsel %vm14075_vm6, %v935_v51, %v942_v11 }
 0x1f1   :  { %v12194_v1 = vpop.f32.mrf.mxu1 }
 0x1f2   :  { %v797_v10 = vmul.f32 0.1, %v760_v0  ;;  %v14161_v1 = vrot.slane %v1045_v53, 4 }
 0x1f3   :  { %v762_v9 = vpop.f32.mrf.mxu1 }
 0x1f4   :  { %v806_v22 = vmax.f32 %v760_v0, %v797_v10  ;;  %v763_v20 = vadd.f32 %v14092_v48, %v762_v9  ;;  %v1798_v10 = vshrl.u32 %v10547_v44, 16  ;;  %v10549_v9 = vld [vmem:[%s14019_s25 + $0x74] sm:$0xf] }
 0x1f5   :  { %v12195_v32 = vpop.f32.mrf.mxu1  ;;  %v1818_v5 = vshrl.u32 %v10549_v9, 16 }
 0x1f6   :  { %v11514_v16 = vpack.c.bf16 %v806_v22, %v806_v22  ;;  %v798_v55 = vmul.f32 0.1, %v763_v20  ;;  %v1465_v22 = vor.u32 %v1464_v33, %v1461_v63  ;;  %v14174_v32 = vor.u32 %v1474_v28, %v1471_v61 }
 0x1f7   :  { %v767_v0 = vpop.f32.mrf.mxu1  ;;  %v1800_v63 = vrot.slane %v1798_v10, 4  ;;  %v1814_v33 = vshll.u32 %v10549_v9, 16  ;;  %v1484_v61 = vrot.slane %v1482_v17, 7  ;;  %v1810_v28 = vrot.slane %v1808_v62, 4  ;;  %v14201_v9 = vld [vmem:[#allocation2] sm:$0x8] }
 0x1f8   :  { %852 = vst [vmem:[#allocation2 + $0x4] sm:$0xf] %v11514_v16  ;;  %v768_v59 = vadd.f32 %v14092_v48, %v767_v0  ;;  %v1481_v16 = vrot.slane %v1479_v43, 6  ;;  %v807_v0 = vmax.f32 %v763_v20, %v798_v55  ;;  %v1467_v20 = vrot.slane %v1465_v22, 4 }
 0x1f9   :  { %v12198_v45 = vpop.f32.mrf.mxu1  ;;  %v14203_v62 = vrot.slane %v1804_v15, 5  ;;  %v10513_v15 = vld [vmem:[%s14019_s25 + $0x58] sm:$0xf] }
 0x1fa   :  { %v799_v11 = vmul.f32 0.1, %v768_v59  ;;  %v1489_v3 = vshrl.u32 %v10513_v15, 16  ;;  %v1492_v14 = vshll.u32 %v10513_v15, 16  ;;  %v1828_v15 = vshrl.u32 %v14184_v21, 16 }
 0x1fb   :  { %v770_v50 = vpop.f32.mrf.mxu1  ;;  %v10551_v21 = vld [vmem:[%s14019_s25 + $0x7c] sm:$0xf] }
 0x1fc   :  { %v808_v45 = vmax.f32 %v768_v59, %v799_v11  ;;  %v771_v44 = vadd.f32 %v14092_v48, %v770_v50  ;;  %v14194_v11 = vsel %vm14179_vm9, %v1457_v18, %v1465_v22  ;;  %v1801_v18 = vor.u32 %v1800_v63, %v14186_v24 }
 0x1fd   :  { %v12199_v35 = vpop.f32.mrf.mxu1  ;;  %v14206_v22 = vrot.slane %v1814_v33, 5  ;;  %v14224_v33 = vrot.slane %v1824_v7, 5 }
 0x1fe   :  { %v11538_v43 = vpack.c.bf16 %v808_v45, %v807_v0  ;;  %v1477_v35 = vrot.slane %v14174_v32, 4  ;;  %v800_v8 = vmul.f32 0.1, %v771_v44  ;;  %v1820_v0 = vrot.slane %v1818_v5, 4 }
 0x1ff   :  { %v775_v55 = vpop.f32.mrf.mxu1  ;;  %v14188_v59 = vld [vmem:[#allocation2 + $0x4] sm:$0xf] }
 0x200   :  { %11575 = vst [vmem:[#allocation2 + $0x8] sm:$0xff] %v11538_v43   ;;  %v776_v10 = vadd.f32 %v14092_v48, %v775_v55  ;;  %v974_v17 = vmul.bf16 %v14097_v54, %v14188_v59  ;;  %v14211_v43 = vsel %vm14179_vm9, %v1467_v20, %v14174_v32  ;;  %v14213_v55 = vor.u32 %v1484_v61, %v1481_v16  ;;  %v10514_v16 = vld [vmem:[%s14019_s25 + $0x5c] sm:$0xf] }
 0x201   :  { %v12202_v50 = vpop.f32.mrf.mxu1  ;;  %v1811_v54 = vor.u32 %v1810_v28, %v14203_v62  ;;  %v809_v5 = vmax.f32 %v771_v44, %v800_v8  ;;  %v1821_v27 = vor.u32 %v1820_v0, %v14206_v22  ;;  %v1502_v8 = vshll.u32 %v10514_v16, 16 }
 0x202   :  { %v801_v45 = vmul.f32 0.1, %v776_v10  ;;  %v1059_v50 = vmul.bf16 %v14056_v6, %v14188_v59  ;;  %v14222_v63 = vcombine.low %v973_v30, %v974_v17  ;;  %v14231_v6 = vrot.slane %v1801_v18, 4 }
 0x203   :  { %v778_v56 = vpop.f32.mrf.mxu1  ;;  %v14240_v44 = vrot.slane %v1811_v54, 4  ;;  %v1491_v32 = vrot.slane %v1489_v3, 6 }
 0x204   :  { %v810_v20 = vmax.f32 %v776_v10, %v801_v45  ;;  %v779_v61 = vadd.f32 %v14092_v48, %v778_v56  ;;  %v1499_v56 = vshrl.u32 %v10514_v16, 16  ;;  %v10483_v18 = vcombine.low %v14059_v52, %v1059_v50 }
 0x205   :  { %v12203_v51 = vpop.f32.mrf.mxu1  ;;  %v1274_v0 = vshll.u32 %v14222_v63, 16  ;;  %v14251_v45 = vsel %vm14179_vm9, %v1477_v35, %v14213_v55 }
 0x206   :  { %v11543_v30 = vpack.c.bf16 %v810_v20, %v809_v5  ;;  %v802_v54 = vmul.f32 0.1, %v779_v61  ;;  %v1111_v28 = vrot.slane %v10483_v18, 1  ;;  %v1272_v18 = vshrl.u32 %v14222_v63, 16 }
 0x207   :  { %v783_v10 = vpop.f32.mrf.mxu1  ;;  %v14242_v51 = vld [vmem:[#allocation2 + $0x8] sm:$0xf]  ;;  %v14244_v17 = vld [vmem:[#allocation2 + $0xc] sm:$0xf] }
 0x208   :  { %11576 = vst [vmem:[#allocation2 + $0x10] sm:$0xff] %v11543_v30   ;;  %v784_v16 = vadd.f32 %v14092_v48, %v783_v10  ;;  %v1060_v5 = vmul.bf16 %v14085_v29, %v14242_v51  ;;  %v1061_v52 = vmul.bf16 %v14089_v12, %v14244_v17  ;;  %v975_v20 = vmul.bf16 %v14105_v57, %v14242_v51 }
 0x209   :  { %v12206_v50 = vpop.f32.mrf.mxu1  ;;  %v976_v35 = vmul.bf16 %v14109_v26, %v14244_v17  ;;  %v14267_v30 = vrot.slane %v1821_v27, 4  ;;  %v1494_v12 = vrot.slane %v1492_v14, 7  ;;  %v1276_v57 = vrot.slane %v1274_v0, 1 }
 0x20a   :  { %v803_v10 = vmul.f32 0.1, %v784_v16  ;;  %v14269_v29 = vcombine.low %v1060_v5, %v1061_v52  ;;  %v811_v27 = vmax.f32 %v779_v61, %v802_v54  ;;  %v1501_v0 = vrot.slane %v1499_v56, 6  ;;  %v13342_v61 = vld [vmem:[%s13982_s21 + $0xf8] sm:$0xff]  }
 0x20b   :  { %v786_v50 = vpop.f32.mrf.mxu1  ;;  %v14271_v38 = vcombine.low %v975_v20, %v976_v35  ;;  %v13341_v20 = vld [vmem:[%s13982_s21 + $0xb8] sm:$0xff]   ;;  %v1504_v35 = vrot.slane %v1502_v8, 7  ;;  %v14289_v54 = vrot.slane %v1828_v15, 4  ;;  %v17378_v15 = vmov 0.0  }
 0x20c   :  { %v812_v58 = vmax.f32 %v784_v16, %v803_v10  ;;  %v14279_v5 = vadd.f32 %v14092_v48, %v786_v50  ;;  %v1112_v3 = vrot.slane %v14269_v29, 1  ;;  %v1834_v16 = vshll.u32 %v10551_v21, 16 }
 0x20d   :  { %v12207_v14 = vpop.f32.mrf.mxu1  ;;  %v1279_v52 = vshll.u32 %v14271_v38, 16  ;;  %v1277_v50 = vor.u32 %v1276_v57, %v1272_v18 }
 0x20e   :  { %v11548_v4 = vpack.c.bf16 %v812_v58, %v811_v27  ;;  %v1113_v26 = vsel %vm1110_vm12, %v1111_v28, %v1112_v3  ;;  %v1827_v58 = vsel %vm14236_vm14, %v14267_v30, %v14224_v33  ;;  %v1838_v28 = vshrl.u32 %v10551_v21, 16  ;;  %v14308_v27 = vld [vmem:[%s14019_s25 + $0x80] sm:$0xf]  ;;  %v13343_v21 = vld [vmem:[%s13982_s21 + $0xb0] sm:$0xff]  }
 0x20f   :  { %v791_v10 = vpop.f32.mrf.mxu1  ;;  %12229 = vmatmul.mubr.bf16.vlgmr.msra.gmra.mxu1 %v1113_v26  ;;  %v1281_v14 = vrot.slane %v1279_v52, 1  ;;  %v14291_v63 = vld [vmem:[#allocation2 + $0x10] sm:$0xf]  ;;  %v14293_v40 = vld [vmem:[#allocation2 + $0x14] sm:$0xf] }
 0x210   :  { %11577 = vst [vmem:[#allocation2 + $0x18] sm:$0xff] %v11548_v4   ;;  %v804_v56 = vmul.f32 0.1, %v14279_v5  ;;  %v792_v8 = vadd.f32 %v14092_v48, %v791_v10  ;;  %12232 = vmatprep.mubr.msk.bf16.mxu1 %vm13733_vm0, %v17378_v15  ;;  %v1062_v57 = vmul.bf16 %v14118_v42, %v14291_v63  ;;  %v1063_v26 = vmul.bf16 %v14123_v46, %v14293_v40 }
 0x211   :  { %v12210_v18 = vpop.f32.mrf.mxu1  ;;  %v1282_v52 = vsel %vm1270_vm13, %v1277_v50, %v1281_v14  ;;  %12285 = vmatpush3.bf16.msra.mxu1 %v13341_v20  ;;  %v977_v4 = vmul.bf16 %v14128_v49, %v14291_v63  ;;  %v978_v48 = vmul.bf16 %v14132_v47, %v14293_v40  ;;  %v14316_v10 = vor.u32 %v1494_v12, %v1491_v32  ;;  %v13344_v47 = vld [vmem:[%s13982_s21 + $0xf0] sm:$0xff]  }
 0x212   :  { %v805_v42 = vmul.f32 0.1, %v792_v8  ;;  %12265 = vmatmul.mubr.bf16.vlgmr.msra.gmra.mxu0 %v1282_v52  ;;  %v14318_v46 = vcombine.low %v1062_v57, %v1063_v26  ;;  %12286 = vmatprep.subr.bf16.mxu1 %v17378_v15  ;;  %v14321_v18 = vor.u32 %v1504_v35, %v1501_v0  ;;  %v1831_v20 = vor.u32 %v14289_v54, %v14224_v33  ;;  %v10515_v26 = vld [vmem:[%s14019_s25 + $0x60] sm:$0xf] }
 0x213   :  { %v794_v50 = vpop.f32.mrf.mxu1  ;;  %12268 = vmatprep.mubr.msk.bf16.mxu0 %vm13733_vm0, %v17378_v15  ;;  %v14327_v49 = vcombine.low %v977_v4, %v978_v48  ;;  %12321 = vmatpush3.bf16.msra.mxu0 %v13342_v61  ;;  %v14330_v32 = vrot.slane %v1834_v16, 5  ;;  %v1840_v12 = vrot.slane %v1838_v28, 4  ;;  %v1844_v57 = vshll.u32 %v14308_v27, 16  ;;  %v13345_v28 = vld [vmem:[%s13982_s21 + $0xa8] sm:$0xff]  }
 0x214   :  { %v813_v0 = vmax.f32 %v14279_v5, %v804_v56  ;;  %v814_v35 = vmax.f32 %v792_v8, %v805_v42  ;;  %v1114_v54 = vrot.slane %v14318_v46, 1  ;;  %12322 = vmatprep.subr.bf16.mxu0 %v17378_v15  ;;  %v1848_v52 = vshrl.u32 %v14308_v27, 16  ;;  %v13346_v27 = vld [vmem:[%s13982_s21 + $0xe8] sm:$0xff]  }
 0x215   :  { %v12211_v4 = vpop.f32.mrf.mxu1  ;;  %v1283_v61 = vshrl.u32 %v14271_v38, 16  ;;  %v1287_v16 = vshll.u32 %v14327_v49, 16  ;;  %12287 = vmatpush3.bf16.msra.mxu1 %v13343_v21  ;;  %v17379_v48 = vrot.slane %v14213_v55, 4  ;;  %v1497_v56 = vrot.slane %v14316_v10, 4  ;;  %v10516_v21 = vld [vmem:[%s14019_s25 + $0x64] sm:$0xf] }
 0x216   :  { %v11553_v8 = vpack.c.bf16 %v814_v35, %v813_v0  ;;  %v1115_v38 = vsel %vm1110_vm12, %v1112_v3, %v1114_v54  ;;  %12288 = vmatprep.subr.bf16.mxu1 %v17378_v15  ;;  %v1509_v42 = vshrl.u32 %v10515_v26, 16  ;;  %v1512_v55 = vshll.u32 %v10515_v26, 16 }
 0x217   :  { %v14346_v5 = vsel %vm14179_vm9, %v17379_v48, %v14316_v10  ;;  %12233 = vmatmul.mubr.bf16.gmra.mxu1 %v1115_v38  ;;  %v1285_v50 = vor.u32 %v1283_v61, %v1281_v14  ;;  %v1289_v4 = vrot.slane %v1287_v16, 1  ;;  %12323 = vmatpush3.bf16.msra.mxu0 %v13344_v47  ;;  %v14357_v10 = vld [vmem:[#allocation2 + $0x18] sm:$0xf]  ;;  %v14359_v0 = vld [vmem:[#allocation2 + $0x1c] sm:$0xf]  ;;  %v14361_v35 = vrot.slane %v1831_v20, 4 }
 0x218   :  { %v1841_v29 = vor.u32 %v1840_v12, %v14330_v32  ;;  %11578 = vst [vmem:[#allocation2 + $0x20] sm:$0xff] %v11553_v8   ;;  %12236 = vmatprep.mubr.msk.bf16.mxu1 %vm13733_vm0, %v17378_v15  ;;  %v1064_v3 = vmul.bf16 %v14144_v36, %v14357_v10  ;;  %v1065_v14 = vmul.bf16 %v14148_v31, %v14359_v0  ;;  %v10553_v20 = vld [vmem:[%s14019_s25 + $0x84] sm:$0xf]  ;;  %v14378_v16 = vrot.slane %v1844_v57, 5 }
 0x219   :  { %v979_v47 = vmul.bf16 %v14152_v41, %v14357_v10  ;;  %v980_v26 = vmul.bf16 %v14157_v34, %v14359_v0  ;;  %v1290_v12 = vsel %vm1270_vm13, %v1285_v50, %v1289_v4  ;;  %12289 = vmatpush3.bf16.msra.mxu1 %v13345_v28  ;;  %12324 = vmatprep.subr.bf16.mxu0 %v17378_v15  ;;  %v13347_v61 = vld [vmem:[%s13982_s21 + $0xa0] sm:$0xff]   ;;  %v1519_v36 = vshrl.u32 %v10516_v21, 16 }
 0x21a   :  { %v1522_v48 = vshll.u32 %v10516_v21, 16  ;;  %12269 = vmatmul.mubr.bf16.gmra.mxu0 %v1290_v12  ;;  %v14380_v31 = vcombine.low %v1064_v3, %v1065_v14  ;;  %12290 = vmatprep.subr.bf16.mxu1 %v17378_v15  ;;  %v1511_v41 = vrot.slane %v1509_v42, 6  ;;  %v1514_v34 = vrot.slane %v1512_v55, 7  ;;  %v13348_v28 = vld [vmem:[%s13982_s21 + $0xe0] sm:$0xff]  }
 0x21b   :  { %v14382_v8 = vcombine.low %v979_v47, %v980_v26  ;;  %12272 = vmatprep.mubr.msk.bf16.mxu0 %vm13733_vm0, %v17378_v15  ;;  %12325 = vmatpush3.bf16.msra.mxu0 %v13346_v27  ;;  %v14388_v38 = vrot.slane %v1841_v29, 4  ;;  %v1850_v57 = vrot.slane %v1848_v52, 4  ;;  %v1854_v50 = vshll.u32 %v10553_v20, 16  ;;  %v13349_v27 = vld [vmem:[%s13982_s21 + $0x98] sm:$0xff]  }
 0x21c   :  { %v1858_v21 = vshrl.u32 %v10553_v20, 16  ;;  %v1116_v3 = vrot.slane %v14380_v31, 1  ;;  %v1291_v14 = vshrl.u32 %v14327_v49, 16  ;;  %12326 = vmatprep.subr.bf16.mxu0 %v17378_v15  ;;  %v1507_v42 = vrot.slane %v14321_v18, 4 }
 0x21d   :  { %v1295_v47 = vshll.u32 %v14382_v8, 16  ;;  %12291 = vmatpush3.bf16.msra.mxu1 %v13347_v61  ;;  %v14399_v52 = vsel %vm14179_vm9, %v1497_v56, %v14321_v18  ;;  %v1521_v49 = vrot.slane %v1519_v36, 6  ;;  %v1524_v29 = vrot.slane %v1522_v48, 7  ;;  %v13350_v61 = vld [vmem:[%s13982_s21 + $0xd8] sm:$0xff]   ;;  %v14413_v56 = vld [vmem:[%s14019_s25 + $0x88] sm:$0xf] }
 0x21e   :  { %v1117_v26 = vsel %vm1110_vm12, %v1114_v54, %v1116_v3  ;;  %v1293_v20 = vor.u32 %v1291_v14, %v1289_v4  ;;  %12292 = vmatprep.subr.bf16.mxu1 %v17378_v15  ;;  %v1515_v18 = vor.u32 %v1514_v34, %v1511_v41  ;;  %v1847_v46 = vsel %vm14236_vm14, %v14388_v38, %v14378_v16 }
 0x21f   :  { %v1297_v12 = vrot.slane %v1295_v47, 1  ;;  %12237 = vmatmul.mubr.bf16.gmra.mxu1 %v1117_v26  ;;  %12327 = vmatpush3.bf16.msra.mxu0 %v13348_v28  ;;  %v14415_v55 = vld [vmem:[#allocation2 + $0x20] sm:$0xf]  ;;  %v870_v36 = vld [vmem:[#allocation2 + $0x24] sm:$0x1]  ;;  %v1851_v54 = vor.u32 %v1850_v57, %v14378_v16  ;;  %v14422_v4 = vrot.slane %v1854_v50, 5  ;;  %v14440_v26 = vor.u32 %v1524_v29, %v1521_v49 }
 0x220   :  { %v1860_v48 = vrot.slane %v1858_v21, 4  ;;  %12240 = vmatprep.mubr.msk.bf16.mxu1 %vm13733_vm0, %v17378_v15  ;;  %v1066_v34 = vmul.bf16 %v14167_v13, %v14415_v55  ;;  %v1067_v28 = vmul.bf16 %v14161_v1, %v870_v36  ;;  %v981_v14 = vmul.bf16 %v14172_v23, %v14415_v55  ;;  %12328 = vmatprep.subr.bf16.mxu0 %v17378_v15  ;;  %v13351_v50 = vld [vmem:[%s13982_s21 + $0x90] sm:$0xff]  }
 0x221   :  { %v1298_v41 = vsel %vm1270_vm13, %v1293_v20, %v1297_v12  ;;  %12293 = vmatpush3.bf16.msra.mxu1 %v13349_v27  ;;  %v17380_v47 = vrot.slane %v14138_v60, 4  ;;  %v14438_v21 = vsel %vm14179_vm9, %v1507_v42, %v1515_v18  ;;  %v1864_v1 = vshll.u32 %v14413_v56, 16  ;;  %v13352_v49 = vld [vmem:[%s13982_s21 + $0xd0] sm:$0xff]  }
 0x222   :  { %12273 = vmatmul.mubr.bf16.gmra.mxu0 %v1298_v41  ;;  %v14443_v13 = vcombine.low %v1066_v34, %v1067_v28  ;;  %12294 = vmatprep.subr.bf16.mxu1 %v17378_v15  ;;  %v1550_v60 = vmul.bf16 %v14211_v43, %v14242_v51  ;;  %v1551_v23 = vmul.bf16 %v14251_v45, %v14244_v17  ;;  %v1517_v27 = vrot.slane %v1515_v18, 4  ;;  %v10517_v43 = vld [vmem:[%s14019_s25 + $0x68] sm:$0xf] }
 0x223   :  { %v982_v57 = vmul.bf16 %v17380_v47, %v870_v36  ;;  %12276 = vmatprep.mubr.msk.bf16.mxu0 %vm13733_vm0, %v17378_v15  ;;  %12329 = vmatpush3.bf16.msra.mxu0 %v13350_v61  ;;  %v1549_v29 = vmul.bf16 %v14194_v11, %v14188_v59  ;;  %v1861_v20 = vor.u32 %v1860_v48, %v14422_v4  ;;  %v1868_v36 = vshrl.u32 %v14413_v56, 16  ;;  %v13353_v34 = vld [vmem:[%s13982_s21 + $0x88] sm:$0xff]  }
 0x224   :  { %v1118_v41 = vrot.slane %v14443_v13, 1  ;;  %12330 = vmatprep.subr.bf16.mxu0 %v17378_v15  ;;  %v17381_v45 = vsel %vm14236_vm14, %v14240_v44, %v14206_v22  ;;  %v1896_v11 = vmul.bf16 %v1827_v58, %v14244_v17  ;;  %v14474_v18 = vrot.slane %v1851_v54, 4  ;;  %v10555_v54 = vld [vmem:[%s14019_s25 + $0x8c] sm:$0xf] }
 0x225   :  { %v14452_v42 = vcombine.low %v981_v14, %v982_v57  ;;  %v1895_v61 = vmul.bf16 %v17381_v45, %v14242_v51  ;;  %v1299_v56 = vshrl.u32 %v14382_v8, 16  ;;  %12295 = vmatpush3.bf16.msra.mxu1 %v13351_v50  ;;  %v17382_v22 = vsel %vm14236_vm14, %v14231_v6, %v14203_v62  ;;  %v13354_v6 = vld [vmem:[%s13982_s21 + $0xc8] sm:$0xff]  }
 0x226   :  { %v1894_v44 = vmul.bf16 %v17382_v22, %v14188_v59  ;;  %v14485_v28 = vrot.slane %v1864_v1, 5  ;;  %v1119_v33 = vsel %vm1110_vm12, %v1116_v3, %v1118_v41  ;;  %12296 = vmatprep.subr.bf16.mxu1 %v17378_v15  ;;  %v10535_v17 = vcombine.low %v1550_v60, %v1551_v23 }
 0x227   :  { %v1303_v48 = vshll.u32 %v14452_v42, 16  ;;  %v14496_v30 = vsel %vm14179_vm9, %v1517_v27, %v14440_v26  ;;  %v1529_v58 = vshrl.u32 %v10517_v43, 16  ;;  %12241 = vmatmul.mubr.bf16.gmra.mxu1 %v1119_v33  ;;  %v1301_v59 = vor.u32 %v1299_v56, %v1297_v12  ;;  %12331 = vmatpush3.bf16.msra.mxu0 %v13352_v49 }
 0x228   :  { %v17383_v31 = vmul.bf16 %v14029_v25, %v14044_v37  ;;  %v14502_v3 = vrot.slane %v1861_v20, 4  ;;  %12244 = vmatprep.mubr.msk.bf16.mxu1 %vm13733_vm0, %v17378_v15  ;;  %12332 = vmatprep.subr.bf16.mxu0 %v17378_v15  ;;  %v10573_v14 = vcombine.low %v1895_v61, %v1896_v11  ;;  %v1857_v12 = vsel %vm14236_vm14, %v14474_v18, %v14422_v4  ;;  %v13355_v37 = vld [vmem:[%s13982_s21 + $0x80] sm:$0xff]  }
 0x229   :  { %v1305_v62 = vrot.slane %v1303_v48, 1  ;;  %v1532_v47 = vshll.u32 %v10517_v43, 16  ;;  %v1870_v57 = vrot.slane %v1868_v36, 4  ;;  %12297 = vmatpush3.bf16.msra.mxu1 %v13353_v34  ;;  %v17384_v50 = vmul.bf16 %v14186_v24, %v14201_v9  ;;  %v13356_v36 = vld [vmem:[%s13982_s21 + $0xc0] sm:$0xff]  }
 0x22a   :  { %v10534_v8 = vcombine.low %v17383_v31, %v1549_v29  ;;  %v1552_v60 = vmul.bf16 %v14346_v5, %v14291_v63  ;;  %v1553_v23 = vmul.bf16 %v14399_v52, %v14293_v40  ;;  %12298 = vmatprep.subr.bf16.mxu1 %v17378_v15  ;;  %v1610_v27 = vshrl.u32 %v10535_v17, 16 }
 0x22b   :  { %v1306_v25 = vsel %vm1270_vm13, %v1301_v59, %v1305_v62  ;;  %v10572_v1 = vcombine.low %v17384_v50, %v1894_v44  ;;  %v1613_v49 = vshll.u32 %v10535_v17, 16  ;;  %v1531_v29 = vrot.slane %v1529_v58, 6  ;;  %12333 = vmatpush3.bf16.msra.mxu0 %v13354_v6  ;;  %v13357_v50 = vld [vmem:[%s13982_s21 + $0x138] sm:$0xff]  }
 0x22c   :  { %12277 = vmatmul.mubr.bf16.gmra.mxu0 %v1306_v25  ;;  %v1874_v20 = vshll.u32 %v10555_v54, 16  ;;  %v1602_v24 = vshrl.u32 %v10534_v8, 16  ;;  %v1605_v9 = vshll.u32 %v10534_v8, 16  ;;  %v1867_v5 = vsel %vm14236_vm14, %v14502_v3, %v14485_v28  ;;  %12334 = vmatprep.subr.bf16.mxu0 %v17378_v15 }
 0x22d   :  { %12280 = vmatprep.mubr.msk.bf16.mxu0 %vm13733_vm0, %v17378_v15  ;;  %v1878_v52 = vshrl.u32 %v10555_v54, 16  ;;  %v1955_v43 = vshrl.u32 %v10573_v14, 16  ;;  %v1958_v45 = vshll.u32 %v10573_v14, 16  ;;  %v17385_v61 = vsel %vm14236_vm14, %v14361_v35, %v14330_v32  ;;  %12299 = vmatpush3.bf16.msra.mxu1 %v13355_v37 }
 0x22e   :  { %v1897_v11 = vmul.bf16 %v17385_v61, %v14291_v63  ;;  %v1898_v56 = vmul.bf16 %v1847_v46, %v14293_v40  ;;  %v1947_v48 = vshrl.u32 %v10572_v1, 16  ;;  %v10536_v34 = vcombine.low %v1552_v60, %v1553_v23  ;;  %12356 = vmatprep.subr.bf16.mxu1 %v17378_v15 }
 0x22f   :  { %v1534_v22 = vrot.slane %v1532_v47, 7  ;;  %v1871_v44 = vor.u32 %v1870_v57, %v14485_v28  ;;  %v1307_v33 = vshrl.u32 %v14452_v42, 16  ;;  %v1612_v17 = vrot.slane %v1610_v27, 1  ;;  %12245 = vmatmul.mubr.bf16.gmra.mxu1 %v1118_v41  ;;  %12335 = vmatpush3.bf16.msra.mxu0 %v13356_v36  ;;  %v13358_v36 = vld [vmem:[%s13982_s21 + $0x178] sm:$0xff]  }
 0x230   :  { %v1615_v58 = vrot.slane %v1613_v49, 2  ;;  %v1950_v59 = vshll.u32 %v10572_v1, 16  ;;  %v1604_v32 = vrot.slane %v1602_v24, 1  ;;  %v1607_v35 = vrot.slane %v1605_v9, 2  ;;  %12300 = vmatprep.mubr.msk.bf16.mxu1 %vm13733_vm0, %v17378_v15  ;;  %12392 = vmatprep.subr.bf16.mxu0 %v17378_v15  ;;  %v1435_v24 = vld [vmem:[#allocation2 + $0x24] sm:$0x3] }
 0x231   :  { %v14547_v40 = vrot.slane %v1874_v20, 5  ;;  %v1880_v16 = vrot.slane %v1878_v52, 4  ;;  %v1309_v38 = vor.u32 %v1307_v33, %v1305_v62  ;;  %v1957_v46 = vrot.slane %v1955_v43, 3  ;;  %v14603_v33 = vld [vmem:[%s14019_s25 + $0xbc] sm:$0xf] }
 0x232   :  { %v1960_v42 = vrot.slane %v1958_v45, 4  ;;  %v10574_v28 = vcombine.low %v1897_v11, %v1898_v56  ;;  %v1949_v6 = vrot.slane %v1947_v48, 3  ;;  %v1619_v31 = vshrl.u32 %v10536_v34, 16  ;;  %v14596_v11 = vld [vmem:[#allocation2 + $0x24] sm:$0xf] }
 0x233   :  { %v1622_v13 = vshll.u32 %v10536_v34, 16  ;;  %v1535_v41 = vor.u32 %v1534_v22, %v1531_v29  ;;  %v14552_v8 = vor.u32 %v1615_v58, %v1612_v17  ;;  %v1952_v3 = vrot.slane %v1950_v59, 4  ;;  %v14599_v56 = vld [vmem:[%s14019_s25 + $0xb8] sm:$0xf]  ;;  %v13360_v17 = vld [vmem:[%s13982_s21 + $0x170] sm:$0xff]   ;;  %v13361_v59 = vld [vmem:[%s13982_s21 + $0x128] sm:$0xff]  }
 0x234   :  { %12281 = vmatmul.mubr.bf16.gmra.mxu0 %v1309_v38  ;;  %v1554_v62 = vmul.bf16 %v14438_v21, %v14357_v10  ;;  %v1555_v54 = vmul.bf16 %v14496_v30, %v14359_v0  ;;  %v1527_v14 = vrot.slane %v14440_v26, 4  ;;  %v1872_v47 = vrot.slane %v1871_v44, 4 }
 0x235   :  { %12336 = vmatprep.mubr.msk.bf16.mxu0 %vm13733_vm0, %v17378_v15  ;;  %v1881_v57 = vor.u32 %v1880_v16, %v14547_v40  ;;  %v1608_v25 = vor.u32 %v1607_v35, %v1604_v32  ;;  %v14562_v37 = vor.u32 %v1960_v42, %v1957_v46  ;;  %v1964_v1 = vshrl.u32 %v10574_v28, 16 }
 0x236   :  { %v1967_v60 = vshll.u32 %v10574_v28, 16  ;;  %v1621_v21 = vrot.slane %v1619_v31, 1  ;;  %v1624_v23 = vrot.slane %v1622_v13, 2  ;;  %v1899_v26 = vmul.bf16 %v1857_v12, %v14357_v10 }
 0x237   :  { %v1900_v30 = vmul.bf16 %v1867_v5, %v14359_v0  ;;  %v1617_v27 = vsel %vm1600_vm15, %v1608_v25, %v14552_v8  ;;  %v1953_v49 = vor.u32 %v1952_v3, %v1949_v6  ;;  %v10537_v29 = vcombine.low %v1554_v62, %v1555_v54  ;;  %v13359_v0 = vld [vmem:[%s13982_s21 + $0x130] sm:$0xff]   ;;  %v13362_v62 = vld [vmem:[%s13982_s21 + $0x168] sm:$0xff]  }
 0x238   :  { %v1537_v20 = vrot.slane %v1535_v41, 4  ;;  %12301 = vmatmul.mubr.bf16.vlgmr.msra.gmra.mxu1 %v1617_v27  ;;  %v1536_v9 = vsel %vm14179_vm9, %v1527_v14, %v1535_v41  ;;  %v1877_v18 = vsel %vm14236_vm14, %v1872_v47, %v14547_v40  ;;  %v1882_v12 = vrot.slane %v1881_v57, 4  ;;  %v14586_v5 = vld [vmem:[%s14019_s25 + $0xb4] sm:$0xf]  ;;  %v14614_v40 = vld [vmem:[%s14019_s25 + $0xc0] sm:$0xf] }
 0x239   :  { %v1962_v4 = vsel %vm1945_vm1, %v1953_v49, %v14562_v37  ;;  %12304 = vmatprep.mubr.msk.bf16.mxu1 %vm13733_vm0, %v17378_v15  ;;  %12357 = vmatpush3.bf16.msra.mxu1 %v13357_v50  ;;  %v14593_v52 = vor.u32 %v1624_v23, %v1621_v21  ;;  %v1966_v43 = vrot.slane %v1964_v1, 3  ;;  %v1969_v45 = vrot.slane %v1967_v60, 4  ;;  %v13363_v14 = vld [vmem:[%s13982_s21 + $0x120] sm:$0xff]  }
 0x23a   :  { %12358 = vmatprep.subr.bf16.mxu1 %v17378_v15  ;;  %v10575_v61 = vcombine.low %v1899_v26, %v1900_v30  ;;  %v1628_v48 = vshrl.u32 %v10537_v29, 16  ;;  %v1631_v34 = vshll.u32 %v10537_v29, 16  ;;  %v1556_v22 = vmul.bf16 %v1536_v9, %v14415_v55  ;;  %v13364_v23 = vld [vmem:[%s13982_s21 + $0x160] sm:$0xff]  }
 0x23b   :  { %v1557_v44 = vmul.bf16 %v1537_v20, %v1435_v24  ;;  %v2338_v58 = vshrl.u32 %v14586_v5, 16  ;;  %v1901_v32 = vmul.bf16 %v1877_v18, %v14415_v55  ;;  %v1902_v35 = vmul.bf16 %v1882_v12, %v14596_v11  ;;  %v13367_v18 = vld [vmem:[%s13982_s21 + $0x110] sm:$0xff]  }
 0x23c   :  { %12337 = vmatmul.mubr.bf16.vlgmr.msra.gmra.mxu0 %v1962_v4  ;;  %v2346_v16 = vshrl.u32 %v14599_v56, 16  ;;  %v2349_v38 = vshll.u32 %v14599_v56, 16  ;;  %v1970_v46 = vor.u32 %v1969_v45, %v1966_v43  ;;  %v1973_v42 = vshrl.u32 %v10575_v61, 16  ;;  %v13366_v4 = vld [vmem:[%s13982_s21 + $0x158] sm:$0xff]  }
 0x23d   :  { %12340 = vmatprep.mubr.msk.bf16.mxu0 %vm13733_vm0, %v17378_v15  ;;  %12393 = vmatpush3.bf16.msra.mxu0 %v13358_v36  ;;  %v1976_v28 = vshll.u32 %v10575_v61, 16  ;;  %v2355_v6 = vshrl.u32 %v14603_v33, 16  ;;  %v1626_v31 = vsel %vm1600_vm15, %v14552_v8, %v14593_v52  ;;  %v1630_v13 = vrot.slane %v1628_v48, 1 }
 0x23e   :  { %12359 = vmatpush3.bf16.msra.mxu1 %v13359_v0  ;;  %12394 = vmatprep.subr.bf16.mxu0 %v17378_v15  ;;  %v1633_v41 = vrot.slane %v1631_v34, 2  ;;  %v10538_v3 = vcombine.low %v1556_v22, %v1557_v44  ;;  %v2364_v54 = vshrl.u32 %v14614_v40, 16  ;;  %v10576_v47 = vcombine.low %v1901_v32, %v1902_v35  ;;  %v10628_v0 = vld [vmem:[%s14019_s25 + $0xc8] sm:$0xf]  ;;  %v10627_v22 = vld [vmem:[%s14019_s25 + $0xc4] sm:$0xf] }
 0x23f   :  { %12360 = vmatprep.subr.bf16.mxu1 %v17378_v15  ;;  %v2367_v57 = vshll.u32 %v14614_v40, 16  ;;  %v1971_v8 = vsel %vm1945_vm1, %v14562_v37, %v1970_v46  ;;  %v1975_v25 = vrot.slane %v1973_v42, 3  ;;  %v1978_v50 = vrot.slane %v1976_v28, 4  ;;  %v13365_v37 = vld [vmem:[%s13982_s21 + $0x118] sm:$0xff]   ;;  %v13369_v32 = vld [vmem:[%s13982_s21 + $0x108] sm:$0xff]  }
 0x240   :  { %12305 = vmatmul.mubr.bf16.gmra.mxu1 %v1626_v31  ;;  %v1634_v1 = vor.u32 %v1633_v41, %v1630_v13  ;;  %v1637_v60 = vshrl.u32 %v10538_v3, 16  ;;  %v1640_v21 = vshll.u32 %v10538_v3, 16  ;;  %v2340_v26 = vrot.slane %v2338_v58, 7  ;;  %v14660_v35 = vld [vmem:[#allocation2 + $0x8] sm:$0xf] }
 0x241   :  { %12395 = vmatpush3.bf16.msra.mxu0 %v13360_v17  ;;  %12308 = vmatprep.mubr.msk.bf16.mxu1 %vm13733_vm0, %v17378_v15  ;;  %v1982_v30 = vshrl.u32 %v10576_v47, 16  ;;  %v1985_v27 = vshll.u32 %v10576_v47, 16  ;;  %v2348_v49 = vrot.slane %v2346_v16, 7  ;;  %v1979_v29 = vor.u32 %v1978_v50, %v1975_v25  ;;  %v14666_v31 = vld [vmem:[#allocation2 + $0x10] sm:$0xf]  ;;  %v13371_v47 = vld [vmem:[%s13982_s21 + $0x100] sm:$0xff]  }
 0x242   :  { %12361 = vmatpush3.bf16.msra.mxu1 %v13361_v59  ;;  %12396 = vmatprep.subr.bf16.mxu0 %v17378_v15  ;;  %v1635_v20 = vsel %vm1600_vm15, %v14593_v52, %v1634_v1  ;;  %v1639_v36 = vrot.slane %v1637_v60, 1  ;;  %v1642_v24 = vrot.slane %v1640_v21, 2  ;;  %v14641_v9 = vrot.slane %v2364_v54, 7 }
 0x243   :  { %12362 = vmatprep.subr.bf16.mxu1 %v17378_v15  ;;  %v2344_v12 = vrot.slane %v2340_v26, 4  ;;  %v2351_v43 = vor.u32 %v2349_v38, %v2348_v49  ;;  %v2357_v45 = vrot.slane %v2355_v6, 7  ;;  %v2358_v52 = vshll.u32 %v14603_v33, 16  ;;  %v13368_v33 = vld [vmem:[%s13982_s21 + $0x150] sm:$0xff]   ;;  %v2317_v6 = vld [vmem:[#allocation2 + $0x4] sm:$0xf] }
 0x244   :  { %12341 = vmatmul.mubr.bf16.gmra.mxu0 %v1971_v8  ;;  %v1980_v61 = vsel %vm1945_vm1, %v1970_v46, %v1979_v29  ;;  %v1984_v56 = vrot.slane %v1982_v30, 3  ;;  %v1987_v48 = vrot.slane %v1985_v27, 4  ;;  %v2341_v34 = vshll.u32 %v14586_v5, 16  ;;  %v13372_v27 = vld [vmem:[%s13982_s21 + $0x140] sm:$0xff]  }
 0x245   :  { %12344 = vmatprep.mubr.msk.bf16.mxu0 %vm13733_vm0, %v17378_v15  ;;  %12397 = vmatpush3.bf16.msra.mxu0 %v13362_v62  ;;  %v1643_v44 = vor.u32 %v1642_v24, %v1639_v36  ;;  %v2362_v17 = vrot.slane %v2357_v45, 4  ;;  %v2369_v58 = vor.u32 %v2367_v57, %v14641_v9  ;;  %v2382_v59 = vshrl.u32 %v10628_v0, 16  ;;  %v13370_v62 = vld [vmem:[%s13982_s21 + $0x148] sm:$0xff]  }
 0x246   :  { %12363 = vmatpush3.bf16.msra.mxu1 %v13363_v14  ;;  %12398 = vmatprep.subr.bf16.mxu0 %v17378_v15  ;;  %v2352_v5 = vsel %vm14075_vm6, %v2344_v12, %v2351_v43  ;;  %v2353_v40 = vrot.slane %v2348_v49, 4  ;;  %v2360_v16 = vor.u32 %v2358_v52, %v2357_v45  ;;  %v2373_v38 = vshrl.u32 %v10627_v22, 16  ;;  %v10630_v14 = vld [vmem:[%s14019_s25 + $0xd0] sm:$0xf]  ;;  %v14678_v57 = vld [vmem:[#allocation2 + $0xc] sm:$0xf] }
 0x247   :  { %12364 = vmatprep.subr.bf16.mxu1 %v17378_v15  ;;  %v1988_v46 = vor.u32 %v1987_v48, %v1984_v56  ;;  %v2343_v42 = vor.u32 %v2341_v34, %v2340_v26  ;;  %v1644_v28 = vsel %vm1600_vm15, %v1634_v1, %v1643_v44  ;;  %v2370_v13 = vsel %vm14075_vm6, %v2362_v17, %v2369_v58  ;;  %v14708_v56 = vld [vmem:[#allocation2 + $0x14] sm:$0xf] }
 0x248   :  { %12309 = vmatmul.mubr.bf16.gmra.mxu1 %v1635_v20  ;;  %v14670_v41 = vrot.slane %v2382_v59, 7  ;;  %v2385_v3 = vshll.u32 %v10628_v0, 16  ;;  %v2428_v54 = vmul.bf16 %v2352_v5, %v14660_v35  ;;  %v2361_v8 = vsel %vm14075_vm6, %v2353_v40, %v2360_v16  ;;  %v10586_v0 = vld [vmem:[%s14019_s25 + $0x94] sm:$0xf]  ;;  %v13725_v5 = vld [vmem:[#allocation2 + $0x4] sm:$0xf] }
 0x249   :  { %12399 = vmatpush3.bf16.msra.mxu0 %v13364_v23  ;;  %12312 = vmatprep.mubr.msk.bf16.mxu1 %vm13733_vm0, %v17378_v15  ;;  %v2375_v25 = vrot.slane %v2373_v38, 7  ;;  %v2376_v50 = vshll.u32 %v10627_v22, 16  ;;  %v1989_v1 = vsel %vm1945_vm1, %v1979_v29, %v1988_v46  ;;  %v2427_v60 = vmul.bf16 %v2343_v42, %v2317_v6  ;;  %v10629_v23 = vld [vmem:[%s14019_s25 + $0xcc] sm:$0xf]  ;;  %v13373_v38 = vld [vmem:[%s13982_s21 + $0x1b8] sm:$0xff]  }
 0x24a   :  { %12365 = vmatpush3.bf16.msra.mxu1 %v13365_v37  ;;  %12400 = vmatprep.subr.bf16.mxu0 %v17378_v15  ;;  %v2430_v21 = vmul.bf16 %v2370_v13, %v14666_v31  ;;  %v2387_v37 = vor.u32 %v2385_v3, %v14670_v41  ;;  %v2400_v30 = vshrl.u32 %v10630_v14, 16  ;;  %v2429_v49 = vmul.bf16 %v2361_v8, %v14678_v57  ;;  %v10662_v6 = vld [vmem:[%s14019_s25 + $0xdc] sm:$0xf]  ;;  %v10587_v8 = vld [vmem:[%s14019_s25 + $0x98] sm:$0xf] }
 0x24b   :  { %12366 = vmatprep.subr.bf16.mxu1 %v17378_v15  ;;  %v2380_v26 = vrot.slane %v2375_v25, 4  ;;  %v10648_v29 = vcombine.low %v2427_v60, %v2428_v54  ;;  %v2371_v20 = vrot.slane %v14641_v9, 4  ;;  %v2378_v36 = vor.u32 %v2376_v50, %v2375_v25  ;;  %v10585_v9 = vld [vmem:[%s14019_s25 + $0x90] sm:$0xf]  ;;  %v10588_v54 = vld [vmem:[%s14019_s25 + $0x9c] sm:$0xf] }
 0x24c   :  { %12345 = vmatmul.mubr.bf16.gmra.mxu0 %v1980_v61  ;;  %v2391_v24 = vshrl.u32 %v10629_v23, 16  ;;  %v14702_v43 = vrot.slane %v2400_v30, 7  ;;  %v2403_v45 = vshll.u32 %v10630_v14, 16  ;;  %v10631_v61 = vld [vmem:[%s14019_s25 + $0xd4] sm:$0xf]  ;;  %v2394_v22 = vshll.u32 %v10629_v23, 16 }
 0x24d   :  { %12348 = vmatprep.mubr.msk.bf16.mxu0 %vm13733_vm0, %v17378_v15  ;;  %12401 = vmatpush3.bf16.msra.mxu0 %v13366_v4  ;;  %v14694_v4 = vcombine.low %v2429_v49, %v2430_v21  ;;  %v2388_v12 = vsel %vm14075_vm6, %v2380_v26, %v2387_v37  ;;  %v2482_v52 = vshll.u32 %v10648_v29, 16  ;;  %v2379_v48 = vsel %vm14075_vm6, %v2371_v20, %v2378_v36  ;;  %v14731_v25 = vld [vmem:[#allocation2 + $0x20] sm:$0xf]  ;;  %v13374_v23 = vld [vmem:[%s13982_s21 + $0x1f8] sm:$0xff]   ;;  %v10664_v26 = vld [vmem:[%s14019_s25 + $0xe4] sm:$0xf] }
 0x24e   :  { %12367 = vmatpush3.bf16.msra.mxu1 %v13367_v18  ;;  %12402 = vmatprep.subr.bf16.mxu0 %v17378_v15  ;;  %v14698_v18 = vld [vmem:[#allocation2 + $0x18] sm:$0xf]  ;;  %v2393_v34 = vrot.slane %v2391_v24, 7  ;;  %v2134_v40 = vmul.bf16 %v13725_v5, %v10585_v9  ;;  %v2389_v42 = vrot.slane %v14670_v41, 4  ;;  %v2480_v3 = vshrl.u32 %v10648_v29, 16  ;;  %v13375_v49 = vld [vmem:[%s13982_s21 + $0x1b0] sm:$0xff]  }
 0x24f   :  { %12368 = vmatprep.subr.bf16.mxu1 %v17378_v15  ;;  %v2487_v17 = vshll.u32 %v14694_v4, 16  ;;  %v2432_v58 = vmul.bf16 %v2388_v12, %v14698_v18  ;;  %v2484_v16 = vrot.slane %v2482_v52, 1  ;;  %v2407_v50 = vrot.slane %v14702_v43, 4  ;;  %v14743_v29 = vld [vmem:[#allocation2 + $0x1c] sm:$0xf]  ;;  %v13377_v5 = vld [vmem:[%s13982_s21 + $0x1a8] sm:$0xff]  }
 0x250   :  { %12313 = vmatmul.mubr.bf16.gmra.mxu1 %v1644_v28  ;;  %v2398_v59 = vrot.slane %v2393_v34, 4  ;;  %v2396_v28 = vor.u32 %v2394_v22, %v2393_v34  ;;  %v2412_v60 = vshll.u32 %v10631_v61, 16  ;;  %v2680_v36 = vshll.u32 %v10662_v6, 16  ;;  %v13726_v22 = vld [vmem:[#allocation2 + $0xc] sm:$0xf] }
 0x251   :  { %12403 = vmatpush3.bf16.msra.mxu0 %v13368_v33  ;;  %12316 = vmatprep.mubr.msk.bf16.mxu1 %vm13733_vm0, %v17378_v15  ;;  %v2405_v33 = vor.u32 %v2403_v45, %v14702_v43  ;;  %v2485_v21 = vor.u32 %v2484_v16, %v2480_v3  ;;  %v2137_v43 = vmul.bf16 %v10588_v54, %v14291_v63  ;;  %v2700_v34 = vshll.u32 %v10664_v26, 16  ;;  %v13376_v63 = vld [vmem:[%s13982_s21 + $0x1f0] sm:$0xff]   ;;  %v10665_v3 = vld [vmem:[%s14019_s25 + $0xe8] sm:$0xf]  ;;  %v10589_v54 = vld [vmem:[%s14019_s25 + $0xa0] sm:$0xf] }
 0x252   :  { %12369 = vmatpush3.bf16.msra.mxu1 %v13369_v32  ;;  %12404 = vmatprep.subr.bf16.mxu0 %v17378_v15  ;;  %v2409_v32 = vshrl.u32 %v10631_v61, 16  ;;  %v2397_v20 = vsel %vm14075_vm6, %v2389_v42, %v2396_v28  ;;  %v2682_v16 = vrot.slane %v2680_v36, 6  ;;  %v2491_v28 = vshrl.u32 %v14694_v4, 16 }
 0x253   :  { %12370 = vmatprep.subr.bf16.mxu1 %v17378_v15  ;;  %v2406_v41 = vsel %vm14075_vm6, %v2398_v59, %v2405_v33  ;;  %v2702_v4 = vrot.slane %v2700_v34, 6  ;;  %v13380_v34 = vld [vmem:[%s13982_s21 + $0x1e0] sm:$0xff]  }
 0x254   :  { %12349 = vmatmul.mubr.bf16.gmra.mxu0 %v1989_v1  ;;  %v14736_v1 = vrot.slane %v2409_v32, 7  ;;  %v2434_v52 = vmul.bf16 %v2406_v41, %v14731_v25  ;;  %v14761_v32 = vld [vmem:[%s14019_s25 + $0xa4] sm:$0xf]  ;;  %v14780_v41 = vld [vmem:[%s14019_s25 + $0x100] sm:$0xf] }
 0x255   :  { %12352 = vmatprep.mubr.msk.bf16.mxu0 %vm13733_vm0, %v17378_v15  ;;  %12405 = vmatpush3.bf16.msra.mxu0 %v13370_v62  ;;  %v14724_v62 = vrot.slane %v2487_v17, 1  ;;  %v2433_v17 = vmul.bf16 %v2397_v20, %v14743_v29  ;;  %v2707_v20 = vshrl.u32 %v10665_v3, 16 }
 0x256   :  { %12371 = vmatpush3.bf16.msra.mxu1 %v13371_v47  ;;  %12406 = vmatprep.subr.bf16.mxu0 %v17378_v15  ;;  %v10663_v47 = vld [vmem:[%s14019_s25 + $0xe0] sm:$0xf]  ;;  %v2414_v61 = vor.u32 %v2412_v60, %v14736_v1  ;;  %v2416_v9 = vrot.slane %v14736_v1, 4  ;;  %v13378_v60 = vld [vmem:[%s13982_s21 + $0x1e8] sm:$0xff]  }
 0x257   :  { %12428 = vmatprep.subr.bf16.mxu1 %v17378_v15  ;;  %v2687_v24 = vshrl.u32 %v10663_v47, 16  ;;  %v2490_v12 = vsel %vm1270_vm13, %v2485_v21, %v14724_v62  ;;  %v2493_v1 = vor.u32 %v2491_v28, %v14724_v62  ;;  %v10592_v28 = vld [vmem:[%s14019_s25 + $0xac] sm:$0xf] }
 0x258   :  { %12317 = vmatmul.mubr.bf16.gmra.mxu1 %v1643_v44  ;;  %v2135_v44 = vmul.bf16 %v10586_v0, %v14242_v51  ;;  %v2431_v51 = vmul.bf16 %v2379_v48, %v14708_v56  ;;  %v2690_v0 = vshll.u32 %v10663_v47, 16  ;;  %v2697_v48 = vshrl.u32 %v10664_v26, 16  ;;  %v14787_v26 = vld [vmem:[%s14019_s25 + $0x104] sm:$0xf] }
 0x259   :  { %12407 = vmatpush3.bf16.msra.mxu0 %v13372_v27  ;;  %12372 = vmatprep.mubr.msk.bf16.mxu1 %vm13733_vm0, %v17378_v15  ;;  %v2677_v27 = vshrl.u32 %v10662_v6, 16  ;;  %v14768_v6 = vcombine.low %v2433_v17, %v2434_v52  ;;  %v14777_v47 = vsel %vm14075_vm6, %v2407_v50, %v2414_v61  ;;  %v13379_v50 = vld [vmem:[%s13982_s21 + $0x1a0] sm:$0xff]   ;;  %v3022_v61 = vrot.slane %v14780_v41, 5  ;;  %v13382_v41 = vld [vmem:[%s13982_s21 + $0x1d8] sm:$0xff]  }
 0x25a   :  { %12464 = vmatprep.subr.bf16.mxu0 %v17378_v15  ;;  %v10610_v13 = vcombine.low %v2134_v40, %v2135_v44  ;;  %v14727_v14 = vcombine.low %v2431_v51, %v2432_v58  ;;  %v2136_v44 = vmul.bf16 %v13726_v22, %v10587_v8  ;;  %v2326_v58 = vld [vmem:[#allocation2 + $0x28] sm:$0x1]  ;;  %v2689_v51 = vrot.slane %v2687_v24, 5 }
 0x25b   :  { %v2679_v40 = vrot.slane %v2677_v27, 5  ;;  %v2699_v8 = vrot.slane %v2697_v48, 5  ;;  %v2436_v21 = vmul.bf16 %v2416_v9, %v2326_v58  ;;  %v2139_v24 = vmul.bf16 %v14761_v32, %v14357_v10  ;;  %v13727_v10 = vld [vmem:[#allocation2 + $0x14] sm:$0xf]  ;;  %v10667_v58 = vld [vmem:[%s14019_s25 + $0xf0] sm:$0xf] }
 0x25c   :  { %12353 = vmatmul.mubr.bf16.gmra.mxu0 %v1988_v46  ;;  %v10661_v46 = vld [vmem:[%s14019_s25 + $0xd8] sm:$0xf]  ;;  %v2495_v45 = vshll.u32 %v14727_v14, 16  ;;  %v10611_v42 = vcombine.low %v2136_v44, %v2137_v43  ;;  %v2710_v43 = vshll.u32 %v10665_v3, 16  ;;  %v3025_v9 = vrot.slane %v14787_v26, 5 }
 0x25d   :  { %12408 = vmatprep.mubr.msk.bf16.mxu0 %vm13733_vm0, %v17378_v15  ;;  %v2668_v37 = vshrl.u32 %v10661_v46, 16  ;;  %v2671_v30 = vshll.u32 %v10661_v46, 16  ;;  %v2683_v27 = vor.u32 %v2682_v16, %v2679_v40  ;;  %v14807_v52 = vor.u32 %v2702_v4, %v2699_v8 }
 0x25e   :  { %v14765_v46 = vrot.slane %v2495_v45, 1  ;;  %v2138_v48 = vmul.bf16 %v13727_v10, %v10589_v54  ;;  %v17386_v44 = vmov 0  ;;  %v2709_v32 = vrot.slane %v2707_v20, 5 }
 0x25f   :  { %v2670_v59 = vrot.slane %v2668_v37, 5  ;;  %v2673_v33 = vrot.slane %v2671_v30, 6  ;;  %v14790_v37 = vld [vmem:[%s14019_s25 + $0x108] sm:$0xf]  ;;  %v14795_v30 = vld [vmem:[#allocation2 + $0x24] sm:$0xf] }
 0x260   :  { %12373 = vmatmul.mubr.bf16.vlgmr.msra.gmra.mxu1 %v10610_v13  ;;  %v14771_v13 = vld [vmem:[%s14019_s25 + $0xfc] sm:$0xf]  ;;  %v2498_v36 = vsel %vm1270_vm13, %v2493_v1, %v14765_v46  ;;  %v2435_v22 = vmul.bf16 %v14777_v47, %v14795_v30  ;;  %v17387_v44 = vsel %vm14818_vm8, 4294967295, %v17386_v44  ;;  %v3028_v17 = vrot.slane %v14790_v37, 5 }
 0x261   :  { %12376 = vmatprep.mubr.msk.bf16.mxu1 %vm13733_vm0, %v17378_v15  ;;  %12429 = vmatpush3.bf16.msra.mxu1 %v13373_v38  ;;  %v2692_v38 = vrot.slane %v2690_v0, 6  ;;  %v2503_v0 = vshll.u32 %v14768_v6, 16  ;;  %17388 = vst [vmem:[#allocation8_spill] sm:$0xff] %v17387_v44  ;;  %v10612_v16 = vcombine.low %v2138_v48, %v2139_v24  ;;  %v3024_v47 = vrot.slane %v3022_v61, 4 }
 0x262   :  { %12430 = vmatprep.subr.bf16.mxu1 %v17378_v15  ;;  %v2727_v8 = vshrl.u32 %v10667_v58, 16  ;;  %v14836_v4 = vcombine.low %v2435_v22, %v2436_v21  ;;  %v13383_v21 = vld [vmem:[%s13982_s21 + $0x190] sm:$0xff]  }
 0x263   :  { %v2693_v62 = vor.u32 %v2692_v38, %v2689_v51  ;;  %v2499_v51 = vshrl.u32 %v14727_v14, 16  ;;  %v2505_v38 = vrot.slane %v2503_v0, 1  ;;  %v2730_v0 = vshll.u32 %v10667_v58, 16 }
 0x264   :  { %12409 = vmatmul.mubr.bf16.vlgmr.msra.gmra.mxu0 %v2490_v12  ;;  %v10666_v12 = vld [vmem:[%s14019_s25 + $0xec] sm:$0xf] }
 0x265   :  { %12412 = vmatprep.mubr.msk.bf16.mxu0 %vm13733_vm0, %v17378_v15  ;;  %12465 = vmatpush3.bf16.msra.mxu0 %v13374_v23  ;;  %v14784_v23 = vor.u32 %v2673_v33, %v2670_v59  ;;  %v13381_v59 = vld [vmem:[%s13982_s21 + $0x198] sm:$0xff]   ;;  %v2685_v33 = vrot.slane %v2683_v27, 4  ;;  %v2720_v40 = vshll.u32 %v10666_v12, 16  ;;  %v2501_v14 = vor.u32 %v2499_v51, %v14765_v46  ;;  %v10591_v46 = vld [vmem:[%s14019_s25 + $0xa8] sm:$0xf] }
 0x266   :  { %12431 = vmatpush3.bf16.msra.mxu1 %v13375_v49  ;;  %12466 = vmatprep.subr.bf16.mxu0 %v17378_v15  ;;  %v3020_v49 = vrot.slane %v14771_v13, 5 }
 0x267   :  { %12432 = vmatprep.subr.bf16.mxu1 %v17378_v15  ;;  %v2675_v45 = vrot.slane %v14784_v23, 4  ;;  %v2694_v20 = vsel %vm14818_vm8, %v2685_v33, %v2693_v62  ;;  %v2722_v10 = vrot.slane %v2720_v40, 6  ;;  %v2511_v33 = vshll.u32 %v14836_v4, 16  ;;  %v13385_v40 = vld [vmem:[%s13982_s21 + $0x188] sm:$0xff]  }
 0x268   :  { %12377 = vmatmul.mubr.bf16.gmra.mxu1 %v10611_v42  ;;  %v2712_v42 = vrot.slane %v2710_v43, 6  ;;  %v3021_v54 = vrot.slane %v3020_v49, 4  ;;  %v2141_v43 = vmul.bf16 %v10592_v28, %v14415_v55  ;;  %v2729_v55 = vrot.slane %v2727_v8, 5 }
 0x269   :  { %12467 = vmatpush3.bf16.msra.mxu0 %v13376_v63  ;;  %12380 = vmatprep.mubr.msk.bf16.mxu1 %vm13733_vm0, %v17378_v15  ;;  %v2695_v63 = vrot.slane %v2693_v62, 4  ;;  %v14831_v3 = vsel %vm14818_vm8, %v2675_v45, %v2683_v27  ;;  %v10668_v27 = vld [vmem:[%s14019_s25 + $0xf4] sm:$0xf]  ;;  %v2768_v51 = vmul.bf16 %v2694_v20, %v14678_v57  ;;  %v13386_v20 = vld [vmem:[%s13982_s21 + $0x1c8] sm:$0xff]  }
 0x26a   :  { %12433 = vmatpush3.bf16.msra.mxu1 %v13377_v5  ;;  %12468 = vmatprep.subr.bf16.mxu0 %v17378_v15  ;;  %v2717_v5 = vshrl.u32 %v10666_v12, 16  ;;  %v2506_v12 = vsel %vm1270_vm13, %v2501_v14, %v2505_v38  ;;  %v2713_v45 = vor.u32 %v2712_v42, %v2709_v32  ;;  %v14867_v62 = vsel %vm14844_vm10, %v3021_v54, %v3022_v61  ;;  %v13384_v61 = vld [vmem:[%s13982_s21 + $0x1d0] sm:$0xff]   ;;  %v2652_v32 = vld [vmem:[#allocation2 + $0x4] sm:$0xc] }
 0x26b   :  { %12434 = vmatprep.subr.bf16.mxu1 %v17378_v15  ;;  %v2704_v1 = vsel %vm14818_vm8, %v2695_v63, %v14807_v52  ;;  %v2737_v22 = vshrl.u32 %v10668_v27, 16  ;;  %v13728_v63 = vld [vmem:[#allocation2 + $0x1c] sm:$0xf]  ;;  %v2732_v42 = vrot.slane %v2730_v0, 6 }
 0x26c   :  { %12413 = vmatmul.mubr.bf16.gmra.mxu0 %v2498_v36  ;;  %v2705_v36 = vrot.slane %v14807_v52, 4  ;;  %v2719_v24 = vrot.slane %v2717_v5, 5  ;;  %v2769_v48 = vmul.bf16 %v2704_v1, %v14666_v31  ;;  %v14870_v52 = vld [vmem:[%s14019_s25 + $0x10c] sm:$0xf]  ;;  %v2140_v58 = vmul.bf16 %v13728_v63, %v10591_v46 }
 0x26d   :  { %12416 = vmatprep.mubr.msk.bf16.mxu0 %vm13733_vm0, %v17378_v15  ;;  %12469 = vmatpush3.bf16.msra.mxu0 %v13378_v60  ;;  %v17389_v60 = vmov 0  ;;  %v2715_v5 = vrot.slane %v2713_v45, 4  ;;  %v3031_v14 = vrot.slane %v14870_v52, 5  ;;  %v2766_v1 = vmul.bf16 %v14784_v23, %v2652_v32 }
 0x26e   :  { %12435 = vmatpush3.bf16.msra.mxu1 %v13379_v50  ;;  %12470 = vmatprep.subr.bf16.mxu0 %v17378_v15  ;;  %v17390_v60 = vsel %vm14844_vm10, 4294967295, %v17389_v60  ;;  %v14850_v50 = vrot.slane %v3025_v9, 4  ;;  %v10613_v28 = vcombine.low %v2140_v58, %v2141_v43  ;;  %v14886_v8 = vor.u32 %v2722_v10, %v2719_v24 }
 0x26f   :  { %12436 = vmatprep.subr.bf16.mxu1 %v17378_v15  ;;  %17391 = vst [vmem:[#allocation9_spill] sm:$0xff] %v17390_v60  ;;  %v10687_v46 = vcombine.low %v2768_v51, %v2769_v48  ;;  %v2714_v24 = vsel %vm14818_vm8, %v2705_v36, %v2713_v45  ;;  %v3033_v26 = vrot.slane %v3031_v14, 4  ;;  %v2733_v0 = vor.u32 %v2732_v42, %v2729_v55  ;;  %v14935_v51 = vld [vmem:[%s14019_s25 + $0x114] sm:$0xf] }
 0x270   :  { %12381 = vmatmul.mubr.bf16.gmra.mxu1 %v10612_v16  ;;  %v2767_v16 = vmul.bf16 %v14831_v3, %v14660_v35  ;;  %v14895_v3 = vsel %vm14844_vm10, %v3024_v47, %v3025_v9  ;;  %v2724_v23 = vsel %vm14818_vm8, %v2715_v5, %v14886_v8  ;;  %v13387_v9 = vld [vmem:[%s13982_s21 + $0x180] sm:$0xff]   ;;  %v3029_v55 = vsel %vm14844_vm10, %v14850_v50, %v3028_v17 }
 0x271   :  { %12471 = vmatpush3.bf16.msra.mxu0 %v13380_v34  ;;  %12384 = vmatprep.mubr.msk.bf16.mxu1 %vm13733_vm0, %v17378_v15  ;;  %v14873_v34 = vld [vmem:[%s14019_s25 + $0x110] sm:$0xf]  ;;  %v2828_v63 = vshrl.u32 %v10687_v46, 16  ;;  %v2831_v58 = vshll.u32 %v10687_v46, 16  ;;  %v2735_v32 = vrot.slane %v2733_v0, 4  ;;  %v3057_v46 = vmul.bf16 %v14867_v62, %v14660_v35 }
 0x272   :  { %12437 = vmatpush3.bf16.msra.mxu1 %v13381_v59  ;;  %12472 = vmatprep.subr.bf16.mxu0 %v17378_v15  ;;  %v2507_v59 = vshrl.u32 %v14768_v6, 16  ;;  %v2740_v6 = vshll.u32 %v10668_v27, 16  ;;  %v3034_v27 = vrot.slane %v14873_v34, 5  ;;  %v10686_v47 = vcombine.low %v2766_v1, %v2767_v16  ;;  %v10737_v34 = vld [vmem:[%s14019_s25 + $0x120] sm:$0xf] }
 0x273   :  { %12438 = vmatprep.subr.bf16.mxu1 %v17378_v15 }
 0x274   :  { %12417 = vmatmul.mubr.bf16.gmra.mxu0 %v2506_v12  ;;  %v2509_v54 = vor.u32 %v2507_v59, %v2505_v38  ;;  %v10669_v38 = vld [vmem:[%s14019_s25 + $0xf8] sm:$0xf]  ;;  %v2739_v12 = vrot.slane %v2737_v22, 5  ;;  %v2742_v43 = vrot.slane %v2740_v6, 6  ;;  %v2771_v22 = vmul.bf16 %v2724_v23, %v14698_v18 }
 0x275   :  { %12420 = vmatprep.mubr.msk.bf16.mxu0 %vm13733_vm0, %v17378_v15  ;;  %12473 = vmatpush3.bf16.msra.mxu0 %v13382_v41  ;;  %v10593_v41 = vld [vmem:[%s14019_s25 + $0xb0] sm:$0xf]  ;;  %v2747_v45 = vshrl.u32 %v10669_v38, 16  ;;  %v2750_v48 = vshll.u32 %v10669_v38, 16  ;;  %v3030_v59 = vrot.slane %v3028_v17, 4  ;;  %v2820_v50 = vshrl.u32 %v10686_v47, 16 }
 0x276   :  { %12439 = vmatpush3.bf16.msra.mxu1 %v13383_v21  ;;  %12474 = vmatprep.subr.bf16.mxu0 %v17378_v15  ;;  %v2513_v21 = vrot.slane %v2511_v33, 1  ;;  %v2142_v36 = vmul.bf16 %v10593_v41, %v14596_v11  ;;  %v13388_v11 = vld [vmem:[%s13982_s21 + $0x1c0] sm:$0xff]   ;;  %v14929_v33 = vsel %vm14844_vm10, %v3033_v26, %v3034_v27  ;;  %v2823_v5 = vshll.u32 %v10686_v47, 16  ;;  %v10706_v47 = vld [vmem:[%s14019_s25 + $0x118] sm:$0xf] }
 0x277   :  { %12440 = vmatprep.subr.bf16.mxu1 %v17378_v15  ;;  %v2743_v16 = vor.u32 %v2742_v43, %v2739_v12  ;;  %v3059_v17 = vmul.bf16 %v3029_v55, %v14666_v31  ;;  %v2749_v42 = vrot.slane %v2747_v45, 5  ;;  %v2752_v6 = vrot.slane %v2750_v48, 6  ;;  %v14940_v41 = vld [vmem:[#allocation2 + $0x4] sm:$0x8] }
 0x278   :  { %12385 = vmatmul.mubr.bf16.gmra.mxu1 %v10613_v28  ;;  %v2514_v10 = vsel %vm1270_vm13, %v2509_v54, %v2513_v21  ;;  %v10614_v37 = vcombine.low %v2142_v36, %v2142_v36  ;;  %v2515_v28 = vshrl.u32 %v14836_v4, 16  ;;  %v2830_v54 = vrot.slane %v2828_v63, 2  ;;  %v13389_v63 = vld [vmem:[%s13982_s21 + $0x238] sm:$0xff]  }
 0x279   :  { %12475 = vmatpush3.bf16.msra.mxu0 %v13384_v61  ;;  %12388 = vmatprep.mubr.msk.bf16.mxu1 %vm13733_vm0, %v17378_v15  ;;  %v2725_v61 = vrot.slane %v14886_v8, 4  ;;  %v2833_v8 = vrot.slane %v2831_v58, 3  ;;  %v3058_v38 = vmul.bf16 %v14895_v3, %v14678_v57  ;;  %v3037_v4 = vrot.slane %v14935_v51, 5 }
 0x27a   :  { %12441 = vmatpush3.bf16.msra.mxu1 %v13385_v40  ;;  %12476 = vmatprep.subr.bf16.mxu0 %v17378_v15  ;;  %v2770_v40 = vmul.bf16 %v2714_v24, %v14708_v56  ;;  %v2517_v24 = vor.u32 %v2515_v28, %v2513_v21  ;;  %v2822_v23 = vrot.slane %v2820_v50, 2  ;;  %v2825_v26 = vrot.slane %v2823_v5, 3 }
 0x27b   :  { %12442 = vmatprep.subr.bf16.mxu1 %v17378_v15  ;;  %v3056_v62 = vmul.bf16 %v3020_v49, %v14940_v41  ;;  %v14957_v3 = vcombine.low %v3058_v38, %v3059_v17  ;;  %v2745_v12 = vrot.slane %v2743_v16, 4  ;;  %v2753_v21 = vor.u32 %v2752_v6, %v2749_v42  ;;  %v13390_v6 = vld [vmem:[%s13982_s21 + $0x230] sm:$0xff]  }
 0x27c   :  { %12421 = vmatmul.mubr.bf16.gmra.mxu0 %v2514_v10  ;;  %v10688_v1 = vcombine.low %v2770_v40, %v2771_v22  ;;  %v14960_v43 = vor.u32 %v2833_v8, %v2830_v54  ;;  %v3032_v49 = vsel %vm14844_vm10, %v3030_v59, %v3031_v14  ;;  %v3036_v45 = vrot.slane %v3034_v27, 4  ;;  %v10738_v27 = vld [vmem:[%s14019_s25 + $0x124] sm:$0xf]  ;;  %v14984_v40 = vld [vmem:[#allocation2 + $0x28] sm:$0x7] }
 0x27d   :  { %12424 = vmatprep.mubr.msk.bf16.mxu0 %vm13733_vm0, %v17378_v15  ;;  %12477 = vmatpush3.bf16.msra.mxu0 %v13386_v20  ;;  %v2744_v20 = vsel %vm14818_vm8, %v2735_v32, %v2743_v16  ;;  %v10724_v13 = vcombine.low %v3056_v62, %v3057_v46  ;;  %v2826_v48 = vor.u32 %v2825_v26, %v2822_v23  ;;  %v3039_v55 = vrot.slane %v3037_v4, 4  ;;  %v10739_v16 = vld [vmem:[%s14019_s25 + $0x128] sm:$0xf]  ;;  %v10707_v54 = vld [vmem:[%s14019_s25 + $0x11c] sm:$0xf] }
 0x27e   :  { %12443 = vmatpush3.bf16.msra.mxu1 %v13387_v9  ;;  %12478 = vmatprep.subr.bf16.mxu0 %v17378_v15  ;;  %v2734_v9 = vsel %vm14818_vm8, %v2725_v61, %v2733_v0  ;;  %v2837_v10 = vshrl.u32 %v10688_v1, 16  ;;  %v2840_v36 = vshll.u32 %v10688_v1, 16  ;;  %v2773_v0 = vmul.bf16 %v2744_v20, %v14731_v25 }
 0x27f   :  { %12500 = vmatprep.subr.bf16.mxu1 %v17378_v15  ;;  %v2772_v58 = vmul.bf16 %v2734_v9, %v14743_v29  ;;  %v3040_v22 = vrot.slane %v10706_v47, 5  ;;  %v3061_v52 = vmul.bf16 %v14929_v33, %v14698_v18  ;;  %v2754_v14 = vsel %vm14818_vm8, %v2745_v12, %v2753_v21 }
 0x280   :  { %12389 = vmatmul.mubr.bf16.gmra.mxu1 %v10614_v37  ;;  %v2755_v59 = vrot.slane %v2753_v21, 4  ;;  %v2835_v61 = vsel %vm2818_vm2, %v2826_v48, %v14960_v43  ;;  %v2839_v32 = vrot.slane %v2837_v10, 2  ;;  %v2842_v50 = vrot.slane %v2840_v36, 3 }
 0x281   :  { %12479 = vmatpush3.bf16.msra.mxu0 %v13388_v11  ;;  %12444 = vmatprep.mubr.msk.bf16.mxu1 %vm13733_vm0, %v17378_v15  ;;  %v3110_v11 = vrot.slane %v14957_v3, 3  ;;  %v10689_v5 = vcombine.low %v2772_v58, %v2773_v0  ;;  %v3109_v37 = vrot.slane %v10724_v13, 3  ;;  %v3060_v33 = vmul.bf16 %v3032_v49, %v14708_v56  ;;  %v13391_v0 = vld [vmem:[%s13982_s21 + $0x228] sm:$0xff]   ;;  %v10741_v58 = vld [vmem:[%s14019_s25 + $0x130] sm:$0xf] }
 0x282   :  { %12536 = vmatprep.subr.bf16.mxu0 %v17378_v15  ;;  %v3267_v17 = vshrl.u32 %v10737_v34, 16  ;;  %v3287_v42 = vshrl.u32 %v10739_v16, 16  ;;  %v3041_v28 = vsel %vm14844_vm10, %v3039_v55, %v3040_v22  ;;  %v3264_v8 = vshll.u32 %v10737_v34, 16 }
 0x283   :  { %v3273_v1 = vshll.u32 %v10738_v27, 16  ;;  %v3277_v46 = vshrl.u32 %v10738_v27, 16  ;;  %v3111_v38 = vsel %vm3108_vm11, %v3109_v37, %v3110_v11  ;;  %v14997_v20 = vcombine.low %v3060_v33, %v3061_v52  ;;  %v10740_v52 = vld [vmem:[%s14019_s25 + $0x12c] sm:$0xf] }
 0x284   :  { %12425 = vmatmul.mubr.bf16.gmra.mxu0 %v2517_v24  ;;  %v2775_v24 = vmul.bf16 %v2755_v59, %v14984_v40  ;;  %v3283_v23 = vshll.u32 %v10739_v16, 16  ;;  %v2843_v26 = vor.u32 %v2842_v50, %v2839_v32  ;;  %v2846_v9 = vshrl.u32 %v10689_v5, 16 }
 0x285   :  { %12480 = vmatprep.mubr.msk.bf16.mxu0 %vm13733_vm0, %v17378_v15  ;;  %v2849_v62 = vshll.u32 %v10689_v5, 16  ;;  %v2774_v47 = vmul.bf16 %v2754_v14, %v14795_v30  ;;  %v3042_v12 = vrot.slane %v3040_v22, 4  ;;  %v3043_v21 = vrot.slane %v10707_v54, 5  ;;  %v13392_v5 = vld [vmem:[%s13982_s21 + $0x220] sm:$0xff]  }
 0x286   :  { %v3269_v10 = vrot.slane %v3267_v17, 4  ;;  %v3289_v36 = vrot.slane %v3287_v42, 4  ;;  %v3038_v13 = vsel %vm14844_vm10, %v3036_v45, %v3037_v4  ;;  %v15009_v49 = vrot.slane %v3264_v8, 5 }
 0x287   :  { %v15011_v48 = vrot.slane %v3273_v1, 5  ;;  %v3112_v55 = vrot.slane %v14997_v20, 3  ;;  %v3063_v22 = vmul.bf16 %v3041_v28, %v14731_v25  ;;  %v15018_v14 = vrot.slane %v3283_v23, 5 }
 0x288   :  { %12445 = vmatmul.mubr.bf16.vlgmr.msra.gmra.mxu1 %v2835_v61  ;;  %v3307_v51 = vshrl.u32 %v10741_v58, 16  ;;  %v2844_v4 = vsel %vm2818_vm2, %v14960_v43, %v2843_v26  ;;  %v2848_v45 = vrot.slane %v2846_v9, 2  ;;  %v2851_v59 = vrot.slane %v2849_v62, 3 }
 0x289   :  { %12448 = vmatprep.mubr.msk.bf16.mxu1 %vm13733_vm0, %v17378_v15  ;;  %12501 = vmatpush3.bf16.msra.mxu1 %v13389_v63  ;;  %v3279_v63 = vrot.slane %v3277_v46, 4  ;;  %v10690_v34 = vcombine.low %v2774_v47, %v2775_v24  ;;  %v3062_v27 = vmul.bf16 %v3038_v13, %v14743_v29  ;;  %v3045_v61 = vrot.slane %v3043_v21, 4 }
 0x28a   :  { %12502 = vmatprep.subr.bf16.mxu1 %v17378_v15  ;;  %v3270_v32 = vor.u32 %v3269_v10, %v15009_v49  ;;  %v3290_v50 = vor.u32 %v3289_v36, %v15018_v14  ;;  %v3293_v16 = vshll.u32 %v10740_v52, 16  ;;  %v3297_v37 = vshrl.u32 %v10740_v52, 16 }
 0x28b   :  { %v3303_v33 = vshll.u32 %v10741_v58, 16  ;;  %v3113_v43 = vsel %vm3108_vm11, %v3110_v11, %v3112_v55  ;;  %v15031_v17 = vcombine.low %v3062_v27, %v3063_v22  ;;  %v3044_v42 = vsel %vm14844_vm10, %v3042_v12, %v3043_v21  ;;  %v10742_v12 = vld [vmem:[%s14019_s25 + $0x134] sm:$0xf] }
 0x28c   :  { %12481 = vmatmul.mubr.bf16.vlgmr.msra.gmra.mxu0 %v3111_v38  ;;  %v2852_v28 = vor.u32 %v2851_v59, %v2848_v45  ;;  %v2855_v54 = vshrl.u32 %v10690_v34, 16  ;;  %v2858_v8 = vshll.u32 %v10690_v34, 16  ;;  %v3309_v1 = vrot.slane %v3307_v51, 4  ;;  %v13393_v38 = vld [vmem:[%s13982_s21 + $0x218] sm:$0xff]   ;;  %v13394_v22 = vld [vmem:[%s13982_s21 + $0x210] sm:$0xff]  }
 0x28d   :  { %12484 = vmatprep.mubr.msk.bf16.mxu0 %vm13733_vm0, %v17378_v15  ;;  %12503 = vmatpush3.bf16.msra.mxu1 %v13390_v6  ;;  %v3280_v6 = vor.u32 %v3279_v63, %v15011_v48  ;;  %v3065_v3 = vmul.bf16 %v3045_v61, %v14984_v40  ;;  %v3271_v11 = vrot.slane %v3270_v32, 4  ;;  %v3291_v46 = vrot.slane %v3290_v50, 4 }
 0x28e   :  { %12504 = vmatprep.subr.bf16.mxu1 %v17378_v15  ;;  %v3064_v20 = vmul.bf16 %v3044_v42, %v14795_v30  ;;  %v3295_v24 = vrot.slane %v3293_v16, 5  ;;  %v3299_v23 = vrot.slane %v3297_v37, 4  ;;  %v15042_v9 = vrot.slane %v3303_v33, 5  ;;  %v10744_v37 = vld [vmem:[%s14019_s25 + $0x13c] sm:$0xf] }
 0x28f   :  { %v3114_v62 = vrot.slane %v15031_v17, 3  ;;  %v3281_v47 = vrot.slane %v3280_v6, 4  ;;  %v2853_v40 = vsel %vm2818_vm2, %v2843_v26, %v2852_v28  ;;  %v2857_v21 = vrot.slane %v2855_v54, 2 }
 0x290   :  { %12449 = vmatmul.mubr.bf16.gmra.mxu1 %v2844_v4  ;;  %v2860_v10 = vrot.slane %v2858_v8, 3  ;;  %v3310_v36 = vor.u32 %v3309_v1, %v15042_v9  ;;  %v3296_v13 = vsel %vm14236_vm14, %v3291_v46, %v3295_v24  ;;  %v15054_v58 = vcombine.low %v3064_v20, %v3065_v3  ;;  %v10745_v1 = vld [vmem:[%s14019_s25 + $0x140] sm:$0xf] }
 0x291   :  { %12452 = vmatprep.mubr.msk.bf16.mxu1 %vm13733_vm0, %v17378_v15  ;;  %12505 = vmatpush3.bf16.msra.mxu1 %v13391_v0  ;;  %v10743_v0 = vld [vmem:[%s14019_s25 + $0x138] sm:$0xf]  ;;  %v3276_v26 = vsel %vm14236_vm14, %v3271_v11, %v15011_v48  ;;  %v3300_v52 = vor.u32 %v3299_v23, %v3295_v24  ;;  %v3313_v51 = vshll.u32 %v10742_v12, 16  ;;  %v3115_v4 = vsel %vm3108_vm11, %v3112_v55, %v3114_v62  ;;  %v13395_v55 = vld [vmem:[%s13982_s21 + $0x208] sm:$0xff]   ;;  %v13396_v3 = vld [vmem:[%s13982_s21 + $0x200] sm:$0xff]   ;;  %s10392_s21 = sld [smem:[%s17339_s0 + %s13751_s18]]   ;;  %s13766_s18 = smov 34  }
 0x292   :  { %12506 = vmatprep.subr.bf16.mxu1 %v17378_v15  ;;  %v3327_v63 = vshrl.u32 %v10743_v0, 16  ;;  %v3286_v45 = vsel %vm14236_vm14, %v3281_v47, %v15018_v14  ;;  %v3317_v59 = vshrl.u32 %v10742_v12, 16  ;;  %v3323_v34 = vshll.u32 %v10743_v0, 16  ;;  %s10396_s25 = sld [smem:[%s17339_s0 + %s13752_s22]]   ;;  %s13767_s22 = smov 35  }
 0x293   :  { %v2861_v27 = vor.u32 %v2860_v10, %v2857_v21  ;;  %v3365_v61 = vmul.bf16 %v3296_v13, %v14666_v31  ;;  %v3311_v32 = vrot.slane %v3310_v36, 4  ;;  %v3363_v50 = vmul.bf16 %v3276_v26, %v14660_v35 }
 0x294   :  { %12485 = vmatmul.mubr.bf16.gmra.mxu0 %v3113_v43  ;;  %v3329_v48 = vrot.slane %v3327_v63, 4  ;;  %v3301_v16 = vrot.slane %v3300_v52, 4  ;;  %v3315_v14 = vrot.slane %v3313_v51, 5  ;;  %v3116_v33 = vrot.slane %v15054_v58, 3 }
 0x295   :  { %12488 = vmatprep.mubr.msk.bf16.mxu0 %vm13733_vm0, %v17378_v15  ;;  %12507 = vmatpush3.bf16.msra.mxu1 %v13392_v5  ;;  %v3364_v5 = vmul.bf16 %v3286_v45, %v14678_v57  ;;  %v3319_v31 = vrot.slane %v3317_v59, 4  ;;  %v3325_v43 = vrot.slane %v3323_v34, 5  ;;  %v2862_v17 = vsel %vm2818_vm2, %v2852_v28, %v2861_v27 }
 0x296   :  { %12508 = vmatprep.subr.bf16.mxu1 %v17378_v15  ;;  %v3362_v42 = vmul.bf16 %v15009_v49, %v14940_v41  ;;  %v3316_v35 = vsel %vm14236_vm14, %v3311_v32, %v3315_v14  ;;  %v3333_v54 = vshll.u32 %v10744_v37, 16  ;;  %v3337_v8 = vshrl.u32 %v10744_v37, 16  ;;  %v13397_v32 = vld [vmem:[%s14591_s3 + $0x38] sm:$0xff]   ;;  %v3252_v37 = vld [vmem:[#allocation2 + $0x28] sm:$0xf] }
 0x297   :  { %v10763_v6 = vcombine.low %v3364_v5, %v3365_v61  ;;  %v3330_v57 = vor.u32 %v3329_v48, %v3325_v43  ;;  %v3306_v28 = vsel %vm14236_vm14, %v3301_v16, %v15042_v9  ;;  %v3117_v41 = vsel %vm3108_vm11, %v3114_v62, %v3116_v33 }
 0x298   :  { %12453 = vmatmul.mubr.bf16.gmra.mxu1 %v2853_v40  ;;  %v10762_v11 = vcombine.low %v3362_v42, %v3363_v50  ;;  %v3367_v49 = vmul.bf16 %v3316_v35, %v14698_v18  ;;  %v3320_v46 = vor.u32 %v3319_v31, %v3315_v14  ;;  %v3343_v24 = vshll.u32 %v10745_v1, 16 }
 0x299   :  { %12456 = vmatprep.mubr.msk.bf16.mxu1 %vm13733_vm0, %v17378_v15  ;;  %12509 = vmatpush3.bf16.msra.mxu1 %v13393_v38  ;;  %v3423_v38 = vshrl.u32 %v10763_v6, 16  ;;  %v3426_v20 = vshll.u32 %v10763_v6, 16  ;;  %v3347_v23 = vshrl.u32 %v10745_v1, 16  ;;  %v3366_v47 = vmul.bf16 %v3306_v28, %v14708_v56  ;;  %v13399_v6 = vld [vmem:[%s14591_s3 + $0x28] sm:$0xff]   ;;  %v13400_v1 = vld [vmem:[%s14591_s3 + $0x20] sm:$0xff]   ;;  %v13401_v28 = vld [vmem:[%s14591_s3 + $0x18] sm:$0xff]  }
 0x29a   :  { %12510 = vmatprep.subr.bf16.mxu1 %v17378_v15  ;;  %v3331_v12 = vrot.slane %v3330_v57, 4  ;;  %v3335_v40 = vrot.slane %v3333_v54, 5  ;;  %v3339_v9 = vrot.slane %v3337_v8, 4  ;;  %v3415_v62 = vshrl.u32 %v10762_v11, 16 }
 0x29b   :  { %v3418_v21 = vshll.u32 %v10762_v11, 16  ;;  %v10764_v10 = vcombine.low %v3366_v47, %v3367_v49  ;;  %v3321_v18 = vrot.slane %v3320_v46, 4  ;;  %v3425_v36 = vrot.slane %v3423_v38, 3  ;;  %v13402_v38 = vld [vmem:[%s14591_s3 + $0x10] sm:$0xff]   ;;  %v13404_v47 = vld [vmem:[%s14591_s3] sm:$0xff]  }
 0x29c   :  { %12489 = vmatmul.mubr.bf16.gmra.mxu0 %v3115_v4  ;;  %v3428_v0 = vrot.slane %v3426_v20, 4  ;;  %v3345_v13 = vrot.slane %v3343_v24, 5  ;;  %v3349_v63 = vrot.slane %v3347_v23, 4  ;;  %v3336_v58 = vsel %vm14236_vm14, %v3331_v12, %v3335_v40  ;;  %v13403_v24 = vld [vmem:[%s14591_s3 + $0x8] sm:$0xff]  }
 0x29d   :  { %12492 = vmatprep.mubr.msk.bf16.mxu0 %vm13733_vm0, %v17378_v15  ;;  %12511 = vmatpush3.bf16.msra.mxu1 %v13394_v22  ;;  %v3340_v56 = vor.u32 %v3339_v9, %v3335_v40  ;;  %v3417_v22 = vrot.slane %v3415_v62, 3  ;;  %v3420_v26 = vrot.slane %v3418_v21, 4  ;;  %v3432_v52 = vshrl.u32 %v10764_v10, 16 }
 0x29e   :  { %12512 = vmatprep.subr.bf16.mxu1 %v17378_v15  ;;  %v3435_v51 = vshll.u32 %v10764_v10, 16  ;;  %v3326_v4 = vsel %vm14236_vm14, %v3321_v18, %v3325_v43  ;;  %v3429_v45 = vor.u32 %v3428_v0, %v3425_v36  ;;  %v3369_v59 = vmul.bf16 %v3336_v58, %v14731_v25 }
 0x29f   :  { %v3350_v34 = vor.u32 %v3349_v63, %v3345_v13  ;;  %v3421_v61 = vor.u32 %v3420_v26, %v3417_v22  ;;  %v3368_v48 = vmul.bf16 %v3326_v4, %v14743_v29 }
 0x2a0   :  { %12457 = vmatmul.mubr.bf16.gmra.mxu1 %v2862_v17  ;;  %v3437_v50 = vrot.slane %v3435_v51, 4 }
 0x2a1   :  { %12460 = vmatprep.mubr.msk.bf16.mxu1 %vm13733_vm0, %v17378_v15  ;;  %12513 = vmatpush3.bf16.msra.mxu1 %v13395_v55  ;;  %v3434_v55 = vrot.slane %v3432_v52, 3  ;;  %v3430_v5 = vsel %vm1945_vm1, %v3421_v61, %v3429_v45  ;;  %v10765_v16 = vcombine.low %v3368_v48, %v3369_v59  ;;  %v3351_v14 = vrot.slane %v3350_v34, 4 }
 0x2a2   :  { %12514 = vmatprep.subr.bf16.mxu1 %v17378_v15 }
 0x2a3   :  { %v3438_v31 = vor.u32 %v3437_v50, %v3434_v55  ;;  %v3441_v29 = vshrl.u32 %v10765_v16, 16  ;;  %v3444_v43 = vshll.u32 %v10765_v16, 16  ;;  %v3371_v42 = vmul.bf16 %v3351_v14, %v3252_v37  ;;  %v17392_v16 = vld [vmem:[#allocation4_spill] sm:$0xff] }
 0x2a4   :  { %12493 = vmatmul.mubr.bf16.gmra.mxu0 %v3117_v41  ;;  %v13405_v14 = vld [vmem:[%s15153_s7 + $0x38] sm:$0xff]  }
 0x2a5   :  { %12496 = vmatprep.mubr.msk.bf16.mxu0 %vm13733_vm0, %v17378_v15  ;;  %12515 = vmatpush3.bf16.msra.mxu1 %v13396_v3  ;;  %v3439_v35 = vsel %vm1945_vm1, %v3429_v45, %v3438_v31  ;;  %v3443_v57 = vrot.slane %v3441_v29, 3  ;;  %v3446_v54 = vrot.slane %v3444_v43, 4 }
 0x2a6   :  { %12572 = vmatprep.subr.bf16.mxu1 %v17378_v15  ;;  %12537 = vmatpush3.bf16.msra.mxu0 %v13405_v14 }
 0x2a7   :  { %12538 = vmatprep.subr.bf16.mxu0 %v17378_v15 }
 0x2a8   :  { %12461 = vmatmul.mubr.bf16.gmra.mxu1 %v2861_v27  ;;  %v3341_v27 = vrot.slane %v3340_v56, 4 }
 0x2a9   :  { %12516 = vmatprep.mubr.msk.bf16.mxu1 %vm13733_vm0, %v17378_v15 }
 0x2aa   :  { %v3346_v25 = vsel %vm14236_vm14, %v3341_v27, %v3345_v13 }
 0x2ab   :  { %v3370_v17 = vmul.bf16 %v3346_v25, %v14795_v30  ;;  %v3447_v30 = vor.u32 %v3446_v54, %v3443_v57 }
 0x2ac   :  { %12497 = vmatmul.mubr.bf16.gmra.mxu0 %v3116_v33  ;;  %v13398_v33 = vld [vmem:[%s14591_s3 + $0x30] sm:$0xff]   ;;  %s10394_s3 = sld [smem:[%s17339_s0 + %s13754_s30]]  }
 0x2ad   :  { %12552 = vmatprep.mubr.msk.bf16.mxu0 %vm13733_vm0, %v17378_v15  ;;  %v10766_v8 = vcombine.low %v3370_v17, %v3371_v42  ;;  %v3448_v41 = vsel %vm1945_vm1, %v3438_v31, %v3447_v30 }
 0x2af   :  { %v3450_v3 = vshrl.u32 %v10766_v8, 16  ;;  %v3453_v11 = vshll.u32 %v10766_v8, 16  ;;  %v17393_v8 = vld [vmem:[#allocation3_spill] sm:$0xff] }
 0x2b0   :  { %12517 = vmatmul.mubr.bf16.vlgmr.msra.gmra.mxu1 %v3430_v5 }
 0x2b1   :  { %12520 = vmatprep.mubr.msk.bf16.mxu1 %vm13733_vm0, %v17378_v15  ;;  %12573 = vmatpush3.bf16.msra.mxu1 %v13397_v32  ;;  %v3452_v49 = vrot.slane %v3450_v3, 3  ;;  %v3455_v46 = vrot.slane %v3453_v11, 4  ;;  %v13408_v3 = vld [vmem:[%s15153_s7 + $0x20] sm:$0xff]  }
 0x2b2   :  { %12574 = vmatprep.subr.bf16.mxu1 %v17378_v15 }
 0x2b3   :  { %v3456_v20 = vor.u32 %v3455_v46, %v3452_v49 }
 0x2b5   :  { %12575 = vmatpush3.bf16.msra.mxu1 %v13398_v33  ;;  %v3457_v23 = vsel %vm1945_vm1, %v3447_v30, %v3456_v20  ;;  %v13406_v33 = vld [vmem:[%s15153_s7 + $0x30] sm:$0xff]  }
 0x2b6   :  { %12576 = vmatprep.subr.bf16.mxu1 %v17378_v15  ;;  %12539 = vmatpush3.bf16.msra.mxu0 %v13406_v33 }
 0x2b7   :  { %12540 = vmatprep.subr.bf16.mxu0 %v17378_v15 }
 0x2b8   :  { %12521 = vmatmul.mubr.bf16.gmra.mxu1 %v3439_v35 }
 0x2b9   :  { %12524 = vmatprep.mubr.msk.bf16.mxu1 %vm13733_vm0, %v17378_v15  ;;  %12577 = vmatpush3.bf16.msra.mxu1 %v13399_v6  ;;  %v13407_v6 = vld [vmem:[%s15153_s7 + $0x28] sm:$0xff]  }
 0x2ba   :  { %12578 = vmatprep.subr.bf16.mxu1 %v17378_v15  ;;  %12541 = vmatpush3.bf16.msra.mxu0 %v13407_v6 }
 0x2bb   :  { %12542 = vmatprep.subr.bf16.mxu0 %v17378_v15 }
 0x2bd   :  { %12579 = vmatpush3.bf16.msra.mxu1 %v13400_v1 }
 0x2be   :  { %12580 = vmatprep.subr.bf16.mxu1 %v17378_v15  ;;  %12543 = vmatpush3.bf16.msra.mxu0 %v13408_v3 }
 0x2bf   :  { %12544 = vmatprep.subr.bf16.mxu0 %v17378_v15 }
 0x2c0   :  { %12525 = vmatmul.mubr.bf16.gmra.mxu1 %v3448_v41 }
 0x2c1   :  { %12528 = vmatprep.mubr.msk.bf16.mxu1 %vm13733_vm0, %v17378_v15  ;;  %12581 = vmatpush3.bf16.msra.mxu1 %v13401_v28 }
 0x2c2   :  { %12582 = vmatprep.subr.bf16.mxu1 %v17378_v15 }
 0x2c5   :  { %12583 = vmatpush3.bf16.msra.mxu1 %v13402_v38 }
 0x2c6   :  { %12584 = vmatprep.subr.bf16.mxu1 %v17378_v15 }
 0x2c8   :  { %12529 = vmatmul.mubr.bf16.gmra.mxu1 %v3457_v23  ;;  %v17394_v23 = vld [vmem:[#allocation5_spill] sm:$0xff] }
 0x2c9   :  { %12532 = vmatprep.mubr.msk.bf16.mxu1 %vm13733_vm0, %v17378_v15  ;;  %12585 = vmatpush3.bf16.msra.mxu1 %v13403_v24 }
 0x2ca   :  { %12586 = vmatprep.subr.bf16.mxu1 %v17378_v15 }
 0x2cd   :  { %12587 = vmatpush3.bf16.msra.mxu1 %v13404_v47 }
 0x2ce   :  { %12644 = vmatprep.subr.bf16.mxu1 %v17378_v15 }
 0x2cf   :  { %v1207_v12 = vpop.f32.mrf.mxu1 }
 0x2d0   :  { %12533 = vmatmul.mubr.bf16.gmra.mxu1 %v3456_v20  ;;  %v13409_v20 = vld [vmem:[%s15153_s7 + $0x18] sm:$0xff]  }
 0x2d1   :  { %12588 = vmatprep.mubr.msk.bf16.mxu1 %vm13733_vm0, %v17378_v15  ;;  %v12230_v40 = vpop.f32.mrf.mxu1  ;;  %12545 = vmatpush3.bf16.msra.mxu0 %v13409_v20 }
 0x2d2   :  { %v1397_v9 = vpop.f32.mrf.mxu0  ;;  %12546 = vmatprep.subr.bf16.mxu0 %v17378_v15 }
 0x2d3   :  { %v15136_v62 = vadd.f32 %v1397_v9, %v1207_v12  ;;  %v1210_v21 = vpop.f32.mrf.mxu1 }
 0x2d4   :  { %v12266_v10 = vpop.f32.mrf.mxu0 }
 0x2d5   :  { %v12231_v18 = vpop.f32.mrf.mxu1 }
 0x2d6   :  { %v1400_v36 = vpop.f32.mrf.mxu0 }
 0x2d7   :  { %v15138_v0 = vadd.f32 %v1400_v36, %v1210_v21  ;;  %v1215_v13 = vpop.f32.mrf.mxu1 }
 0x2d8   :  { %12589 = vmatmul.mubr.bf16.vlgmr.msra.gmra.mxu1 %v13930_v2  ;;  %v12267_v63 = vpop.f32.mrf.mxu0 }
 0x2d9   :  { %12592 = vmatprep.mubr.msk.bf16.mxu1 %vm13733_vm0, %v17378_v15  ;;  %v12234_v58 = vpop.f32.mrf.mxu1 }
 0x2da   :  { %v1405_v56 = vpop.f32.mrf.mxu0 }
 0x2db   :  { %v15143_v22 = vadd.f32 %v1405_v56, %v1215_v13  ;;  %v1218_v26 = vpop.f32.mrf.mxu1  ;;  %v13410_v13 = vld [vmem:[%s15153_s7 + $0x10] sm:$0xff]  }
 0x2dc   :  { %v12270_v52 = vpop.f32.mrf.mxu0  ;;  %12547 = vmatpush3.bf16.msra.mxu0 %v13410_v13 }
 0x2dd   :  { %v12235_v51 = vpop.f32.mrf.mxu1  ;;  %12548 = vmatprep.subr.bf16.mxu0 %v17378_v15 }
 0x2de   :  { %v1408_v4 = vpop.f32.mrf.mxu0 }
 0x2df   :  { %v15145_v45 = vadd.f32 %v1408_v4, %v1218_v26  ;;  %v1223_v59 = vpop.f32.mrf.mxu1 }
 0x2e0   :  { %12593 = vmatmul.mubr.bf16.gmra.mxu1 %v13950_v39  ;;  %v12271_v34 = vpop.f32.mrf.mxu0 }
 0x2e1   :  { %12596 = vmatprep.mubr.msk.bf16.mxu1 %vm13733_vm0, %v17378_v15  ;;  %v12238_v2 = vpop.f32.mrf.mxu1 }
 0x2e2   :  { %v1413_v27 = vpop.f32.mrf.mxu0 }
 0x2e3   :  { %v15155_v61 = vadd.f32 %v1413_v27, %v1223_v59  ;;  %v1226_v32 = vpop.f32.mrf.mxu1 }
 0x2e4   :  { %v12274_v48 = vpop.f32.mrf.mxu0 }
 0x2e5   :  { %v12239_v55 = vpop.f32.mrf.mxu1 }
 0x2e6   :  { %v1416_v39 = vpop.f32.mrf.mxu0 }
 0x2e7   :  { %v15157_v50 = vadd.f32 %v1416_v39, %v1226_v32  ;;  %v1231_v5 = vpop.f32.mrf.mxu1  ;;  %v13412_v32 = vld [vmem:[%s15153_s7] sm:$0xff]  }
 0x2e8   :  { %12597 = vmatmul.mubr.bf16.gmra.mxu1 %v17392_v16  ;;  %v12275_v37 = vpop.f32.mrf.mxu0 }
 0x2e9   :  { %12600 = vmatprep.mubr.msk.bf16.mxu1 %vm13733_vm0, %v17378_v15  ;;  %v12242_v25 = vpop.f32.mrf.mxu1 }
 0x2eb   :  { %v1234_v43 = vpop.f32.mrf.mxu1 }
 0x2ec   :  { %v1421_v31 = vpop.f32.mrf.mxu0 }
 0x2ed   :  { %v15165_v29 = vadd.f32 %v1421_v31, %v1231_v5  ;;  %v12243_v42 = vpop.f32.mrf.mxu1 }
 0x2ee   :  { %v12278_v17 = vpop.f32.mrf.mxu0 }
 0x2ef   :  { %v1239_v54 = vpop.f32.mrf.mxu1 }
 0x2f0   :  { %v1424_v35 = vpop.f32.mrf.mxu0  ;;  %12601 = vmatmul.mubr.bf16.gmra.mxu1 %v17393_v8 }
 0x2f1   :  { %v15169_v57 = vadd.f32 %v1424_v35, %v1234_v43  ;;  %12604 = vmatprep.mubr.msk.bf16.mxu1 %vm13733_vm0, %v17378_v15  ;;  %v12246_v30 = vpop.f32.mrf.mxu1 }
 0x2f2   :  { %v12279_v1 = vpop.f32.mrf.mxu0 }
 0x2f3   :  { %v1242_v41 = vpop.f32.mrf.mxu1 }
 0x2f4   :  { %v1429_v11 = vpop.f32.mrf.mxu0 }
 0x2f5   :  { %v15176_v28 = vadd.f32 %v1429_v11, %v1239_v54  ;;  %v12247_v46 = vpop.f32.mrf.mxu1 }
 0x2f6   :  { %v12282_v49 = vpop.f32.mrf.mxu0 }
 0x2f8   :  { %v1432_v38 = vpop.f32.mrf.mxu0  ;;  %v1732_v24 = vpop.f32.mrf.mxu1  ;;  %12605 = vmatmul.mubr.bf16.gmra.mxu1 %v17394_v23 }
 0x2f9   :  { %v1770_v12 = vadd.f32 %v1732_v24, %v15136_v62  ;;  %12660 = vmatprep.mubr.msk.bf16.mxu1 %vm13733_vm0, %v17378_v15  ;;  %v13411_v62 = vld [vmem:[%s15153_s7 + $0x8] sm:$0xff]   ;;  %s16860_s7 = sld [smem:[%s17339_s0 + %s13755_s4]]  }
 0x2fa   :  { %v12283_v47 = vpop.f32.mrf.mxu0  ;;  %v12302_v40 = vpop.f32.mrf.mxu1  ;;  %12549 = vmatpush3.bf16.msra.mxu0 %v13411_v62 }
 0x2fb   :  { %12550 = vmatprep.subr.bf16.mxu0 %v17378_v15 }
 0x2fc   :  { %v2077_v9 = vpop.f32.mrf.mxu0  ;;  %v1735_v10 = vpop.f32.mrf.mxu1 }
 0x2fd   :  { %v15185_v21 = vadd.f32 %v2077_v9, %v1770_v12  ;;  %v1771_v18 = vadd.f32 %v1735_v10, %v15138_v0 }
 0x2fe   :  { %v12338_v36 = vpop.f32.mrf.mxu0  ;;  %v12303_v63 = vpop.f32.mrf.mxu1  ;;  %12551 = vmatpush3.bf16.msra.mxu0 %v13412_v32 }
 0x2ff   :  { %12608 = vmatprep.subr.bf16.mxu0 %v17378_v15 }
 0x300   :  { %v2080_v58 = vpop.f32.mrf.mxu0  ;;  %v1740_v26 = vpop.f32.mrf.mxu1 }
 0x301   :  { %v2116_v56 = vadd.f32 %v2080_v58, %v1771_v18  ;;  %v1772_v52 = vadd.f32 %v1740_v26, %v15143_v22 }
 0x302   :  { %v12339_v51 = vpop.f32.mrf.mxu0  ;;  %v12306_v4 = vpop.f32.mrf.mxu1 }
 0x304   :  { %v2085_v59 = vpop.f32.mrf.mxu0  ;;  %v1743_v2 = vpop.f32.mrf.mxu1 }
 0x305   :  { %v2117_v34 = vadd.f32 %v2085_v59, %v1772_v52  ;;  %v1773_v0 = vadd.f32 %v1743_v2, %v15145_v45 }
 0x306   :  { %v12342_v27 = vpop.f32.mrf.mxu0  ;;  %v12307_v48 = vpop.f32.mrf.mxu1 }
 0x308   :  { %v2088_v55 = vpop.f32.mrf.mxu0  ;;  %v1748_v5 = vpop.f32.mrf.mxu1 }
 0x309   :  { %v2118_v39 = vadd.f32 %v2088_v55, %v1773_v0  ;;  %v1774_v22 = vadd.f32 %v1748_v5, %v15155_v61 }
 0x30a   :  { %v12343_v16 = vpop.f32.mrf.mxu0  ;;  %v12310_v14 = vpop.f32.mrf.mxu1 }
 0x30c   :  { %v2093_v37 = vpop.f32.mrf.mxu0  ;;  %v1751_v33 = vpop.f32.mrf.mxu1 }
 0x30d   :  { %v2119_v25 = vadd.f32 %v2093_v37, %v1774_v22  ;;  %v1775_v31 = vadd.f32 %v1751_v33, %v15157_v50 }
 0x30e   :  { %v12346_v43 = vpop.f32.mrf.mxu0  ;;  %v12311_v45 = vpop.f32.mrf.mxu1 }
 0x310   :  { %v2096_v17 = vpop.f32.mrf.mxu0  ;;  %v1756_v6 = vpop.f32.mrf.mxu1 }
 0x311   :  { %v2120_v42 = vadd.f32 %v2096_v17, %v1775_v31  ;;  %v1776_v35 = vadd.f32 %v1756_v6, %v15165_v29 }
 0x312   :  { %v12347_v54 = vpop.f32.mrf.mxu0  ;;  %v12314_v8 = vpop.f32.mrf.mxu1 }
 0x314   :  { %v2101_v1 = vpop.f32.mrf.mxu0  ;;  %v1759_v3 = vpop.f32.mrf.mxu1 }
 0x315   :  { %v2121_v30 = vadd.f32 %v2101_v1, %v1776_v35  ;;  %v1777_v61 = vadd.f32 %v1759_v3, %v15169_v57 }
 0x316   :  { %v12350_v11 = vpop.f32.mrf.mxu0  ;;  %v12315_v41 = vpop.f32.mrf.mxu1 }
 0x318   :  { %v2104_v49 = vpop.f32.mrf.mxu0  ;;  %v1764_v38 = vpop.f32.mrf.mxu1 }
 0x319   :  { %v2122_v46 = vadd.f32 %v2104_v49, %v1777_v61  ;;  %v1778_v50 = vadd.f32 %v1764_v38, %v15176_v28 }
 0x31a   :  { %v12351_v20 = vpop.f32.mrf.mxu0  ;;  %v12318_v24 = vpop.f32.mrf.mxu1 }
 0x31c   :  { %v2109_v23 = vpop.f32.mrf.mxu0  ;;  %v1767_v12 = vpop.f32.mrf.mxu1 }
 0x31d   :  { %v2123_v47 = vadd.f32 %v2109_v23, %v1778_v50 }
 0x31e   :  { %v12354_v29 = vpop.f32.mrf.mxu0  ;;  %v12319_v40 = vpop.f32.mrf.mxu1 }
 0x320   :  { %v2112_v9 = vpop.f32.mrf.mxu0  ;;  %v2270_v10 = vpop.f32.mrf.mxu1 }
 0x321   :  { %v2308_v36 = vadd.f32 %v2270_v10, %v15185_v21 }
 0x322   :  { %v12355_v18 = vpop.f32.mrf.mxu0  ;;  %v12374_v57 = vpop.f32.mrf.mxu1 }
 0x324   :  { %v2605_v13 = vpop.f32.mrf.mxu0  ;;  %v2273_v58 = vpop.f32.mrf.mxu1 }
 0x325   :  { %v15202_v63 = vadd.f32 %v2605_v13, %v2308_v36  ;;  %v2309_v62 = vadd.f32 %v2273_v58, %v2116_v56 }
 0x326   :  { %v12410_v26 = vpop.f32.mrf.mxu0  ;;  %v12375_v28 = vpop.f32.mrf.mxu1 }
 0x328   :  { %v2608_v52 = vpop.f32.mrf.mxu0  ;;  %v2278_v4 = vpop.f32.mrf.mxu1 }
 0x329   :  { %v15204_v51 = vadd.f32 %v2608_v52, %v2309_v62  ;;  %v2310_v59 = vadd.f32 %v2278_v4, %v2117_v34 }
 0x32a   :  { %v12411_v2 = vpop.f32.mrf.mxu0  ;;  %v12378_v0 = vpop.f32.mrf.mxu1 }
 0x32c   :  { %v2613_v27 = vpop.f32.mrf.mxu0  ;;  %v2281_v48 = vpop.f32.mrf.mxu1 }
 0x32d   :  { %v15206_v32 = vadd.f32 %v2613_v27, %v2310_v59  ;;  %v2311_v21 = vadd.f32 %v2281_v48, %v2118_v39 }
 0x32e   :  { %v12414_v55 = vpop.f32.mrf.mxu0  ;;  %v12379_v5 = vpop.f32.mrf.mxu1 }
 0x330   :  { %v2616_v22 = vpop.f32.mrf.mxu0  ;;  %v2286_v56 = vpop.f32.mrf.mxu1 }
 0x331   :  { %v15208_v16 = vadd.f32 %v2616_v22, %v2311_v21  ;;  %v2312_v14 = vadd.f32 %v2286_v56, %v2119_v25 }
 0x332   :  { %v12415_v37 = vpop.f32.mrf.mxu0  ;;  %v12382_v33 = vpop.f32.mrf.mxu1 }
 0x334   :  { %v2621_v31 = vpop.f32.mrf.mxu0  ;;  %v2289_v34 = vpop.f32.mrf.mxu1 }
 0x335   :  { %v15210_v43 = vadd.f32 %v2621_v31, %v2312_v14  ;;  %v2313_v45 = vadd.f32 %v2289_v34, %v2120_v42 }
 0x336   :  { %v12418_v17 = vpop.f32.mrf.mxu0  ;;  %v12383_v6 = vpop.f32.mrf.mxu1 }
 0x338   :  { %v2624_v35 = vpop.f32.mrf.mxu0  ;;  %v2294_v39 = vpop.f32.mrf.mxu1 }
 0x339   :  { %v15212_v54 = vadd.f32 %v2624_v35, %v2313_v45  ;;  %v2314_v8 = vadd.f32 %v2294_v39, %v2121_v30 }
 0x33a   :  { %v12419_v1 = vpop.f32.mrf.mxu0  ;;  %v12386_v3 = vpop.f32.mrf.mxu1 }
 0x33c   :  { %v2629_v61 = vpop.f32.mrf.mxu0  ;;  %v2297_v25 = vpop.f32.mrf.mxu1 }
 0x33d   :  { %v15214_v11 = vadd.f32 %v2629_v61, %v2314_v8  ;;  %v2315_v41 = vadd.f32 %v2297_v25, %v2122_v46 }
 0x33e   :  { %v12422_v49 = vpop.f32.mrf.mxu0  ;;  %v12387_v38 = vpop.f32.mrf.mxu1 }
 0x340   :  { %v2632_v50 = vpop.f32.mrf.mxu0  ;;  %v2302_v20 = vpop.f32.mrf.mxu1 }
 0x341   :  { %v15221_v42 = vadd.f32 %v2632_v50, %v2315_v41  ;;  %v2316_v30 = vadd.f32 %v2302_v20, %v2123_v47 }
 0x342   :  { %v12423_v24 = vpop.f32.mrf.mxu0  ;;  %v12390_v23 = vpop.f32.mrf.mxu1 }
 0x344   :  { %v2637_v12 = vpop.f32.mrf.mxu0  ;;  %v2305_v40 = vpop.f32.mrf.mxu1 }
 0x345   :  { %v15223_v29 = vadd.f32 %v2637_v12, %v2316_v30  ;;  %v15244_v12 = vld [vmem:[%s10383_s15] ss:$0 sm:$0xff]  ;;  %s10400_s15 = sld [smem:[%s17339_s0 + %s13757_s12]]  }
 0x346   :  { %v12426_v46 = vpop.f32.mrf.mxu0  ;;  %v12391_v9 = vpop.f32.mrf.mxu1 }
 0x348   :  { %v2640_v10 = vpop.f32.mrf.mxu0  ;;  %v2950_v18 = vpop.f32.mrf.mxu1 }
 0x349   :  { %v2988_v25 = vadd.f32 %v2950_v18, %v15202_v63 }
 0x34a   :  { %v12427_v36 = vpop.f32.mrf.mxu0  ;;  %v12446_v57 = vpop.f32.mrf.mxu1 }
 0x34c   :  { %v3205_v13 = vpop.f32.mrf.mxu0  ;;  %v2953_v58 = vpop.f32.mrf.mxu1 }
 0x34d   :  { %v3243_v20 = vadd.f32 %v3205_v13, %v2988_v25  ;;  %v2989_v30 = vadd.f32 %v2953_v58, %v15204_v51 }
 0x34e   :  { %v12482_v62 = vpop.f32.mrf.mxu0  ;;  %v12447_v26 = vpop.f32.mrf.mxu1 }
 0x350   :  { %v3208_v28 = vpop.f32.mrf.mxu0  ;;  %v2958_v52 = vpop.f32.mrf.mxu1 }
 0x351   :  { %v3244_v10 = vadd.f32 %v3208_v28, %v2989_v30  ;;  %v2990_v36 = vadd.f32 %v2958_v52, %v15206_v32 }
 0x352   :  { %v12483_v4 = vpop.f32.mrf.mxu0  ;;  %v12450_v47 = vpop.f32.mrf.mxu1 }
 0x354   :  { %v3213_v59 = vpop.f32.mrf.mxu0  ;;  %v2961_v2 = vpop.f32.mrf.mxu1 }
 0x355   :  { %v2991_v62 = vadd.f32 %v2961_v2, %v15208_v16  ;;  %v3245_v26 = vadd.f32 %v3213_v59, %v2990_v36 }
 0x356   :  { %v12486_v0 = vpop.f32.mrf.mxu0  ;;  %v12451_v27 = vpop.f32.mrf.mxu1 }
 0x358   :  { %v3216_v48 = vpop.f32.mrf.mxu0  ;;  %v2966_v21 = vpop.f32.mrf.mxu1 }
 0x359   :  { %v3246_v27 = vadd.f32 %v3216_v48, %v2991_v62  ;;  %v2992_v28 = vadd.f32 %v2966_v21, %v15210_v43  ;;  %v13414_v43 = vld [vmem:[%s15219_s11 + $0x30] sm:$0xff]  }
 0x35a   :  { %v12487_v55 = vpop.f32.mrf.mxu0  ;;  %v12454_v5 = vpop.f32.mrf.mxu1 }
 0x35c   :  { %v3221_v22 = vpop.f32.mrf.mxu0  ;;  %v2969_v56 = vpop.f32.mrf.mxu1 }
 0x35d   :  { %v2993_v59 = vadd.f32 %v2969_v56, %v15212_v54 }
 0x35e   :  { %v12490_v14 = vpop.f32.mrf.mxu0  ;;  %v12455_v37 = vpop.f32.mrf.mxu1 }
 0x35f   :  { %v13413_v37 = vld [vmem:[%s15219_s11 + $0x38] sm:$0xff]  }
 0x360   :  { %v15225_v33 = vpop.f32.mrf.mxu0  ;;  %v15227_v31 = vpop.f32.mrf.mxu1 }
 0x362   :  { %v12491_v34 = vpop.f32.mrf.mxu0  ;;  %v12458_v45 = vpop.f32.mrf.mxu1 }
 0x363   :  { %v3247_v45 = vadd.f32 %v3221_v22, %v2992_v28  ;;  %v2994_v22 = vadd.f32 %v15227_v31, %v15214_v11 }
 0x364   :  { %v15229_v17 = vpop.f32.mrf.mxu0  ;;  %v15231_v6 = vpop.f32.mrf.mxu1 }
 0x366   :  { %v12494_v35 = vpop.f32.mrf.mxu0  ;;  %v12459_v39 = vpop.f32.mrf.mxu1 }
 0x368   :  { %v15233_v8 = vpop.f32.mrf.mxu0  ;;  %v15235_v1 = vpop.f32.mrf.mxu1 }
 0x36a   :  { %v12495_v3 = vpop.f32.mrf.mxu0  ;;  %v12462_v61 = vpop.f32.mrf.mxu1 }
 0x36b   :  { %v3248_v61 = vadd.f32 %v15225_v33, %v2993_v59 }
 0x36c   :  { %v15241_v41 = vpop.f32.mrf.mxu0  ;;  %v2985_v49 = vpop.f32.mrf.mxu1 }
 0x36e   :  { %v12498_v38 = vpop.f32.mrf.mxu0  ;;  %v12463_v50 = vpop.f32.mrf.mxu1 }
 0x36f   :  { %v13415_v50 = vld [vmem:[%s15219_s11 + $0x28] sm:$0xff]  }
 0x370   :  { %v3240_v24 = vpop.f32.mrf.mxu0  ;;  %v3545_v23 = vpop.f32.mrf.mxu1 }
 0x371   :  { %v3583_v46 = vadd.f32 %v3545_v23, %v3243_v20  ;;  %v2995_v24 = vadd.f32 %v15231_v6, %v15221_v42  ;;  %v3249_v23 = vadd.f32 %v15229_v17, %v2994_v22  ;;  %v2996_v17 = vadd.f32 %v15235_v1, %v15223_v29 }
 0x372   :  { %v12499_v40 = vpop.f32.mrf.mxu0  ;;  %v12518_v9 = vpop.f32.mrf.mxu1 }
 0x373   :  { %v3599_v63 = vadd.f32 %v15244_v12, %v3583_v46  ;;  %v13416_v46 = vld [vmem:[%s15219_s11 + $0x20] sm:$0xff]   ;;  %v3250_v36 = vadd.f32 %v15233_v8, %v2995_v24 }
 0x374   :  { %v3548_v18 = vpop.f32.mrf.mxu1  ;;  %v13420_v24 = vld [vmem:[%s15219_s11] sm:$0xff]  }
 0x375   :  { %v3584_v57 = vadd.f32 %v3548_v18, %v3244_v10  ;;  %v3608_v51 = vmul.f32 0.1, %v3599_v63 }
 0x376   :  { %v12519_v13 = vpop.f32.mrf.mxu1 }
 0x377   :  { %v3600_v58 = vadd.f32 %v15244_v12, %v3584_v57  ;;  %v3617_v32 = vmax.f32 %v3599_v63, %v3608_v51  ;;  %v3251_v51 = vadd.f32 %v15241_v41, %v2996_v17 }
 0x378   :  { %v3553_v4 = vpop.f32.mrf.mxu1 }
 0x379   :  { %v3609_v47 = vmul.f32 0.1, %v3600_v58  ;;  %v3585_v0 = vadd.f32 %v3553_v4, %v3245_v26 }
 0x37a   :  { %v12522_v55 = vpop.f32.mrf.mxu1 }
 0x37b   :  { %v3618_v52 = vmax.f32 %v3600_v58, %v3609_v47  ;;  %v3601_v5 = vadd.f32 %v15244_v12, %v3585_v0 }
 0x37c   :  { %v3556_v14 = vpop.f32.mrf.mxu1 }
 0x37d   :  { %v3626_v16 = vpack.c.bf16 %v3618_v52, %v3617_v32  ;;  %v3586_v2 = vadd.f32 %v3556_v14, %v3246_v27  ;;  %v3610_v35 = vmul.f32 0.1, %v3601_v5 }
 0x37e   :  { %v12523_v34 = vpop.f32.mrf.mxu1 }
 0x37f   :  { %v3602_v39 = vadd.f32 %v15244_v12, %v3586_v2  ;;  %12553 = vmatmul.mubr.bf16.vlgmr.msra.gmra.mxu0 %v3626_v16  ;;  %v3619_v56 = vmax.f32 %v3601_v5, %v3610_v35 }
 0x380   :  { %v3561_v48 = vpop.f32.mrf.mxu1  ;;  %12556 = vmatprep.mubr.msk.bf16.mxu0 %vm13733_vm0, %v17378_v15  ;;  %12609 = vmatpush3.bf16.msra.mxu0 %v13413_v37 }
 0x381   :  { %v3611_v21 = vmul.f32 0.1, %v3602_v39  ;;  %v3587_v3 = vadd.f32 %v3561_v48, %v3247_v45  ;;  %12610 = vmatprep.subr.bf16.mxu0 %v17378_v15 }
 0x382   :  { %v12526_v54 = vpop.f32.mrf.mxu1 }
 0x383   :  { %v3620_v25 = vmax.f32 %v3602_v39, %v3611_v21  ;;  %v3603_v49 = vadd.f32 %v15244_v12, %v3587_v3 }
 0x384   :  { %v3564_v38 = vpop.f32.mrf.mxu1  ;;  %12611 = vmatpush3.bf16.msra.mxu0 %v13414_v43 }
 0x385   :  { %v3627_v20 = vpack.c.bf16 %v3620_v25, %v3619_v56  ;;  %v3588_v30 = vadd.f32 %v3564_v38, %v3248_v61  ;;  %12612 = vmatprep.subr.bf16.mxu0 %v17378_v15  ;;  %v3612_v40 = vmul.f32 0.1, %v3603_v49 }
 0x386   :  { %v12527_v33 = vpop.f32.mrf.mxu1 }
 0x387   :  { %v3604_v11 = vadd.f32 %v15244_v12, %v3588_v30  ;;  %12557 = vmatmul.mubr.bf16.gmra.mxu0 %v3627_v20  ;;  %v3621_v6 = vmax.f32 %v3603_v49, %v3612_v40  ;;  %v13418_v20 = vld [vmem:[%s15219_s11 + $0x10] sm:$0xff]   ;;  %v13419_v30 = vld [vmem:[%s15219_s11 + $0x8] sm:$0xff]   ;;  %v15309_v33 = vld [vmem:[%s10387_s19] ss:$0 sm:$0xff]  ;;  %s17109_s19 = sld [smem:[%s17339_s0 + %s13758_s16]]  }
 0x388   :  { %v3569_v31 = vpop.f32.mrf.mxu1  ;;  %12560 = vmatprep.mubr.msk.bf16.mxu0 %vm13733_vm0, %v17378_v15  ;;  %12613 = vmatpush3.bf16.msra.mxu0 %v13415_v50  ;;  %v13417_v50 = vld [vmem:[%s15219_s11 + $0x18] sm:$0xff]   ;;  %s16889_s11 = sld [smem:[%s17339_s0 + %s13756_s8]]  }
 0x389   :  { %v3613_v9 = vmul.f32 0.1, %v3604_v11  ;;  %v3589_v10 = vadd.f32 %v3569_v31, %v3249_v23  ;;  %12614 = vmatprep.subr.bf16.mxu0 %v17378_v15  ;;  %v15311_v23 = vld [vmem:[%s10385_s23] ss:$0 sm:$0xff]  ;;  %s10408_s23 = sld [smem:[%s17339_s0 + %s13759_s20]]  }
 0x38a   :  { %v12530_v42 = vpop.f32.mrf.mxu1 }
 0x38b   :  { %v3622_v63 = vmax.f32 %v3604_v11, %v3613_v9  ;;  %v3605_v18 = vadd.f32 %v15244_v12, %v3589_v10 }
 0x38c   :  { %v3572_v57 = vpop.f32.mrf.mxu1  ;;  %12615 = vmatpush3.bf16.msra.mxu0 %v13416_v46 }
 0x38d   :  { %v3628_v62 = vpack.c.bf16 %v3622_v63, %v3621_v6  ;;  %v3590_v13 = vadd.f32 %v3572_v57, %v3250_v36  ;;  %12616 = vmatprep.subr.bf16.mxu0 %v17378_v15  ;;  %v3614_v58 = vmul.f32 0.1, %v3605_v18 }
 0x38e   :  { %v12531_v26 = vpop.f32.mrf.mxu1 }
 0x38f   :  { %v3606_v8 = vadd.f32 %v15244_v12, %v3590_v13  ;;  %12561 = vmatmul.mubr.bf16.gmra.mxu0 %v3628_v62  ;;  %v3623_v0 = vmax.f32 %v3605_v18, %v3614_v58 }
 0x390   :  { %v3577_v4 = vpop.f32.mrf.mxu1  ;;  %12564 = vmatprep.mubr.msk.bf16.mxu0 %vm13733_vm0, %v17378_v15  ;;  %12617 = vmatpush3.bf16.msra.mxu0 %v13417_v50 }
 0x391   :  { %v3615_v29 = vmul.f32 0.1, %v3606_v8  ;;  %v3591_v1 = vadd.f32 %v3577_v4, %v3251_v51  ;;  %12618 = vmatprep.subr.bf16.mxu0 %v17378_v15 }
 0x392   :  { %v12534_v47 = vpop.f32.mrf.mxu1 }
 0x393   :  { %v3624_v27 = vmax.f32 %v3606_v8, %v3615_v29  ;;  %v3607_v55 = vadd.f32 %v15244_v12, %v3591_v1 }
 0x394   :  { %v3580_v28 = vpop.f32.mrf.mxu1  ;;  %12619 = vmatpush3.bf16.msra.mxu0 %v13418_v20 }
 0x395   :  { %v3629_v32 = vpack.c.bf16 %v3624_v27, %v3623_v0  ;;  %v3616_v52 = vmul.f32 0.1, %v3607_v55  ;;  %12620 = vmatprep.subr.bf16.mxu0 %v17378_v15 }
 0x396   :  { %v12535_v5 = vpop.f32.mrf.mxu1 }
 0x397   :  { %12565 = vmatmul.mubr.bf16.gmra.mxu0 %v3629_v32  ;;  %v3625_v14 = vmax.f32 %v3607_v55, %v3616_v52 }
 0x398   :  { %v3879_v41 = vpop.f32.mrf.mxu1  ;;  %12568 = vmatprep.mubr.msk.bf16.mxu0 %vm13733_vm0, %v17378_v15  ;;  %12621 = vmatpush3.bf16.msra.mxu0 %v13419_v30 }
 0x399   :  { %v3630_v2 = vpack.c.bf16 %v3625_v14, %v3625_v14  ;;  %12622 = vmatprep.subr.bf16.mxu0 %v17378_v15  ;;  %v3880_v11 = vadd.f32 %v15309_v33, %v3879_v41 }
 0x39a   :  { %v12590_v37 = vpop.f32.mrf.mxu1 }
 0x39c   :  { %v3882_v16 = vpop.f32.mrf.mxu1  ;;  %12623 = vmatpush3.bf16.msra.mxu0 %v13420_v24 }
 0x39d   :  { %12680 = vmatprep.subr.bf16.mxu0 %v17378_v15  ;;  %v3883_v36 = vadd.f32 %v15309_v33, %v3882_v16 }
 0x39e   :  { %v12591_v59 = vpop.f32.mrf.mxu1 }
 0x39f   :  { %12569 = vmatmul.mubr.bf16.gmra.mxu0 %v3630_v2 }
 0x3a0   :  { %v3887_v34 = vpop.f32.mrf.mxu1  ;;  %12624 = vmatprep.mubr.msk.bf16.mxu0 %vm13733_vm0, %v17378_v15 }
 0x3a1   :  { %v3888_v57 = vadd.f32 %v15309_v33, %v3887_v34 }
 0x3a2   :  { %v12594_v12 = vpop.f32.mrf.mxu1 }
 0x3a4   :  { %v3890_v45 = vpop.f32.mrf.mxu1 }
 0x3a5   :  { %v3891_v29 = vadd.f32 %v15309_v33, %v3890_v45 }
 0x3a6   :  { %v12595_v35 = vpop.f32.mrf.mxu1 }
 0x3a8   :  { %v3895_v39 = vpop.f32.mrf.mxu1 }
 0x3a9   :  { %v3896_v32 = vadd.f32 %v15309_v33, %v3895_v39 }
 0x3aa   :  { %v12598_v48 = vpop.f32.mrf.mxu1 }
 0x3ac   :  { %v15287_v43 = vpop.f32.mrf.mxu1 }
 0x3ad   :  { %v3899_v59 = vadd.f32 %v15309_v33, %v15287_v43 }
 0x3ae   :  { %v12599_v21 = vpop.f32.mrf.mxu1 }
 0x3b0   :  { %v15289_v3 = vpop.f32.mrf.mxu1 }
 0x3b1   :  { %v3904_v21 = vadd.f32 %v15309_v33, %v15289_v3 }
 0x3b2   :  { %v12602_v61 = vpop.f32.mrf.mxu1 }
 0x3b4   :  { %v15291_v54 = vpop.f32.mrf.mxu1 }
 0x3b5   :  { %v3907_v20 = vadd.f32 %v15309_v33, %v15291_v54 }
 0x3b6   :  { %v12603_v22 = vpop.f32.mrf.mxu1 }
 0x3b8   :  { %v15293_v56 = vpop.f32.mrf.mxu1 }
 0x3ba   :  { %v12606_v25 = vpop.f32.mrf.mxu1 }
 0x3bc   :  { %v3914_v49 = vpop.f32.mrf.mxu1 }
 0x3be   :  { %v12607_v38 = vpop.f32.mrf.mxu1 }
 0x43f   :  { %v3736_v40 = vpop.f32.mrf.mxu0 }
 0x440   :  { %v3737_v31 = vadd.f32 %v15311_v23, %v3736_v40 }
 0x441   :  { %v12554_v46 = vpop.f32.mrf.mxu0 }
 0x442   :  { %v3917_v9 = vadd.f32 %v3880_v11, %v3737_v31  ;;  %v3912_v46 = vadd.f32 %v15309_v33, %v15293_v56  ;;  %v13421_v56 = vld [vmem:[%s15363_s27 + $0x78] sm:$0xff]  }
 0x443   :  { %v3739_v10 = vpop.f32.mrf.mxu0  ;;  %v13422_v33 = vld [vmem:[%s15363_s27 + $0x38] sm:$0xff]   ;;  %12645 = vmatpush3.bf16.msra.mxu1 %v13421_v56 }
 0x444   :  { %v3740_v42 = vadd.f32 %v15311_v23, %v3739_v10  ;;  %v3926_v6 = vmul.f32 0.1, %v3917_v9  ;;  %12646 = vmatprep.subr.bf16.mxu1 %v17378_v15 }
 0x445   :  { %v12555_v17 = vpop.f32.mrf.mxu0 }
 0x446   :  { %v3918_v63 = vadd.f32 %v3883_v36, %v3740_v42  ;;  %v3935_v51 = vmax.f32 %v3917_v9, %v3926_v6 }
 0x447   :  { %v3744_v18 = vpop.f32.mrf.mxu0 }
 0x448   :  { %v3927_v62 = vmul.f32 0.1, %v3918_v63  ;;  %v3745_v13 = vadd.f32 %v15311_v23, %v3744_v18 }
 0x449   :  { %v12558_v26 = vpop.f32.mrf.mxu0 }
 0x44a   :  { %v3936_v58 = vmax.f32 %v3918_v63, %v3927_v62  ;;  %v3919_v8 = vadd.f32 %v3888_v57, %v3745_v13  ;;  %v13424_v26 = vld [vmem:[%s15363_s27 + $0x30] sm:$0xff]  }
 0x44b   :  { %v3747_v4 = vpop.f32.mrf.mxu0 }
 0x44c   :  { %v15320_v1 = vpack.c.bf16 %v3936_v58, %v3935_v51  ;;  %v3748_v47 = vadd.f32 %v15311_v23, %v3747_v4  ;;  %v3928_v27 = vmul.f32 0.1, %v3919_v8  ;;  %v13425_v51 = vld [vmem:[%s15363_s27 + $0x68] sm:$0xff]   ;;  %v13428_v4 = vld [vmem:[%s15363_s27 + $0x20] sm:$0xff]  }
 0x44d   :  { %v12559_v0 = vpop.f32.mrf.mxu0  ;;  %v13426_v58 = vld [vmem:[%s15363_s27 + $0x28] sm:$0xff]  }
 0x44e   :  { %17395 = vst [vmem:[#allocation4_spill] sm:$0xff] %v15320_v1  ;;  %v3920_v55 = vadd.f32 %v3891_v29, %v3748_v47  ;;  %12625 = vmatmul.mubr.bf16.vlgmr.msra.gmra.mxu0 %v15320_v1  ;;  %v3937_v14 = vmax.f32 %v3919_v8, %v3928_v27  ;;  %v13427_v8 = vld [vmem:[%s15363_s27 + $0x60] sm:$0xff]   ;;  %v13429_v29 = vld [vmem:[%s15363_s27 + $0x58] sm:$0xff]   ;;  %v13431_v0 = vld [vmem:[%s15363_s27 + $0x50] sm:$0xff]  }
 0x44f   :  { %v3752_v28 = vpop.f32.mrf.mxu0  ;;  %12628 = vmatprep.mubr.msk.bf16.mxu0 %vm13733_vm0, %v17378_v15  ;;  %12681 = vmatpush3.bf16.msra.mxu0 %v13422_v33  ;;  %v13430_v47 = vld [vmem:[%s15363_s27 + $0x18] sm:$0xff]   ;;  %v13432_v27 = vld [vmem:[%s15363_s27 + $0x10] sm:$0xff]  }
 0x450   :  { %v3929_v52 = vmul.f32 0.1, %v3920_v55  ;;  %v3753_v5 = vadd.f32 %v15311_v23, %v3752_v28  ;;  %12682 = vmatprep.subr.bf16.mxu0 %v17378_v15  ;;  %v13434_v28 = vld [vmem:[%s15363_s27 + $0x8] sm:$0xff]   ;;  %v15459_v33 = vld [vmem:[%s15400_s1 + $0x3c] sm:$0xf] }
 0x451   :  { %v12562_v41 = vpop.f32.mrf.mxu0 }
 0x452   :  { %v3938_v37 = vmax.f32 %v3920_v55, %v3929_v52  ;;  %v3921_v16 = vadd.f32 %v3896_v32, %v3753_v5  ;;  %v13433_v55 = vld [vmem:[%s15363_s27 + $0x48] sm:$0xff]   ;;  %v13435_v32 = vld [vmem:[%s15363_s27 + $0x40] sm:$0xff]  }
 0x453   :  { %v3755_v2 = vpop.f32.mrf.mxu0  ;;  %12683 = vmatpush3.bf16.msra.mxu0 %v13424_v26  ;;  %v13436_v52 = vld [vmem:[%s15363_s27] sm:$0xff]   ;;  %v10863_v5 = vld [vmem:[%s15400_s1 + $0x48] sm:$0xf] }
 0x454   :  { %v15330_v34 = vpack.c.bf16 %v3938_v37, %v3937_v14  ;;  %v3756_v12 = vadd.f32 %v15311_v23, %v3755_v2  ;;  %v3930_v35 = vmul.f32 0.1, %v3921_v16  ;;  %12684 = vmatprep.subr.bf16.mxu0 %v17378_v15  ;;  %v10812_v41 = vld [vmem:[%s15400_s1 + $0x24] sm:$0xf]  ;;  %v15405_v14 = vld [vmem:[%s15400_s1] sm:$0xf] }
 0x455   :  { %v12563_v45 = vpop.f32.mrf.mxu0  ;;  %v15408_v37 = vld [vmem:[%s15400_s1 + $0x2c] sm:$0xf]  ;;  %v4737_v2 = vshll.u32 %v10863_v5, 16 }
 0x456   :  { %17396 = vst [vmem:[#allocation3_spill] sm:$0xff] %v15330_v34  ;;  %v3922_v48 = vadd.f32 %v3899_v59, %v3756_v12  ;;  %12629 = vmatmul.mubr.bf16.gmra.mxu0 %v15330_v34  ;;  %v3939_v25 = vmax.f32 %v3921_v16, %v3930_v35  ;;  %v4734_v16 = vshrl.u32 %v10863_v5, 16  ;;  %v15411_v59 = vld [vmem:[%s15400_s1 + $0x28] sm:$0xf]  ;;  %v4311_v12 = vrot.slane %v10812_v41, 7 }
 0x457   :  { %v3760_v39 = vpop.f32.mrf.mxu0  ;;  %12632 = vmatprep.mubr.msk.bf16.mxu0 %vm13733_vm0, %v17378_v15  ;;  %12685 = vmatpush3.bf16.msra.mxu0 %v13426_v58  ;;  %v15414_v45 = vld [vmem:[%s15400_s1 + $0x30] sm:$0xf]  ;;  %v15417_v35 = vld [vmem:[%s15400_s1 + $0x4] sm:$0xf] }
 0x458   :  { %v3931_v61 = vmul.f32 0.1, %v3922_v48  ;;  %v3761_v22 = vadd.f32 %v15311_v23, %v3760_v39  ;;  %12686 = vmatprep.subr.bf16.mxu0 %v17378_v15  ;;  %v4316_v39 = vrot.slane %v15408_v37, 7 }
 0x459   :  { %v12566_v43 = vpop.f32.mrf.mxu0 }
 0x45a   :  { %v3940_v49 = vmax.f32 %v3922_v48, %v3931_v61  ;;  %v3923_v38 = vadd.f32 %v3904_v21, %v3761_v22  ;;  %v4176_v48 = vshrl.u32 %v15405_v14, 16  ;;  %v15422_v21 = vld [vmem:[%s15400_s1 + $0x8] sm:$0xf]  ;;  %v4736_v61 = vrot.slane %v4734_v16, 6 }
 0x45b   :  { %v3763_v50 = vpop.f32.mrf.mxu0  ;;  %12687 = vmatpush3.bf16.msra.mxu0 %v13428_v4  ;;  %v4739_v22 = vrot.slane %v4737_v2, 7  ;;  %v4312_v43 = vrot.slane %v4311_v12, 4  ;;  %v4172_v4 = vld [vmem:[%s15400_s1 + $0x18] sm:$0xf] }
 0x45c   :  { %v15341_v30 = vpack.c.bf16 %v3940_v49, %v3939_v25  ;;  %v3764_v24 = vadd.f32 %v15311_v23, %v3763_v50  ;;  %v3932_v11 = vmul.f32 0.1, %v3923_v38  ;;  %12688 = vmatprep.subr.bf16.mxu0 %v17378_v15  ;;  %v4313_v25 = vrot.slane %v15411_v59, 7  ;;  %v15428_v50 = vld [vmem:[%s15400_s1 + $0xc] sm:$0xf] }
 0x45d   :  { %v12567_v40 = vpop.f32.mrf.mxu0  ;;  %v4319_v49 = vrot.slane %v15414_v45, 7  ;;  %v4229_v16 = vshrl.u32 %v4172_v4, 16 }
 0x45e   :  { %17397 = vst [vmem:[#allocation5_spill] sm:$0xff] %v15341_v30  ;;  %v3924_v31 = vadd.f32 %v3907_v20, %v3764_v24  ;;  %12633 = vmatmul.mubr.bf16.gmra.mxu0 %v15341_v30  ;;  %v3941_v36 = vmax.f32 %v3923_v38, %v3932_v11  ;;  %v4184_v38 = vshrl.u32 %v15417_v35, 16  ;;  %v15430_v20 = vrot.slane %v4176_v48, 7  ;;  %v15434_v40 = vld [vmem:[%s15400_s1 + $0x10] sm:$0xf] }
 0x45f   :  { %v3768_v3 = vpop.f32.mrf.mxu0  ;;  %12636 = vmatprep.mubr.msk.bf16.mxu0 %vm13733_vm0, %v17378_v15  ;;  %12689 = vmatpush3.bf16.msra.mxu0 %v13430_v47  ;;  %v4193_v24 = vshrl.u32 %v15422_v21, 16  ;;  %v4315_v11 = vrot.slane %v4313_v25, 4  ;;  %v15488_v48 = vld [vmem:[%s15400_s1 + $0x20] sm:$0xf] }
 0x460   :  { %v3933_v9 = vmul.f32 0.1, %v3924_v31  ;;  %v3769_v10 = vadd.f32 %v15311_v23, %v3768_v3  ;;  %v13423_v23 = vld [vmem:[%s15363_s27 + $0x70] sm:$0xff]   ;;  %12690 = vmatprep.subr.bf16.mxu0 %v17378_v15 }
 0x461   :  { %v12570_v54 = vpop.f32.mrf.mxu0  ;;  %12647 = vmatpush3.bf16.msra.mxu1 %v13423_v23  ;;  %v15439_v3 = vld [vmem:[%s15400_s1 + $0x34] sm:$0xf]  ;;  %v15456_v56 = vrot.slane %v4193_v24, 7  ;;  %v15463_v23 = vrot.slane %v4319_v49, 4 }
 0x462   :  { %v3942_v42 = vmax.f32 %v3924_v31, %v3933_v9  ;;  %v3925_v17 = vadd.f32 %v3912_v46, %v3769_v10  ;;  %12648 = vmatprep.subr.bf16.mxu1 %v17378_v15  ;;  %v4318_v31 = vrot.slane %v4316_v39, 4  ;;  %v15441_v46 = vor.u32 %v4739_v22, %v4736_v61 }
 0x463   :  { %v3771_v6 = vpop.f32.mrf.mxu0  ;;  %12691 = vmatpush3.bf16.msra.mxu0 %v13432_v27  ;;  %v4179_v9 = vshll.u32 %v15405_v14, 16  ;;  %v4187_v10 = vshll.u32 %v15417_v35, 16  ;;  %v4196_v54 = vshll.u32 %v15422_v21, 16  ;;  %v4322_v26 = vrot.slane %v15439_v3, 7  ;;  %v10820_v35 = vld [vmem:[%s15400_s1 + $0x44] sm:$0xf] }
 0x464   :  { %v15350_v63 = vpack.c.bf16 %v3942_v42, %v3941_v36  ;;  %v3934_v18 = vmul.f32 0.1, %v3925_v17  ;;  %12692 = vmatprep.subr.bf16.mxu0 %v17378_v15  ;;  %17400 = vst [vmem:[#allocation12_spill] sm:$0xff] %v15441_v46  ;;  %v15446_v36 = vrot.slane %v4184_v38, 7  ;;  %v4202_v42 = vshrl.u32 %v15428_v50, 16 }
 0x465   :  { %v12571_v57 = vpop.f32.mrf.mxu0  ;;  %12649 = vmatpush3.bf16.msra.mxu1 %v13425_v51  ;;  %v15451_v6 = vld [vmem:[%s15400_s1 + $0x38] sm:$0xf]  ;;  %v15466_v51 = vld [vmem:[#allocation2] sm:$0xe]  ;;  %v4324_v5 = vrot.slane %v4322_v26, 4  ;;  %v4214_v14 = vshll.u32 %v15434_v40, 16 }
 0x466   :  { %17398 = vst [vmem:[#allocation10_spill] sm:$0xff] %v15350_v63  ;;  %12637 = vmatmul.mubr.bf16.gmra.mxu0 %v15350_v63  ;;  %v3943_v62 = vmax.f32 %v3925_v17, %v3934_v18  ;;  %12650 = vmatprep.subr.bf16.mxu1 %v17378_v15  ;;  %v4205_v17 = vshll.u32 %v15428_v50, 16  ;;  %v4171_v18 = vld [vmem:[%s15400_s1 + $0x14] sm:$0xf]  ;;  %v4211_v57 = vshrl.u32 %v15434_v40, 16  ;;  %17401 = vst [vmem:[#allocation13_spill] sm:$0xff] %v15466_v51 }
 0x467   :  { %12640 = vmatprep.mubr.msk.bf16.mxu0 %vm13733_vm0, %v17378_v15  ;;  %12693 = vmatpush3.bf16.msra.mxu0 %v13434_v28  ;;  %v4191_v27 = vrot.slane %v15446_v36, 4  ;;  %v4325_v28 = vrot.slane %v15451_v6, 7  ;;  %v4223_v59 = vshll.u32 %v4171_v18, 16  ;;  %v15491_v21 = vmul.bf16 %v4311_v12, %v15466_v51 }
 0x468   :  { %v15355_v13 = vpack.c.bf16 %v3943_v62, %v3943_v62  ;;  %12694 = vmatprep.subr.bf16.mxu0 %v17378_v15  ;;  %v4182_v62 = vrot.slane %v15430_v20, 4  ;;  %v15472_v47 = vrot.slane %v4211_v57, 7  ;;  %v15497_v40 = vsel %vm14048_vm5, %v4312_v43, %v4313_v25 }
 0x469   :  { %12651 = vmatpush3.bf16.msra.mxu1 %v13427_v8  ;;  %v4220_v8 = vshrl.u32 %v4171_v18, 16  ;;  %v4327_v22 = vrot.slane %v4325_v28, 4  ;;  %v15499_v18 = vld [vmem:[#allocation2] sm:$0xf]  ;;  %v15502_v57 = vor.u32 %v4179_v9, %v15430_v20  ;;  %v15504_v12 = vrot.slane %v4229_v16, 7 }
 0x46a   :  { %17399 = vst [vmem:[#allocation11_spill] sm:$0xff] %v15355_v13  ;;  %12652 = vmatprep.subr.bf16.mxu1 %v17378_v15  ;;  %v4218_v61 = vrot.slane %v15472_v47, 4  ;;  %v4198_v43 = vor.u32 %v4196_v54, %v15456_v56  ;;  %v15518_v20 = vsel %vm14048_vm5, %v4315_v11, %v4316_v39  ;;  %v15524_v9 = vsel %vm14048_vm5, %v4318_v31, %v4319_v49  ;;  %v10865_v39 = vld [vmem:[%s15400_s1 + $0x50] sm:$0xf] }
 0x46b   :  { %12695 = vmatpush3.bf16.msra.mxu0 %v13436_v52  ;;  %v4173_v52 = vld [vmem:[%s15400_s1 + $0x1c] sm:$0xf]  ;;  %v4222_v2 = vrot.slane %v4220_v8, 7  ;;  %v4189_v8 = vor.u32 %v4187_v10, %v15446_v36  ;;  %v4334_v16 = vrot.slane %v10820_v35, 7  ;;  %v4247_v10 = vshrl.u32 %v15488_v48, 16 }
 0x46c   :  { %12752 = vmatprep.subr.bf16.mxu0 %v17378_v15  ;;  %v4241_v25 = vshll.u32 %v4173_v52, 16  ;;  %v4216_v37 = vor.u32 %v4214_v14, %v15472_v47  ;;  %v4236_v11 = vrot.slane %v15504_v12, 4  ;;  %v4250_v49 = vshll.u32 %v15488_v48, 16  ;;  %v10866_v14 = vld [vmem:[%s15400_s1 + $0x54] sm:$0xf] }
 0x46d   :  { %12653 = vmatpush3.bf16.msra.mxu1 %v13429_v29  ;;  %v15470_v29 = vrot.slane %v4202_v42, 7  ;;  %v4227_v24 = vrot.slane %v4222_v2, 4  ;;  %v4232_v42 = vshll.u32 %v4172_v4, 16  ;;  %v15542_v35 = vsel %vm14075_vm6, %v4191_v27, %v4198_v43 }
 0x46e   :  { %12641 = vmatmul.mubr.bf16.gmra.mxu0 %v15355_v13  ;;  %12654 = vmatprep.subr.bf16.mxu1 %v17378_v15  ;;  %v15547_v47 = vrot.slane %v4334_v16, 4  ;;  %v4756_v48 = vshll.u32 %v10865_v39, 16  ;;  %v15559_v27 = vsel %vm14048_vm5, %v15463_v23, %v4322_v26  ;;  %v4766_v43 = vshll.u32 %v10866_v14, 16 }
 0x46f   :  { %12696 = vmatprep.mubr.msk.bf16.mxu0 %vm13733_vm0, %v17378_v15  ;;  %v4209_v41 = vrot.slane %v15470_v29, 4  ;;  %v4207_v36 = vor.u32 %v4205_v17, %v15470_v29  ;;  %v4234_v29 = vor.u32 %v4232_v42, %v15504_v12  ;;  %v15563_v42 = vsel %vm14048_vm5, %v4324_v5, %v4325_v28  ;;  %v10901_v28 = vld [vmem:[%s15400_s1 + $0x6c] sm:$0xf] }
 0x470   :  { %v4768_v17 = vrot.slane %v4766_v43, 7 }
 0x471   :  { %12655 = vmatpush3.bf16.msra.mxu1 %v13431_v0  ;;  %v15475_v0 = vld [vmem:[%s15400_s1 + $0x40] sm:$0xf]  ;;  %v15591_v5 = vsel %vm14075_vm6, %v4227_v24, %v4234_v29 }
 0x472   :  { %12656 = vmatprep.subr.bf16.mxu1 %v17378_v15  ;;  %v4331_v50 = vrot.slane %v15475_v0, 7  ;;  %v10864_v0 = vld [vmem:[%s15400_s1 + $0x4c] sm:$0xf] }
 0x473   :  { %v4743_v31 = vshrl.u32 %v10864_v0, 16 }
 0x474   :  { %v4333_v4 = vrot.slane %v4331_v50, 4 }
 0x475   :  { %12657 = vmatpush3.bf16.msra.mxu1 %v13433_v55  ;;  %v4200_v55 = vrot.slane %v15456_v56, 4  ;;  %v4225_v56 = vor.u32 %v4223_v59, %v4222_v2  ;;  %v4746_v2 = vshll.u32 %v10864_v0, 16  ;;  %v4753_v59 = vshrl.u32 %v10865_v39, 16  ;;  %v10902_v0 = vld [vmem:[%s15400_s1 + $0x70] sm:$0xf] }
 0x476   :  { %12658 = vmatprep.subr.bf16.mxu1 %v17378_v15  ;;  %v15583_v26 = vsel %vm14048_vm5, %v4333_v4, %v4334_v16  ;;  %v4758_v16 = vrot.slane %v4756_v48, 7 }
 0x477   :  { %v15575_v3 = vsel %vm14075_vm6, %v4218_v61, %v4225_v56  ;;  %v4745_v61 = vrot.slane %v4743_v31, 6  ;;  %v5088_v56 = vshrl.u32 %v10902_v0, 16 }
 0x479   :  { %12659 = vmatpush3.bf16.msra.mxu1 %v13435_v32  ;;  %v4328_v32 = vrot.slane %v15459_v33, 7  ;;  %v4238_v33 = vshrl.u32 %v4173_v52, 16  ;;  %v15538_v52 = vsel %vm14075_vm6, %v4182_v62, %v4189_v8  ;;  %v15552_v62 = vsel %vm14075_vm6, %v4200_v55, %v4207_v36 }
 0x47a   :  { %12716 = vmatprep.subr.bf16.mxu1 %v17378_v15  ;;  %v15571_v55 = vsel %vm14075_vm6, %v4209_v41, %v4216_v37  ;;  %v4748_v8 = vrot.slane %v4746_v2, 7  ;;  %v5075_v36 = vshll.u32 %v10901_v28, 16  ;;  %v5078_v37 = vshrl.u32 %v10901_v28, 16 }
 0x47b   :  { %v4330_v38 = vrot.slane %v4328_v32, 4  ;;  %v15533_v45 = vrot.slane %v4238_v33, 7  ;;  %v15567_v12 = vsel %vm14048_vm5, %v4327_v22, %v4328_v32  ;;  %v15587_v32 = vld [vmem:[%s15509_s5] ss:$0 sm:$0xff]  ;;  %v15594_v22 = vrot.slane %v4247_v10, 7  ;;  %s10404_s5 = sld [smem:[%s17339_s0 + %s13762_s2]]  }
 0x47c   :  { %v10903_v33 = vld [vmem:[%s15400_s1 + $0x74] sm:$0xf]  ;;  %v4749_v28 = vor.u32 %v4748_v8, %v4745_v61 }
 0x47d   :  { %v15579_v23 = vsel %vm14048_vm5, %v4330_v38, %v4331_v50  ;;  %v4243_v41 = vor.u32 %v4241_v25, %v15533_v45  ;;  %v4755_v38 = vrot.slane %v4753_v59, 6  ;;  %v4763_v50 = vshrl.u32 %v10866_v14, 16 }
 0x47e   :  { %v4245_v39 = vrot.slane %v15533_v45, 4  ;;  %v5094_v25 = vshll.u32 %v10903_v33, 16  ;;  %v5098_v10 = vshrl.u32 %v10903_v33, 16  ;;  %v4252_v14 = vor.u32 %v4250_v49, %v15594_v22  ;;  %v10904_v49 = vld [vmem:[%s15400_s1 + $0x78] sm:$0xf] }
 0x47f   :  { %v15602_v31 = vsel %vm14075_vm6, %v4236_v11, %v4243_v41  ;;  %v5084_v59 = vshll.u32 %v10902_v0, 16  ;;  %v4765_v54 = vrot.slane %v4763_v50, 6  ;;  %v15607_v45 = vor.u32 %v4758_v16, %v4755_v38 }
 0x480   :  { %v15609_v33 = vrot.slane %v5075_v36, 5  ;;  %v5090_v11 = vrot.slane %v5088_v56, 4  ;;  %v15613_v13 = vrot.slane %v5094_v25, 5  ;;  %v5100_v0 = vrot.slane %v5098_v10, 4 }
 0x481   :  { %v15617_v8 = vsel %vm14075_vm6, %v4245_v39, %v4252_v14  ;;  %v15619_v38 = vrot.slane %v5084_v59, 5  ;;  %v17403_v36 = vrot.slane %v15441_v46, 4  ;;  %v15627_v56 = vor.u32 %v4768_v17, %v4765_v54  ;;  %v10905_v59 = vld [vmem:[%s15400_s1 + $0x7c] sm:$0xf]  ;;  %v15636_v17 = vld [vmem:[#allocation2] sm:$0x8] }
 0x482   :  { %v5104_v14 = vshll.u32 %v10904_v49, 16  ;;  %v5114_v30 = vshll.u32 %v10905_v59, 16 }
 0x483   :  { %v5091_v39 = vor.u32 %v5090_v11, %v15619_v38 }
 0x50e   :  { %v4054_v4 = vpop.f32.mrf.mxu0 }
 0x50f   :  { %v4055_v24 = vadd.f32 %v15587_v32, %v4054_v4  ;;  %v10867_v4 = vld [vmem:[%s15400_s1 + $0x58] sm:$0xf] }
 0x510   :  { %v12626_v29 = vpop.f32.mrf.mxu0  ;;  %v4773_v50 = vshrl.u32 %v10867_v4, 16  ;;  %v4776_v43 = vshll.u32 %v10867_v4, 16 }
 0x511   :  { %v4092_v48 = vmul.f32 0.1, %v4055_v24  ;;  %v5080_v29 = vrot.slane %v5078_v37, 4  ;;  %v4751_v37 = vrot.slane %v4749_v28, 4 }
 0x512   :  { %v4057_v58 = vpop.f32.mrf.mxu0  ;;  %v4778_v2 = vrot.slane %v4776_v43, 7 }
 0x513   :  { %v4101_v41 = vmax.f32 %v4055_v24, %v4092_v48  ;;  %v4058_v6 = vadd.f32 %v15587_v32, %v4057_v58  ;;  %v15625_v58 = vsel %vm14179_vm9, %v17403_v36, %v4749_v28  ;;  %v10868_v24 = vld [vmem:[%s15400_s1 + $0x5c] sm:$0xf]  ;;  %v5081_v10 = vor.u32 %v5080_v29, %v15609_v33 }
 0x514   :  { %v12627_v61 = vpop.f32.mrf.mxu0  ;;  %v5108_v48 = vshrl.u32 %v10904_v49, 16  ;;  %v5101_v28 = vor.u32 %v5100_v0, %v15613_v13  ;;  %v4775_v36 = vrot.slane %v4773_v50, 6  ;;  %v4783_v29 = vshrl.u32 %v10868_v24, 16 }
 0x515   :  { %v11523_v16 = vpack.c.bf16 %v4101_v41, %v4101_v41  ;;  %v4093_v4 = vmul.f32 0.1, %v4058_v6  ;;  %v4761_v61 = vrot.slane %v15607_v45, 4  ;;  %v4786_v63 = vshll.u32 %v10868_v24, 16 }
 0x516   :  { %v4062_v25 = vpop.f32.mrf.mxu0  ;;  %v15641_v49 = vsel %vm14179_vm9, %v4751_v37, %v15607_v45  ;;  %v15644_v1 = vrot.slane %v5081_v10, 4  ;;  %v15646_v0 = vrot.slane %v5091_v39, 4  ;;  %v5110_v50 = vrot.slane %v5108_v48, 4 }
 0x517   :  { %4147 = vst [vmem:[#allocation2 + $0x4] sm:$0xf] %v11523_v16  ;;  %v4063_v41 = vadd.f32 %v15587_v32, %v4062_v25  ;;  %v10906_v16 = vld [vmem:[%s15400_s1 + $0x80] sm:$0xf]  ;;  %v5118_v25 = vshrl.u32 %v10905_v59, 16  ;;  %v4102_v43 = vmax.f32 %v4058_v6, %v4093_v4  ;;  %v15651_v44 = vrot.slane %v5101_v28, 4 }
 0x518   :  { %v12630_v54 = vpop.f32.mrf.mxu0  ;;  %v4779_v37 = vor.u32 %v4778_v2, %v4775_v36  ;;  %v4785_v19 = vrot.slane %v4783_v29, 6  ;;  %v4788_v51 = vrot.slane %v4786_v63, 7  ;;  %v5124_v59 = vshll.u32 %v10906_v16, 16  ;;  %v10869_v2 = vld [vmem:[%s15400_s1 + $0x60] sm:$0xf] }
 0x519   :  { %v4094_v11 = vmul.f32 0.1, %v4063_v41  ;;  %v15648_v54 = vrot.slane %v5104_v14, 5  ;;  %v15655_v39 = vrot.slane %v5114_v30, 5  ;;  %v5120_v14 = vrot.slane %v5118_v25, 4 }
 0x51a   :  { %v4065_v34 = vpop.f32.mrf.mxu0  ;;  %v4781_v29 = vrot.slane %v4779_v37, 4  ;;  %v17405_v10 = vmul.bf16 %v15502_v57, %v15499_v18 }
 0x51b   :  { %v4103_v60 = vmax.f32 %v4063_v41, %v4094_v11  ;;  %v4066_v24 = vadd.f32 %v15587_v32, %v4065_v34  ;;  %17404 = vst [vmem:[#allocation14_spill] sm:$0xff] %v15655_v39  ;;  %v15662_v34 = vsel %vm14179_vm9, %v4761_v61, %v15627_v56  ;;  %v5111_v30 = vor.u32 %v5110_v50, %v15648_v54 }
 0x51c   :  { %v12631_v45 = vpop.f32.mrf.mxu0  ;;  %v15682_v11 = vor.u32 %v4788_v51, %v4785_v19  ;;  %v5121_v50 = vor.u32 %v5120_v14, %v15655_v39  ;;  %v4796_v51 = vshll.u32 %v10869_v2, 16 }
 0x51d   :  { %v11558_v46 = vpack.c.bf16 %v4103_v60, %v4102_v43  ;;  %v4771_v60 = vrot.slane %v15627_v56, 4  ;;  %v4095_v4 = vmul.f32 0.1, %v4066_v24  ;;  %v15685_v43 = vrot.slane %v5124_v59, 5 }
 0x51e   :  { %v4070_v48 = vpop.f32.mrf.mxu0  ;;  %v15657_v6 = vld [vmem:[#allocation2 + $0x4] sm:$0xf]  ;;  %v4793_v45 = vshrl.u32 %v10869_v2, 16  ;;  %v15695_v19 = vrot.slane %v5111_v30, 4 }
 0x51f   :  { %11579 = vst [vmem:[#allocation2 + $0x8] sm:$0xff] %v11558_v46   ;;  %v4071_v41 = vadd.f32 %v15587_v32, %v4070_v48  ;;  %v4266_v28 = vmul.bf16 %v15538_v52, %v15657_v6  ;;  %v5128_v46 = vshrl.u32 %v10906_v16, 16  ;;  %v10870_v52 = vld [vmem:[%s15400_s1 + $0x64] sm:$0xf]  ;;  %v4104_v16 = vmax.f32 %v4066_v24, %v4095_v4 }
 0x520   :  { %v12634_v36 = vpop.f32.mrf.mxu0  ;;  %17406 = vst [vmem:[#allocation15_spill] sm:$0xff] %v15695_v19  ;;  %v15700_v14 = vsel %vm14179_vm9, %v4771_v60, %v4779_v37  ;;  %v4803_v57 = vshrl.u32 %v10870_v52, 16  ;;  %v10907_v30 = vld [vmem:[%s15400_s1 + $0x84] sm:$0xf]  ;;  %v15709_v24 = vrot.slane %v5121_v50, 4  ;;  %v4795_v4 = vrot.slane %v4793_v45, 6 }
 0x521   :  { %v4096_v25 = vmul.f32 0.1, %v4071_v41  ;;  %v4348_v36 = vmul.bf16 %v15497_v40, %v15657_v6  ;;  %v15693_v63 = vcombine.low %v17405_v10, %v4266_v28  ;;  %17407 = vst [vmem:[#allocation16_spill] sm:$0xff] %v15700_v14  ;;  %v15705_v40 = vsel %vm14179_vm9, %v4781_v29, %v15682_v11 }
 0x522   :  { %v4073_v48 = vpop.f32.mrf.mxu0  ;;  %17408 = vst [vmem:[#allocation17_spill] sm:$0xff] %v15705_v40  ;;  %v4806_v10 = vshll.u32 %v10870_v52, 16  ;;  %v5134_v18 = vshll.u32 %v10907_v30, 16  ;;  %v13437_v40 = vld [vmem:[%s15363_s27 + $0xb8] sm:$0xff]  }
 0x523   :  { %v4105_v56 = vmax.f32 %v4071_v41, %v4096_v25  ;;  %v4074_v59 = vadd.f32 %v15587_v32, %v4073_v48  ;;  %v15711_v41 = vrot.slane %v5128_v46, 4  ;;  %v4561_v29 = vshll.u32 %v15693_v63, 16 }
 0x524   :  { %v12635_v61 = vpop.f32.mrf.mxu0  ;;  %v4798_v25 = vrot.slane %v4796_v51, 7 }
 0x525   :  { %v11563_v2 = vpack.c.bf16 %v4105_v56, %v4104_v16  ;;  %v10837_v61 = vcombine.low %v15491_v21, %v4348_v36  ;;  %v4097_v50 = vmul.f32 0.1, %v4074_v59  ;;  %v4805_v16 = vrot.slane %v4803_v57, 6 }
 0x526   :  { %v4078_v28 = vpop.f32.mrf.mxu0  ;;  %v15713_v37 = vld [vmem:[#allocation2 + $0x8] sm:$0xf]  ;;  %v15715_v60 = vld [vmem:[#allocation2 + $0xc] sm:$0xf]  ;;  %v4808_v56 = vrot.slane %v4806_v10, 7 }
 0x527   :  { %11580 = vst [vmem:[#allocation2 + $0x10] sm:$0xff] %v11563_v2   ;;  %v4079_v46 = vadd.f32 %v15587_v32, %v4078_v28  ;;  %v4349_v52 = vmul.bf16 %v15518_v20, %v15713_v37  ;;  %v4350_v45 = vmul.bf16 %v15524_v9, %v15715_v60  ;;  %v4267_v48 = vmul.bf16 %v15542_v35, %v15713_v37  ;;  %v15735_v28 = vld [vmem:[%s15400_s1 + $0x88] sm:$0xf] }
 0x528   :  { %v12638_v21 = vpop.f32.mrf.mxu0  ;;  %v4268_v36 = vmul.bf16 %v15552_v62, %v15715_v60  ;;  %v5138_v20 = vshrl.u32 %v10907_v30, 16  ;;  %v4399_v19 = vrot.slane %v10837_v61, 1  ;;  %v5131_v35 = vor.u32 %v15711_v41, %v15685_v43 }
 0x529   :  { %v4098_v51 = vmul.f32 0.1, %v4079_v46  ;;  %v15732_v2 = vcombine.low %v4349_v52, %v4350_v45  ;;  %v4563_v21 = vrot.slane %v4561_v29, 1  ;;  %v4106_v62 = vmax.f32 %v4074_v59, %v4097_v50  ;;  %v13438_v50 = vld [vmem:[%s15363_s27 + $0xf8] sm:$0xff]  }
 0x52a   :  { %v4081_v39 = vpop.f32.mrf.mxu0  ;;  %v15737_v9 = vcombine.low %v4267_v48, %v4268_v36  ;;  %v4559_v30 = vshrl.u32 %v15693_v63, 16  ;;  %v5144_v41 = vshll.u32 %v15735_v28, 16  ;;  %v5140_v48 = vrot.slane %v5138_v20, 4  ;;  %v15760_v63 = vld [vmem:[%s15400_s1 + $0x68] sm:$0xf] }
 0x52b   :  { %v4107_v57 = vmax.f32 %v4079_v46, %v4098_v51  ;;  %v15742_v10 = vadd.f32 %v15587_v32, %v4081_v39  ;;  %v4400_v52 = vrot.slane %v15732_v2, 1  ;;  %v15757_v46 = vrot.slane %v5134_v18, 5 }
 0x52c   :  { %v12639_v45 = vpop.f32.mrf.mxu0  ;;  %v4566_v61 = vshll.u32 %v15737_v9, 16  ;;  %v4564_v51 = vor.u32 %v4563_v21, %v4559_v30  ;;  %v17409_v2 = vrot.slane %v15682_v11, 4 }
 0x52d   :  { %v11568_v59 = vpack.c.bf16 %v4107_v57, %v4106_v62  ;;  %v4401_v39 = vsel %vm1110_vm12, %v4399_v19, %v4400_v52  ;;  %v15766_v62 = vor.u32 %v4798_v25, %v4795_v4  ;;  %v5148_v57 = vshrl.u32 %v15735_v28, 16  ;;  %v13439_v28 = vld [vmem:[%s15363_s27 + $0xb0] sm:$0xff]  }
 0x52e   :  { %v4086_v36 = vpop.f32.mrf.mxu0  ;;  %12661 = vmatmul.mubr.bf16.vlgmr.msra.gmra.mxu1 %v4401_v39  ;;  %v4568_v45 = vrot.slane %v4566_v61, 1  ;;  %v15762_v14 = vld [vmem:[#allocation2 + $0x10] sm:$0xf]  ;;  %v15764_v29 = vld [vmem:[#allocation2 + $0x14] sm:$0xf]  ;;  %v4813_v61 = vshrl.u32 %v15760_v63, 16 }
 0x52f   :  { %11581 = vst [vmem:[#allocation2 + $0x18] sm:$0xff] %v11568_v59   ;;  %v4099_v19 = vmul.f32 0.1, %v15742_v10  ;;  %v4087_v18 = vadd.f32 %v15587_v32, %v4086_v36  ;;  %12664 = vmatprep.mubr.msk.bf16.mxu1 %vm13733_vm0, %v17378_v15  ;;  %v4351_v20 = vmul.bf16 %v15559_v27, %v15762_v14  ;;  %v4352_v21 = vmul.bf16 %v15563_v42, %v15764_v29 }
 0x530   :  { %v12642_v30 = vpop.f32.mrf.mxu0  ;;  %v4569_v4 = vsel %vm1270_vm13, %v4564_v51, %v4568_v45  ;;  %12717 = vmatpush3.bf16.msra.mxu1 %v13437_v40  ;;  %v4269_v25 = vmul.bf16 %v15571_v55, %v15762_v14  ;;  %v4270_v32 = vmul.bf16 %v15575_v3, %v15764_v29  ;;  %v15787_v42 = vor.u32 %v4808_v56, %v4805_v16  ;;  %v13440_v3 = vld [vmem:[%s15363_s27 + $0xf0] sm:$0xff]  }
 0x531   :  { %v4100_v59 = vmul.f32 0.1, %v4087_v18  ;;  %12697 = vmatmul.mubr.bf16.vlgmr.msra.gmra.mxu0 %v4569_v4  ;;  %v15784_v27 = vcombine.low %v4351_v20, %v4352_v21  ;;  %12718 = vmatprep.subr.bf16.mxu1 %v17378_v15  ;;  %v5141_v40 = vor.u32 %v5140_v48, %v15757_v46  ;;  %v4801_v36 = vrot.slane %v15766_v62, 4  ;;  %v15800_v21 = vld [vmem:[%s15400_s1 + $0x8c] sm:$0xf] }
 0x532   :  { %v4089_v39 = vpop.f32.mrf.mxu0  ;;  %12700 = vmatprep.mubr.msk.bf16.mxu0 %vm13733_vm0, %v17378_v15  ;;  %v15792_v55 = vcombine.low %v4269_v25, %v4270_v32  ;;  %12753 = vmatpush3.bf16.msra.mxu0 %v13438_v50  ;;  %v15796_v51 = vrot.slane %v5131_v35, 4  ;;  %v4816_v20 = vshll.u32 %v15760_v63, 16  ;;  %v4108_v56 = vmax.f32 %v15742_v10, %v4099_v19  ;;  %v13441_v63 = vld [vmem:[%s15363_s27 + $0xa8] sm:$0xff]  }
 0x533   :  { %v4109_v16 = vmax.f32 %v4087_v18, %v4100_v59  ;;  %v4402_v48 = vrot.slane %v15784_v27, 1  ;;  %12754 = vmatprep.subr.bf16.mxu0 %v17378_v15  ;;  %v15805_v30 = vrot.slane %v5144_v41, 5  ;;  %v4570_v4 = vshrl.u32 %v15737_v9, 16  ;;  %v13442_v41 = vld [vmem:[%s15363_s27 + $0xe8] sm:$0xff]   ;;  %v15821_v18 = vld [vmem:[%s15400_s1 + $0xb4] sm:$0xf] }
 0x534   :  { %v12643_v50 = vpop.f32.mrf.mxu0  ;;  %v4574_v35 = vshll.u32 %v15792_v55, 16  ;;  %12719 = vmatpush3.bf16.msra.mxu1 %v13439_v28  ;;  %v4815_v25 = vrot.slane %v4813_v61, 6  ;;  %v5150_v32 = vrot.slane %v5148_v57, 4  ;;  %v15817_v19 = vrot.slane %v5141_v40, 4 }
 0x535   :  { %v11573_v39 = vpack.c.bf16 %v4109_v16, %v4108_v56  ;;  %v4403_v10 = vsel %vm1110_vm12, %v4400_v52, %v4402_v48  ;;  %12720 = vmatprep.subr.bf16.mxu1 %v17378_v15  ;;  %v5154_v9 = vshll.u32 %v15800_v21, 16  ;;  %v4572_v28 = vor.u32 %v4570_v4, %v4568_v45 }
 0x536   :  { %12665 = vmatmul.mubr.bf16.gmra.mxu1 %v4403_v10  ;;  %v4576_v57 = vrot.slane %v4574_v35, 1  ;;  %12755 = vmatpush3.bf16.msra.mxu0 %v13440_v3  ;;  %v15823_v61 = vld [vmem:[#allocation2 + $0x18] sm:$0xf]  ;;  %v15825_v59 = vld [vmem:[#allocation2 + $0x1c] sm:$0xf]  ;;  %v15832_v52 = vsel %vm14179_vm9, %v17409_v2, %v15766_v62  ;;  %v4818_v40 = vrot.slane %v4816_v20, 7  ;;  %v5151_v16 = vor.u32 %v5150_v32, %v15805_v30 }
 0x537   :  { %11582 = vst [vmem:[#allocation2 + $0x20] sm:$0xff] %v11573_v39   ;;  %12668 = vmatprep.mubr.msk.bf16.mxu1 %vm13733_vm0, %v17378_v15  ;;  %v4353_v45 = vmul.bf16 %v15567_v12, %v15823_v61  ;;  %v4354_v3 = vmul.bf16 %v15579_v23, %v15825_v59  ;;  %v4271_v56 = vmul.bf16 %v15591_v5, %v15823_v61  ;;  %v13443_v20 = vld [vmem:[%s15363_s27 + $0xa0] sm:$0xff]   ;;  %v5158_v12 = vshrl.u32 %v15800_v21, 16  ;;  %v15861_v35 = vld [vmem:[%s15400_s1 + $0xb8] sm:$0xf] }
 0x538   :  { %v4272_v11 = vmul.bf16 %v15602_v31, %v15825_v59  ;;  %v4577_v62 = vsel %vm1270_vm13, %v4572_v28, %v4576_v57  ;;  %12721 = vmatpush3.bf16.msra.mxu1 %v13441_v63  ;;  %12756 = vmatprep.subr.bf16.mxu0 %v17378_v15  ;;  %v5617_v23 = vshrl.u32 %v15821_v18, 16  ;;  %v5137_v31 = vsel %vm14236_vm14, %v15796_v51, %v15757_v46  ;;  %v13444_v21 = vld [vmem:[%s15363_s27 + $0xe0] sm:$0xff]   ;;  %v13454_v46 = vld [vmem:[%s15363_s27 + $0x178] sm:$0xff]  }
 0x539   :  { %12701 = vmatmul.mubr.bf16.gmra.mxu0 %v4577_v62  ;;  %v15850_v50 = vcombine.low %v4353_v45, %v4354_v3  ;;  %12722 = vmatprep.subr.bf16.mxu1 %v17378_v15  ;;  %v4811_v4 = vrot.slane %v15787_v42, 4  ;;  %v15869_v63 = vsel %vm14179_vm9, %v4801_v36, %v15787_v42  ;;  %v15871_v32 = vor.u32 %v4818_v40, %v4815_v25  ;;  %v15885_v36 = vld [vmem:[%s15400_s1 + $0xbc] sm:$0xf] }
 0x53a   :  { %v15852_v5 = vcombine.low %v4271_v56, %v4272_v11  ;;  %12704 = vmatprep.mubr.msk.bf16.mxu0 %vm13733_vm0, %v17378_v15  ;;  %12757 = vmatpush3.bf16.msra.mxu0 %v13442_v41  ;;  %v15873_v39 = vrot.slane %v5154_v9, 5  ;;  %v5620_v10 = vshll.u32 %v15821_v18, 16  ;;  %v4578_v2 = vshrl.u32 %v15792_v55, 16  ;;  %v13445_v25 = vld [vmem:[%s15363_s27 + $0x98] sm:$0xff]  }
 0x53b   :  { %v4404_v28 = vrot.slane %v15850_v50, 1  ;;  %12758 = vmatprep.subr.bf16.mxu0 %v17378_v15  ;;  %v5147_v42 = vsel %vm14236_vm14, %v15817_v19, %v15805_v30  ;;  %v15888_v41 = vrot.slane %v5151_v16, 4  ;;  %v5160_v9 = vrot.slane %v5158_v12, 4  ;;  %v13446_v16 = vld [vmem:[%s15363_s27 + $0xd8] sm:$0xff]  }
 0x53c   :  { %v4582_v45 = vshll.u32 %v15852_v5, 16  ;;  %12723 = vmatpush3.bf16.msra.mxu1 %v13443_v20  ;;  %v15890_v18 = vrot.slane %v5617_v23, 7  ;;  %v5625_v55 = vshrl.u32 %v15861_v35, 16  ;;  %v4580_v3 = vor.u32 %v4578_v2, %v4576_v57  ;;  %v13447_v2 = vld [vmem:[%s15363_s27 + $0x90] sm:$0xff]  }
 0x53d   :  { %v4405_v40 = vsel %vm1110_vm12, %v4402_v48, %v4404_v28  ;;  %12724 = vmatprep.subr.bf16.mxu1 %v17378_v15  ;;  %v5628_v11 = vshll.u32 %v15861_v35, 16  ;;  %v4834_v12 = vmul.bf16 %v15641_v49, %v15713_v37  ;;  %v4835_v27 = vmul.bf16 %v15662_v34, %v15715_v60 }
 0x53e   :  { %v4584_v56 = vrot.slane %v4582_v45, 1  ;;  %12669 = vmatmul.mubr.bf16.gmra.mxu1 %v4405_v40  ;;  %12759 = vmatpush3.bf16.msra.mxu0 %v13444_v21  ;;  %v15900_v62 = vld [vmem:[#allocation2 + $0x20] sm:$0xf]  ;;  %v4165_v20 = vld [vmem:[#allocation2 + $0x24] sm:$0x1]  ;;  %v15910_v48 = vsel %vm14179_vm9, %v4811_v4, %v15871_v32  ;;  %v5634_v57 = vshrl.u32 %v15885_v36, 16 }
 0x53f   :  { %12672 = vmatprep.mubr.msk.bf16.mxu1 %vm13733_vm0, %v17378_v15  ;;  %v4355_v35 = vmul.bf16 %v15583_v26, %v15900_v62  ;;  %v4356_v49 = vmul.bf16 %v15547_v47, %v4165_v20  ;;  %v4273_v34 = vmul.bf16 %v15617_v8, %v15900_v62  ;;  %v17410_v21 = vrot.slane %v15594_v22, 4  ;;  %12760 = vmatprep.subr.bf16.mxu0 %v17378_v15  ;;  %v4722_v51 = vld [vmem:[#allocation2 + $0x24] sm:$0x3] }
 0x540   :  { %v4585_v23 = vsel %vm1270_vm13, %v4580_v3, %v4584_v56  ;;  %12725 = vmatpush3.bf16.msra.mxu1 %v13445_v25  ;;  %v5161_v26 = vor.u32 %v5160_v9, %v15873_v39  ;;  %v15930_v40 = vrot.slane %v5625_v55, 7  ;;  %v4833_v22 = vmul.bf16 %v15625_v58, %v15657_v6  ;;  %v13448_v55 = vld [vmem:[%s15363_s27 + $0xd0] sm:$0xff]  }
 0x541   :  { %v4274_v4 = vmul.bf16 %v17410_v21, %v4165_v20  ;;  %12705 = vmatmul.mubr.bf16.gmra.mxu0 %v4585_v23  ;;  %v15932_v47 = vcombine.low %v4355_v35, %v4356_v49  ;;  %12726 = vmatprep.subr.bf16.mxu1 %v17378_v15  ;;  %v15939_v25 = vor.u32 %v5620_v10, %v15890_v18  ;;  %v5623_v23 = vrot.slane %v15890_v18, 4 }
 0x542   :  { %12708 = vmatprep.mubr.msk.bf16.mxu0 %vm13733_vm0, %v17378_v15  ;;  %12761 = vmatpush3.bf16.msra.mxu0 %v13446_v16  ;;  %v17411_v58 = vsel %vm14236_vm14, %v15646_v0, %v15613_v13  ;;  %v17412_v10 = vsel %vm14236_vm14, %v15651_v44, %v15648_v54  ;;  %v10889_v16 = vcombine.low %v4834_v12, %v4835_v27  ;;  %v15967_v49 = vrot.slane %v5634_v57, 7  ;;  %v13449_v54 = vld [vmem:[%s15363_s27 + $0x88] sm:$0xff]   ;;  %v15975_v12 = vld [vmem:[%s15400_s1 + $0xc0] sm:$0xf] }
 0x543   :  { %v15943_v9 = vcombine.low %v4273_v34, %v4274_v4  ;;  %v5175_v3 = vmul.bf16 %v17411_v58, %v15713_v37  ;;  %v5176_v20 = vmul.bf16 %v17412_v10, %v15715_v60  ;;  %v4406_v35 = vrot.slane %v15932_v47, 1  ;;  %12762 = vmatprep.subr.bf16.mxu0 %v17378_v15  ;;  %v15992_v58 = vld [vmem:[%s15400_s1 + $0xc4] sm:$0xf] }
 0x544   :  { %v17413_v13 = vsel %vm14236_vm14, %v15644_v1, %v15619_v38  ;;  %v4586_v34 = vshrl.u32 %v15852_v5, 16  ;;  %12727 = vmatpush3.bf16.msra.mxu1 %v13447_v2  ;;  %v15972_v18 = vrot.slane %v5161_v26, 4  ;;  %v5630_v27 = vor.u32 %v5628_v11, %v15930_v40  ;;  %v17414_v38 = vld [vmem:[#allocation12_spill] sm:$0xff]  ;;  %v13450_v26 = vld [vmem:[%s15363_s27 + $0xc8] sm:$0xff]  }
 0x545   :  { %v5174_v0 = vmul.bf16 %v17413_v13, %v15657_v6  ;;  %v4590_v44 = vshll.u32 %v15943_v9, 16  ;;  %v4407_v1 = vsel %vm1110_vm12, %v4404_v28, %v4406_v35  ;;  %12728 = vmatprep.subr.bf16.mxu1 %v17378_v15  ;;  %v17415_v6 = vld [vmem:[#allocation13_spill] sm:$0xff]  ;;  %v5632_v21 = vrot.slane %v15930_v40, 4 }
 0x546   :  { %v17416_v5 = vmul.bf16 %v17414_v38, %v17415_v6  ;;  %v5637_v4 = vshll.u32 %v15885_v36, 16  ;;  %12673 = vmatmul.mubr.bf16.gmra.mxu1 %v4407_v1  ;;  %v4588_v2 = vor.u32 %v4586_v34, %v4584_v56  ;;  %12763 = vmatpush3.bf16.msra.mxu0 %v13448_v55  ;;  %v10927_v50 = vcombine.low %v5175_v3, %v5176_v20  ;;  %v13451_v20 = vld [vmem:[%s15363_s27 + $0x80] sm:$0xff]   ;;  %v17418_v34 = vld [vmem:[#allocation16_spill] sm:$0xff]  ;;  %v16011_v6 = vld [vmem:[%s15400_s1 + $0xc8] sm:$0xf] }
 0x547   :  { %v4592_v11 = vrot.slane %v4590_v44, 1  ;;  %12676 = vmatprep.mubr.msk.bf16.mxu1 %vm13733_vm0, %v17378_v15  ;;  %12764 = vmatprep.subr.bf16.mxu0 %v17378_v15  ;;  %v17417_v36 = vmul.bf16 %v15609_v33, %v15636_v17  ;;  %v5643_v56 = vshrl.u32 %v15975_v12, 16  ;;  %v5646_v55 = vshll.u32 %v15975_v12, 16  ;;  %v17419_v1 = vld [vmem:[#allocation17_spill] sm:$0xff] }
 0x548   :  { %v10888_v57 = vcombine.low %v17416_v5, %v4833_v22  ;;  %v4893_v22 = vshrl.u32 %v10889_v16, 16  ;;  %12729 = vmatpush3.bf16.msra.mxu1 %v13449_v54  ;;  %v4896_v13 = vshll.u32 %v10889_v16, 16  ;;  %v4836_v44 = vmul.bf16 %v17418_v34, %v15762_v14  ;;  %v13452_v16 = vld [vmem:[%s15363_s27 + $0xc0] sm:$0xff]  }
 0x549   :  { %v16000_v10 = vcombine.low %v17417_v36, %v5174_v0  ;;  %v4593_v3 = vsel %vm1270_vm13, %v4588_v2, %v4592_v11  ;;  %v4837_v38 = vmul.bf16 %v17419_v1, %v15764_v29  ;;  %12730 = vmatprep.subr.bf16.mxu1 %v17378_v15  ;;  %v16016_v5 = vsel %vm14075_vm6, %v5623_v23, %v5630_v27  ;;  %v17422_v34 = vld [vmem:[#allocation14_spill] sm:$0xff]  ;;  %v10943_v28 = vld [vmem:[%s15400_s1 + $0xa0] sm:$0xf]  ;;  %v13584_v0 = vld [vmem:[%s16860_s7 + $0x90] sm:$0xff]  }
 0x54a   :  { %12709 = vmatmul.mubr.bf16.gmra.mxu0 %v4593_v3  ;;  %v4885_v33 = vshrl.u32 %v10888_v57, 16  ;;  %v4888_v17 = vshll.u32 %v10888_v57, 16  ;;  %v5652_v54 = vshrl.u32 %v15992_v58, 16  ;;  %v5234_v2 = vshrl.u32 %v10927_v50, 16  ;;  %v17421_v3 = vld [vmem:[#allocation15_spill] sm:$0xff] }
 0x54b   :  { %12712 = vmatprep.mubr.msk.bf16.mxu0 %vm13733_vm0, %v17378_v15  ;;  %12765 = vmatpush3.bf16.msra.mxu0 %v13450_v26  ;;  %v5237_v36 = vshll.u32 %v10927_v50, 16  ;;  %v17423_v57 = vsel %vm14236_vm14, %v17421_v3, %v17422_v34  ;;  %v17424_v23 = vsel %vm14236_vm14, %v15709_v24, %v15685_v43  ;;  %v5639_v26 = vor.u32 %v5637_v4, %v15967_v49  ;;  %v16042_v43 = vld [vmem:[%s15400_s1 + $0xcc] sm:$0xf] }
 0x54c   :  { %v5177_v1 = vmul.bf16 %v17423_v57, %v15762_v14  ;;  %v5178_v27 = vmul.bf16 %v17424_v23, %v15764_v29  ;;  %12766 = vmatprep.subr.bf16.mxu0 %v17378_v15  ;;  %v16036_v50 = vrot.slane %v5643_v56, 7  ;;  %v5661_v45 = vshrl.u32 %v16011_v6, 16  ;;  %12731 = vmatpush3.bf16.msra.mxu1 %v13451_v20 }
 0x54d   :  { %v4895_v3 = vrot.slane %v4893_v22, 1  ;;  %v4898_v34 = vrot.slane %v4896_v13, 2  ;;  %v5226_v57 = vshrl.u32 %v16000_v10, 16  ;;  %v10890_v8 = vcombine.low %v4836_v44, %v4837_v38  ;;  %12788 = vmatprep.subr.bf16.mxu1 %v17378_v15  ;;  %v10944_v38 = vld [vmem:[%s15400_s1 + $0xa4] sm:$0xf] }
 0x54e   :  { %v4594_v24 = vshrl.u32 %v15943_v9, 16  ;;  %v4887_v23 = vrot.slane %v4885_v33, 1  ;;  %v5229_v4 = vshll.u32 %v16000_v10, 16  ;;  %v16047_v56 = vrot.slane %v5652_v54, 7  ;;  %12677 = vmatmul.mubr.bf16.gmra.mxu1 %v4406_v35  ;;  %v10945_v33 = vld [vmem:[%s15400_s1 + $0xa8] sm:$0xf] }
 0x54f   :  { %12767 = vmatpush3.bf16.msra.mxu0 %v13452_v16  ;;  %v4890_v22 = vrot.slane %v4888_v17, 2  ;;  %v5236_v20 = vrot.slane %v5234_v2, 3  ;;  %v5239_v13 = vrot.slane %v5237_v36, 4  ;;  %v10928_v44 = vcombine.low %v5177_v1, %v5178_v27  ;;  %12732 = vmatprep.mubr.msk.bf16.mxu1 %vm13733_vm0, %v17378_v15  ;;  %v10946_v2 = vld [vmem:[%s15400_s1 + $0xac] sm:$0xf] }
 0x550   :  { %v4596_v9 = vor.u32 %v4594_v24, %v4592_v11  ;;  %12824 = vmatprep.subr.bf16.mxu0 %v17378_v15  ;;  %v16060_v10 = vsel %vm14075_vm6, %v5632_v21, %v5639_v26  ;;  %v5664_v47 = vshll.u32 %v16011_v6, 16  ;;  %v5670_v35 = vshrl.u32 %v16042_v43, 16 }
 0x551   :  { %v16065_v17 = vor.u32 %v4898_v34, %v4895_v3  ;;  %v5228_v11 = vrot.slane %v5226_v57, 3  ;;  %v4902_v54 = vshrl.u32 %v10890_v8, 16  ;;  %v4905_v16 = vshll.u32 %v10890_v8, 16  ;;  %v13453_v3 = vld [vmem:[%s15363_s27 + $0x138] sm:$0xff]  }
 0x552   :  { %12713 = vmatmul.mubr.bf16.gmra.mxu0 %v4596_v9  ;;  %v4838_v40 = vmul.bf16 %v15832_v52, %v15823_v61  ;;  %v4839_v21 = vmul.bf16 %v15869_v63, %v15825_v59  ;;  %v5417_v6 = vmul.bf16 %v10943_v28, %v15764_v29  ;;  %v5418_v36 = vmul.bf16 %v10944_v38, %v15823_v61  ;;  %v16082_v52 = vld [vmem:[%s15400_s1 + $0xd0] sm:$0xf] }
 0x553   :  { %v4891_v1 = vor.u32 %v4890_v22, %v4887_v23  ;;  %12768 = vmatprep.mubr.msk.bf16.mxu0 %vm13733_vm0, %v17378_v15  ;;  %v5231_v27 = vrot.slane %v5229_v4, 4  ;;  %v16076_v26 = vor.u32 %v5239_v13, %v5236_v20  ;;  %v5243_v8 = vshrl.u32 %v10928_v44, 16 }
 0x554   :  { %v5246_v34 = vshll.u32 %v10928_v44, 16  ;;  %v16079_v57 = vcombine.low %v5417_v6, %v5418_v36  ;;  %v5419_v63 = vmul.bf16 %v10945_v33, %v15825_v59  ;;  %v5420_v29 = vmul.bf16 %v10946_v2, %v15900_v62 }
 0x555   :  { %v4904_v28 = vrot.slane %v4902_v54, 1  ;;  %v4907_v24 = vrot.slane %v4905_v16, 2  ;;  %v5179_v23 = vmul.bf16 %v5137_v31, %v15823_v61  ;;  %v5180_v4 = vmul.bf16 %v5147_v42, %v15825_v59  ;;  %v13455_v42 = vld [vmem:[%s15363_s27 + $0x130] sm:$0xff]  }
 0x556   :  { %v4900_v22 = vsel %vm1600_vm15, %v4891_v1, %v16065_v17  ;;  %v10891_v20 = vcombine.low %v4838_v40, %v4839_v21  ;;  %v16100_v13 = vrot.slane %v5661_v45, 7  ;;  %v16102_v44 = vcombine.low %v5419_v63, %v5420_v29  ;;  %v16125_v54 = vld [vmem:[%s15400_s1 + $0xd4] sm:$0xf]  ;;  %v16131_v21 = vld [vmem:[#allocation2 + $0x24] sm:$0xf] }
 0x557   :  { %12733 = vmatmul.mubr.bf16.vlgmr.msra.gmra.mxu1 %v4900_v22  ;;  %v5232_v38 = vor.u32 %v5231_v27, %v5228_v11  ;;  %v5648_v61 = vor.u32 %v5646_v55, %v16036_v50  ;;  %v5650_v30 = vrot.slane %v16036_v50, 4  ;;  %v5679_v19 = vshrl.u32 %v16082_v52, 16  ;;  %v13458_v22 = vld [vmem:[%s15363_s27 + $0x168] sm:$0xff]  }
 0x558   :  { %12736 = vmatprep.mubr.msk.bf16.mxu1 %vm13733_vm0, %v17378_v15  ;;  %12789 = vmatpush3.bf16.msra.mxu1 %v13453_v3  ;;  %v5245_v59 = vrot.slane %v5243_v8, 3  ;;  %v5248_v31 = vrot.slane %v5246_v34, 4  ;;  %v16113_v45 = vrot.slane %v5670_v35, 7  ;;  %v5673_v9 = vshll.u32 %v16042_v43, 16 }
 0x559   :  { %v5241_v12 = vsel %vm1945_vm1, %v5232_v38, %v16076_v26  ;;  %v16118_v55 = vor.u32 %v4907_v24, %v4904_v28  ;;  %12790 = vmatprep.subr.bf16.mxu1 %v17378_v15  ;;  %v10929_v50 = vcombine.low %v5179_v23, %v5180_v4  ;;  %v17425_v33 = vshll.u32 %v15992_v58, 16  ;;  %v13456_v58 = vld [vmem:[%s15363_s27 + $0x170] sm:$0xff]  }
 0x55a   :  { %12769 = vmatmul.mubr.bf16.vlgmr.msra.gmra.mxu0 %v5241_v12  ;;  %v4911_v35 = vshrl.u32 %v10891_v20, 16  ;;  %v4914_v16 = vshll.u32 %v10891_v20, 16  ;;  %v4840_v43 = vmul.bf16 %v15910_v48, %v15900_v62  ;;  %v17426_v2 = vrot.slane %v15871_v32, 4  ;;  %v13457_v32 = vld [vmem:[%s15363_s27 + $0x128] sm:$0xff]   ;;  %v13459_v20 = vld [vmem:[%s15363_s27 + $0x120] sm:$0xff]  }
 0x55b   :  { %v5657_v11 = vor.u32 %v17425_v33, %v16047_v56  ;;  %12772 = vmatprep.mubr.msk.bf16.mxu0 %vm13733_vm0, %v17378_v15  ;;  %12825 = vmatpush3.bf16.msra.mxu0 %v13454_v46  ;;  %v5659_v6 = vrot.slane %v16047_v56, 4  ;;  %v5666_v36 = vor.u32 %v5664_v47, %v16100_v13  ;;  %v5668_v1 = vrot.slane %v16100_v13, 4  ;;  %v11018_v33 = vld [vmem:[%s15400_s1 + $0xe4] sm:$0xf] }
 0x55c   :  { %v4841_v40 = vmul.bf16 %v17426_v2, %v4722_v51  ;;  %v16139_v27 = vrot.slane %v5679_v19, 7  ;;  %v16141_v8 = vor.u32 %v5248_v31, %v5245_v59  ;;  %12791 = vmatpush3.bf16.msra.mxu1 %v13455_v42  ;;  %12826 = vmatprep.subr.bf16.mxu0 %v17378_v15  ;;  %v5675_v48 = vor.u32 %v5673_v9, %v16113_v45  ;;  %v11015_v51 = vld [vmem:[%s15400_s1 + $0xd8] sm:$0xf]  ;;  %v11017_v42 = vld [vmem:[%s15400_s1 + $0xe0] sm:$0xf] }
 0x55d   :  { %v5682_v3 = vshll.u32 %v16082_v52, 16  ;;  %v5688_v56 = vshrl.u32 %v16125_v54, 16  ;;  %12792 = vmatprep.subr.bf16.mxu1 %v17378_v15  ;;  %v5252_v47 = vshrl.u32 %v10929_v50, 16  ;;  %v5255_v34 = vshll.u32 %v10929_v50, 16 }
 0x55e   :  { %v17427_v63 = vsel %vm14236_vm14, %v15888_v41, %v15873_v39  ;;  %v5182_v28 = vmul.bf16 %v15972_v18, %v16131_v21  ;;  %v4909_v52 = vsel %vm1600_vm15, %v16065_v17, %v16118_v55  ;;  %v4913_v24 = vrot.slane %v4911_v35, 1 }
 0x55f   :  { %v5181_v29 = vmul.bf16 %v17427_v63, %v15900_v62  ;;  %v4916_v23 = vrot.slane %v4914_v16, 2  ;;  %v10892_v4 = vcombine.low %v4840_v43, %v4841_v40  ;;  %12737 = vmatmul.mubr.bf16.gmra.mxu1 %v4909_v52  ;;  %12827 = vmatpush3.bf16.msra.mxu0 %v13456_v58  ;;  %v17428_v13 = vrot.slane %v15967_v49, 4  ;;  %v13461_v43 = vld [vmem:[%s15363_s27 + $0x118] sm:$0xff]   ;;  %v16214_v63 = vld [vmem:[#allocation2 + $0x8] sm:$0xf] }
 0x560   :  { %v16170_v41 = vsel %vm14075_vm6, %v5650_v30, %v5657_v11  ;;  %v5677_v62 = vrot.slane %v16113_v45, 4  ;;  %v5686_v18 = vrot.slane %v16139_v27, 4  ;;  %12740 = vmatprep.mubr.msk.bf16.mxu1 %vm13733_vm0, %v17378_v15  ;;  %12793 = vmatpush3.bf16.msra.mxu1 %v13457_v32  ;;  %v16178_v49 = vsel %vm14075_vm6, %v5659_v6, %v5666_v36  ;;  %v13462_v32 = vld [vmem:[%s15363_s27 + $0x158] sm:$0xff]  }
 0x561   :  { %v16166_v39 = vsel %vm14075_vm6, %v17428_v13, %v5648_v61  ;;  %v5684_v17 = vor.u32 %v5682_v3, %v16139_v27  ;;  %v16181_v38 = vrot.slane %v5688_v56, 7  ;;  %v5691_v46 = vshll.u32 %v16125_v54, 16  ;;  %v11016_v61 = vld [vmem:[%s15400_s1 + $0xdc] sm:$0xf]  ;;  %12828 = vmatprep.subr.bf16.mxu0 %v17378_v15  ;;  %12794 = vmatprep.subr.bf16.mxu1 %v17378_v15 }
 0x562   :  { %v5250_v30 = vsel %vm1945_vm1, %v16076_v26, %v16141_v8  ;;  %v5254_v19 = vrot.slane %v5252_v47, 3  ;;  %v5257_v59 = vrot.slane %v5255_v34, 4  ;;  %v10930_v31 = vcombine.low %v5181_v29, %v5182_v28  ;;  %v13460_v26 = vld [vmem:[%s15363_s27 + $0x160] sm:$0xff]   ;;  %v13463_v34 = vld [vmem:[%s15363_s27 + $0x110] sm:$0xff]   ;;  %v5605_v28 = vld [vmem:[#allocation2 + $0x28] sm:$0x1] }
 0x563   :  { %12773 = vmatmul.mubr.bf16.gmra.mxu0 %v5250_v30  ;;  %v16192_v45 = vor.u32 %v4916_v23, %v4913_v24  ;;  %v4920_v9 = vshrl.u32 %v10892_v4, 16  ;;  %v4923_v12 = vshll.u32 %v10892_v4, 16  ;;  %v16196_v50 = vsel %vm14075_vm6, %v5668_v1, %v5675_v48 }
 0x564   :  { %12776 = vmatprep.mubr.msk.bf16.mxu0 %vm13733_vm0, %v17378_v15  ;;  %12829 = vmatpush3.bf16.msra.mxu0 %v13458_v22  ;;  %v5944_v11 = vshrl.u32 %v11015_v51, 16  ;;  %v5947_v54 = vshll.u32 %v11015_v51, 16  ;;  %v5953_v35 = vshrl.u32 %v11016_v61, 16  ;;  %v5956_v16 = vshll.u32 %v11016_v61, 16  ;;  %v16218_v22 = vld [vmem:[#allocation2 + $0x10] sm:$0xf] }
 0x565   :  { %12795 = vmatpush3.bf16.msra.mxu1 %v13459_v20  ;;  %12830 = vmatprep.subr.bf16.mxu0 %v17378_v15  ;;  %v5693_v2 = vor.u32 %v5691_v46, %v16181_v38  ;;  %v5695_v40 = vrot.slane %v16181_v38, 4  ;;  %v5963_v58 = vshrl.u32 %v11017_v42, 16  ;;  %v5966_v6 = vshll.u32 %v11017_v42, 16 }
 0x566   :  { %v16206_v36 = vor.u32 %v5257_v59, %v5254_v19  ;;  %12796 = vmatprep.subr.bf16.mxu1 %v17378_v15  ;;  %v5261_v1 = vshrl.u32 %v10930_v31, 16  ;;  %v5264_v27 = vshll.u32 %v10930_v31, 16  ;;  %v5973_v48 = vshrl.u32 %v11018_v33, 16  ;;  %v16241_v59 = vld [vmem:[#allocation2 + $0xc] sm:$0xf] }
 0x567   :  { %v4918_v3 = vsel %vm1600_vm15, %v16118_v55, %v16192_v45  ;;  %v4922_v56 = vrot.slane %v4920_v9, 1  ;;  %v4925_v47 = vrot.slane %v4923_v12, 2  ;;  %v5976_v29 = vshll.u32 %v11018_v33, 16  ;;  %v5596_v55 = vld [vmem:[#allocation2 + $0x4] sm:$0xf] }
 0x568   :  { %12741 = vmatmul.mubr.bf16.gmra.mxu1 %v4918_v3  ;;  %12831 = vmatpush3.bf16.msra.mxu0 %v13460_v26  ;;  %v5946_v52 = vrot.slane %v5944_v11, 5  ;;  %v5949_v24 = vrot.slane %v5947_v54, 6  ;;  %v5955_v23 = vrot.slane %v5953_v35, 5  ;;  %v5958_v4 = vrot.slane %v5956_v16, 6  ;;  %v16246_v9 = vld [vmem:[%s15400_s1 + $0x100] sm:$0xf] }
 0x569   :  { %12744 = vmatprep.mubr.msk.bf16.mxu1 %vm13733_vm0, %v17378_v15  ;;  %12797 = vmatpush3.bf16.msra.mxu1 %v13461_v43  ;;  %v16222_v20 = vsel %vm14075_vm6, %v5677_v62, %v5684_v17  ;;  %v16226_v13 = vsel %vm14075_vm6, %v5686_v18, %v5693_v2  ;;  %v5965_v38 = vrot.slane %v5963_v58, 5  ;;  %v5968_v46 = vrot.slane %v5966_v6, 6  ;;  %v16236_v18 = vld [vmem:[%s15400_s1 + $0xfc] sm:$0xf]  ;;  %v11092_v17 = vld [vmem:[%s15400_s1 + $0x124] sm:$0xf] }
 0x56a   :  { %v5259_v51 = vsel %vm1945_vm1, %v16141_v8, %v16206_v36  ;;  %v5263_v61 = vrot.slane %v5261_v1, 3  ;;  %v5266_v30 = vrot.slane %v5264_v27, 4  ;;  %12832 = vmatprep.subr.bf16.mxu0 %v17378_v15  ;;  %12798 = vmatprep.subr.bf16.mxu1 %v17378_v15  ;;  %v5707_v62 = vmul.bf16 %v16016_v5, %v16214_v63  ;;  %v13464_v5 = vld [vmem:[%s15363_s27 + $0x150] sm:$0xff]   ;;  %v13465_v54 = vld [vmem:[%s15363_s27 + $0x108] sm:$0xff]  }
 0x56b   :  { %12777 = vmatmul.mubr.bf16.gmra.mxu0 %v5259_v51  ;;  %v16239_v19 = vor.u32 %v4925_v47, %v4922_v56  ;;  %v16243_v8 = vmul.bf16 %v5695_v40, %v5605_v28  ;;  %v5975_v31 = vrot.slane %v5973_v48, 5  ;;  %v5978_v42 = vrot.slane %v5976_v29, 6  ;;  %v10940_v12 = vld [vmem:[%s15400_s1 + $0x94] sm:$0xf]  ;;  %v11093_v1 = vld [vmem:[%s15400_s1 + $0x128] sm:$0xf] }
 0x56c   :  { %12780 = vmatprep.mubr.msk.bf16.mxu0 %vm13733_vm0, %v17378_v15  ;;  %12833 = vmatpush3.bf16.msra.mxu0 %v13462_v32  ;;  %v5706_v33 = vmul.bf16 %v15939_v25, %v5596_v55  ;;  %v5709_v26 = vmul.bf16 %v16166_v39, %v16218_v22  ;;  %v16255_v11 = vor.u32 %v5958_v4, %v5955_v23  ;;  %v6292_v43 = vrot.slane %v16236_v18, 5  ;;  %v10939_v39 = vld [vmem:[%s15400_s1 + $0x90] sm:$0xf]  ;;  %v11094_v56 = vld [vmem:[%s15400_s1 + $0x12c] sm:$0xf] }
 0x56d   :  { %12799 = vmatpush3.bf16.msra.mxu1 %v13463_v34  ;;  %12834 = vmatprep.subr.bf16.mxu0 %v17378_v15  ;;  %v16259_v35 = vor.u32 %v5949_v24, %v5946_v52  ;;  %v16261_v16 = vor.u32 %v5968_v46, %v5965_v38  ;;  %v6544_v2 = vshll.u32 %v11092_v17, 16  ;;  %v16264_v25 = vor.u32 %v5266_v30, %v5263_v61  ;;  %v10941_v34 = vld [vmem:[%s15400_s1 + $0x98] sm:$0xf]  ;;  %v10942_v23 = vld [vmem:[%s15400_s1 + $0x9c] sm:$0xf] }
 0x56e   :  { %12800 = vmatprep.subr.bf16.mxu1 %v17378_v15  ;;  %v5708_v40 = vmul.bf16 %v16060_v10, %v16241_v59  ;;  %v16270_v58 = vcombine.low %v5706_v33, %v5707_v62  ;;  %v6294_v6 = vrot.slane %v16246_v9, 5  ;;  %v4927_v27 = vsel %vm1600_vm15, %v16192_v45, %v16239_v19  ;;  %v13466_v10 = vld [vmem:[%s15363_s27 + $0x148] sm:$0xff]   ;;  %v13729_v45 = vld [vmem:[#allocation2 + $0x4] sm:$0xf]  ;;  %v11095_v62 = vld [vmem:[%s15400_s1 + $0x130] sm:$0xf] }
 0x56f   :  { %v5414_v32 = vmul.bf16 %v10940_v12, %v15713_v37  ;;  %v5951_v48 = vrot.slane %v16259_v35, 4  ;;  %v16279_v3 = vor.u32 %v5978_v42, %v5975_v31  ;;  %v5961_v29 = vrot.slane %v16255_v11, 4  ;;  %v13467_v37 = vld [vmem:[%s15363_s27 + $0x100] sm:$0xff]  }
 0x570   :  { %12745 = vmatmul.mubr.bf16.gmra.mxu1 %v4927_v27  ;;  %12835 = vmatpush3.bf16.msra.mxu0 %v13464_v5  ;;  %v16283_v47 = vcombine.low %v5708_v40, %v5709_v26  ;;  %v16287_v28 = vrot.slane %v6544_v2, 5  ;;  %v6548_v52 = vshrl.u32 %v11092_v17, 16  ;;  %v5413_v24 = vmul.bf16 %v13729_v45, %v10939_v39  ;;  %v13468_v17 = vld [vmem:[%s15363_s27 + $0x140] sm:$0xff]   ;;  %v16315_v2 = vld [vmem:[#allocation2 + $0x18] sm:$0xf] }
 0x571   :  { %12748 = vmatprep.mubr.msk.bf16.mxu1 %vm13733_vm0, %v17378_v15  ;;  %12801 = vmatpush3.bf16.msra.mxu1 %v13465_v54  ;;  %v5971_v4 = vrot.slane %v16261_v16, 4  ;;  %v6554_v55 = vshll.u32 %v11093_v1, 16  ;;  %v6558_v38 = vshrl.u32 %v11093_v1, 16  ;;  %v5268_v46 = vsel %vm1945_vm1, %v16206_v36, %v16264_v25  ;;  %v16313_v54 = vld [vmem:[#allocation2 + $0x14] sm:$0xf] }
 0x572   :  { %12836 = vmatprep.subr.bf16.mxu0 %v17378_v15  ;;  %12802 = vmatprep.subr.bf16.mxu1 %v17378_v15  ;;  %v5761_v51 = vshll.u32 %v16270_v58, 16  ;;  %v6550_v61 = vrot.slane %v6548_v52, 4  ;;  %v6564_v30 = vshll.u32 %v11094_v56, 16  ;;  %v16302_v31 = vcombine.low %v5413_v24, %v5414_v32  ;;  %v11096_v27 = vld [vmem:[%s15400_s1 + $0x134] sm:$0xf] }
 0x573   :  { %12781 = vmatmul.mubr.bf16.gmra.mxu0 %v5268_v46  ;;  %v16306_v42 = vrot.slane %v6292_v43, 4  ;;  %v6556_v5 = vrot.slane %v6554_v55, 5  ;;  %v6560_v36 = vrot.slane %v6558_v38, 4  ;;  %v5759_v12 = vshrl.u32 %v16270_v58, 16 }
 0x574   :  { %12784 = vmatprep.mubr.msk.bf16.mxu0 %vm13733_vm0, %v17378_v15  ;;  %12837 = vmatpush3.bf16.msra.mxu0 %v13466_v10  ;;  %v5766_v33 = vshll.u32 %v16283_v47, 16  ;;  %v5415_v26 = vmul.bf16 %v10941_v34, %v15715_v60  ;;  %v6551_v39 = vor.u32 %v6550_v61, %v16287_v28  ;;  %v5416_v40 = vmul.bf16 %v10942_v23, %v15762_v14 }
 0x575   :  { %12803 = vmatpush3.bf16.msra.mxu1 %v13467_v37  ;;  %12838 = vmatprep.subr.bf16.mxu0 %v17378_v15  ;;  %v6561_v1 = vor.u32 %v6560_v36, %v6556_v5  ;;  %v6568_v32 = vshrl.u32 %v11094_v56, 16  ;;  %v6574_v10 = vshll.u32 %v11095_v62, 16  ;;  %v5763_v58 = vrot.slane %v5761_v51, 1  ;;  %v11097_v51 = vld [vmem:[%s15400_s1 + $0x138] sm:$0xf] }
 0x576   :  { %12860 = vmatprep.subr.bf16.mxu1 %v17378_v15  ;;  %v6552_v52 = vrot.slane %v6551_v39, 4  ;;  %v6566_v60 = vrot.slane %v6564_v30, 5  ;;  %v6578_v34 = vshrl.u32 %v11095_v62, 16  ;;  %v5710_v45 = vmul.bf16 %v16170_v41, %v16313_v54 }
 0x577   :  { %v5711_v37 = vmul.bf16 %v16178_v49, %v16315_v2  ;;  %v6562_v24 = vrot.slane %v6561_v1, 4  ;;  %v6570_v55 = vrot.slane %v6568_v32, 4  ;;  %v6576_v56 = vrot.slane %v6574_v10, 5 }
 0x578   :  { %12749 = vmatmul.mubr.bf16.gmra.mxu1 %v16239_v19  ;;  %12839 = vmatpush3.bf16.msra.mxu0 %v13468_v17  ;;  %v6557_v14 = vsel %vm14236_vm14, %v6552_v52, %v6556_v5  ;;  %v6580_v23 = vrot.slane %v6578_v34, 4  ;;  %v6584_v38 = vshll.u32 %v11096_v27, 16  ;;  %v16331_v41 = vrot.slane %v5766_v33, 1  ;;  %v11098_v5 = vld [vmem:[%s15400_s1 + $0x13c] sm:$0xf] }
 0x579   :  { %12804 = vmatprep.mubr.msk.bf16.mxu1 %vm13733_vm0, %v17378_v15  ;;  %v16333_v46 = vcombine.low %v5415_v26, %v5416_v40  ;;  %v5770_v49 = vshrl.u32 %v16283_v47, 16  ;;  %12896 = vmatprep.subr.bf16.mxu0 %v17378_v15  ;;  %v6567_v19 = vsel %vm14236_vm14, %v6562_v24, %v6566_v60  ;;  %v6635_v61 = vmul.bf16 %v6557_v14, %v16241_v59  ;;  %v16351_v34 = vld [vmem:[#allocation2 + $0x20] sm:$0xf] }
 0x57a   :  { %v6636_v30 = vmul.bf16 %v6567_v19, %v16218_v22  ;;  %v6571_v62 = vor.u32 %v6570_v55, %v6566_v60  ;;  %v6581_v17 = vor.u32 %v6580_v23, %v6576_v56  ;;  %v5764_v36 = vor.u32 %v5763_v58, %v5759_v12  ;;  %v13469_v60 = vld [vmem:[%s15363_s27 + $0x1b8] sm:$0xff]   ;;  %v11099_v55 = vld [vmem:[%s15400_s1 + $0x140] sm:$0xf] }
 0x57b   :  { %12785 = vmatmul.mubr.bf16.gmra.mxu0 %v16264_v25  ;;  %v16344_v33 = vcombine.low %v5710_v45, %v5711_v37  ;;  %v6586_v26 = vrot.slane %v6584_v38, 5  ;;  %v6588_v39 = vshrl.u32 %v11096_v27, 16  ;;  %v6594_v10 = vshll.u32 %v11097_v51, 16 }
 0x57c   :  { %12840 = vmatprep.mubr.msk.bf16.mxu0 %vm13733_vm0, %v17378_v15  ;;  %v11117_v40 = vcombine.low %v6635_v61, %v6636_v30  ;;  %v6572_v1 = vrot.slane %v6571_v62, 4  ;;  %v6582_v32 = vrot.slane %v6581_v17, 4  ;;  %v5769_v52 = vsel %vm1270_vm13, %v5764_v36, %v16331_v41  ;;  %v13470_v61 = vld [vmem:[%s15363_s27 + $0x1f8] sm:$0xff]   ;;  %v13471_v17 = vld [vmem:[%s15363_s27 + $0x1b0] sm:$0xff]  }
 0x57d   :  { %v6590_v25 = vrot.slane %v6588_v39, 4  ;;  %v6598_v12 = vshrl.u32 %v11097_v51, 16  ;;  %v6604_v58 = vshll.u32 %v11098_v5, 16  ;;  %v6596_v19 = vrot.slane %v6594_v10, 5  ;;  %v16368_v36 = vld [vmem:[#allocation2 + $0x1c] sm:$0xf] }
 0x57e   :  { %v6694_v45 = vshrl.u32 %v11117_v40, 16  ;;  %v6697_v27 = vshll.u32 %v11117_v40, 16  ;;  %v6577_v37 = vsel %vm14236_vm14, %v6572_v1, %v6576_v56  ;;  %v6587_v24 = vsel %vm14236_vm14, %v6582_v32, %v6586_v26 }
 0x57f   :  { %v6637_v14 = vmul.bf16 %v6577_v37, %v16313_v54  ;;  %v6638_v23 = vmul.bf16 %v6587_v24, %v16315_v2  ;;  %v6591_v38 = vor.u32 %v6590_v25, %v6586_v26  ;;  %v5774_v51 = vshll.u32 %v16344_v33, 16  ;;  %v13472_v37 = vld [vmem:[%s15363_s27 + $0x1f0] sm:$0xff]  }
 0x580   :  { %12805 = vmatmul.mubr.bf16.vlgmr.msra.gmra.mxu1 %v16302_v31  ;;  %v5713_v30 = vmul.bf16 %v16222_v20, %v16351_v34  ;;  %v6600_v62 = vrot.slane %v6598_v12, 4  ;;  %v6606_v56 = vrot.slane %v6604_v58, 5  ;;  %v6608_v40 = vshrl.u32 %v11098_v5, 16 }
 0x581   :  { %12808 = vmatprep.mubr.msk.bf16.mxu1 %vm13733_vm0, %v17378_v15  ;;  %12861 = vmatpush3.bf16.msra.mxu1 %v13469_v60  ;;  %v11118_v39 = vcombine.low %v6637_v14, %v6638_v23  ;;  %v6592_v26 = vrot.slane %v6591_v38, 4  ;;  %v6614_v31 = vshll.u32 %v11099_v55, 16  ;;  %v6696_v1 = vrot.slane %v6694_v45, 3 }
 0x582   :  { %12862 = vmatprep.subr.bf16.mxu1 %v17378_v15  ;;  %v6699_v32 = vrot.slane %v6697_v27, 4  ;;  %v6601_v10 = vor.u32 %v6600_v62, %v6596_v19  ;;  %v6618_v20 = vshrl.u32 %v11099_v55, 16  ;;  %v6610_v58 = vrot.slane %v6608_v40, 4  ;;  %v11019_v55 = vld [vmem:[%s15400_s1 + $0xe8] sm:$0xf] }
 0x583   :  { %12841 = vmatmul.mubr.bf16.vlgmr.msra.gmra.mxu0 %v5769_v52  ;;  %v6703_v25 = vshrl.u32 %v11118_v39, 16  ;;  %v6706_v12 = vshll.u32 %v11118_v39, 16  ;;  %v6597_v60 = vsel %vm14236_vm14, %v6592_v26, %v6596_v19  ;;  %v16375_v5 = vrot.slane %v5774_v51, 1  ;;  %v13473_v52 = vld [vmem:[%s15363_s27 + $0x1a8] sm:$0xff]   ;;  %v16394_v39 = vld [vmem:[%s15400_s1 + $0x104] sm:$0xf] }
 0x584   :  { %12844 = vmatprep.mubr.msk.bf16.mxu0 %vm13733_vm0, %v17378_v15  ;;  %12897 = vmatpush3.bf16.msra.mxu0 %v13470_v61  ;;  %v5712_v45 = vmul.bf16 %v16196_v50, %v16368_v36  ;;  %v6602_v27 = vrot.slane %v6601_v10, 4  ;;  %v6616_v24 = vrot.slane %v6614_v31, 5  ;;  %v6611_v38 = vor.u32 %v6610_v58, %v6606_v56 }
 0x585   :  { %12863 = vmatpush3.bf16.msra.mxu1 %v13471_v17  ;;  %12898 = vmatprep.subr.bf16.mxu0 %v17378_v15  ;;  %v6705_v14 = vrot.slane %v6703_v25, 3  ;;  %v6708_v23 = vrot.slane %v6706_v12, 4  ;;  %v6620_v19 = vrot.slane %v6618_v20, 4  ;;  %v16386_v61 = vor.u32 %v6699_v32, %v6696_v1  ;;  %v16391_v17 = vld [vmem:[#allocation2 + $0x24] sm:$0xf]  ;;  %v13474_v1 = vld [vmem:[%s15363_s27 + $0x1e8] sm:$0xff]  }
 0x586   :  { %12864 = vmatprep.subr.bf16.mxu1 %v17378_v15  ;;  %v16384_v51 = vcombine.low %v5712_v45, %v5713_v30  ;;  %v6607_v50 = vsel %vm14236_vm14, %v6602_v27, %v6606_v56  ;;  %v6639_v62 = vmul.bf16 %v6597_v60, %v16368_v36  ;;  %v6612_v31 = vrot.slane %v6611_v38, 4  ;;  %v6523_v25 = vld [vmem:[#allocation2 + $0x28] sm:$0xf]  ;;  %v13475_v12 = vld [vmem:[%s15363_s27 + $0x1a0] sm:$0xff]   ;;  %v11020_v60 = vld [vmem:[%s15400_s1 + $0xec] sm:$0xf] }
 0x587   :  { %v16396_v26 = vor.u32 %v6708_v23, %v6705_v14  ;;  %v6640_v40 = vmul.bf16 %v6607_v50, %v16351_v34  ;;  %v6621_v30 = vor.u32 %v6620_v19, %v6616_v24  ;;  %v5772_v56 = vor.u32 %v5770_v49, %v16331_v41  ;;  %v13476_v38 = vld [vmem:[%s15363_s27 + $0x1e0] sm:$0xff]  }
 0x588   :  { %12809 = vmatmul.mubr.bf16.gmra.mxu1 %v16333_v46  ;;  %12899 = vmatpush3.bf16.msra.mxu0 %v13472_v37  ;;  %v16406_v32 = vrot.slane %v6294_v6, 4  ;;  %v5983_v10 = vshrl.u32 %v11019_v55, 16  ;;  %v5986_v20 = vshll.u32 %v11019_v55, 16  ;;  %v6617_v46 = vsel %vm14236_vm14, %v6612_v31, %v6616_v24 }
 0x589   :  { %12812 = vmatprep.mubr.msk.bf16.mxu1 %vm13733_vm0, %v17378_v15  ;;  %12865 = vmatpush3.bf16.msra.mxu1 %v13473_v52  ;;  %v16415_v47 = vsel %vm1945_vm1, %v16386_v61, %v16396_v26  ;;  %v11119_v41 = vcombine.low %v6639_v62, %v6640_v40  ;;  %v6622_v49 = vrot.slane %v6621_v30, 4  ;;  %v5777_v58 = vsel %vm1270_vm13, %v5772_v56, %v16375_v5  ;;  %v13477_v40 = vld [vmem:[%s15363_s27 + $0x198] sm:$0xff]  }
 0x58a   :  { %v5782_v37 = vshll.u32 %v16384_v51, 16  ;;  %12900 = vmatprep.subr.bf16.mxu0 %v17378_v15  ;;  %12866 = vmatprep.subr.bf16.mxu1 %v17378_v15  ;;  %v16429_v27 = vsel %vm14818_vm8, %v5951_v48, %v16255_v11  ;;  %v6641_v24 = vmul.bf16 %v6617_v46, %v16391_v17  ;;  %v6297_v52 = vrot.slane %v16394_v39, 5  ;;  %v11021_v11 = vld [vmem:[%s15400_s1 + $0xf0] sm:$0xf] }
 0x58b   :  { %12845 = vmatmul.mubr.bf16.gmra.mxu0 %v5777_v58  ;;  %v6712_v55 = vshrl.u32 %v11119_v41, 16  ;;  %v6715_v14 = vshll.u32 %v11119_v41, 16  ;;  %v6642_v23 = vmul.bf16 %v6622_v49, %v6523_v25  ;;  %v5714_v19 = vmul.bf16 %v16226_v13, %v16391_v17  ;;  %v13478_v49 = vld [vmem:[%s15363_s27 + $0x1d8] sm:$0xff]  }
 0x58c   :  { %12848 = vmatprep.mubr.msk.bf16.mxu0 %vm13733_vm0, %v17378_v15  ;;  %12901 = vmatpush3.bf16.msra.mxu0 %v13474_v1  ;;  %v5985_v48 = vrot.slane %v5983_v10, 5  ;;  %v5993_v50 = vshrl.u32 %v11020_v60, 16  ;;  %v5996_v62 = vshll.u32 %v11020_v60, 16  ;;  %v5988_v31 = vrot.slane %v5986_v20, 6  ;;  %v16453_v20 = vld [vmem:[%s15400_s1 + $0x108] sm:$0xf] }
 0x58d   :  { %12867 = vmatpush3.bf16.msra.mxu1 %v13475_v12  ;;  %12902 = vmatprep.subr.bf16.mxu0 %v17378_v15  ;;  %v6714_v30 = vrot.slane %v6712_v55, 3  ;;  %v6717_v56 = vrot.slane %v6715_v14, 4  ;;  %v11120_v25 = vcombine.low %v6641_v24, %v6642_v23  ;;  %v5778_v1 = vshrl.u32 %v16344_v33, 16  ;;  %v11022_v55 = vld [vmem:[%s15400_s1 + $0xf4] sm:$0xf] }
 0x58e   :  { %v5784_v41 = vrot.slane %v5782_v37, 1  ;;  %12868 = vmatprep.subr.bf16.mxu1 %v17378_v15  ;;  %v5970_v13 = vsel %vm14818_vm8, %v5961_v29, %v16261_v16  ;;  %v5980_v10 = vsel %vm14818_vm8, %v5971_v4, %v16279_v3  ;;  %v16460_v12 = vsel %vm14844_vm10, %v16306_v42, %v6294_v6  ;;  %v13479_v6 = vld [vmem:[%s15363_s27 + $0x190] sm:$0xff]  }
 0x58f   :  { %v6718_v60 = vor.u32 %v6717_v56, %v6714_v30  ;;  %v6721_v46 = vshrl.u32 %v11120_v25, 16  ;;  %v6724_v29 = vshll.u32 %v11120_v25, 16  ;;  %v5780_v16 = vor.u32 %v5778_v1, %v16375_v5  ;;  %v13481_v25 = vld [vmem:[%s15363_s27 + $0x188] sm:$0xff]  }
 0x590   :  { %12813 = vmatmul.mubr.bf16.gmra.mxu1 %v16079_v57  ;;  %12903 = vmatpush3.bf16.msra.mxu0 %v13476_v38  ;;  %v16466_v4 = vcombine.low %v5714_v19, %v16243_v8  ;;  %v5995_v9 = vrot.slane %v5993_v50, 5  ;;  %v5998_v58 = vrot.slane %v5996_v62, 6  ;;  %v5989_v42 = vor.u32 %v5988_v31, %v5985_v48  ;;  %v5931_v31 = vld [vmem:[#allocation2 + $0x4] sm:$0xc] }
 0x591   :  { %12816 = vmatprep.mubr.msk.bf16.mxu1 %vm13733_vm0, %v17378_v15  ;;  %12869 = vmatpush3.bf16.msra.mxu1 %v13477_v40  ;;  %v16474_v37 = vsel %vm1945_vm1, %v16396_v26, %v6718_v60  ;;  %v6723_v57 = vrot.slane %v6721_v46, 3  ;;  %v6726_v5 = vrot.slane %v6724_v29, 4  ;;  %v5785_v24 = vsel %vm1270_vm13, %v5780_v16, %v5784_v41  ;;  %v13480_v40 = vld [vmem:[%s15363_s27 + $0x1d0] sm:$0xff]  }
 0x592   :  { %12904 = vmatprep.subr.bf16.mxu0 %v17378_v15  ;;  %12870 = vmatprep.subr.bf16.mxu1 %v17378_v15  ;;  %v6300_v8 = vrot.slane %v16453_v20, 5  ;;  %v6003_v14 = vshrl.u32 %v11021_v11, 16  ;;  %v6006_v23 = vshll.u32 %v11021_v11, 16  ;;  %v6045_v38 = vmul.bf16 %v5980_v10, %v16218_v22  ;;  %v10947_v46 = vld [vmem:[%s15400_s1 + $0xb0] sm:$0xf] }
 0x593   :  { %12849 = vmatmul.mubr.bf16.gmra.mxu0 %v5785_v24  ;;  %v6299_v26 = vrot.slane %v6297_v52, 4  ;;  %v5991_v19 = vrot.slane %v5989_v42, 4  ;;  %v16484_v48 = vor.u32 %v6726_v5, %v6723_v57  ;;  %v5786_v50 = vshrl.u32 %v16384_v51, 16  ;;  %v16500_v51 = vld [vmem:[%s15400_s1 + $0x10c] sm:$0xf] }
 0x594   :  { %12852 = vmatprep.mubr.msk.bf16.mxu0 %vm13733_vm0, %v17378_v15  ;;  %v5790_v62 = vshll.u32 %v16466_v4, 16  ;;  %12905 = vmatpush3.bf16.msra.mxu0 %v13478_v49  ;;  %v5981_v30 = vrot.slane %v16279_v3, 4  ;;  %v16492_v56 = vor.u32 %v5998_v58, %v5995_v9  ;;  %v6043_v1 = vmul.bf16 %v16429_v27, %v16214_v63  ;;  %v13482_v58 = vld [vmem:[%s15363_s27 + $0x1c8] sm:$0xff]   ;;  %v11023_v57 = vld [vmem:[%s15400_s1 + $0xf8] sm:$0xf] }
 0x595   :  { %12871 = vmatpush3.bf16.msra.mxu1 %v13479_v6  ;;  %12906 = vmatprep.subr.bf16.mxu0 %v17378_v15  ;;  %v6044_v10 = vmul.bf16 %v5970_v13, %v16241_v59  ;;  %v6013_v20 = vshrl.u32 %v11022_v55, 16  ;;  %v16504_v11 = vsel %vm1945_vm1, %v6718_v60, %v16484_v48  ;;  %v5788_v3 = vor.u32 %v5786_v50, %v5784_v41 }
 0x596   :  { %12872 = vmatprep.subr.bf16.mxu1 %v17378_v15  ;;  %v6005_v29 = vrot.slane %v6003_v14, 5  ;;  %v6008_v16 = vrot.slane %v6006_v23, 6  ;;  %v6016_v49 = vshll.u32 %v11022_v55, 16  ;;  %v6042_v27 = vmul.bf16 %v16259_v35, %v5931_v31 }
 0x597   :  { %v11041_v13 = vcombine.low %v6044_v10, %v6045_v38  ;;  %v16514_v9 = vsel %vm14844_vm10, %v16406_v32, %v6297_v52  ;;  %v6000_v41 = vsel %vm14818_vm8, %v5991_v19, %v16492_v56  ;;  %v5792_v60 = vrot.slane %v5790_v62, 1  ;;  %v13483_v52 = vld [vmem:[%s15363_s27 + $0x180] sm:$0xff]  }
 0x598   :  { %12817 = vmatmul.mubr.bf16.gmra.mxu1 %v16102_v44  ;;  %12907 = vmatpush3.bf16.msra.mxu0 %v13480_v40  ;;  %v6301_v35 = vsel %vm14844_vm10, %v6299_v26, %v6300_v8  ;;  %v16523_v6 = vrot.slane %v6300_v8, 4  ;;  %v6303_v39 = vrot.slane %v16500_v51, 5  ;;  %v5421_v32 = vmul.bf16 %v10947_v46, %v16131_v21  ;;  %v16545_v10 = vld [vmem:[#allocation2 + $0x4] sm:$0x8] }
 0x599   :  { %12820 = vmatprep.mubr.msk.bf16.mxu1 %vm13733_vm0, %v17378_v15  ;;  %12873 = vmatpush3.bf16.msra.mxu1 %v13481_v25  ;;  %v11040_v5 = vcombine.low %v6042_v27, %v6043_v1  ;;  %v5990_v44 = vsel %vm14818_vm8, %v5981_v30, %v5989_v42  ;;  %v6015_v24 = vrot.slane %v6013_v20, 5  ;;  %v5793_v55 = vsel %vm1270_vm13, %v5788_v3, %v5792_v60  ;;  %v13484_v42 = vld [vmem:[%s15363_s27 + $0x1c0] sm:$0xff]   ;;  %v11058_v3 = vld [vmem:[%s15400_s1 + $0x110] sm:$0xf] }
 0x59a   :  { %12908 = vmatprep.subr.bf16.mxu0 %v17378_v15  ;;  %12874 = vmatprep.subr.bf16.mxu1 %v17378_v15  ;;  %v6047_v8 = vmul.bf16 %v6000_v41, %v16315_v2  ;;  %v6009_v14 = vor.u32 %v6008_v16, %v6005_v29  ;;  %v6018_v23 = vrot.slane %v6016_v49, 6  ;;  %v6103_v21 = vshrl.u32 %v11041_v13, 16 }
 0x59b   :  { %12853 = vmatmul.mubr.bf16.gmra.mxu0 %v5793_v55  ;;  %v6106_v38 = vshll.u32 %v11041_v13, 16  ;;  %v6023_v26 = vshrl.u32 %v11023_v57, 16  ;;  %v6026_v19 = vshll.u32 %v11023_v57, 16  ;;  %v6046_v50 = vmul.bf16 %v5990_v44, %v16313_v54 }
 0x59c   :  { %12856 = vmatprep.mubr.msk.bf16.mxu0 %vm13733_vm0, %v17378_v15  ;;  %12909 = vmatpush3.bf16.msra.mxu0 %v13482_v58  ;;  %v6305_v62 = vrot.slane %v6303_v39, 4  ;;  %v6001_v40 = vrot.slane %v16492_v56, 4  ;;  %v6011_v31 = vrot.slane %v6009_v14, 4  ;;  %v10968_v30 = vcombine.low %v5421_v32, %v5421_v32 }
 0x59d   :  { %12875 = vmatpush3.bf16.msra.mxu1 %v13483_v52  ;;  %12910 = vmatprep.subr.bf16.mxu0 %v17378_v15  ;;  %v6095_v25 = vshrl.u32 %v11040_v5, 16  ;;  %v6098_v1 = vshll.u32 %v11040_v5, 16  ;;  %v6331_v20 = vmul.bf16 %v6301_v35, %v16218_v22  ;;  %v5794_v46 = vshrl.u32 %v16466_v4, 16  ;;  %v11059_v52 = vld [vmem:[%s15400_s1 + $0x114] sm:$0xf] }
 0x59e   :  { %v6330_v29 = vmul.bf16 %v16514_v9, %v16241_v59  ;;  %v11042_v16 = vcombine.low %v6046_v50, %v6047_v8  ;;  %12932 = vmatprep.subr.bf16.mxu1 %v17378_v15  ;;  %v6019_v56 = vor.u32 %v6018_v23, %v6015_v24  ;;  %v6105_v49 = vrot.slane %v6103_v21, 2 }
 0x59f   :  { %v6108_v27 = vrot.slane %v6106_v38, 3  ;;  %v6025_v13 = vrot.slane %v6023_v26, 5  ;;  %v6028_v41 = vrot.slane %v6026_v19, 6  ;;  %v6328_v22 = vmul.bf16 %v6292_v43, %v16545_v10  ;;  %v13485_v26 = vld [vmem:[%s15363_s27 + $0x238] sm:$0xff]  }
 0x5a0   :  { %12821 = vmatmul.mubr.bf16.gmra.mxu1 %v10968_v30  ;;  %12911 = vmatpush3.bf16.msra.mxu0 %v13484_v42  ;;  %v6329_v4 = vmul.bf16 %v16460_v12, %v16214_v63  ;;  %v6306_v58 = vrot.slane %v11058_v3, 5  ;;  %v6020_v59 = vsel %vm14818_vm8, %v6011_v31, %v6019_v56  ;;  %v5796_v9 = vor.u32 %v5794_v46, %v5792_v60  ;;  %v11060_v42 = vld [vmem:[%s15400_s1 + $0x118] sm:$0xf]  ;;  %v13486_v46 = vld [vmem:[%s15363_s27 + $0x230] sm:$0xff]  }
 0x5a1   :  { %12876 = vmatprep.mubr.msk.bf16.mxu1 %vm13733_vm0, %v17378_v15  ;;  %v6097_v35 = vrot.slane %v6095_v25, 2  ;;  %v6100_v57 = vrot.slane %v6098_v1, 3  ;;  %v16562_v32 = vcombine.low %v6330_v29, %v6331_v20  ;;  %12968 = vmatprep.subr.mxu0 %v17378_v15  ;;  %v6112_v18 = vshrl.u32 %v11042_v16, 16 }
 0x5a2   :  { %v6115_v43 = vshll.u32 %v11042_v16, 16  ;;  %v6307_v12 = vsel %vm14844_vm10, %v6305_v62, %v6306_v58  ;;  %v6010_v60 = vsel %vm14818_vm8, %v6001_v40, %v6009_v14  ;;  %v6109_v5 = vor.u32 %v6108_v27, %v6105_v49 }
 0x5a3   :  { %12857 = vmatmul.mubr.bf16.gmra.mxu0 %v5796_v9  ;;  %v6049_v44 = vmul.bf16 %v6020_v59, %v16351_v34  ;;  %v6029_v24 = vor.u32 %v6028_v41, %v6025_v13  ;;  %v11078_v55 = vcombine.low %v6328_v22, %v6329_v4  ;;  %v6304_v8 = vsel %vm14844_vm10, %v16523_v6, %v6303_v39  ;;  %v11061_v59 = vld [vmem:[%s15400_s1 + $0x11c] sm:$0xf] }
 0x5a4   :  { %12912 = vmatprep.mubr.msk.bf16.mxu0 %vm13733_vm0, %v17378_v15  ;;  %v6309_v23 = vrot.slane %v11059_v52, 5  ;;  %v6021_v21 = vrot.slane %v6019_v56, 4  ;;  %v6101_v38 = vor.u32 %v6100_v57, %v6097_v35  ;;  %v6333_v14 = vmul.bf16 %v6307_v12, %v16315_v2  ;;  %v16585_v2 = vld [vmem:[#allocation2 + $0x28] sm:$0x7] }
 0x5a5   :  { %v6048_v19 = vmul.bf16 %v6010_v60, %v16368_v36  ;;  %v6381_v50 = vrot.slane %v16562_v32, 3  ;;  %v6114_v62 = vrot.slane %v6112_v18, 2  ;;  %v6117_v40 = vrot.slane %v6115_v43, 3  ;;  %v13487_v35 = vld [vmem:[%s15363_s27 + $0x228] sm:$0xff]  }
 0x5a6   :  { %v6311_v51 = vrot.slane %v6309_v23, 4  ;;  %v6110_v31 = vsel %vm2818_vm2, %v6101_v38, %v6109_v5  ;;  %v6332_v6 = vmul.bf16 %v6304_v8, %v16313_v54  ;;  %v6031_v30 = vrot.slane %v6029_v24, 4  ;;  %v11091_v54 = vld [vmem:[%s15400_s1 + $0x120] sm:$0xf]  ;;  %s10402_s1 = sld [smem:[%s17339_s0 + %s13761_s28]]  }
 0x5a7   :  { %v11043_v39 = vcombine.low %v6048_v19, %v6049_v44  ;;  %v6380_v25 = vrot.slane %v11078_v55, 3  ;;  %v6312_v1 = vrot.slane %v11060_v42, 5  ;;  %v6030_v20 = vsel %vm14818_vm8, %v6021_v21, %v6029_v24  ;;  %v13489_v42 = vld [vmem:[%s15363_s27 + $0x218] sm:$0xff]  }
 0x5a8   :  { %12877 = vmatmul.mubr.bf16.vlgmr.msra.gmra.mxu1 %v6110_v31  ;;  %v16591_v3 = vcombine.low %v6332_v6, %v6333_v14  ;;  %v6308_v29 = vrot.slane %v6306_v58, 4  ;;  %v6118_v56 = vor.u32 %v6117_v40, %v6114_v62  ;;  %v6538_v27 = vshrl.u32 %v11091_v54, 16 }
 0x5a9   :  { %12880 = vmatprep.mubr.msk.bf16.mxu1 %vm13733_vm0, %v17378_v15  ;;  %12933 = vmatpush3.bf16.msra.mxu1 %v13485_v26  ;;  %v6382_v16 = vsel %vm3108_vm11, %v6380_v25, %v6381_v50  ;;  %v6313_v49 = vsel %vm14844_vm10, %v6311_v51, %v6312_v1  ;;  %v6121_v13 = vshrl.u32 %v11043_v39, 16  ;;  %v6124_v41 = vshll.u32 %v11043_v39, 16 }
 0x5aa   :  { %12934 = vmatprep.subr.bf16.mxu1 %v17378_v15  ;;  %v6050_v22 = vmul.bf16 %v6030_v20, %v16391_v17  ;;  %v6051_v4 = vmul.bf16 %v6031_v30, %v16585_v2  ;;  %v6535_v58 = vshll.u32 %v11091_v54, 16  ;;  %v6383_v9 = vrot.slane %v16591_v3, 3  ;;  %v13490_v30 = vld [vmem:[%s15363_s27 + $0x210] sm:$0xff]   ;;  %v13491_v20 = vld [vmem:[%s15363_s27 + $0x208] sm:$0xff]  }
 0x5ab   :  { %12913 = vmatmul.mubr.bf16.vlgmr.msra.gmra.mxu0 %v6382_v16  ;;  %v6310_v57 = vsel %vm14844_vm10, %v6308_v29, %v6309_v23  ;;  %v6335_v32 = vmul.bf16 %v6313_v49, %v16351_v34  ;;  %v6314_v52 = vrot.slane %v6312_v1, 4  ;;  %v6315_v18 = vrot.slane %v11061_v59, 5  ;;  %v13488_v23 = vld [vmem:[%s15363_s27 + $0x220] sm:$0xff]  }
 0x5ac   :  { %12916 = vmatprep.mubr.msk.bf16.mxu0 %vm13733_vm0, %v17378_v15  ;;  %v6540_v43 = vrot.slane %v6538_v27, 4  ;;  %v6119_v12 = vsel %vm2818_vm2, %v6109_v5, %v6118_v56  ;;  %v6123_v60 = vrot.slane %v6121_v13, 2  ;;  %v6126_v44 = vrot.slane %v6124_v41, 3 }
 0x5ad   :  { %12935 = vmatpush3.bf16.msra.mxu1 %v13486_v46  ;;  %v11044_v24 = vcombine.low %v6050_v22, %v6051_v4  ;;  %v6334_v55 = vmul.bf16 %v6310_v57, %v16368_v36  ;;  %v6537_v8 = vrot.slane %v6535_v58, 5  ;;  %v6384_v34 = vsel %vm3108_vm11, %v6381_v50, %v6383_v9 }
 0x5ae   :  { %12936 = vmatprep.subr.bf16.mxu1 %v17378_v15  ;;  %v6317_v38 = vrot.slane %v6315_v18, 4  ;;  %v6127_v26 = vor.u32 %v6126_v44, %v6123_v60  ;;  %v6316_v36 = vsel %vm14844_vm10, %v6314_v52, %v6315_v18  ;;  %v17431_v22 = vmov 0  }
 0x5af   :  { %v11081_v21 = vcombine.low %v6334_v55, %v6335_v32  ;;  %v6541_v5 = vor.u32 %v6540_v43, %v6537_v8  ;;  %v6130_v14 = vshrl.u32 %v11044_v24, 16  ;;  %v6133_v19 = vshll.u32 %v11044_v24, 16 }
 0x5b0   :  { %12881 = vmatmul.mubr.bf16.gmra.mxu1 %v6119_v12  ;;  %v6336_v50 = vmul.bf16 %v6316_v36, %v16391_v17  ;;  %v6337_v40 = vmul.bf16 %v6317_v38, %v16585_v2  ;;  %v6128_v31 = vsel %vm2818_vm2, %v6118_v56, %v6127_v26  ;;  %v6633_v54 = vmul.bf16 %v6537_v8, %v16545_v10 }
 0x5b1   :  { %12884 = vmatprep.mubr.msk.bf16.mxu1 %vm13733_vm0, %v17378_v15  ;;  %12937 = vmatpush3.bf16.msra.mxu1 %v13487_v35  ;;  %v6385_v62 = vrot.slane %v11081_v21, 3  ;;  %v6542_v51 = vrot.slane %v6541_v5, 4  ;;  %v6132_v6 = vrot.slane %v6130_v14, 2  ;;  %v6135_v39 = vrot.slane %v6133_v19, 3 }
 0x5b2   :  { %12938 = vmatprep.subr.bf16.mxu1 %v17378_v15  ;;  %v11082_v1 = vcombine.low %v6336_v50, %v6337_v40 }
 0x5b3   :  { %12917 = vmatmul.mubr.bf16.gmra.mxu0 %v6384_v34  ;;  %v6386_v25 = vsel %vm3108_vm11, %v6383_v9, %v6385_v62  ;;  %v6547_v17 = vsel %vm14236_vm14, %v6542_v51, %v16287_v28  ;;  %v6136_v2 = vor.u32 %v6135_v39, %v6132_v6  ;;  %v13492_v28 = vld [vmem:[%s15363_s27 + $0x200] sm:$0xff]   ;;  %s17156_s27 = sld [smem:[%s17339_s0 + %s13760_s24]]  }
 0x5b4   :  { %12920 = vmatprep.mubr.msk.bf16.mxu0 %vm13733_vm0, %v17378_v15  ;;  %v6634_v3 = vmul.bf16 %v6547_v17, %v16214_v63  ;;  %v6387_v46 = vrot.slane %v11082_v1, 3 }
 0x5b5   :  { %12939 = vmatpush3.bf16.msra.mxu1 %v13488_v23  ;;  %v6137_v29 = vsel %vm2818_vm2, %v6127_v26, %v6136_v2 }
 0x5b6   :  { %12940 = vmatprep.subr.bf16.mxu1 %v17378_v15  ;;  %v11116_v16 = vcombine.low %v6633_v54, %v6634_v3  ;;  %v6388_v56 = vsel %vm3108_vm11, %v6385_v62, %v6387_v46 }
 0x5b8   :  { %12885 = vmatmul.mubr.bf16.gmra.mxu1 %v6128_v31  ;;  %v6686_v63 = vshrl.u32 %v11116_v16, 16  ;;  %v6689_v49 = vshll.u32 %v11116_v16, 16 }
 0x5b9   :  { %12888 = vmatprep.mubr.msk.bf16.mxu1 %vm13733_vm0, %v17378_v15  ;;  %12941 = vmatpush3.bf16.msra.mxu1 %v13489_v42 }
 0x5ba   :  { %12942 = vmatprep.subr.bf16.mxu1 %v17378_v15  ;;  %v6688_v10 = vrot.slane %v6686_v63, 3  ;;  %v6691_v27 = vrot.slane %v6689_v49, 4 }
 0x5bb   :  { %12921 = vmatmul.mubr.bf16.gmra.mxu0 %v6386_v25 }
 0x5bc   :  { %12924 = vmatprep.mubr.msk.bf16.mxu0 %vm13733_vm0, %v17378_v15  ;;  %v6692_v13 = vor.u32 %v6691_v27, %v6688_v10 }
 0x5bd   :  { %12943 = vmatpush3.bf16.msra.mxu1 %v13490_v30 }
 0x5be   :  { %12944 = vmatprep.subr.bf16.mxu1 %v17378_v15  ;;  %v6701_v41 = vsel %vm1945_vm1, %v6692_v13, %v16386_v61 }
 0x5c0   :  { %12889 = vmatmul.mubr.bf16.gmra.mxu1 %v6137_v29 }
 0x5c1   :  { %12892 = vmatprep.mubr.msk.bf16.mxu1 %vm13733_vm0, %v17378_v15  ;;  %12945 = vmatpush3.bf16.msra.mxu1 %v13491_v20 }
 0x5c2   :  { %12946 = vmatprep.subr.bf16.mxu1 %v17378_v15 }
 0x5c3   :  { %12925 = vmatmul.mubr.bf16.gmra.mxu0 %v6388_v56 }
 0x5c4   :  { %12928 = vmatprep.mubr.msk.bf16.mxu0 %vm13733_vm0, %v17378_v15 }
 0x5c5   :  { %12947 = vmatpush3.bf16.msra.mxu1 %v13492_v28 }
 0x5c8   :  { %12893 = vmatmul.mubr.bf16.gmra.mxu1 %v6136_v2 }
 0x5c9   :  { %12948 = vmatprep.mubr.msk.bf16.mxu1 %vm13733_vm0, %v17378_v15 }
 0x5cb   :  { %12929 = vmatmul.mubr.bf16.gmra.mxu0 %v6387_v46 }
 0x5cc   :  { %12986 = vmatprep.mubr.msk.f32.mxu0 %vm13733_vm0, %v17378_v15 }
 0x5d0   :  { %12949 = vmatmul.mubr.bf16.vlgmr.msra.gmra.mxu1 %v6701_v41 }
 0x5d1   :  { %12952 = vmatprep.mubr.msk.bf16.mxu1 %vm13733_vm0, %v17378_v15 }
 0x5d8   :  { %12953 = vmatmul.mubr.bf16.gmra.mxu1 %v16415_v47 }
 0x5d9   :  { %12956 = vmatprep.mubr.msk.bf16.mxu1 %vm13733_vm0, %v17378_v15 }
 0x5e0   :  { %12957 = vmatmul.mubr.bf16.gmra.mxu1 %v16474_v37 }
 0x5e1   :  { %12960 = vmatprep.mubr.msk.bf16.mxu1 %vm13733_vm0, %v17378_v15 }
 0x5e8   :  { %12961 = vmatmul.mubr.bf16.gmra.mxu1 %v16504_v11 }
 0x5e9   :  { %12964 = vmatprep.mubr.msk.bf16.mxu1 %vm13733_vm0, %v17378_v15 }
 0x5ee   :  { %v4495_v61 = vpop.f32.mrf.mxu1 }
 0x5f0   :  { %12965 = vmatmul.mubr.bf16.gmra.mxu1 %v16484_v48  ;;  %v12662_v4 = vpop.f32.mrf.mxu1 }
 0x5f1   :  { %7111 = vmatprep.mubr.bf16.mxu1 %v17431_v22  ;;  %v4684_v47 = vpop.f32.mrf.mxu0 }
 0x5f2   :  { %v4685_v59 = vadd.f32 %v4684_v47, %v4495_v61  ;;  %v4498_v58 = vpop.f32.mrf.mxu1 }
 0x5f3   :  { %v12698_v9 = vpop.f32.mrf.mxu0 }
 0x5f4   :  { %v12663_v35 = vpop.f32.mrf.mxu1 }
 0x5f5   :  { %v4687_v37 = vpop.f32.mrf.mxu0 }
 0x5f6   :  { %v4688_v57 = vadd.f32 %v4687_v37, %v4498_v58  ;;  %v4503_v32 = vpop.f32.mrf.mxu1 }
 0x5f7   :  { %v12699_v52 = vpop.f32.mrf.mxu0 }
 0x5f8   :  { %v12666_v18 = vpop.f32.mrf.mxu1 }
 0x5f9   :  { %v4692_v11 = vpop.f32.mrf.mxu0 }
 0x5fa   :  { %v4693_v43 = vadd.f32 %v4692_v11, %v4503_v32  ;;  %v4506_v12 = vpop.f32.mrf.mxu1 }
 0x5fb   :  { %v12702_v60 = vpop.f32.mrf.mxu0 }
 0x5fc   :  { %v12667_v44 = vpop.f32.mrf.mxu1 }
 0x5fd   :  { %v4695_v24 = vpop.f32.mrf.mxu0 }
 0x5fe   :  { %v4696_v48 = vadd.f32 %v4695_v24, %v4506_v12  ;;  %v4511_v55 = vpop.f32.mrf.mxu1 }
 0x5ff   :  { %v12703_v8 = vpop.f32.mrf.mxu0 }
 0x600   :  { %v12670_v23 = vpop.f32.mrf.mxu1 }
 0x601   :  { %v4700_v34 = vpop.f32.mrf.mxu0 }
 0x602   :  { %v4701_v21 = vadd.f32 %v4700_v34, %v4511_v55  ;;  %v4514_v38 = vpop.f32.mrf.mxu1 }
 0x603   :  { %v12706_v5 = vpop.f32.mrf.mxu0 }
 0x604   :  { %v12671_v26 = vpop.f32.mrf.mxu1 }
 0x605   :  { %v4703_v14 = vpop.f32.mrf.mxu0 }
 0x606   :  { %v4704_v19 = vadd.f32 %v4703_v14, %v4514_v38  ;;  %v4519_v36 = vpop.f32.mrf.mxu1 }
 0x607   :  { %v12707_v42 = vpop.f32.mrf.mxu0 }
 0x608   :  { %v12674_v62 = vpop.f32.mrf.mxu1 }
 0x60a   :  { %v4708_v50 = vpop.f32.mrf.mxu0  ;;  %v4522_v51 = vpop.f32.mrf.mxu1 }
 0x60b   :  { %v4709_v40 = vadd.f32 %v4708_v50, %v4519_v36 }
 0x60c   :  { %v12710_v31 = vpop.f32.mrf.mxu0  ;;  %v12675_v6 = vpop.f32.mrf.mxu1 }
 0x60e   :  { %v4711_v39 = vpop.f32.mrf.mxu0  ;;  %v4527_v25 = vpop.f32.mrf.mxu1 }
 0x60f   :  { %v4712_v30 = vadd.f32 %v4711_v39, %v4522_v51 }
 0x610   :  { %v12711_v1 = vpop.f32.mrf.mxu0  ;;  %v12678_v17 = vpop.f32.mrf.mxu1 }
 0x612   :  { %v4716_v2 = vpop.f32.mrf.mxu0  ;;  %v4530_v3 = vpop.f32.mrf.mxu1 }
 0x613   :  { %v4717_v20 = vadd.f32 %v4716_v2, %v4527_v25 }
 0x614   :  { %v12714_v46 = vpop.f32.mrf.mxu0  ;;  %v12679_v29 = vpop.f32.mrf.mxu1 }
 0x616   :  { %v4719_v54 = vpop.f32.mrf.mxu0 }
 0x617   :  { %v5015_v28 = vpop.f32.mrf.mxu1 }
 0x618   :  { %v12715_v16 = vpop.f32.mrf.mxu0  ;;  %v5053_v56 = vadd.f32 %v5015_v28, %v4685_v59 }
 0x619   :  { %v12734_v63 = vpop.f32.mrf.mxu1 }
 0x61a   :  { %v5356_v49 = vpop.f32.mrf.mxu0 }
 0x61b   :  { %v5394_v10 = vadd.f32 %v5356_v49, %v5053_v56  ;;  %v5018_v27 = vpop.f32.mrf.mxu1 }
 0x61c   :  { %v5054_v13 = vadd.f32 %v5018_v27, %v4688_v57  ;;  %v12770_v41 = vpop.f32.mrf.mxu0 }
 0x61d   :  { %v12735_v61 = vpop.f32.mrf.mxu1 }
 0x61e   :  { %v5359_v4 = vpop.f32.mrf.mxu0 }
 0x61f   :  { %v5395_v47 = vadd.f32 %v5359_v4, %v5054_v13  ;;  %v5023_v58 = vpop.f32.mrf.mxu1 }
 0x620   :  { %v5055_v9 = vadd.f32 %v5023_v58, %v4693_v43  ;;  %v12771_v35 = vpop.f32.mrf.mxu0 }
 0x621   :  { %v12738_v37 = vpop.f32.mrf.mxu1 }
 0x623   :  { %v5364_v32 = vpop.f32.mrf.mxu0  ;;  %v5026_v18 = vpop.f32.mrf.mxu1 }
 0x624   :  { %v5396_v52 = vadd.f32 %v5364_v32, %v5055_v9  ;;  %v5056_v11 = vadd.f32 %v5026_v18, %v4696_v48 }
 0x625   :  { %v12774_v12 = vpop.f32.mrf.mxu0  ;;  %v12739_v60 = vpop.f32.mrf.mxu1 }
 0x627   :  { %v5367_v59 = vpop.f32.mrf.mxu0 }
 0x628   :  { %v5397_v44 = vadd.f32 %v5367_v59, %v5056_v11  ;;  %v5031_v24 = vpop.f32.mrf.mxu1 }
 0x629   :  { %v5057_v55 = vadd.f32 %v5031_v24, %v4701_v21  ;;  %v12775_v8 = vpop.f32.mrf.mxu0 }
 0x62a   :  { %v12742_v57 = vpop.f32.mrf.mxu1 }
 0x62b   :  { %v5372_v23 = vpop.f32.mrf.mxu0 }
 0x62c   :  { %v5398_v34 = vadd.f32 %v5372_v23, %v5057_v55  ;;  %v5034_v38 = vpop.f32.mrf.mxu1 }
 0x62d   :  { %v5058_v5 = vadd.f32 %v5034_v38, %v4704_v19  ;;  %v12778_v26 = vpop.f32.mrf.mxu0 }
 0x62e   :  { %v12743_v43 = vpop.f32.mrf.mxu1 }
 0x62f   :  { %v5375_v14 = vpop.f32.mrf.mxu0 }
 0x630   :  { %v5399_v36 = vadd.f32 %v5375_v14, %v5058_v5  ;;  %v5039_v42 = vpop.f32.mrf.mxu1 }
 0x631   :  { %v5059_v62 = vadd.f32 %v5039_v42, %v4709_v40  ;;  %v12779_v50 = vpop.f32.mrf.mxu0 }
 0x632   :  { %v12746_v48 = vpop.f32.mrf.mxu1 }
 0x633   :  { %v5380_v51 = vpop.f32.mrf.mxu0 }
 0x634   :  { %v5400_v31 = vadd.f32 %v5380_v51, %v5059_v62  ;;  %v5042_v6 = vpop.f32.mrf.mxu1 }
 0x635   :  { %v5060_v39 = vadd.f32 %v5042_v6, %v4712_v30  ;;  %v12782_v25 = vpop.f32.mrf.mxu0 }
 0x636   :  { %v12747_v21 = vpop.f32.mrf.mxu1 }
 0x637   :  { %v5383_v1 = vpop.f32.mrf.mxu0 }
 0x638   :  { %v5401_v17 = vadd.f32 %v5383_v1, %v5060_v39  ;;  %v5047_v2 = vpop.f32.mrf.mxu1 }
 0x639   :  { %v5061_v3 = vadd.f32 %v5047_v2, %v4717_v20  ;;  %v12783_v46 = vpop.f32.mrf.mxu0 }
 0x63a   :  { %v12750_v19 = vpop.f32.mrf.mxu1 }
 0x63b   :  { %v5388_v29 = vpop.f32.mrf.mxu0 }
 0x63c   :  { %v5402_v54 = vadd.f32 %v5388_v29, %v5061_v3  ;;  %v5050_v28 = vpop.f32.mrf.mxu1 }
 0x63d   :  { %v12786_v16 = vpop.f32.mrf.mxu0 }
 0x63e   :  { %v12751_v56 = vpop.f32.mrf.mxu1 }
 0x63f   :  { %v5391_v40 = vpop.f32.mrf.mxu0 }
 0x640   :  { %v5549_v63 = vpop.f32.mrf.mxu1 }
 0x641   :  { %v12787_v49 = vpop.f32.mrf.mxu0  ;;  %v5587_v27 = vadd.f32 %v5549_v63, %v5394_v10 }
 0x642   :  { %v12806_v13 = vpop.f32.mrf.mxu1 }
 0x643   :  { %v5884_v41 = vpop.f32.mrf.mxu0 }
 0x644   :  { %v5922_v30 = vadd.f32 %v5884_v41, %v5587_v27  ;;  %v5552_v61 = vpop.f32.mrf.mxu1 }
 0x645   :  { %v5588_v4 = vadd.f32 %v5552_v61, %v5395_v47  ;;  %v12842_v58 = vpop.f32.mrf.mxu0 }
 0x646   :  { %v12807_v20 = vpop.f32.mrf.mxu1 }
 0x647   :  { %v5887_v9 = vpop.f32.mrf.mxu0 }
 0x648   :  { %v5923_v35 = vadd.f32 %v5887_v9, %v5588_v4  ;;  %v5557_v37 = vpop.f32.mrf.mxu1 }
 0x649   :  { %v5589_v32 = vadd.f32 %v5557_v37, %v5396_v52  ;;  %v12843_v18 = vpop.f32.mrf.mxu0 }
 0x64a   :  { %v12810_v11 = vpop.f32.mrf.mxu1 }
 0x64b   :  { %v5892_v10 = vpop.f32.mrf.mxu0 }
 0x64c   :  { %v5924_v12 = vadd.f32 %v5892_v10, %v5589_v32  ;;  %v5560_v60 = vpop.f32.mrf.mxu1 }
 0x64d   :  { %v5590_v59 = vadd.f32 %v5560_v60, %v5397_v44  ;;  %v12846_v24 = vpop.f32.mrf.mxu0 }
 0x64e   :  { %v12811_v47 = vpop.f32.mrf.mxu1 }
 0x64f   :  { %v5895_v55 = vpop.f32.mrf.mxu0 }
 0x650   :  { %v5925_v8 = vadd.f32 %v5895_v55, %v5590_v59  ;;  %v5565_v57 = vpop.f32.mrf.mxu1 }
 0x651   :  { %v5591_v23 = vadd.f32 %v5565_v57, %v5398_v34  ;;  %v12847_v38 = vpop.f32.mrf.mxu0 }
 0x652   :  { %v12814_v5 = vpop.f32.mrf.mxu1 }
 0x653   :  { %v5900_v26 = vpop.f32.mrf.mxu0 }
 0x654   :  { %v16672_v43 = vadd.f32 %v5900_v26, %v5591_v23  ;;  %v5568_v14 = vpop.f32.mrf.mxu1 }
 0x655   :  { %v5592_v42 = vadd.f32 %v5568_v14, %v5399_v36  ;;  %v12850_v52 = vpop.f32.mrf.mxu0 }
 0x656   :  { %v12815_v62 = vpop.f32.mrf.mxu1 }
 0x657   :  { %v5903_v50 = vpop.f32.mrf.mxu0 }
 0x658   :  { %v16674_v48 = vadd.f32 %v5903_v50, %v5592_v42  ;;  %v5573_v51 = vpop.f32.mrf.mxu1 }
 0x659   :  { %v5593_v44 = vadd.f32 %v5573_v51, %v5400_v31  ;;  %v12851_v6 = vpop.f32.mrf.mxu0 }
 0x65a   :  { %v12818_v39 = vpop.f32.mrf.mxu1 }
 0x65b   :  { %v5908_v25 = vpop.f32.mrf.mxu0 }
 0x65c   :  { %v16676_v21 = vadd.f32 %v5908_v25, %v5593_v44  ;;  %v5576_v34 = vpop.f32.mrf.mxu1 }
 0x65d   :  { %v5594_v1 = vadd.f32 %v5576_v34, %v5401_v17  ;;  %v12854_v2 = vpop.f32.mrf.mxu0 }
 0x65e   :  { %v12819_v3 = vpop.f32.mrf.mxu1 }
 0x65f   :  { %v5911_v46 = vpop.f32.mrf.mxu0 }
 0x660   :  { %v16678_v19 = vadd.f32 %v5911_v46, %v5594_v1  ;;  %v5581_v36 = vpop.f32.mrf.mxu1 }
 0x661   :  { %v5595_v29 = vadd.f32 %v5581_v36, %v5402_v54  ;;  %v12855_v28 = vpop.f32.mrf.mxu0 }
 0x662   :  { %v12822_v16 = vpop.f32.mrf.mxu1 }
 0x663   :  { %v5916_v56 = vpop.f32.mrf.mxu0  ;;  %v13519_v16 = vld [vmem:[%s16701_s13 + $0x74] ss:$8 sps:$4 sm:$0xff]  }
 0x664   :  { %v16680_v40 = vadd.f32 %v5916_v56, %v5595_v29  ;;  %v5584_v31 = vpop.f32.mrf.mxu1  ;;  %v13517_v29 = vld [vmem:[%s16701_s13 + $0x70] ss:$8 sps:$4 sm:$0xff]   ;;  %7079 = vmatprep.subr.bf16.mxu1 %v13519_v16 }
 0x665   :  { %v12858_v63 = vpop.f32.mrf.mxu0  ;;  %v13522_v31 = vld [vmem:[%s16701_s13 + $0x64] ss:$8 sps:$4 sm:$0xff]   ;;  %7080 = vmatpush1.bf16.msra.mxu1 %v13517_v29 }
 0x666   :  { %v12823_v49 = vpop.f32.mrf.mxu1  ;;  %7081 = vmatprep.subr.bf16.mxu1 %v13522_v31 }
 0x667   :  { %v5919_v27 = vpop.f32.mrf.mxu0 }
 0x668   :  { %v6225_v13 = vpop.f32.mrf.mxu1  ;;  %v13520_v27 = vld [vmem:[%s16701_s13 + $0x60] ss:$8 sps:$4 sm:$0xff]  }
 0x669   :  { %v12859_v41 = vpop.f32.mrf.mxu0  ;;  %v6263_v61 = vadd.f32 %v6225_v13, %v5922_v30  ;;  %7082 = vmatpush1.bf16.msra.mxu1 %v13520_v27  ;;  %v13502_v27 = vld [vmem:[%s16670_s9 + $0x40] ss:$8 sps:$4 sm:$0xff]  }
 0x66a   :  { %v12878_v17 = vpop.f32.mrf.mxu1  ;;  %v13525_v41 = vld [vmem:[%s16701_s13 + $0x54] ss:$8 sps:$4 sm:$0xff]  }
 0x66b   :  { %v6476_v4 = vpop.f32.mrf.mxu0  ;;  %v13523_v17 = vld [vmem:[%s16701_s13 + $0x50] ss:$8 sps:$4 sm:$0xff]   ;;  %7083 = vmatprep.subr.bf16.mxu1 %v13525_v41 }
 0x66c   :  { %v16682_v58 = vadd.f32 %v6476_v4, %v6263_v61  ;;  %v6228_v20 = vpop.f32.mrf.mxu1  ;;  %v13505_v41 = vld [vmem:[%s16670_s9 + $0x30] ss:$8 sps:$4 sm:$0xff]  }
 0x66d   :  { %v6264_v9 = vadd.f32 %v6228_v20, %v5923_v35  ;;  %v12914_v37 = vpop.f32.mrf.mxu0  ;;  %7084 = vmatpush1.bf16.msra.mxu1 %v13523_v17  ;;  %v13508_v17 = vld [vmem:[%s16670_s9 + $0x20] ss:$8 sps:$4 sm:$0xff]  }
 0x66e   :  { %v12879_v54 = vpop.f32.mrf.mxu1 }
 0x66f   :  { %v6479_v32 = vpop.f32.mrf.mxu0  ;;  %v13526_v54 = vld [vmem:[%s16701_s13 + $0x40] ss:$8 sps:$4 sm:$0xff]  }
 0x670   :  { %v16684_v18 = vadd.f32 %v6479_v32, %v6264_v9  ;;  %v6233_v11 = vpop.f32.mrf.mxu1  ;;  %v13528_v9 = vld [vmem:[%s16701_s13 + $0x44] ss:$8 sps:$4 sm:$0xff]  }
 0x671   :  { %v6265_v10 = vadd.f32 %v6233_v11, %v5924_v12  ;;  %v12915_v60 = vpop.f32.mrf.mxu0  ;;  %7085 = vmatprep.subr.bf16.mxu1 %v13528_v9  ;;  %v13531_v11 = vld [vmem:[%s16701_s13 + $0x34] ss:$8 sps:$4 sm:$0xff]   ;;  %v13516_v9 = vld [vmem:[%s16670_s9 + $0x4] ss:$8 sps:$4 sm:$0xff]  }
 0x672   :  { %v12882_v59 = vpop.f32.mrf.mxu1  ;;  %7086 = vmatpush1.bf16.msra.mxu1 %v13526_v54  ;;  %v13529_v60 = vld [vmem:[%s16701_s13 + $0x30] ss:$8 sps:$4 sm:$0xff]  }
 0x673   :  { %v6484_v24 = vpop.f32.mrf.mxu0  ;;  %7087 = vmatprep.subr.bf16.mxu1 %v13531_v11  ;;  %v17432_v54 = vld [vmem:[#allocation4_spill] sm:$0xff]  ;;  %v17434_v11 = vld [vmem:[#allocation5_spill] sm:$0xff] }
 0x674   :  { %v16686_v47 = vadd.f32 %v6484_v24, %v6265_v10  ;;  %v6236_v55 = vpop.f32.mrf.mxu1 }
 0x675   :  { %v6266_v30 = vadd.f32 %v6236_v55, %v5925_v8  ;;  %v12918_v57 = vpop.f32.mrf.mxu0 }
 0x676   :  { %v12883_v23 = vpop.f32.mrf.mxu1  ;;  %7088 = vmatpush1.bf16.msra.mxu1 %v13529_v60  ;;  %v17436_v60 = vld [vmem:[#allocation11_spill] sm:$0xff] }
 0x677   :  { %v6487_v38 = vpop.f32.mrf.mxu0 }
 0x678   :  { %v16688_v5 = vadd.f32 %v6487_v38, %v6266_v30  ;;  %v16690_v35 = vpop.f32.mrf.mxu1 }
 0x679   :  { %v12919_v26 = vpop.f32.mrf.mxu0  ;;  %v6267_v16 = vadd.f32 %v16690_v35, %v16672_v43 }
 0x67a   :  { %v12886_v14 = vpop.f32.mrf.mxu1 }
 0x67b   :  { %v16692_v42 = vpop.f32.mrf.mxu0 }
 0x67c   :  { %v16694_v52 = vpop.f32.mrf.mxu1 }
 0x67d   :  { %v12922_v12 = vpop.f32.mrf.mxu0 }
 0x67e   :  { %v12887_v62 = vpop.f32.mrf.mxu1 }
 0x67f   :  { %v16696_v50 = vpop.f32.mrf.mxu0 }
 0x680   :  { %v6249_v51 = vpop.f32.mrf.mxu1 }
 0x681   :  { %v12923_v44 = vpop.f32.mrf.mxu0 }
 0x682   :  { %v12890_v8 = vpop.f32.mrf.mxu1 }
 0x683   :  { %v6500_v6 = vpop.f32.mrf.mxu0  ;;  %v6269_v8 = vadd.f32 %v6249_v51, %v16676_v21 }
 0x684   :  { %v6252_v39 = vpop.f32.mrf.mxu1 }
 0x685   :  { %v12926_v25 = vpop.f32.mrf.mxu0  ;;  %v6270_v62 = vadd.f32 %v6252_v39, %v16678_v19  ;;  %v16743_v39 = vld [vmem:[%s16730_s17] sm:$0xff] }
 0x686   :  { %v12891_v34 = vpop.f32.mrf.mxu1 }
 0x687   :  { %v6503_v1 = vpop.f32.mrf.mxu0 }
 0x688   :  { %v6257_v2 = vpop.f32.mrf.mxu1 }
 0x689   :  { %v12927_v3 = vpop.f32.mrf.mxu0  ;;  %v6271_v14 = vadd.f32 %v6257_v2, %v16680_v40  ;;  %v13501_v2 = vld [vmem:[%s16670_s9 + $0x54] ss:$8 sps:$4 sm:$0xff]  }
 0x68a   :  { %v12894_v46 = vpop.f32.mrf.mxu1  ;;  %v6268_v3 = vadd.f32 %v16694_v52, %v16674_v48  ;;  %v6518_v48 = vadd.f32 %v16692_v42, %v6267_v16 }
 0x68b   :  { %v6508_v36 = vpop.f32.mrf.mxu0  ;;  %v6521_v46 = vadd.f32 %v6503_v1, %v6270_v62  ;;  %v13496_v1 = vld [vmem:[%s16670_s9 + $0x60] ss:$8 sps:$4 sm:$0xff]  }
 0x68c   :  { %v6260_v28 = vpop.f32.mrf.mxu1  ;;  %v6522_v25 = vadd.f32 %v6508_v36, %v6271_v14  ;;  %v6519_v19 = vadd.f32 %v16696_v50, %v6268_v3  ;;  %v13499_v36 = vld [vmem:[%s16670_s9 + $0x50] ss:$8 sps:$4 sm:$0xff]  }
 0x68d   :  { %v12930_v56 = vpop.f32.mrf.mxu0 }
 0x68e   :  { %v12895_v63 = vpop.f32.mrf.mxu1  ;;  %v6520_v56 = vadd.f32 %v6500_v6, %v6269_v8  ;;  %v13495_v6 = vld [vmem:[%s16670_s9 + $0x74] ss:$8 sps:$4 sm:$0xff]  }
 0x68f   :  { %v6511_v49 = vpop.f32.mrf.mxu0  ;;  %v16763_v63 = vld [vmem:[%s16730_s17 + $0x10] sm:$0x3] }
 0x690   :  { %v16707_v13 = vpop.f32.mrf.mxu1  ;;  %v13504_v49 = vld [vmem:[%s16670_s9 + $0x44] ss:$8 sps:$4 sm:$0xff]  }
 0x691   :  { %v12931_v61 = vpop.f32.mrf.mxu0 }
 0x692   :  { %v12950_v4 = vpop.f32.mrf.mxu1  ;;  %v13510_v61 = vld [vmem:[%s16670_s9 + $0x24] ss:$8 sps:$4 sm:$0xff]  }
 0x693   :  { %v13513_v4 = vld [vmem:[%s16670_s9 + $0x14] ss:$8 sps:$4 sm:$0xff]  }
 0x694   :  { %v6819_v20 = vpop.f32.mrf.mxu1 }
 0x695   :  { %v6855_v50 = vadd.f32 %v6819_v20, %v16684_v18  ;;  %v13498_v18 = vld [vmem:[%s16670_s9 + $0x64] ss:$8 sps:$4 sm:$0xff]   ;;  %v13511_v20 = vld [vmem:[%s16670_s9 + $0x10] ss:$8 sps:$4 sm:$0xff]  }
 0x696   :  { %v12951_v37 = vpop.f32.mrf.mxu1 }
 0x697   :  { %v13514_v37 = vld [vmem:[%s16670_s9] ss:$8 sps:$4 sm:$0xff]  }
 0x698   :  { %v6824_v32 = vpop.f32.mrf.mxu1 }
 0x699   :  { %v6856_v42 = vadd.f32 %v6824_v32, %v16686_v47  ;;  %v13493_v47 = vld [vmem:[%s16670_s9 + $0x70] ss:$8 sps:$4 sm:$0xff]  }
 0x69a   :  { %v12954_v10 = vpop.f32.mrf.mxu1  ;;  %v17433_v32 = vld [vmem:[#allocation3_spill] sm:$0xff] }
 0x69b   :  { %v17435_v10 = vld [vmem:[#allocation10_spill] sm:$0xff] }
 0x69c   :  { %v6827_v59 = vpop.f32.mrf.mxu1 }
 0x69d   :  { %v6857_v35 = vadd.f32 %v6827_v59, %v16688_v5  ;;  %v6854_v5 = vadd.f32 %v16707_v13, %v16682_v58  ;;  %v16753_v58 = vld [vmem:[%s16730_s17 + $0x8] sm:$0xff]  ;;  %v13507_v13 = vld [vmem:[%s16670_s9 + $0x34] ss:$8 sps:$4 sm:$0xff]   ;;  %s10406_s9 = sld [smem:[%s17339_s0 + %s13763_s6]]  }
 0x69e   :  { %v12955_v24 = vpop.f32.mrf.mxu1  ;;  %v13532_v59 = vld [vmem:[%s16701_s13 + $0x20] ss:$8 sps:$4 sm:$0xff]   ;;  %s10409_s17 = sld [smem:[%s17339_s0 + %s13765_s14]]  }
 0x69f   :  { %v13534_v24 = vld [vmem:[%s16701_s13 + $0x24] ss:$8 sps:$4 sm:$0xff]  }
 0x6a0   :  { %v6832_v55 = vpop.f32.mrf.mxu1  ;;  %7089 = vmatprep.subr.bf16.mxu1 %v13534_v24 }
 0x6a1   :  { %v6858_v43 = vadd.f32 %v6832_v55, %v6518_v48  ;;  %7090 = vmatpush1.bf16.msra.mxu1 %v13532_v59  ;;  %v13535_v55 = vld [vmem:[%s16701_s13 + $0x10] ss:$8 sps:$4 sm:$0xff]  }
 0x6a2   :  { %v12958_v30 = vpop.f32.mrf.mxu1 }
 0x6a3   :  { %v13537_v30 = vld [vmem:[%s16701_s13 + $0x14] ss:$8 sps:$4 sm:$0xff]  }
 0x6a4   :  { %v6835_v57 = vpop.f32.mrf.mxu1  ;;  %7091 = vmatprep.subr.bf16.mxu1 %v13537_v30 }
 0x6a5   :  { %v6859_v52 = vadd.f32 %v6835_v57, %v6519_v19  ;;  %v13540_v57 = vld [vmem:[%s16701_s13 + $0x4] ss:$8 sps:$4 sm:$0xff]   ;;  %7092 = vmatpush1.bf16.msra.mxu1 %v13535_v55 }
 0x6a6   :  { %v12959_v23 = vpop.f32.mrf.mxu1  ;;  %7093 = vmatprep.subr.bf16.mxu1 %v13540_v57 }
 0x6a7   :  { %v13538_v23 = vld [vmem:[%s16701_s13] ss:$8 sps:$4 sm:$0xff]   ;;  %s17252_s13 = sld [smem:[%s17339_s0 + %s13764_s10]]  }
 0x6a8   :  { %v6840_v38 = vpop.f32.mrf.mxu1 }
 0x6a9   :  { %v6860_v21 = vadd.f32 %v6840_v38, %v6520_v56  ;;  %7094 = vmatpush1.bf16.msra.mxu1 %v13538_v23  ;;  %v11129_v38 = vld [vmem:[%s10392_s21] ss:$0 sm:$0xff]  ;;  %s10411_s21 = sld [smem:[%s17339_s0 + %s13766_s18]]  }
 0x6aa   :  { %v12962_v26 = vpop.f32.mrf.mxu1 }
 0x6ac   :  { %v6843_v12 = vpop.f32.mrf.mxu1 }
 0x6ad   :  { %v6861_v31 = vadd.f32 %v6843_v12, %v6521_v46 }
 0x6ae   :  { %v12963_v44 = vpop.f32.mrf.mxu1 }
 0x6b0   :  { %v6848_v34 = vpop.f32.mrf.mxu1 }
 0x6b1   :  { %v6862_v29 = vadd.f32 %v6848_v34, %v6522_v25 }
 0x6b2   :  { %v12966_v28 = vpop.f32.mrf.mxu1 }
 0x6b3   :  { %12969 = vmatpush3.msra.mxu0 %v6862_v29 }
 0x6b4   :  { %v6851_v40 = vpop.f32.mrf.mxu1  ;;  %12970 = vmatprep.subr.mxu0 %v17378_v15 }
 0x6b5   :  { %12971 = vmatpush3.msra.mxu0 %v6861_v31 }
 0x6b6   :  { %v12967_v51 = vpop.f32.mrf.mxu1  ;;  %12972 = vmatprep.subr.mxu0 %v17378_v15 }
 0x6b7   :  { %12973 = vmatpush3.msra.mxu0 %v6860_v21 }
 0x6b8   :  { %12974 = vmatprep.subr.mxu0 %v17378_v15 }
 0x6b9   :  { %12975 = vmatpush3.msra.mxu0 %v6859_v52 }
 0x6ba   :  { %12976 = vmatprep.subr.mxu0 %v17378_v15 }
 0x6bb   :  { %12977 = vmatpush3.msra.mxu0 %v6858_v43 }
 0x6bc   :  { %12978 = vmatprep.subr.mxu0 %v17378_v15 }
 0x6bd   :  { %12979 = vmatpush3.msra.mxu0 %v6857_v35 }
 0x6be   :  { %12980 = vmatprep.subr.mxu0 %v17378_v15 }
 0x6bf   :  { %12981 = vmatpush3.msra.mxu0 %v6856_v42 }
 0x6c0   :  { %12982 = vmatprep.subr.mxu0 %v17378_v15 }
 0x6c1   :  { %12983 = vmatpush3.msra.mxu0 %v6855_v50 }
 0x6c2   :  { %12984 = vmatprep.subr.mxu0 %v17378_v15 }
 0x6c3   :  { %12985 = vmatpush3.msra.mxu0 %v6854_v5 }
 0x6c4   :  { %12987 = vmatmul.mubr.msk.f32.vlgmr.msra.gmra.mxu0 %vm6873_vm3, %v16743_v39  ;;  %7238 = vmatprep.subr.bf16.mxu0 %v13495_v6 }
 0x6c5   :  { %7239 = vmatpush1.bf16.msra.mxu0 %v13493_v47  ;;  %12989 = vmatprep.mubr.msk.f32.mxu0 %vm13733_vm0, %v17378_v15 }
 0x6c6   :  { %7240 = vmatprep.subr.bf16.mxu0 %v13498_v18  ;;  %v6989_v18 = vlaneseq }
 0x6c8   :  { %12990 = vmatmul.mubr.msk.f32.gmra.mxu0 %vm6873_vm3, %v16753_v58 }
 0x6c9   :  { %7241 = vmatpush1.bf16.msra.mxu0 %v13496_v1  ;;  %12992 = vmatprep.mubr.msk.f32.mxu0 %vm13733_vm0, %v17378_v15 }
 0x6ca   :  { %7242 = vmatprep.subr.bf16.mxu0 %v13501_v2 }
 0x6cc   :  { %12993 = vmatmul.mubr.msk.f32.gmra.mxu0 %vm6873_vm3, %v16763_v63 }
 0x6cd   :  { %7243 = vmatpush1.bf16.msra.mxu0 %v13499_v36  ;;  %7270 = vmatprep.mubr.bf16.mxu0 %v17431_v22  ;;  %v16801_v36 = vshrl.u32 %v6989_v18, 7 }
 0x6ce   :  { %7244 = vmatprep.subr.bf16.mxu0 %v13504_v49 }
 0x6d1   :  { %7245 = vmatpush1.bf16.msra.mxu0 %v13502_v27 }
 0x6d2   :  { %7246 = vmatprep.subr.bf16.mxu0 %v13507_v13  ;;  %v16804_v13 = vsub.s32 1, %v16801_v36 }
 0x6d5   :  { %7247 = vmatpush1.bf16.msra.mxu0 %v13505_v41  ;;  %v16807_v41 = vsub.s32 0, %v16801_v36 }
 0x6d6   :  { %7248 = vmatprep.subr.bf16.mxu0 %v13510_v61 }
 0x6d9   :  { %7249 = vmatpush1.bf16.msra.mxu0 %v13508_v17  ;;  %v7146_v17 = vld [vmem:[%s10396_s25] sm:$0x3]  ;;  %s10412_s25 = sld [smem:[%s17339_s0 + %s13767_s22]]  }
 0x6da   :  { %7250 = vmatprep.subr.bf16.mxu0 %v13513_v4 }
 0x6dd   :  { %7251 = vmatpush1.bf16.msra.mxu0 %v13511_v20  ;;  %v7155_v20 = vrot.slane %v7146_v17, %v16804_v13 }
 0x6de   :  { %7252 = vmatprep.subr.bf16.mxu0 %v13516_v9  ;;  %v7151_v9 = vrot.slane %v7146_v17, %v16807_v41 }
 0x6e1   :  { %7253 = vmatpush1.bf16.msra.mxu0 %v13514_v37 }
 0x6e4   :  { %7271 = vmatmul.mubr.bf16.vlgmr.msra.gmra.mxu0 %v17432_v54 }
 0x6e5   :  { %7280 = vmatprep.mubr.bf16.mxu0 %v17431_v22 }
 0x6ec   :  { %7281 = vmatmul.mubr.bf16.gmra.mxu0 %v17433_v32 }
 0x6ed   :  { %7290 = vmatprep.mubr.bf16.mxu0 %v17431_v22 }
 0x6f4   :  { %7291 = vmatmul.mubr.bf16.gmra.mxu0 %v17434_v11 }
 0x6f5   :  { %7300 = vmatprep.mubr.bf16.mxu0 %v17431_v22 }
 0x6fc   :  { %7301 = vmatmul.mubr.bf16.gmra.mxu0 %v17435_v10 }
 0x6fd   :  { %7310 = vmatprep.mubr.bf16.mxu0 %v17431_v22 }
 0x704   :  { %7311 = vmatmul.mubr.bf16.gmra.mxu0 %v17436_v60 }
 0x784   :  { %v6949_v26 = vpop.f32.mrf.mxu0 }
 0x785   :  { %v6950_v14 = vadd.f32 %v11129_v38, %v6949_v26 }
 0x786   :  { %v12988_v12 = vpop.f32.mrf.mxu0 }
 0x787   :  { %v6963_v44 = vmul.f32 0.1, %v6950_v14 }
 0x788   :  { %v6954_v62 = vpop.f32.mrf.mxu0 }
 0x789   :  { %v6955_v8 = vadd.f32 %v11129_v38, %v6954_v62  ;;  %v6966_v46 = vmax.f32 %v6950_v14, %v6963_v44 }
 0x78a   :  { %v12991_v25 = vpop.f32.mrf.mxu0 }
 0x78b   :  { %v6964_v34 = vmul.f32 0.1, %v6955_v8 }
 0x78c   :  { %v6959_v3 = vpop.f32.mrf.mxu0 }
 0x78d   :  { %v6967_v29 = vmax.f32 %v6955_v8, %v6964_v34  ;;  %v6960_v28 = vadd.f32 %v11129_v38, %v6959_v3  ;;  %v13543_v3 = vld [vmem:[%s16820_s29 + $0x70] sm:$0xff]  }
 0x78e   :  { %v12994_v16 = vpop.f32.mrf.mxu0 }
 0x78f   :  { %v6969_v56 = vpack.c.bf16 %v6967_v29, %v6966_v46  ;;  %v6965_v31 = vmul.f32 0.1, %v6960_v28  ;;  %v13544_v46 = vld [vmem:[%s16820_s29 + $0x30] sm:$0xff]   ;;  %v13545_v29 = vld [vmem:[%s16820_s29 + $0x68] sm:$0xff]   ;;  %v13547_v16 = vld [vmem:[%s16820_s29 + $0x60] sm:$0xff]  }
 0x791   :  { %7112 = vmatmul.mubr.bf16.vlgmr.msra.gmra.mxu1 %v6969_v56  ;;  %v6968_v40 = vmax.f32 %v6960_v28, %v6965_v31  ;;  %v13546_v28 = vld [vmem:[%s16820_s29 + $0x28] sm:$0xff]   ;;  %v13549_v56 = vld [vmem:[%s16820_s29 + $0x58] sm:$0xff]  }
 0x792   :  { %7121 = vmatprep.mubr.bf16.mxu1 %v17431_v22  ;;  %v13550_v31 = vld [vmem:[%s16820_s29 + $0x18] sm:$0xff]  }
 0x793   :  { %v6970_v19 = vpack.c.bf16 %v6968_v40, %v6968_v40  ;;  %v13551_v40 = vld [vmem:[%s16820_s29 + $0x50] sm:$0xff]  }
 0x799   :  { %7122 = vmatmul.mubr.bf16.gmra.mxu1 %v6970_v19  ;;  %v13552_v19 = vld [vmem:[%s16820_s29 + $0x10] sm:$0xff]  }
 0x79a   :  { %7383 = vmatprep.mubr.f32.mxu1 %v17378_v15 }
 0x7a4   :  { %v7272_v21 = vpop.f32.mrf.mxu0 }
 0x7a5   :  { %v7273_v34 = vadd.f32 %v7272_v21, %v7151_v9  ;;  %v13553_v21 = vld [vmem:[%s16820_s29 + $0x48] sm:$0xff]  }
 0x7a6   :  { %v7274_v51 = vpop.f32.mrf.mxu0 }
 0x7a7   :  { %v7275_v25 = vadd.f32 %v7274_v51, %v7155_v20  ;;  %v13554_v51 = vld [vmem:[%s16820_s29 + $0x8] sm:$0xff]  }
 0x7a8   :  { %v7276_v48 = vpop.f32.mrf.mxu0 }
 0x7a9   :  { %v7277_v8 = vadd.f32 %v7276_v48, %v7151_v9  ;;  %v13555_v48 = vld [vmem:[%s16820_s29 + $0x40] sm:$0xff]  }
 0x7aa   :  { %v7278_v52 = vpop.f32.mrf.mxu0 }
 0x7ab   :  { %v7279_v44 = vadd.f32 %v7278_v52, %v7155_v20  ;;  %v13556_v52 = vld [vmem:[%s16820_s29] sm:$0xff]  }
 0x7ac   :  { %v7282_v43 = vpop.f32.mrf.mxu0 }
 0x7ad   :  { %v7283_v62 = vadd.f32 %v7282_v43, %v7151_v9 }
 0x7ae   :  { %v7284_v35 = vpop.f32.mrf.mxu0 }
 0x7af   :  { %v7285_v12 = vadd.f32 %v7284_v35, %v7155_v20 }
 0x7b0   :  { %v7286_v42 = vpop.f32.mrf.mxu0 }
 0x7b1   :  { %v7287_v14 = vadd.f32 %v7286_v42, %v7151_v9 }
 0x7b2   :  { %v7288_v50 = vpop.f32.mrf.mxu0 }
 0x7b3   :  { %v7289_v26 = vadd.f32 %v7288_v50, %v7155_v20 }
 0x7b4   :  { %v7292_v6 = vpop.f32.mrf.mxu0 }
 0x7b5   :  { %v7293_v38 = vadd.f32 %v7292_v6, %v7151_v9 }
 0x7b6   :  { %v7294_v5 = vpop.f32.mrf.mxu0 }
 0x7b7   :  { %v7295_v23 = vadd.f32 %v7294_v5, %v7155_v20 }
 0x7b8   :  { %v7296_v47 = vpop.f32.mrf.mxu0 }
 0x7b9   :  { %v7297_v57 = vadd.f32 %v7296_v47, %v7151_v9 }
 0x7ba   :  { %v7298_v1 = vpop.f32.mrf.mxu0 }
 0x7bb   :  { %v7299_v30 = vadd.f32 %v7298_v1, %v7155_v20  ;;  %v6987_v1 = vld [vmem:[%s10394_s3] sm:$0x3] }
 0x7bc   :  { %v7302_v2 = vpop.f32.mrf.mxu0 }
 0x7bd   :  { %v7303_v55 = vadd.f32 %v7302_v2, %v7151_v9  ;;  %v6992_v2 = vrot.slane %v6987_v1, %v16807_v41 }
 0x7be   :  { %v7304_v49 = vpop.f32.mrf.mxu0 }
 0x7bf   :  { %v7305_v24 = vadd.f32 %v7304_v49, %v7155_v20  ;;  %v6996_v49 = vrot.slane %v6987_v1, %v16804_v13  ;;  %v16883_v1 = vld [vmem:[%s16860_s7 + $0xb8] sm:$0xff]  }
 0x7c0   :  { %v7306_v27 = vpop.f32.mrf.mxu0 }
 0x7c1   :  { %v7307_v60 = vadd.f32 %v7306_v27, %v7151_v9 }
 0x7c2   :  { %v7308_v61 = vpop.f32.mrf.mxu0 }
 0x7c3   :  { %v7309_v10 = vadd.f32 %v7308_v61, %v7155_v20 }
 0x7c4   :  { %v7312_v4 = vpop.f32.mrf.mxu0 }
 0x7c5   :  { %v7313_v32 = vadd.f32 %v7312_v4, %v7151_v9 }
 0x7c6   :  { %v7314_v37 = vpop.f32.mrf.mxu0 }
 0x7c7   :  { %v7315_v54 = vadd.f32 %v7314_v37, %v7155_v20 }
 0x7c8   :  { %v7316_v11 = vpop.f32.mrf.mxu0 }
 0x7c9   :  { %7333 = vmatprep.subr.mxu1 %v7315_v54 }
 0x7ca   :  { %v7317_v59 = vpop.f32.mrf.mxu0  ;;  %7334 = vmatpush1.msra.mxu1 %v7313_v32 }
 0x7cb   :  { %7335 = vmatprep.subr.mxu1 %v7309_v10 }
 0x7cc   :  { %7336 = vmatpush1.msra.mxu1 %v7307_v60 }
 0x7cd   :  { %7337 = vmatprep.subr.mxu1 %v7305_v24 }
 0x7ce   :  { %7338 = vmatpush1.msra.mxu1 %v7303_v55 }
 0x7cf   :  { %7339 = vmatprep.subr.mxu1 %v7299_v30 }
 0x7d0   :  { %7340 = vmatpush1.msra.mxu1 %v7297_v57 }
 0x7d1   :  { %7341 = vmatprep.subr.mxu1 %v7295_v23 }
 0x7d2   :  { %7342 = vmatpush1.msra.mxu1 %v7293_v38 }
 0x7d3   :  { %7343 = vmatprep.subr.mxu1 %v7289_v26 }
 0x7d4   :  { %7344 = vmatpush1.msra.mxu1 %v7287_v14 }
 0x7d5   :  { %7345 = vmatprep.subr.mxu1 %v7285_v12 }
 0x7d6   :  { %7346 = vmatpush1.msra.mxu1 %v7283_v62 }
 0x7d7   :  { %7347 = vmatprep.subr.mxu1 %v7279_v44 }
 0x7d8   :  { %7348 = vmatpush1.msra.mxu1 %v7277_v8 }
 0x7d9   :  { %7349 = vmatprep.subr.mxu1 %v7275_v25 }
 0x7da   :  { %7350 = vmatpush1.msra.mxu1 %v7273_v34 }
 0x7db   :  { %11165 = vmatmul.mubr.msk.f32.vlgmr.msra.gmra.mxu1 %vm6873_vm3, %v16743_v39  ;;  %v13541_v39 = vld [vmem:[%s16820_s29 + $0x78] sm:$0xff]  }
 0x7dc   :  { %7389 = vmatprep.mubr.f32.mxu1 %v17378_v15  ;;  %11907 = vmatprep.subr.bf16.mxu1 %v13541_v39 }
 0x7df   :  { %11166 = vmatmul.mubr.msk.f32.gmra.mxu1 %vm6873_vm3, %v16753_v58  ;;  %v13542_v58 = vld [vmem:[%s16820_s29 + $0x38] sm:$0xff]  }
 0x7e0   :  { %7395 = vmatprep.mubr.f32.mxu1 %v17378_v15  ;;  %11908 = vmatpush3.bf16.msra.mxu1 %v13542_v58 }
 0x7e1   :  { %11909 = vmatprep.subr.bf16.mxu1 %v13543_v3 }
 0x7e3   :  { %11167 = vmatmul.mubr.msk.f32.gmra.mxu1 %vm6873_vm3, %v16763_v63  ;;  %v13548_v63 = vld [vmem:[%s16820_s29 + $0x20] sm:$0xff]   ;;  %vm16915_vm3 = vmor %vm7638_vm4, %vm7639_vm7  ;;  %vm7857_vm7 = vcmask 1045504  }
 0x7e4   :  { %11910 = vmatpush3.bf16.msra.mxu1 %v13544_v46 }
 0x7e5   :  { %11911 = vmatprep.subr.bf16.mxu1 %v13545_v29 }
 0x7e8   :  { %11912 = vmatpush3.bf16.msra.mxu1 %v13546_v28 }
 0x7e9   :  { %11913 = vmatprep.subr.bf16.mxu1 %v13547_v16 }
 0x7ec   :  { %11914 = vmatpush3.bf16.msra.mxu1 %v13548_v63  ;;  %v13557_v63 = vld [vmem:[%s16860_s7 + $0x38] sm:$0xff]  }
 0x7ed   :  { %11915 = vmatprep.subr.bf16.mxu1 %v13549_v56  ;;  %v13558_v56 = vld [vmem:[%s16860_s7 + $0x78] sm:$0xff]  }
 0x7ee   :  { %12995 = vmatprep.subr.bf16.mxu0 %v13558_v56 }
 0x7ef   :  { %12996 = vmatpush3.bf16.msra.mxu0 %v13558_v56 }
 0x7f0   :  { %11916 = vmatpush3.bf16.msra.mxu1 %v13550_v31  ;;  %v13559_v31 = vld [vmem:[%s16860_s7 + $0x30] sm:$0xff]  }
 0x7f1   :  { %11917 = vmatprep.subr.bf16.mxu1 %v13551_v40  ;;  %v13560_v40 = vld [vmem:[%s16860_s7 + $0x70] sm:$0xff]  }
 0x7f2   :  { %12997 = vmatprep.subr.bf16.mxu0 %v13560_v40 }
 0x7f3   :  { %12998 = vmatpush3.bf16.msra.mxu0 %v13560_v40 }
 0x7f4   :  { %11918 = vmatpush3.bf16.msra.mxu1 %v13552_v19  ;;  %v13561_v19 = vld [vmem:[%s16860_s7 + $0x28] sm:$0xff]  }
 0x7f5   :  { %11919 = vmatprep.subr.bf16.mxu1 %v13553_v21  ;;  %v13562_v21 = vld [vmem:[%s16860_s7 + $0x68] sm:$0xff]  }
 0x7f6   :  { %12999 = vmatprep.subr.bf16.mxu0 %v13562_v21 }
 0x7f7   :  { %13000 = vmatpush3.bf16.msra.mxu0 %v13562_v21 }
 0x7f8   :  { %11920 = vmatpush3.bf16.msra.mxu1 %v13554_v51  ;;  %v13563_v51 = vld [vmem:[%s16860_s7 + $0x20] sm:$0xff]  }
 0x7f9   :  { %11921 = vmatprep.subr.bf16.mxu1 %v13555_v48  ;;  %v13564_v48 = vld [vmem:[%s16860_s7 + $0x60] sm:$0xff]  }
 0x7fa   :  { %13001 = vmatprep.subr.bf16.mxu0 %v13564_v48 }
 0x7fb   :  { %13002 = vmatpush3.bf16.msra.mxu0 %v13564_v48 }
 0x7fc   :  { %11922 = vmatpush3.bf16.msra.mxu1 %v13556_v52  ;;  %v13565_v52 = vld [vmem:[%s16860_s7 + $0x18] sm:$0xff]  }
 0x7fd   :  { %13015 = vmatprep.subr.bf16.mxu1 %v13557_v63 }
 0x851   :  { %v7113_v43 = vpop.f32.mrf.mxu1 }
 0x852   :  { %v7114_v27 = vadd.f32 %v7113_v43, %v6992_v2  ;;  %v13566_v43 = vld [vmem:[%s16860_s7 + $0x58] sm:$0xff]  }
 0x853   :  { %v7115_v35 = vpop.f32.mrf.mxu1  ;;  %13003 = vmatprep.subr.bf16.mxu0 %v13566_v43 }
 0x854   :  { %v7116_v17 = vadd.f32 %v7115_v35, %v6996_v49  ;;  %v13567_v35 = vld [vmem:[%s16860_s7 + $0x10] sm:$0xff]   ;;  %13004 = vmatpush3.bf16.msra.mxu0 %v13566_v43 }
 0x855   :  { %v7117_v42 = vpop.f32.mrf.mxu1 }
 0x856   :  { %v7118_v9 = vadd.f32 %v7117_v42, %v6992_v2  ;;  %v13568_v42 = vld [vmem:[%s16860_s7 + $0x50] sm:$0xff]  }
 0x857   :  { %v7119_v50 = vpop.f32.mrf.mxu1  ;;  %13005 = vmatprep.subr.bf16.mxu0 %v13568_v42 }
 0x858   :  { %v7120_v32 = vadd.f32 %v7119_v50, %v6996_v49  ;;  %v13569_v50 = vld [vmem:[%s16860_s7 + $0x8] sm:$0xff]   ;;  %13006 = vmatpush3.bf16.msra.mxu0 %v13568_v42 }
 0x859   :  { %v7123_v6 = vpop.f32.mrf.mxu1 }
 0x85a   :  { %v7124_v30 = vadd.f32 %v7123_v6, %v6992_v2  ;;  %v13570_v6 = vld [vmem:[%s16860_s7 + $0x48] sm:$0xff]  }
 0x85b   :  { %v7125_v5 = vpop.f32.mrf.mxu1  ;;  %13007 = vmatprep.subr.bf16.mxu0 %v13570_v6  ;;  %v11188_v2 = vld [vmem:[%s16889_s11 + $0xc] sm:$0xf] }
 0x85c   :  { %v7126_v23 = vadd.f32 %v7125_v5, %v6996_v49  ;;  %v13571_v5 = vld [vmem:[%s16860_s7] sm:$0xff]   ;;  %13008 = vmatpush3.bf16.msra.mxu0 %v13570_v6  ;;  %v16908_v6 = vld [vmem:[%s16889_s11 + $0x18] sm:$0xf] }
 0x85d   :  { %v7127_v47 = vpop.f32.mrf.mxu1  ;;  %v11256_v49 = vld [vmem:[%s16889_s11 + $0x24] sm:$0xf] }
 0x85e   :  { %v13572_v47 = vld [vmem:[%s16860_s7 + $0x40] sm:$0xff]  }
 0x85f   :  { %v7128_v18 = vpop.f32.mrf.mxu1  ;;  %13009 = vmatprep.subr.bf16.mxu0 %v13572_v47 }
 0x860   :  { %v16879_v18 = vld [vmem:[%s16860_s7 + $0xf8] sm:$0xff]   ;;  %13010 = vmatpush3.bf16.msra.mxu0 %v13572_v47 }
 0x861   :  { %13035 = vmatprep.subr.bf16.mxu0 %v16883_v1 }
 0x89b   :  { %v7385_v61 = vpop.f32.mrf.mxu1 }
 0x89c   :  { %v7402_v4 = vadd.f32 %v7385_v61, %v7114_v27  ;;  %v7676_v61 = vshrl.u32 %v11188_v2, 16 }
 0x89d   :  { %v7387_v20 = vpop.f32.mrf.mxu1 }
 0x89e   :  { %v7403_v37 = vadd.f32 %v7387_v20, %v7116_v17  ;;  %v7408_v11 = vmul.f32 0.1, %v7402_v4  ;;  %v7679_v17 = vshll.u32 %v11188_v2, 16 }
 0x89f   :  { %v7391_v54 = vpop.f32.mrf.mxu1 }
 0x8a0   :  { %v7404_v10 = vadd.f32 %v7391_v54, %v7118_v9  ;;  %v7409_v59 = vmul.f32 0.1, %v7403_v37  ;;  %v7414_v38 = vmax.f32 %v7402_v4, %v7408_v11  ;;  %v11168_v4 = vld [vmem:[%s10400_s15] ss:$0 sm:$0xff]  ;;  %v8118_v9 = vshll.u32 %v11256_v49, 16 }
 0x8a1   :  { %v7393_v60 = vpop.f32.mrf.mxu1 }
 0x8a2   :  { %v7410_v24 = vmul.f32 0.1, %v7404_v10  ;;  %v7405_v55 = vadd.f32 %v7393_v60, %v7120_v32  ;;  %v7415_v44 = vmax.f32 %v7403_v37, %v7409_v59  ;;  %v8121_v37 = vshrl.u32 %v11256_v49, 16  ;;  %v11189_v32 = vld [vmem:[%s16889_s11 + $0x10] sm:$0xf] }
 0x8a3   :  { %v7397_v57 = vpop.f32.mrf.mxu1  ;;  %v7632_v60 = vld [vmem:[%s16889_s11] sm:$0xf]  ;;  %v7678_v59 = vrot.slane %v7676_v61, 5 }
 0x8a4   :  { %v7416_v26 = vmax.f32 %v7404_v10, %v7410_v24  ;;  %v7411_v14 = vmul.f32 0.1, %v7405_v55  ;;  %v7406_v12 = vadd.f32 %v7397_v57, %v7124_v30  ;;  %v7681_v24 = vrot.slane %v7679_v17, 6  ;;  %v11190_v57 = vld [vmem:[%s16889_s11 + $0x14] sm:$0x1] }
 0x8a5   :  { %v7399_v62 = vpop.f32.mrf.mxu1  ;;  %v7695_v56 = vshrl.u32 %v11190_v57, 16  ;;  %v7698_v21 = vshll.u32 %v11190_v57, 16 }
 0x8a6   :  { %v16845_v8 = vpack.c.bf16 %v7416_v26, %v7414_v38  ;;  %v7417_v25 = vmax.f32 %v7405_v55, %v7411_v14  ;;  %v7407_v34 = vadd.f32 %v7399_v62, %v7126_v23  ;;  %v7412_v3 = vmul.f32 0.1, %v7406_v12  ;;  %v11257_v55 = vld [vmem:[%s16889_s11 + $0x28] sm:$0xf] }
 0x8a7   :  { %v7685_v23 = vshrl.u32 %v11189_v32, 16  ;;  %v7688_v38 = vshll.u32 %v11189_v32, 16  ;;  %v16900_v26 = vrot.slane %v8118_v9, 5  ;;  %v8123_v14 = vrot.slane %v8121_v37, 4  ;;  %v13581_v37 = vld [vmem:[%s16860_s7 + $0xd8] sm:$0xff]  }
 0x8a8   :  { %v7413_v39 = vmul.f32 0.1, %v7407_v34  ;;  %v16847_v58 = vpack.c.bf16 %v7417_v25, %v7415_v44  ;;  %v7418_v28 = vmax.f32 %v7406_v12, %v7412_v3  ;;  %v7641_v25 = vrot.slane %v7632_v60, 6 }
 0x8a9   :  { %v7687_v40 = vrot.slane %v7685_v23, 5  ;;  %v7697_v32 = vrot.slane %v7695_v56, 5  ;;  %v11229_v23 = vld [vmem:[%s16889_s11 + $0x20] sm:$0x1] }
 0x8aa   :  { %v7419_v46 = vmax.f32 %v7407_v34, %v7413_v39  ;;  %7591 = vmatprep.mubr.bf16.mxu1 %v16847_v58  ;;  %v16854_v16 = vpack.c.bf16 %v7418_v28, %v7418_v28  ;;  %v8127_v34 = vshll.u32 %v11257_v55, 16  ;;  %v8131_v39 = vshrl.u32 %v11257_v55, 16  ;;  %v7633_v28 = vld [vmem:[%s16889_s11 + $0x4] sm:$0xf] }
 0x8ab   :  { %7592 = vmatmul.mubr.bf16.vlgmr.msra.gmra.mxu1 %v16845_v8  ;;  %v7642_v61 = vrot.slane %v7641_v25, 4  ;;  %v7967_v55 = vrot.slane %v16908_v6, 5 }
 0x8ac   :  { %v16851_v29 = vpack.c.bf16 %v7419_v46, %v7419_v46  ;;  %13016 = vmatpush3.bf16.msra.mxu1 %v13557_v63  ;;  %v16903_v63 = vor.u32 %v7681_v24, %v7678_v59  ;;  %v8133_v47 = vrot.slane %v8131_v39, 4  ;;  %v8109_v39 = vld [vmem:[#allocation2] sm:$0x8] }
 0x8ad   :  { %13017 = vmatprep.subr.bf16.mxu1 %v13559_v31 }
 0x8ae   :  { %7599 = vmatprep.mubr.bf16.mxu1 %v16851_v29  ;;  %v7683_v17 = vrot.slane %v16903_v63, 4 }
 0x8b0   :  { %13018 = vmatpush3.bf16.msra.mxu1 %v13559_v31 }
 0x8b1   :  { %13019 = vmatprep.subr.bf16.mxu1 %v13561_v19 }
 0x8b3   :  { %7600 = vmatmul.mubr.bf16.gmra.mxu1 %v16854_v16 }
 0x8b4   :  { %13020 = vmatpush3.bf16.msra.mxu1 %v13561_v19  ;;  %v7690_v19 = vrot.slane %v7688_v38, 6 }
 0x8b5   :  { %13021 = vmatprep.subr.bf16.mxu1 %v13563_v51 }
 0x8b8   :  { %13022 = vmatpush3.bf16.msra.mxu1 %v13563_v51  ;;  %v8124_v51 = vor.u32 %v8123_v14, %v16900_v26 }
 0x8b9   :  { %13023 = vmatprep.subr.bf16.mxu1 %v13565_v52 }
 0x8ba   :  { %v8125_v60 = vrot.slane %v8124_v51, 4 }
 0x8bc   :  { %13024 = vmatpush3.bf16.msra.mxu1 %v13565_v52 }
 0x8bd   :  { %13025 = vmatprep.subr.bf16.mxu1 %v13567_v35 }
 0x8c0   :  { %13026 = vmatpush3.bf16.msra.mxu1 %v13567_v35  ;;  %v7634_v35 = vld [vmem:[%s16889_s11 + $0x8] sm:$0x1] }
 0x8c1   :  { %13027 = vmatprep.subr.bf16.mxu1 %v13569_v50  ;;  %v7646_v24 = vrot.slane %v7634_v35, 6 }
 0x8c4   :  { %13028 = vmatpush3.bf16.msra.mxu1 %v13569_v50  ;;  %v7643_v50 = vrot.slane %v7633_v28, 6 }
 0x8c5   :  { %13029 = vmatprep.subr.bf16.mxu1 %v13571_v5 }
 0x8c8   :  { %13030 = vmatpush3.bf16.msra.mxu1 %v13571_v5  ;;  %v8129_v5 = vrot.slane %v8127_v34, 5 }
 0x8c9   :  { %13055 = vmatprep.subr.bf16.mxu1 %v16879_v18 }
 0x8ca   :  { %v8134_v38 = vor.u32 %v8133_v47, %v8129_v5 }
 0x96b   :  { %v11923_v27 = vpop.f32.mrf.mxu1 }
 0x96d   :  { %v11924_v20 = vpop.f32.mrf.mxu1 }
 0x96e   :  { %v11925_v54 = vadd.f32 %v11924_v20, %v11923_v27  ;;  %v7629_v27 = vld [vmem:[#allocation2] sm:$0xc]  ;;  %v16912_v20 = vld [vmem:[%s16889_s11 + $0x2c] sm:$0x1] }
 0x96f   :  { %v11926_v11 = vpop.f32.mrf.mxu1  ;;  %v7651_v57 = vmul.bf16 %v7641_v25, %v7629_v27  ;;  %v8137_v14 = vshll.u32 %v16912_v20, 16  ;;  %v8130_v25 = vsel %vm14236_vm14, %v8125_v60, %v8129_v5 }
 0x970   :  { %v7594_v10 = vadd.f32 %v11925_v54, %v11168_v4  ;;  %v7691_v54 = vor.u32 %v7690_v19, %v7687_v40  ;;  %v7972_v19 = vrot.slane %v11229_v23, 5 }
 0x971   :  { %v11927_v30 = vpop.f32.mrf.mxu1 }
 0x972   :  { %v7607_v12 = vmul.f32 0.1, %v7594_v10  ;;  %v11928_v62 = vadd.f32 %v11927_v30, %v11926_v11  ;;  %v7700_v11 = vrot.slane %v7698_v21, 6  ;;  %v7645_v30 = vrot.slane %v7643_v50, 4 }
 0x973   :  { %v11929_v44 = vpop.f32.mrf.mxu1 }
 0x974   :  { %v7610_v3 = vmax.f32 %v7594_v10, %v7607_v12  ;;  %v7597_v46 = vadd.f32 %v11928_v62, %v11168_v4  ;;  %v11228_v10 = vld [vmem:[%s16889_s11 + $0x1c] sm:$0xf]  ;;  %v7644_v62 = vsel %vm16915_vm3, %v7642_v61, %v7643_v50  ;;  %v7701_v28 = vor.u32 %v7700_v11, %v7697_v32 }
 0x975   :  { %v11930_v31 = vpop.f32.mrf.mxu1  ;;  %v7969_v34 = vrot.slane %v11228_v10, 5  ;;  %v7647_v50 = vsel %vm16915_vm3, %v7645_v30, %v7646_v24  ;;  %v8141_v10 = vshrl.u32 %v16912_v20, 16  ;;  %v16948_v24 = vld [vmem:[%s16889_s11 + $0x3c] sm:$0xf] }
 0x976   :  { %v11532_v48 = vpack.c.bf16 %v7610_v3, %v7610_v3  ;;  %v7608_v52 = vmul.f32 0.1, %v7597_v46  ;;  %v11931_v43 = vadd.f32 %v11930_v31, %v11929_v44  ;;  %v7706_v44 = vmul.bf16 %v16903_v63, %v7629_v27 }
 0x977   :  { %v11932_v42 = vpop.f32.mrf.mxu1  ;;  %v7692_v3 = vsel %vm14818_vm8, %v7683_v17, %v7691_v54  ;;  %v7968_v31 = vrot.slane %v7967_v55, 4  ;;  %v7971_v40 = vrot.slane %v7969_v34, 4  ;;  %v8149_v63 = vmul.bf16 %v16900_v26, %v8109_v39 }
 0x978   :  { %7626 = vst [vmem:[#allocation2 + $0x4] sm:$0xf] %v11532_v48  ;;  %v7611_v2 = vmax.f32 %v7597_v46, %v7608_v52  ;;  %v7602_v49 = vadd.f32 %v11931_v43, %v11168_v4  ;;  %v7693_v46 = vrot.slane %v7691_v54, 4  ;;  %v8135_v48 = vrot.slane %v8134_v38, 4  ;;  %v16952_v38 = vld [vmem:[%s16889_s11 + $0x40] sm:$0xf] }
 0x979   :  { %v11933_v9 = vpop.f32.mrf.mxu1  ;;  %v8139_v52 = vrot.slane %v8137_v14, 5  ;;  %v7973_v26 = vsel %vm14844_vm10, %v7971_v40, %v7972_v19  ;;  %v16955_v14 = vld [vmem:[%s16889_s11 + $0x60] sm:$0xf] }
 0x97a   :  { %v11533_v59 = vpack.c.bf16 %v7611_v2, %v7611_v2  ;;  %v7609_v4 = vmul.f32 0.1, %v7602_v49  ;;  %v7702_v6 = vsel %vm14818_vm8, %v7693_v46, %v7701_v28  ;;  %v7959_v2 = vld [vmem:[#allocation2] sm:$0x8]  ;;  %v11403_v28 = vld [vmem:[%s16889_s11 + $0x64] sm:$0xf] }
 0x97b   :  { %v8140_v9 = vsel %vm14236_vm14, %v8135_v48, %v8139_v52  ;;  %v8948_v40 = vrot.slane %v16955_v14, 6  ;;  %v13575_v52 = vld [vmem:[%s16860_s7 + $0xf0] sm:$0xff]  }
 0x97c   :  { %7627 = vst [vmem:[#allocation2 + $0x8] sm:$0xf] %v11533_v59  ;;  %v7612_v12 = vmax.f32 %v7602_v49, %v7609_v4  ;;  %v7970_v49 = vsel %vm14844_vm10, %v7968_v31, %v7969_v34  ;;  %v7977_v59 = vmul.bf16 %v7967_v55, %v7959_v2  ;;  %v8445_v31 = vshrl.u32 %v16952_v38, 16 }
 0x97e   :  { %v11534_v56 = vpack.c.bf16 %v7612_v12, %v7612_v12 }
 0x97f   :  { %v7630_v21 = vld [vmem:[#allocation2 + $0x4] sm:$0xf] }
 0x980   :  { %v16930_v51 = vld [vmem:[#allocation2 + $0x4] sm:$0xf]  ;;  %7628 = vst [vmem:[#allocation2 + $0xc] sm:$0x1] %v11534_v56  ;;  %v7652_v43 = vmul.bf16 %v7644_v62, %v7630_v21  ;;  %v7707_v35 = vmul.bf16 %v7692_v3, %v7630_v21  ;;  %v7978_v4 = vmul.bf16 %v7970_v49, %v7630_v21  ;;  %v8437_v56 = vshrl.u32 %v16948_v24, 16 }
 0x981   :  { %v8150_v42 = vmul.bf16 %v8130_v25, %v16930_v51 }
 0x982   :  { %v11217_v5 = vcombine.low %v7651_v57, %v7652_v43  ;;  %v11207_v47 = vcombine.low %v7706_v44, %v7707_v35  ;;  %v11317_v43 = vld [vmem:[%s16889_s11 + $0x44] sm:$0x1]  ;;  %v8439_v14 = vrot.slane %v8437_v56, 7 }
 0x983   :  { %v7631_v27 = vld [vmem:[#allocation2 + $0x8] sm:$0x7]  ;;  %v11276_v45 = vcombine.low %v8149_v63, %v8150_v42  ;;  %v11246_v42 = vcombine.low %v7977_v59, %v7978_v4 }
 0x984   :  { %v7670_v61 = vld [vmem:[#allocation2 + $0x8] sm:$0xf]  ;;  %v7653_v54 = vmul.bf16 %v7647_v50, %v7631_v27  ;;  %v7735_v11 = vshrl.u32 %v11207_v47, 16  ;;  %v7738_v60 = vshll.u32 %v11207_v47, 16  ;;  %v7858_v57 = vrot.slane %v11217_v5, 2 }
 0x985   :  { %v16942_v17 = vld [vmem:[#allocation2 + $0x8] sm:$0xf]  ;;  %v7708_v32 = vmul.bf16 %v7702_v6, %v7670_v61  ;;  %v7979_v33 = vmul.bf16 %v7973_v26, %v7670_v61  ;;  %v8181_v55 = vshrl.u32 %v11276_v45, 16  ;;  %v8184_v44 = vshll.u32 %v11276_v45, 16 }
 0x986   :  { %v11218_v30 = vcombine.low %v7653_v54, %v7653_v54  ;;  %v8151_v7 = vmul.bf16 %v8140_v9, %v16942_v17  ;;  %v7737_v12 = vrot.slane %v7735_v11, 2  ;;  %v7740_v62 = vrot.slane %v7738_v60, 3  ;;  %v11404_v6 = vld [vmem:[%s16889_s11 + $0x68] sm:$0x1] }
 0x987   :  { %v11208_v23 = vcombine.low %v7708_v32, %v7708_v32  ;;  %v16957_v20 = vld [vmem:[#allocation2 + $0xc] sm:$0x1]  ;;  %v11247_v25 = vcombine.low %v7979_v33, %v7979_v33  ;;  %v8183_v50 = vrot.slane %v8181_v55, 3  ;;  %v8950_v5 = vrot.slane %v11403_v28, 6  ;;  %v13576_v32 = vld [vmem:[%s16860_s7 + $0xb0] sm:$0xff]   ;;  %v13579_v55 = vld [vmem:[%s16860_s7 + $0xe0] sm:$0xff]  }
 0x988   :  { %v7859_v34 = vrot.slane %v11218_v30, 2  ;;  %v8152_v46 = vmul.bf16 %v8141_v10, %v16957_v20  ;;  %v7741_v35 = vor.u32 %v7740_v62, %v7737_v12  ;;  %v8186_v2 = vrot.slane %v8184_v44, 4  ;;  %v13577_v4 = vld [vmem:[%s16860_s7 + $0xe8] sm:$0xff]  }
 0x989   :  { %v7743_v39 = vshrl.u32 %v11208_v23, 16  ;;  %v7746_v3 = vshll.u32 %v11208_v23, 16  ;;  %v16969_v27 = vrot.slane %v11247_v25, 3  ;;  %v8454_v61 = vshrl.u32 %v11317_v43, 16 }
 0x98a   :  { %v7860_v19 = vsel %vm7857_vm7, %v7858_v57, %v7859_v34  ;;  %v11277_v63 = vcombine.low %v8151_v7, %v8152_v46  ;;  %v8949_v9 = vrot.slane %v8948_v40, 4  ;;  %v8952_v45 = vrot.slane %v8950_v5, 4  ;;  %v13578_v7 = vld [vmem:[%s16860_s7 + $0xa8] sm:$0xff]  }
 0x98b   :  { %v7745_v21 = vrot.slane %v7743_v39, 2  ;;  %v7748_v48 = vrot.slane %v7746_v3, 3  ;;  %13031 = vmatprep.mubr.bf16.mxu1 %v7860_v19  ;;  %v8953_v60 = vrot.slane %v11404_v6, 6  ;;  %v8005_v59 = vrot.slane %v11246_v42, 3  ;;  %v13580_v19 = vld [vmem:[%s16860_s7 + $0xa0] sm:$0xff]   ;;  %v13582_v42 = vld [vmem:[%s16860_s7 + $0x98] sm:$0xff]  }
 0x98c   :  { %13032 = vmatmul.mubr.bf16.vlgmr.msra.gmra.mxu1 %v7859_v34  ;;  %v8189_v49 = vshrl.u32 %v11277_v63, 16  ;;  %v8192_v26 = vshll.u32 %v11277_v63, 16  ;;  %v8187_v33 = vor.u32 %v8186_v2, %v8183_v50  ;;  %v8447_v30 = vrot.slane %v8445_v31, 7  ;;  %v16984_v34 = vld [vmem:[#allocation2 + $0xc] sm:$0x7]  ;;  %v13583_v50 = vld [vmem:[%s16860_s7 + $0xd0] sm:$0xff]  }
 0x98d   :  { %v7749_v47 = vor.u32 %v7748_v48, %v7745_v21  ;;  %13056 = vmatpush3.bf16.msra.mxu1 %v16879_v18  ;;  %v8448_v57 = vshll.u32 %v16952_v38, 16  ;;  %v8007_v23 = vsel %vm3108_vm11, %v8005_v59, %v16969_v27  ;;  %v8457_v12 = vshll.u32 %v11317_v43, 16  ;;  %v8940_v38 = vld [vmem:[#allocation2 + $0x4] sm:$0xc]  ;;  %v17001_v6 = vld [vmem:[#allocation2 + $0xc] sm:$0x3] }
 0x98e   :  { %13057 = vmatprep.subr.bf16.mxu1 %v13575_v52  ;;  %v8191_v11 = vrot.slane %v8189_v49, 3  ;;  %v8194_v10 = vrot.slane %v8192_v26, 4  ;;  %v8456_v44 = vrot.slane %v8454_v61, 7  ;;  %v8954_v39 = vsel %vm16915_vm3, %v8952_v45, %v8953_v60  ;;  %v13585_v61 = vld [vmem:[%s16860_s7 + $0xc8] sm:$0xff]   ;;  %v11373_v60 = vld [vmem:[%s16889_s11 + $0x54] sm:$0xf] }
 0x98f   :  { %v7750_v54 = vsel %vm2818_vm2, %v7741_v35, %v7749_v47  ;;  %v8443_v3 = vrot.slane %v8439_v14, 4  ;;  %v8450_v46 = vor.u32 %v8448_v57, %v8447_v30  ;;  %v8440_v28 = vshll.u32 %v16948_v24, 16  ;;  %v11374_v59 = vld [vmem:[%s16889_s11 + $0x58] sm:$0xf]  ;;  %v11375_v57 = vld [vmem:[%s16889_s11 + $0x5c] sm:$0x1] }
 0x990   :  { %13011 = vmatprep.mubr.bf16.mxu0 %v7750_v54  ;;  %v16974_v18 = vor.u32 %v8194_v10, %v8191_v11  ;;  %v8958_v25 = vmul.bf16 %v8948_v40, %v8940_v38  ;;  %v8960_v31 = vmul.bf16 %v8954_v39, %v16984_v34  ;;  %v8452_v21 = vrot.slane %v8447_v30, 4  ;;  %v13586_v54 = vld [vmem:[%s16860_s7 + $0x88] sm:$0xff]   ;;  %v13590_v38 = vld [vmem:[%s16860_s7 + $0x138] sm:$0xff]  }
 0x991   :  { %13012 = vmatmul.mubr.bf16.vlgmr.msra.gmra.mxu0 %v7749_v47  ;;  %13058 = vmatpush3.bf16.msra.mxu1 %v13575_v52  ;;  %v8459_v48 = vor.u32 %v8457_v12, %v8456_v44  ;;  %v8451_v43 = vsel %vm14075_vm6, %v8443_v3, %v8450_v46  ;;  %v8442_v24 = vor.u32 %v8440_v28, %v8439_v14  ;;  %v8767_v14 = vshll.u32 %v11373_v60, 16  ;;  %v13591_v28 = vld [vmem:[%s16860_s7 + $0x170] sm:$0xff]  }
 0x992   :  { %13036 = vmatpush3.bf16.msra.mxu0 %v16883_v1  ;;  %13051 = vmatprep.mubr.bf16.mxu0 %v8007_v23  ;;  %v8196_v62 = vsel %vm1945_vm1, %v8187_v33, %v16974_v18  ;;  %v8951_v1 = vsel %vm16915_vm3, %v8949_v9, %v8950_v5  ;;  %v11422_v63 = vcombine.low %v8960_v31, %v8960_v31  ;;  %v13589_v33 = vld [vmem:[%s16860_s7 + $0x178] sm:$0xff]   ;;  %v11287_v23 = vld [vmem:[%s16889_s11 + $0x34] sm:$0xf]  ;;  %v8773_v12 = vshrl.u32 %v11374_v59, 16 }
 0x993   :  { %13037 = vmatprep.subr.bf16.mxu0 %v13576_v32  ;;  %13059 = vmatprep.subr.bf16.mxu1 %v13577_v4  ;;  %v8959_v56 = vmul.bf16 %v8951_v1, %v16942_v17  ;;  %v8460_v5 = vsel %vm14075_vm6, %v8452_v21, %v8459_v48  ;;  %v8465_v47 = vmul.bf16 %v8451_v43, %v16942_v17  ;;  %v11286_v1 = vld [vmem:[%s16889_s11 + $0x30] sm:$0xf]  ;;  %v8783_v39 = vshrl.u32 %v11375_v57, 16 }
 0x994   :  { %13071 = vmatprep.mubr.bf16.mxu1 %v8196_v62  ;;  %v16997_v35 = vrot.slane %v11422_v63, 2  ;;  %v8464_v49 = vmul.bf16 %v8442_v24, %v16930_v51  ;;  %v8466_v26 = vmul.bf16 %v8460_v5, %v17001_v6  ;;  %v8776_v62 = vshll.u32 %v11374_v59, 16  ;;  %v13593_v24 = vld [vmem:[%s16860_s7 + $0x168] sm:$0xff]   ;;  %v13599_v59 = vld [vmem:[%s16860_s7 + $0x150] sm:$0xff]  }
 0x995   :  { %13060 = vmatpush3.bf16.msra.mxu1 %v13577_v4  ;;  %v11421_v52 = vcombine.low %v8958_v25, %v8959_v56  ;;  %v13588_v4 = vld [vmem:[%s16860_s7 + $0x80] sm:$0xff]   ;;  %v8786_v3 = vshll.u32 %v11375_v57, 16  ;;  %v8303_v25 = vmul.bf16 %v11287_v23, %v16942_v17  ;;  %v8769_v31 = vrot.slane %v8767_v14, 7  ;;  %v13601_v14 = vld [vmem:[%s16860_s7 + $0x148] sm:$0xff]  }
 0x996   :  { %13038 = vmatpush3.bf16.msra.mxu0 %v13576_v32  ;;  %13061 = vmatprep.subr.bf16.mxu1 %v13579_v55  ;;  %v11334_v9 = vcombine.low %v8464_v49, %v8465_v47  ;;  %v17014_v45 = vcombine.low %v8466_v26, %v8466_v26  ;;  %v13587_v32 = vld [vmem:[%s16860_s7 + $0xc0] sm:$0xff]   ;;  %v8302_v48 = vmul.bf16 %v11286_v1, %v16930_v51  ;;  %v8785_v63 = vrot.slane %v8783_v39, 6  ;;  %v13594_v51 = vld [vmem:[%s16860_s7 + $0x128] sm:$0xff]  }
 0x997   :  { %13039 = vmatprep.subr.bf16.mxu0 %v13578_v7  ;;  %v8986_v40 = vrot.slane %v11421_v52, 2  ;;  %v13592_v52 = vld [vmem:[%s16860_s7 + $0x130] sm:$0xff]   ;;  %v8788_v43 = vrot.slane %v8786_v3, 7  ;;  %v13595_v47 = vld [vmem:[%s16860_s7 + $0x160] sm:$0xff]   ;;  %v13602_v3 = vld [vmem:[%s16860_s7 + $0x108] sm:$0xff]   ;;  %vm10033_vm6 = vcmask 64512  }
 0x998   :  { %v8495_v11 = vshll.u32 %v11334_v9, 16  ;;  %v8500_v10 = vshll.u32 %v17014_v45, 16 }
 0x999   :  { %13062 = vmatpush3.bf16.msra.mxu1 %v13579_v55  ;;  %v17008_v2 = vsel %vm7857_vm7, %v8986_v40, %v16997_v35  ;;  %v8493_v55 = vshrl.u32 %v11334_v9, 16  ;;  %v8789_v5 = vor.u32 %v8788_v43, %v8785_v63  ;;  %v11344_v9 = vld [vmem:[%s16889_s11 + $0x48] sm:$0xf] }
 0x99a   :  { %13040 = vmatpush3.bf16.msra.mxu0 %v13578_v7  ;;  %13063 = vmatprep.subr.bf16.mxu1 %v13581_v37  ;;  %v8497_v30 = vrot.slane %v8495_v11, 1  ;;  %v8764_v7 = vshrl.u32 %v11373_v60, 16  ;;  %v17025_v44 = vrot.slane %v8500_v10, 1  ;;  %v13598_v11 = vld [vmem:[%s16860_s7 + $0x118] sm:$0xff]   ;;  %v8608_v10 = vld [vmem:[#allocation2 + $0x4] sm:$0xe] }
 0x99b   :  { %13041 = vmatprep.subr.bf16.mxu0 %v13580_v19  ;;  %v11346_v60 = vld [vmem:[%s16889_s11 + $0x50] sm:$0x1] }
 0x99c   :  { %v8498_v46 = vor.u32 %v8497_v30, %v8493_v55  ;;  %v8766_v56 = vrot.slane %v8764_v7, 6  ;;  %v8621_v7 = vrot.slane %v11346_v60, 7  ;;  %v13615_v60 = vld [vmem:[%s16860_s7 + $0x1d0] sm:$0xff]  }
 0x99d   :  { %13064 = vmatpush3.bf16.msra.mxu1 %v13581_v37  ;;  %v8778_v37 = vrot.slane %v8776_v62, 7 }
 0x99e   :  { %13042 = vmatpush3.bf16.msra.mxu0 %v13580_v19  ;;  %13065 = vmatprep.subr.bf16.mxu1 %v13583_v50  ;;  %v8775_v19 = vrot.slane %v8773_v12, 6  ;;  %v8503_v21 = vsel %vm1270_vm13, %v8498_v46, %v17025_v44  ;;  %v8770_v40 = vor.u32 %v8769_v31, %v8766_v56  ;;  %v13603_v46 = vld [vmem:[%s16860_s7 + $0x140] sm:$0xff]  }
 0x99f   :  { %13043 = vmatprep.subr.bf16.mxu0 %v13582_v42 }
 0x9a0   :  { %v8771_v49 = vrot.slane %v8770_v40, 4  ;;  %v8794_v53 = vmul.bf16 %v8770_v40, %v8608_v10 }
 0x9a1   :  { %13066 = vmatpush3.bf16.msra.mxu1 %v13583_v50 }
 0x9a2   :  { %13044 = vmatpush3.bf16.msra.mxu0 %v13582_v42  ;;  %13067 = vmatprep.subr.bf16.mxu1 %v13585_v61  ;;  %v8779_v42 = vor.u32 %v8778_v37, %v8775_v19 }
 0x9a3   :  { %13045 = vmatprep.subr.bf16.mxu0 %v13584_v0 }
 0x9a4   :  { %v8781_v50 = vrot.slane %v8779_v42, 4 }
 0x9a5   :  { %13068 = vmatpush3.bf16.msra.mxu1 %v13585_v61  ;;  %v8780_v61 = vsel %vm14179_vm9, %v8771_v49, %v8779_v42  ;;  %v8504_v42 = vshrl.u32 %v17014_v45, 16  ;;  %v13607_v49 = vld [vmem:[%s16860_s7 + $0x1f0] sm:$0xff]  }
 0x9a6   :  { %13046 = vmatpush3.bf16.msra.mxu0 %v13584_v0  ;;  %13069 = vmatprep.subr.bf16.mxu1 %v13587_v32  ;;  %v8790_v26 = vsel %vm14179_vm9, %v8781_v50, %v8789_v5  ;;  %v13597_v0 = vld [vmem:[%s16860_s7 + $0x158] sm:$0xff]  }
 0x9a7   :  { %13047 = vmatprep.subr.bf16.mxu0 %v13586_v54  ;;  %v8506_v50 = vor.u32 %v8504_v42, %v17025_v44  ;;  %v13609_v44 = vld [vmem:[%s16860_s7 + $0x1e8] sm:$0xff]  }
 0x9a9   :  { %13070 = vmatpush3.bf16.msra.mxu1 %v13587_v32  ;;  %v8796_v32 = vmul.bf16 %v8790_v26, %v16984_v34  ;;  %v13600_v34 = vld [vmem:[%s16860_s7 + $0x110] sm:$0xff]  }
 0x9aa   :  { %13048 = vmatpush3.bf16.msra.mxu0 %v13586_v54  ;;  %13095 = vmatprep.subr.bf16.mxu1 %v13589_v33  ;;  %v11345_v54 = vld [vmem:[%s16889_s11 + $0x4c] sm:$0xf] }
 0x9ab   :  { %13049 = vmatprep.subr.bf16.mxu0 %v13588_v4  ;;  %v8618_v30 = vrot.slane %v11345_v54, 7  ;;  %v11393_v57 = vcombine.low %v8796_v32, %v8796_v32  ;;  %v13611_v54 = vld [vmem:[%s16860_s7 + $0x1e0] sm:$0xff]  }
 0x9ac   :  { %13072 = vmatmul.mubr.bf16.vlgmr.msra.gmra.mxu1 %v16974_v18  ;;  %v11305_v18 = vcombine.low %v8302_v48, %v8303_v25  ;;  %v13612_v32 = vld [vmem:[%s16860_s7 + $0x1a0] sm:$0xff]  }
 0x9ad   :  { %13096 = vmatpush3.bf16.msra.mxu1 %v13589_v33  ;;  %13111 = vmatprep.mubr.bf16.mxu1 %v8503_v21  ;;  %v8616_v33 = vrot.slane %v11344_v9, 7  ;;  %v8620_v23 = vrot.slane %v8618_v30, 4  ;;  %v8831_v55 = vshrl.u32 %v11393_v57, 16  ;;  %v13604_v21 = vld [vmem:[%s16860_s7 + $0x100] sm:$0xff]   ;;  %v13610_v9 = vld [vmem:[%s16860_s7 + $0x1a8] sm:$0xff]  }
 0x9ae   :  { %13050 = vmatpush3.bf16.msra.mxu0 %v13588_v4  ;;  %13097 = vmatprep.subr.bf16.mxu1 %v13591_v28  ;;  %v8795_v4 = vmul.bf16 %v8780_v61, %v16942_v17 }
 0x9af   :  { %13075 = vmatprep.subr.bf16.mxu0 %v13590_v38  ;;  %v8617_v62 = vrot.slane %v8616_v33, 4  ;;  %v8622_v39 = vsel %vm14048_vm5, %v8620_v23, %v8621_v7  ;;  %v8833_v19 = vrot.slane %v8831_v55, 1  ;;  %v13622_v23 = vld [vmem:[%s16860_s7 + $0x230] sm:$0xff]   ;;  %v13623_v7 = vld [vmem:[%s16860_s7 + $0x228] sm:$0xff]   ;;  %v13628_v55 = vld [vmem:[%s16860_s7 + $0x200] sm:$0xff]  }
 0x9b0   :  { %v11392_v12 = vcombine.low %v8794_v53, %v8795_v4  ;;  %v8628_v31 = vmul.bf16 %v8622_v39, %v17001_v6  ;;  %v13617_v4 = vld [vmem:[%s16860_s7 + $0x1c8] sm:$0xff]   ;;  %v13620_v53 = vld [vmem:[%s16860_s7 + $0x180] sm:$0xff]  }
 0x9b1   :  { %13052 = vmatmul.mubr.bf16.vlgmr.msra.gmra.mxu0 %v16969_v27  ;;  %13098 = vmatpush3.bf16.msra.mxu1 %v13591_v28  ;;  %v13596_v27 = vld [vmem:[%s16860_s7 + $0x120] sm:$0xff]   ;;  %v8619_v56 = vsel %vm14048_vm5, %v8617_v62, %v8618_v30  ;;  %v13627_v62 = vld [vmem:[%s16860_s7 + $0x208] sm:$0xff]   ;;  %vm9098_vm5 = vcmask 146432  }
 0x9b2   :  { %13076 = vmatpush3.bf16.msra.mxu0 %v13590_v38  ;;  %13091 = vmatprep.mubr.bf16.mxu0 %v11305_v18  ;;  %v8834_v38 = vshll.u32 %v11393_v57, 16  ;;  %v8823_v28 = vshrl.u32 %v11392_v12, 16  ;;  %v8826_v25 = vshll.u32 %v11392_v12, 16  ;;  %v8627_v48 = vmul.bf16 %v8619_v56, %v16942_v17  ;;  %v11288_v18 = vld [vmem:[%s16889_s11 + $0x38] sm:$0x1]  ;;  %v13619_v30 = vld [vmem:[%s16860_s7 + $0x1c0] sm:$0xff]  }
 0x9b3   :  { %13077 = vmatprep.subr.bf16.mxu0 %v13592_v52  ;;  %13099 = vmatprep.subr.bf16.mxu1 %v13593_v24  ;;  %v11364_v40 = vcombine.low %v8628_v31, %v8628_v31  ;;  %v13621_v57 = vld [vmem:[%s16860_s7 + $0x238] sm:$0xff]   ;;  %v13626_v12 = vld [vmem:[%s16860_s7 + $0x210] sm:$0xff]  }
 0x9b4   :  { %v8836_v37 = vrot.slane %v8834_v38, 2  ;;  %v8825_v63 = vrot.slane %v8823_v28, 1  ;;  %v8828_v43 = vrot.slane %v8826_v25, 2 }
 0x9b5   :  { %13100 = vmatpush3.bf16.msra.mxu1 %v13593_v24  ;;  %v8626_v24 = vmul.bf16 %v8616_v33, %v8608_v10  ;;  %v13614_v10 = vld [vmem:[%s16860_s7 + $0x198] sm:$0xff]   ;;  %v13618_v33 = vld [vmem:[%s16860_s7 + $0x188] sm:$0xff]  }
 0x9b6   :  { %13078 = vmatpush3.bf16.msra.mxu0 %v13592_v52  ;;  %13101 = vmatprep.subr.bf16.mxu1 %v13595_v47  ;;  %v13605_v52 = vld [vmem:[%s16860_s7 + $0x1f8] sm:$0xff]   ;;  %v17067_v6 = vor.u32 %v8836_v37, %v8833_v19  ;;  %v8829_v5 = vor.u32 %v8828_v43, %v8825_v63  ;;  %v13644_v63 = vld [vmem:[%s17109_s19 + $0x68] ss:$12 sps:$4 sm:$0xff]  }
 0x9b7   :  { %13079 = vmatprep.subr.bf16.mxu0 %v13594_v51  ;;  %v11363_v17 = vcombine.low %v8626_v24, %v8627_v48  ;;  %v13636_v37 = vld [vmem:[%s17109_s19 + $0x98] ss:$12 sps:$4 sm:$0xff]  }
 0x9b8   :  { %v8838_v45 = vsel %vm1600_vm15, %v8829_v5, %v17067_v6 }
 0x9b9   :  { %13102 = vmatpush3.bf16.msra.mxu1 %v13595_v47  ;;  %v13606_v47 = vld [vmem:[%s16860_s7 + $0x1b8] sm:$0xff]  }
 0x9ba   :  { %13080 = vmatpush3.bf16.msra.mxu0 %v13594_v51  ;;  %13103 = vmatprep.subr.bf16.mxu1 %v13597_v0  ;;  %v8304_v51 = vmul.bf16 %v11288_v18, %v16957_v20  ;;  %v8654_v20 = vrot.slane %v11363_v17, 1 }
 0x9bb   :  { %13081 = vmatprep.subr.bf16.mxu0 %v13596_v27 }
 0x9bc   :  { %v11306_v26 = vcombine.low %v8304_v51, %v8304_v51  ;;  %v13648_v51 = vld [vmem:[%s17109_s19 + $0x50] ss:$12 sps:$4 sm:$0xff]  }
 0x9bd   :  { %13104 = vmatpush3.bf16.msra.mxu1 %v13597_v0  ;;  %v13608_v0 = vld [vmem:[%s16860_s7 + $0x1b0] sm:$0xff]  }
 0x9be   :  { %13082 = vmatpush3.bf16.msra.mxu0 %v13596_v27  ;;  %13105 = vmatprep.subr.bf16.mxu1 %v13599_v59  ;;  %v8655_v27 = vrot.slane %v11364_v40, 1 }
 0x9bf   :  { %13083 = vmatprep.subr.bf16.mxu0 %v13598_v11 }
 0x9c0   :  { %v8656_v61 = vsel %vm1110_vm12, %v8654_v20, %v8655_v27 }
 0x9c1   :  { %13106 = vmatpush3.bf16.msra.mxu1 %v13599_v59  ;;  %v13616_v59 = vld [vmem:[%s16860_s7 + $0x190] sm:$0xff]  }
 0x9c2   :  { %13084 = vmatpush3.bf16.msra.mxu0 %v13598_v11  ;;  %13107 = vmatprep.subr.bf16.mxu1 %v13601_v14  ;;  %v13613_v11 = vld [vmem:[%s16860_s7 + $0x1d8] sm:$0xff]  }
 0x9c3   :  { %13085 = vmatprep.subr.bf16.mxu0 %v13600_v34 }
 0x9c5   :  { %13108 = vmatpush3.bf16.msra.mxu1 %v13601_v14  ;;  %v13625_v14 = vld [vmem:[%s16860_s7 + $0x218] sm:$0xff]  }
 0x9c6   :  { %13086 = vmatpush3.bf16.msra.mxu0 %v13600_v34  ;;  %13109 = vmatprep.subr.bf16.mxu1 %v13603_v46  ;;  %v13624_v34 = vld [vmem:[%s16860_s7 + $0x220] sm:$0xff]  }
 0x9c7   :  { %13087 = vmatprep.subr.bf16.mxu0 %v13602_v3 }
 0x9c9   :  { %13110 = vmatpush3.bf16.msra.mxu1 %v13603_v46 }
 0x9ca   :  { %13088 = vmatpush3.bf16.msra.mxu0 %v13602_v3  ;;  %13135 = vmatprep.subr.bf16.mxu1 %v13605_v52 }
 0x9cb   :  { %13089 = vmatprep.subr.bf16.mxu0 %v13604_v21 }
 0x9cc   :  { %13112 = vmatmul.mubr.bf16.vlgmr.msra.gmra.mxu1 %v8506_v50 }
 0x9cd   :  { %13136 = vmatpush3.bf16.msra.mxu1 %v13605_v52  ;;  %13151 = vmatprep.mubr.bf16.mxu1 %v8838_v45 }
 0x9ce   :  { %13090 = vmatpush3.bf16.msra.mxu0 %v13604_v21  ;;  %13137 = vmatprep.subr.bf16.mxu1 %v13607_v49  ;;  %v13640_v21 = vld [vmem:[%s17109_s19 + $0x80] ss:$12 sps:$4 sm:$0xff]  }
 0x9cf   :  { %13115 = vmatprep.subr.bf16.mxu0 %v13606_v47 }
 0x9d1   :  { %13092 = vmatmul.mubr.bf16.vlgmr.msra.gmra.mxu0 %v11306_v26  ;;  %13138 = vmatpush3.bf16.msra.mxu1 %v13607_v49  ;;  %v13652_v49 = vld [vmem:[%s17109_s19 + $0x38] ss:$12 sps:$4 sm:$0xff]  }
 0x9d2   :  { %13116 = vmatpush3.bf16.msra.mxu0 %v13606_v47  ;;  %13131 = vmatprep.mubr.bf16.mxu0 %v8656_v61 }
 0x9d3   :  { %13117 = vmatprep.subr.bf16.mxu0 %v13608_v0  ;;  %13139 = vmatprep.subr.bf16.mxu1 %v13609_v44 }
 0x9d5   :  { %13140 = vmatpush3.bf16.msra.mxu1 %v13609_v44 }
 0x9d6   :  { %13118 = vmatpush3.bf16.msra.mxu0 %v13608_v0  ;;  %13141 = vmatprep.subr.bf16.mxu1 %v13611_v54 }
 0x9d7   :  { %13119 = vmatprep.subr.bf16.mxu0 %v13610_v9 }
 0x9d9   :  { %13142 = vmatpush3.bf16.msra.mxu1 %v13611_v54 }
 0x9da   :  { %13120 = vmatpush3.bf16.msra.mxu0 %v13610_v9  ;;  %13143 = vmatprep.subr.bf16.mxu1 %v13613_v11 }
 0x9db   :  { %13121 = vmatprep.subr.bf16.mxu0 %v13612_v32 }
 0x9dd   :  { %13144 = vmatpush3.bf16.msra.mxu1 %v13613_v11 }
 0x9de   :  { %13122 = vmatpush3.bf16.msra.mxu0 %v13612_v32  ;;  %13145 = vmatprep.subr.bf16.mxu1 %v13615_v60 }
 0x9df   :  { %13123 = vmatprep.subr.bf16.mxu0 %v13614_v10 }
 0x9e1   :  { %13146 = vmatpush3.bf16.msra.mxu1 %v13615_v60 }
 0x9e2   :  { %13124 = vmatpush3.bf16.msra.mxu0 %v13614_v10  ;;  %13147 = vmatprep.subr.bf16.mxu1 %v13617_v4 }
 0x9e3   :  { %13125 = vmatprep.subr.bf16.mxu0 %v13616_v59 }
 0x9e5   :  { %13148 = vmatpush3.bf16.msra.mxu1 %v13617_v4 }
 0x9e6   :  { %13126 = vmatpush3.bf16.msra.mxu0 %v13616_v59  ;;  %13149 = vmatprep.subr.bf16.mxu1 %v13619_v30 }
 0x9e7   :  { %13127 = vmatprep.subr.bf16.mxu0 %v13618_v33 }
 0x9e9   :  { %13150 = vmatpush3.bf16.msra.mxu1 %v13619_v30 }
 0x9ea   :  { %13128 = vmatpush3.bf16.msra.mxu0 %v13618_v33  ;;  %13175 = vmatprep.subr.mxu1 %v17378_v15 }
 0x9eb   :  { %13129 = vmatprep.subr.bf16.mxu0 %v13620_v53 }
 0x9ec   :  { %13152 = vmatmul.mubr.bf16.vlgmr.msra.gmra.mxu1 %v17067_v6 }
 0x9ed   :  { %13181 = vmatprep.mubr.msk.f32.mxu1 %vm13733_vm0, %v17378_v15 }
 0x9ee   :  { %13130 = vmatpush3.bf16.msra.mxu0 %v13620_v53 }
 0x9ef   :  { %13155 = vmatprep.subr.bf16.mxu0 %v13621_v57 }
 0x9f1   :  { %13132 = vmatmul.mubr.bf16.vlgmr.msra.gmra.mxu0 %v8655_v27 }
 0x9f2   :  { %13156 = vmatpush3.bf16.msra.mxu0 %v13621_v57  ;;  %13171 = vmatprep.mubr.bf16.mxu0 %v17008_v2 }
 0x9f3   :  { %13157 = vmatprep.subr.bf16.mxu0 %v13622_v23 }
 0x9f6   :  { %13158 = vmatpush3.bf16.msra.mxu0 %v13622_v23 }
 0x9f7   :  { %13159 = vmatprep.subr.bf16.mxu0 %v13623_v7 }
 0x9fa   :  { %13160 = vmatpush3.bf16.msra.mxu0 %v13623_v7 }
 0x9fb   :  { %13161 = vmatprep.subr.bf16.mxu0 %v13624_v34 }
 0x9fe   :  { %13162 = vmatpush3.bf16.msra.mxu0 %v13624_v34 }
 0x9ff   :  { %13163 = vmatprep.subr.bf16.mxu0 %v13625_v14 }
 0xa02   :  { %13164 = vmatpush3.bf16.msra.mxu0 %v13625_v14 }
 0xa03   :  { %13165 = vmatprep.subr.bf16.mxu0 %v13626_v12 }
 0xa06   :  { %13166 = vmatpush3.bf16.msra.mxu0 %v13626_v12 }
 0xa07   :  { %13167 = vmatprep.subr.bf16.mxu0 %v13627_v62 }
 0xa0a   :  { %13168 = vmatpush3.bf16.msra.mxu0 %v13627_v62 }
 0xa0b   :  { %13169 = vmatprep.subr.bf16.mxu0 %v13628_v55 }
 0xa0e   :  { %13170 = vmatpush3.bf16.msra.mxu0 %v13628_v55 }
 0xa0f   :  { %13184 = vmatprep.subr.bf16.mxu0 %v17378_v15 }
 0xa11   :  { %13172 = vmatmul.mubr.bf16.vlgmr.msra.gmra.mxu0 %v16997_v35  ;;  %v13632_v35 = vld [vmem:[%s17109_s19 + $0xb0] ss:$12 sps:$4 sm:$0xff]  }
 0xa12   :  { %13200 = vmatprep.mubr.msk.bf16.mxu0 %vm13733_vm0, %v17378_v15  ;;  %13185 = vmatpush3.bf16.msra.mxu0 %v13632_v35 }
 0xa13   :  { %13186 = vmatprep.subr.bf16.mxu0 %v17378_v15 }
 0xa16   :  { %13187 = vmatpush3.bf16.msra.mxu0 %v13636_v37  ;;  %v17129_v37 = vld [vmem:[%s10408_s23] sm:$0xff] }
 0xa17   :  { %13188 = vmatprep.subr.bf16.mxu0 %v17378_v15 }
 0xa1a   :  { %13189 = vmatpush3.bf16.msra.mxu0 %v13640_v21  ;;  %v13629_v21 = vld [vmem:[%s17109_s19 + $0xa8] ss:$12 sps:$4 sm:$0xff]  }
 0xa1b   :  { %13190 = vmatprep.subr.bf16.mxu0 %v17378_v15 }
 0xa1e   :  { %13191 = vmatpush3.bf16.msra.mxu0 %v13644_v63  ;;  %v13639_v63 = vld [vmem:[%s17109_s19 + $0x7c] ss:$12 sps:$4 sm:$0xff]  }
 0xa1f   :  { %13192 = vmatprep.subr.bf16.mxu0 %v17378_v15 }
 0xa22   :  { %13193 = vmatpush3.bf16.msra.mxu0 %v13648_v51  ;;  %v13653_v51 = vld [vmem:[%s17109_s19 + $0x18] ss:$12 sps:$4 sm:$0xff]  }
 0xa23   :  { %13194 = vmatprep.subr.bf16.mxu0 %v17378_v15 }
 0xa26   :  { %13195 = vmatpush3.bf16.msra.mxu0 %v13652_v49  ;;  %v13657_v49 = vld [vmem:[%s17109_s19] ss:$12 sps:$4 sm:$0xff]  }
 0xa27   :  { %13196 = vmatprep.subr.bf16.mxu0 %v17378_v15 }
 0xa4c   :  { %v13033_v2 = vpop.f32.mrf.mxu1 }
 0xa4e   :  { %v7945_v38 = vpop.f32.mrf.mxu1 }
 0xa50   :  { %v13034_v39 = vpop.f32.mrf.mxu1 }
 0xa51   :  { %v13013_v1 = vpop.f32.mrf.mxu0 }
 0xa52   :  { %v7954_v3 = vadd.f32 %v13033_v2, %v13013_v1  ;;  %v7948_v56 = vpop.f32.mrf.mxu1 }
 0xa53   :  { %v7835_v46 = vpop.f32.mrf.mxu0 }
 0xa54   :  { %v7946_v28 = vadd.f32 %v7945_v38, %v7835_v46 }
 0xa55   :  { %v13014_v25 = vpop.f32.mrf.mxu0 }
 0xa57   :  { %v7838_v31 = vpop.f32.mrf.mxu0 }
 0xa58   :  { %v7949_v19 = vadd.f32 %v7948_v56, %v7838_v31 }
 0xa6c   :  { %v13073_v48 = vpop.f32.mrf.mxu1 }
 0xa6e   :  { %v8281_v52 = vpop.f32.mrf.mxu1 }
 0xa70   :  { %v13074_v18 = vpop.f32.mrf.mxu1 }
 0xa71   :  { %v13053_v43 = vpop.f32.mrf.mxu0  ;;  %v13643_v18 = vld [vmem:[%s17109_s19 + $0x64] ss:$12 sps:$4 sm:$0xff]  }
 0xa72   :  { %v8108_v24 = vadd.f32 %v13053_v43, %v7954_v3  ;;  %v8284_v27 = vpop.f32.mrf.mxu1  ;;  %v13637_v43 = vld [vmem:[%s17109_s19 + $0x78] ss:$12 sps:$4 sm:$0xff]  }
 0xa73   :  { %v8092_v40 = vpop.f32.mrf.mxu0 }
 0xa74   :  { %v8106_v42 = vadd.f32 %v8092_v40, %v7946_v28  ;;  %v8297_v6 = vadd.f32 %v13073_v48, %v8108_v24  ;;  %v13635_v48 = vld [vmem:[%s17109_s19 + $0x94] ss:$12 sps:$4 sm:$0xff]   ;;  %v13647_v40 = vld [vmem:[%s17109_s19 + $0x4c] ss:$12 sps:$4 sm:$0xff]  }
 0xa75   :  { %v13054_v17 = vpop.f32.mrf.mxu0  ;;  %v13641_v24 = vld [vmem:[%s17109_s19 + $0x60] ss:$12 sps:$4 sm:$0xff]  }
 0xa76   :  { %v8295_v50 = vadd.f32 %v8281_v52, %v8106_v42  ;;  %v13633_v52 = vld [vmem:[%s17109_s19 + $0x90] ss:$12 sps:$4 sm:$0xff]   ;;  %v13645_v42 = vld [vmem:[%s17109_s19 + $0x48] ss:$12 sps:$4 sm:$0xff]  }
 0xa77   :  { %v8095_v5 = vpop.f32.mrf.mxu0  ;;  %v13655_v17 = vld [vmem:[%s17109_s19 + $0x1c] ss:$12 sps:$4 sm:$0xff]  }
 0xa78   :  { %v8107_v47 = vadd.f32 %v8095_v5, %v7949_v19  ;;  %v13631_v19 = vld [vmem:[%s17109_s19 + $0xac] ss:$12 sps:$4 sm:$0xff]   ;;  %v13659_v5 = vld [vmem:[%s17109_s19 + $0x4] ss:$12 sps:$4 sm:$0xff]  }
 0xa7a   :  { %v8296_v45 = vadd.f32 %v8284_v27, %v8107_v47  ;;  %v13660_v47 = vld [vmem:[%s17109_s19 + $0x8] ss:$12 sps:$4 sm:$0xff]   ;;  %v13663_v27 = vld [vmem:[%s17156_s27 + $0xac] ss:$12 sps:$4 sm:$0xff]  }
 0xa8c   :  { %v13113_v26 = vpop.f32.mrf.mxu1 }
 0xa8e   :  { %v8591_v20 = vpop.f32.mrf.mxu1 }
 0xa90   :  { %v13114_v44 = vpop.f32.mrf.mxu1 }
 0xa91   :  { %v13093_v0 = vpop.f32.mrf.mxu0 }
 0xa92   :  { %v8594_v11 = vpop.f32.mrf.mxu1  ;;  %v8430_v57 = vadd.f32 %v13093_v0, %v8297_v6  ;;  %v13649_v6 = vld [vmem:[%s17109_s19 + $0x30] ss:$12 sps:$4 sm:$0xff]  }
 0xa93   :  { %v8414_v61 = vpop.f32.mrf.mxu0 }
 0xa94   :  { %v8428_v9 = vadd.f32 %v8414_v61, %v8295_v50  ;;  %v8607_v23 = vadd.f32 %v13113_v26, %v8430_v57  ;;  %v13656_v50 = vld [vmem:[%s17109_s19 + $0x20] ss:$12 sps:$4 sm:$0xff]  }
 0xa95   :  { %v13094_v54 = vpop.f32.mrf.mxu0  ;;  %13197 = vmatpush3.bf16.msra.mxu0 %v13656_v50  ;;  %v11431_v26 = vld [vmem:[%s10402_s1] ss:$0 sm:$0xff]  ;;  %v13719_v50 = vld [vmem:[%s17156_s27 + $0xd8] ss:$12 sps:$4 sm:$0xff]  }
 0xa96   :  { %v8605_v32 = vadd.f32 %v8591_v20, %v8428_v9  ;;  %13198 = vmatprep.subr.bf16.mxu0 %v17378_v15  ;;  %v13661_v54 = vld [vmem:[%s17156_s27 + $0xa8] ss:$12 sps:$4 sm:$0xff]   ;;  %v13675_v57 = vld [vmem:[%s17156_s27 + $0x80] ss:$12 sps:$4 sm:$0xff]  }
 0xa97   :  { %v8417_v60 = vpop.f32.mrf.mxu0 }
 0xa98   :  { %v8429_v7 = vadd.f32 %v8417_v60, %v8296_v45  ;;  %v13664_v45 = vld [vmem:[%s17156_s27 + $0x170] ss:$12 sps:$4 sm:$0xff]   ;;  %v13669_v60 = vld [vmem:[%s17156_s27 + $0x158] ss:$12 sps:$4 sm:$0xff]  }
 0xa99   :  { %13199 = vmatpush3.bf16.msra.mxu0 %v13660_v47  ;;  %v13722_v47 = vld [vmem:[%s17156_s27 + $0xc0] ss:$12 sps:$4 sm:$0xff]  }
 0xa9a   :  { %v8606_v12 = vadd.f32 %v8594_v11, %v8429_v7  ;;  %12038 = vmatprep.subr.bf16.mxu0 %v13664_v45  ;;  %v13679_v7 = vld [vmem:[%s17156_s27 + $0x128] ss:$12 sps:$4 sm:$0xff]  }
 0xaac   :  { %v13153_v10 = vpop.f32.mrf.mxu1 }
 0xaae   :  { %v8923_v59 = vpop.f32.mrf.mxu1 }
 0xab0   :  { %v13154_v33 = vpop.f32.mrf.mxu1 }
 0xab1   :  { %v13133_v4 = vpop.f32.mrf.mxu0  ;;  %v13673_v33 = vld [vmem:[%s17156_s27 + $0x7c] ss:$12 sps:$4 sm:$0xff]  }
 0xab2   :  { %v8757_v34 = vadd.f32 %v13133_v4, %v8607_v23  ;;  %v8926_v3 = vpop.f32.mrf.mxu1  ;;  %v13670_v4 = vld [vmem:[%s17156_s27 + $0x98] ss:$12 sps:$4 sm:$0xff]  }
 0xab3   :  { %v8741_v30 = vpop.f32.mrf.mxu0  ;;  %v13678_v23 = vld [vmem:[%s17156_s27 + $0x64] ss:$12 sps:$4 sm:$0xff]  }
 0xab4   :  { %v8939_v62 = vadd.f32 %v13153_v10, %v8757_v34  ;;  %v8755_v39 = vadd.f32 %v8741_v30, %v8605_v32  ;;  %v13665_v32 = vld [vmem:[%s17156_s27 + $0xb0] ss:$12 sps:$4 sm:$0xff]   ;;  %v13668_v10 = vld [vmem:[%s17156_s27 + $0x94] ss:$12 sps:$4 sm:$0xff]  }
 0xab5   :  { %v13134_v53 = vpop.f32.mrf.mxu0  ;;  %v13674_v30 = vld [vmem:[%s17156_s27 + $0x140] ss:$12 sps:$4 sm:$0xff]   ;;  %v13680_v34 = vld [vmem:[%s17156_s27 + $0x68] ss:$12 sps:$4 sm:$0xff]  }
 0xab6   :  { %v8937_v56 = vadd.f32 %v8923_v59, %v8755_v39  ;;  %v13666_v59 = vld [vmem:[%s17156_s27 + $0x90] ss:$12 sps:$4 sm:$0xff]   ;;  %v13671_v53 = vld [vmem:[%s17156_s27 + $0x78] ss:$12 sps:$4 sm:$0xff]  }
 0xab7   :  { %v8744_v14 = vpop.f32.mrf.mxu0  ;;  %v13690_v39 = vld [vmem:[%s17156_s27 + $0x38] ss:$12 sps:$4 sm:$0xff]  }
 0xab8   :  { %v8756_v2 = vadd.f32 %v8744_v14, %v8606_v12  ;;  %v13683_v14 = vld [vmem:[%s17156_s27 + $0x4c] ss:$12 sps:$4 sm:$0xff]   ;;  %v13684_v12 = vld [vmem:[%s17156_s27 + $0x110] ss:$12 sps:$4 sm:$0xff]  }
 0xaba   :  { %v8938_v28 = vadd.f32 %v8926_v3, %v8756_v2  ;;  %v13688_v2 = vld [vmem:[%s17156_s27 + $0x34] ss:$12 sps:$4 sm:$0xff]   ;;  %v13693_v3 = vld [vmem:[%s17156_s27 + $0x1c] ss:$12 sps:$4 sm:$0xff]  }
 0xad1   :  { %v13173_v55 = vpop.f32.mrf.mxu0 }
 0xad2   :  { %v9089_v38 = vadd.f32 %v13173_v55, %v8939_v62  ;;  %v13681_v62 = vld [vmem:[%s17156_s27 + $0x48] ss:$12 sps:$4 sm:$0xff]   ;;  %v13685_v55 = vld [vmem:[%s17156_s27 + $0x50] ss:$12 sps:$4 sm:$0xff]  }
 0xad3   :  { %v9073_v1 = vpop.f32.mrf.mxu0 }
 0xad4   :  { %13176 = vmatpush3.msk.msra.mxu1 %vm7638_vm4, %v9089_v38  ;;  %v9087_v35 = vadd.f32 %v9073_v1, %v8937_v56  ;;  %v13689_v38 = vld [vmem:[%s17156_s27 + $0xf8] ss:$12 sps:$4 sm:$0xff]   ;;  %v13686_v1 = vld [vmem:[%s17156_s27 + $0x30] ss:$12 sps:$4 sm:$0xff]  }
 0xad5   :  { %v13174_v46 = vpop.f32.mrf.mxu0  ;;  %13177 = vmatprep.subr.mxu1 %v17378_v15  ;;  %v13698_v56 = vld [vmem:[%s17156_s27 + $0x4] ss:$12 sps:$4 sm:$0xff]  }
 0xad6   :  { %v13694_v46 = vld [vmem:[%s17156_s27 + $0xe0] ss:$12 sps:$4 sm:$0xff]  }
 0xad7   :  { %v9076_v25 = vpop.f32.mrf.mxu0 }
 0xad8   :  { %v9088_v31 = vadd.f32 %v9076_v25, %v8938_v28  ;;  %v13691_v28 = vld [vmem:[%s17156_s27 + $0x18] ss:$12 sps:$4 sm:$0xff]   ;;  %v13695_v25 = vld [vmem:[%s17156_s27 + $0x20] ss:$12 sps:$4 sm:$0xff]  }
 0xada   :  { %13178 = vmatpush3.msra.mxu1 %v9088_v31  ;;  %v13699_v31 = vld [vmem:[%s17156_s27 + $0xc8] ss:$12 sps:$4 sm:$0xff]  }
 0xadb   :  { %13179 = vmatprep.subr.mxu1 %v17378_v15 }
 0xadc   :  { %13180 = vmatpush3.msra.mxu1 %v9087_v35  ;;  %v13700_v35 = vld [vmem:[%s17156_s27 + $0x8] ss:$12 sps:$4 sm:$0xff]  }
 0xadd   :  { %13182 = vmatmul.mubr.msk.f32.vlgmr.msra.gmra.mxu1 %vm9098_vm5, %v17129_v37  ;;  %9356 = vmatprep.subr.bf16.mxu1 %v13631_v19  ;;  %v13696_v19 = vld [vmem:[%s17156_s27] ss:$12 sps:$4 sm:$0xff]  }
 0xade   :  { %9357 = vmatpush1.bf16.msra.mxu1 %v13629_v21  ;;  %9388 = vmatprep.mubr.bf16.mxu1 %v17431_v22  ;;  %v13651_v22 = vld [vmem:[%s17109_s19 + $0x34] ss:$12 sps:$4 sm:$0xff]   ;;  %v13703_v21 = vld [vmem:[%s17156_s27 + $0x16c] ss:$12 sps:$4 sm:$0xff]  }
 0xadf   :  { %9358 = vmatprep.subr.bf16.mxu1 %v13635_v48  ;;  %v13701_v48 = vld [vmem:[%s17156_s27 + $0x168] ss:$12 sps:$4 sm:$0xff]  }
 0xae2   :  { %9359 = vmatpush1.bf16.msra.mxu1 %v13633_v52  ;;  %v13706_v52 = vld [vmem:[%s17156_s27 + $0x154] ss:$12 sps:$4 sm:$0xff]  }
 0xae3   :  { %9360 = vmatprep.subr.bf16.mxu1 %v13639_v63  ;;  %v13704_v63 = vld [vmem:[%s17156_s27 + $0x150] ss:$12 sps:$4 sm:$0xff]  }
 0xae6   :  { %9361 = vmatpush1.bf16.msra.mxu1 %v13637_v43  ;;  %v13709_v43 = vld [vmem:[%s17156_s27 + $0x13c] ss:$12 sps:$4 sm:$0xff]  }
 0xae7   :  { %9362 = vmatprep.subr.bf16.mxu1 %v13643_v18  ;;  %v13707_v18 = vld [vmem:[%s17156_s27 + $0x138] ss:$12 sps:$4 sm:$0xff]  }
 0xaea   :  { %9363 = vmatpush1.bf16.msra.mxu1 %v13641_v24  ;;  %v13712_v24 = vld [vmem:[%s17156_s27 + $0x124] ss:$12 sps:$4 sm:$0xff]  }
 0xaeb   :  { %9364 = vmatprep.subr.bf16.mxu1 %v13647_v40  ;;  %v13710_v40 = vld [vmem:[%s17156_s27 + $0x120] ss:$12 sps:$4 sm:$0xff]  }
 0xaee   :  { %9365 = vmatpush1.bf16.msra.mxu1 %v13645_v42  ;;  %v13715_v42 = vld [vmem:[%s17156_s27 + $0x10c] ss:$12 sps:$4 sm:$0xff]  }
 0xaef   :  { %9366 = vmatprep.subr.bf16.mxu1 %v13651_v22  ;;  %v13713_v22 = vld [vmem:[%s17156_s27 + $0x108] ss:$12 sps:$4 sm:$0xff]  }
 0xaf2   :  { %9367 = vmatpush1.bf16.msra.mxu1 %v13649_v6  ;;  %v13718_v6 = vld [vmem:[%s17156_s27 + $0xf4] ss:$12 sps:$4 sm:$0xff]  }
 0xaf3   :  { %9368 = vmatprep.subr.bf16.mxu1 %v13655_v17  ;;  %v13721_v17 = vld [vmem:[%s17156_s27 + $0xdc] ss:$12 sps:$4 sm:$0xff]  }
 0xaf6   :  { %9369 = vmatpush1.bf16.msra.mxu1 %v13653_v51  ;;  %v13716_v51 = vld [vmem:[%s17156_s27 + $0xf0] ss:$12 sps:$4 sm:$0xff]  }
 0xaf7   :  { %9370 = vmatprep.subr.bf16.mxu1 %v13659_v5  ;;  %v13724_v5 = vld [vmem:[%s17156_s27 + $0xc4] ss:$12 sps:$4 sm:$0xff]  }
 0xafa   :  { %9371 = vmatpush1.bf16.msra.mxu1 %v13657_v49  ;;  %v9223_v49 = vsub.s32 2, %v16801_v36 }
 0xafb   :  { %9774 = vmatprep.subr.bf16.mxu1 %v13663_v27  ;;  %v17222_v27 = vld [vmem:[%s10404_s5] sm:$0x7] }
 0xafc   :  { %v9224_v45 = vrot.slane %v17222_v27, %v9223_v49 }
 0xb9d   :  { %v9172_v20 = vpop.f32.mrf.mxu1 }
 0xb9e   :  { %v9173_v0 = vadd.f32 %v11431_v26, %v9172_v20 }
 0xb9f   :  { %v13183_v44 = vpop.f32.mrf.mxu1 }
 0xba0   :  { %v9176_v61 = vmul.f32 0.1, %v9173_v0 }
 0xba2   :  { %v9177_v9 = vmax.f32 %v9173_v0, %v9176_v61 }
 0xba4   :  { %v9178_v11 = vpack.c.bf16 %v9177_v9, %v9177_v9 }
 0xba6   :  { %9389 = vmatmul.mubr.bf16.vlgmr.msra.gmra.mxu1 %v9178_v11  ;;  %13201 = vmatmul.mubr.bf16.vlgmr.msra.gmra.mxu0 %v9178_v11 }
 0xba7   :  { %9775 = vmatpush1.bf16.msra.mxu1 %v13661_v54  ;;  %12039 = vmatpush3.bf16.msra.mxu0 %v13665_v32 }
 0xba8   :  { %9806 = vmatprep.mubr.bf16.mxu1 %v16847_v58  ;;  %9857 = vmatprep.mubr.bf16.mxu0 %v16847_v58  ;;  %v13676_v58 = vld [vmem:[%s17156_s27 + $0x60] ss:$12 sps:$4 sm:$0xff]  }
 0xba9   :  { %9776 = vmatprep.subr.bf16.mxu1 %v13668_v10  ;;  %12040 = vmatprep.subr.bf16.mxu0 %v13669_v60 }
 0xbab   :  { %9777 = vmatpush1.bf16.msra.mxu1 %v13666_v59  ;;  %12041 = vmatpush3.bf16.msra.mxu0 %v13670_v4 }
 0xbac   :  { %9778 = vmatprep.subr.bf16.mxu1 %v13673_v33  ;;  %12042 = vmatprep.subr.bf16.mxu0 %v13674_v30 }
 0xbaf   :  { %9779 = vmatpush1.bf16.msra.mxu1 %v13671_v53  ;;  %12043 = vmatpush3.bf16.msra.mxu0 %v13675_v57 }
 0xbb0   :  { %9780 = vmatprep.subr.bf16.mxu1 %v13678_v23  ;;  %12044 = vmatprep.subr.bf16.mxu0 %v13679_v7  ;;  %v9501_v23 = vld [vmem:[%s10406_s9] sm:$0x7] }
 0xbb3   :  { %9781 = vmatpush1.bf16.msra.mxu1 %v13676_v58  ;;  %12045 = vmatpush3.bf16.msra.mxu0 %v13680_v34  ;;  %v9510_v58 = vrot.slane %v9501_v23, %v16804_v13  ;;  %v9506_v34 = vrot.slane %v9501_v23, %v16807_v41 }
 0xbb4   :  { %9782 = vmatprep.subr.bf16.mxu1 %v13683_v14  ;;  %12046 = vmatprep.subr.bf16.mxu0 %v13684_v12 }
 0xbb7   :  { %9783 = vmatpush1.bf16.msra.mxu1 %v13681_v62  ;;  %12047 = vmatpush3.bf16.msra.mxu0 %v13685_v55 }
 0xbb8   :  { %9784 = vmatprep.subr.bf16.mxu1 %v13688_v2  ;;  %12048 = vmatprep.subr.bf16.mxu0 %v13689_v38 }
 0xbbb   :  { %9785 = vmatpush1.bf16.msra.mxu1 %v13686_v1  ;;  %12049 = vmatpush3.bf16.msra.mxu0 %v13690_v39 }
 0xbbc   :  { %9786 = vmatprep.subr.bf16.mxu1 %v13693_v3  ;;  %12050 = vmatprep.subr.bf16.mxu0 %v13694_v46  ;;  %v9514_v46 = vrot.slane %v9501_v23, %v9223_v49  ;;  %v10185_v49 = vld [vmem:[%s17252_s13 + $0x38] sm:$0xff] }
 0xbbf   :  { %9787 = vmatpush1.bf16.msra.mxu1 %v13691_v28  ;;  %12051 = vmatpush3.bf16.msra.mxu0 %v13695_v25 }
 0xbc0   :  { %9788 = vmatprep.subr.bf16.mxu1 %v13698_v56  ;;  %12052 = vmatprep.subr.bf16.mxu0 %v13699_v31 }
 0xbc3   :  { %9789 = vmatpush1.bf16.msra.mxu1 %v13696_v19  ;;  %12053 = vmatpush3.bf16.msra.mxu0 %v13700_v35 }
 0xbc4   :  { %9790 = vmatprep.subr.bf16.mxu1 %v13703_v21  ;;  %v10209_v21 = vld [vmem:[%s17252_s13 + $0xf8] sm:$0xff] }
 0xbc6   :  { %9858 = vmatmul.mubr.bf16.vlgmr.msra.gmra.mxu0 %v16845_v8 }
 0xbc7   :  { %9791 = vmatpush2.bf16.msra.mxu1 %v13701_v48  ;;  %9865 = vmatprep.mubr.bf16.mxu0 %v16851_v29  ;;  %v10208_v48 = vld [vmem:[%s17252_s13 + $0xf0] sm:$0xff] }
 0xbc8   :  { %9792 = vmatprep.subr.bf16.mxu1 %v13706_v52  ;;  %v10192_v52 = vld [vmem:[%s17252_s13 + $0x70] sm:$0xff] }
 0xbcb   :  { %9793 = vmatpush2.bf16.msra.mxu1 %v13704_v63  ;;  %v10207_v63 = vld [vmem:[%s17252_s13 + $0xe8] sm:$0xff] }
 0xbcc   :  { %9794 = vmatprep.subr.bf16.mxu1 %v13709_v43  ;;  %v10191_v43 = vld [vmem:[%s17252_s13 + $0x68] sm:$0xff] }
 0xbce   :  { %9866 = vmatmul.mubr.bf16.gmra.mxu0 %v16854_v16 }
 0xbcf   :  { %9795 = vmatpush2.bf16.msra.mxu1 %v13707_v18  ;;  %9946 = vmatprep.mubr.f32.mxu0 %v17378_v15  ;;  %v10206_v18 = vld [vmem:[%s17252_s13 + $0xe0] sm:$0xff] }
 0xbd0   :  { %9796 = vmatprep.subr.bf16.mxu1 %v13712_v24  ;;  %v10190_v24 = vld [vmem:[%s17252_s13 + $0x60] sm:$0xff] }
 0xbd3   :  { %9797 = vmatpush2.bf16.msra.mxu1 %v13710_v40  ;;  %v10205_v40 = vld [vmem:[%s17252_s13 + $0xd8] sm:$0xff] }
 0xbd4   :  { %9798 = vmatprep.subr.bf16.mxu1 %v13715_v42  ;;  %v10189_v42 = vld [vmem:[%s17252_s13 + $0x58] sm:$0xff] }
 0xbd7   :  { %9799 = vmatpush2.bf16.msra.mxu1 %v13713_v22  ;;  %v10204_v22 = vld [vmem:[%s17252_s13 + $0xd0] sm:$0xff] }
 0xbd8   :  { %9800 = vmatprep.subr.bf16.mxu1 %v13718_v6  ;;  %v10188_v6 = vld [vmem:[%s17252_s13 + $0x50] sm:$0xff] }
 0xbdb   :  { %9801 = vmatpush2.bf16.msra.mxu1 %v13716_v51  ;;  %v10203_v51 = vld [vmem:[%s17252_s13 + $0xc8] sm:$0xff] }
 0xbdc   :  { %9802 = vmatprep.subr.bf16.mxu1 %v13721_v17  ;;  %v10187_v17 = vld [vmem:[%s17252_s13 + $0x48] sm:$0xff] }
 0xbdf   :  { %9803 = vmatpush2.bf16.msra.mxu1 %v13719_v50  ;;  %v10202_v50 = vld [vmem:[%s17252_s13 + $0xc0] sm:$0xff] }
 0xbe0   :  { %9804 = vmatprep.subr.bf16.mxu1 %v13724_v5  ;;  %v10186_v5 = vld [vmem:[%s17252_s13 + $0x40] sm:$0xff] }
 0xbe3   :  { %9805 = vmatpush2.bf16.msra.mxu1 %v13722_v47  ;;  %v10201_v47 = vld [vmem:[%s17252_s13 + $0xb8] sm:$0xff] }
 0xbe4   :  { %12072 = vmatprep.subr.mxu1 %v10209_v21  ;;  %v10212_v21 = vld [vmem:[%s17252_s13 + $0x110] sm:$0xff] }
 0xbe6   :  { %9807 = vmatmul.mubr.bf16.vlgmr.msra.gmra.mxu1 %v16845_v8 }
 0xbe7   :  { %9816 = vmatprep.mubr.bf16.mxu1 %v16851_v29 }
 0xbee   :  { %9817 = vmatmul.mubr.bf16.gmra.mxu1 %v16854_v16 }
 0xc66   :  { %v17225_v26 = vpop.f32.mrf.mxu1  ;;  %v9431_v20 = vpop.f32.mrf.mxu0 }
 0xc67   :  { %v17227_v0 = vadd.f32 %v9431_v20, %v9224_v45  ;;  %v10200_v45 = vld [vmem:[%s17252_s13 + $0xb0] sm:$0xff] }
 0xc68   :  { %v17229_v8 = vpop.f32.mrf.mxu1  ;;  %v13202_v29 = vpop.f32.mrf.mxu0  ;;  %v10184_v20 = vld [vmem:[%s17252_s13 + $0x30] sm:$0xff] }
 0xc69   :  { %v10199_v29 = vld [vmem:[%s17252_s13 + $0xa8] sm:$0xff] }
 0xc6a   :  { %v9394_v16 = vpop.f32.mrf.mxu1  ;;  %v9434_v44 = vpop.f32.mrf.mxu0 }
 0xc6b   :  { %v10183_v16 = vld [vmem:[%s17252_s13 + $0x28] sm:$0xff]  ;;  %v10198_v44 = vld [vmem:[%s17252_s13 + $0xa0] sm:$0xff] }
 0xc6c   :  { %v9395_v61 = vpop.f32.mrf.mxu1  ;;  %v13203_v9 = vpop.f32.mrf.mxu0 }
 0xc6d   :  { %v10182_v61 = vld [vmem:[%s17252_s13 + $0x20] sm:$0xff]  ;;  %v10197_v9 = vld [vmem:[%s17252_s13 + $0x98] sm:$0xff] }
 0xc86   :  { %v12054_v54 = vpop.f32.mrf.mxu0 }
 0xc88   :  { %v12055_v32 = vpop.f32.mrf.mxu0 }
 0xc89   :  { %v12056_v56 = vadd.f32 %v12055_v32, %v12054_v54  ;;  %v10181_v54 = vld [vmem:[%s17252_s13 + $0x18] sm:$0xff]  ;;  %v10196_v32 = vld [vmem:[%s17252_s13 + $0x90] sm:$0xff] }
 0xc8a   :  { %v12057_v11 = vpop.f32.mrf.mxu0 }
 0xc8b   :  { %v9860_v35 = vadd.f32 %v12056_v56, %v9514_v46  ;;  %v10214_v56 = vld [vmem:[%s17252_s13 + $0x120] sm:$0xff] }
 0xc8c   :  { %v12058_v36 = vpop.f32.mrf.mxu0 }
 0xc8d   :  { %v12059_v28 = vadd.f32 %v12058_v36, %v12057_v11  ;;  %v10180_v11 = vld [vmem:[%s17252_s13 + $0x10] sm:$0xff]  ;;  %v9216_v36 = vrot.slane %v17222_v27, %v16807_v41 }
 0xc8e   :  { %v12060_v10 = vpop.f32.mrf.mxu0 }
 0xc8f   :  { %v9863_v19 = vadd.f32 %v12059_v28, %v9514_v46  ;;  %v10195_v28 = vld [vmem:[%s17252_s13 + $0x88] sm:$0xff] }
 0xc90   :  { %v12061_v60 = vpop.f32.mrf.mxu0 }
 0xc91   :  { %v12062_v38 = vadd.f32 %v12061_v60, %v12060_v10  ;;  %v9220_v10 = vrot.slane %v17222_v27, %v16804_v13  ;;  %v9391_v60 = vadd.f32 %v17225_v26, %v9216_v36  ;;  %v10032_v26 = vld [vmem:[%s10409_s17] sm:$0xff] }
 0xc92   :  { %v12063_v59 = vpop.f32.mrf.mxu0 }
 0xc93   :  { %v9868_v31 = vadd.f32 %v12062_v38, %v9514_v46  ;;  %v10219_v38 = vld [vmem:[%s17252_s13 + $0x148] sm:$0xff] }
 0xc94   :  { %v12064_v4 = vpop.f32.mrf.mxu0  ;;  %v10215_v46 = vld [vmem:[%s17252_s13 + $0x128] sm:$0xff] }
 0xc95   :  { %v9393_v4 = vadd.f32 %v17229_v8, %v9220_v10 }
 0xca6   :  { %v9808_v33 = vpop.f32.mrf.mxu1 }
 0xca7   :  { %v9809_v25 = vadd.f32 %v9808_v33, %v9506_v34 }
 0xca8   :  { %v9810_v30 = vpop.f32.mrf.mxu1 }
 0xca9   :  { %v9811_v3 = vadd.f32 %v9810_v30, %v9510_v58 }
 0xcaa   :  { %v9812_v53 = vpop.f32.mrf.mxu1 }
 0xcab   :  { %v9813_v1 = vadd.f32 %v9812_v53, %v9506_v34 }
 0xcac   :  { %v9814_v57 = vpop.f32.mrf.mxu1 }
 0xcad   :  { %v9815_v2 = vadd.f32 %v9814_v57, %v9510_v58 }
 0xcae   :  { %v9818_v7 = vpop.f32.mrf.mxu1 }
 0xcaf   :  { %v9819_v62 = vadd.f32 %v9818_v7, %v9506_v34 }
 0xcb0   :  { %v9820_v14 = vpop.f32.mrf.mxu1 }
 0xcb1   :  { %v9821_v12 = vadd.f32 %v9820_v14, %v9510_v58  ;;  %v10224_v14 = vld [vmem:[%s17252_s13 + $0x170] sm:$0xff] }
 0xcb2   :  { %v9822_v55 = vpop.f32.mrf.mxu1 }
 0xcb3   :  { %11506 = vmatprep.subr.msk.mxu0 %vm7638_vm4, %v9821_v12  ;;  %v10223_v12 = vld [vmem:[%s17252_s13 + $0x168] sm:$0xff]  ;;  %v10221_v55 = vld [vmem:[%s17252_s13 + $0x158] sm:$0xff] }
 0xcb4   :  { %v9823_v39 = vpop.f32.mrf.mxu1  ;;  %11507 = vmatpush1.msk.msra.mxu0 %vm7638_vm4, %v9819_v62  ;;  %v10222_v62 = vld [vmem:[%s17252_s13 + $0x160] sm:$0xff] }
 0xcb5   :  { %9910 = vmatprep.subr.mxu0 %v9815_v2  ;;  %v10220_v2 = vld [vmem:[%s17252_s13 + $0x150] sm:$0xff]  ;;  %v10217_v39 = vld [vmem:[%s17252_s13 + $0x138] sm:$0xff] }
 0xcb6   :  { %9911 = vmatpush1.msra.mxu0 %v9813_v1  ;;  %v10218_v1 = vld [vmem:[%s17252_s13 + $0x140] sm:$0xff] }
 0xcb7   :  { %9912 = vmatprep.subr.mxu0 %v9811_v3  ;;  %v10216_v3 = vld [vmem:[%s17252_s13 + $0x130] sm:$0xff] }
 0xcb8   :  { %9913 = vmatpush1.msra.mxu0 %v9809_v25  ;;  %v10179_v25 = vld [vmem:[%s17252_s13 + $0x8] sm:$0xff] }
 0xcb9   :  { %11508 = vmatmul.mubr.msk.f32.vlgmr.msra.gmra.mxu0 %vm9098_vm5, %v17129_v37  ;;  %13204 = vmatprep.subr.mxu0 %v17378_v15 }
 0xcba   :  { %13205 = vmatpush3.msk.msra.mxu0 %vm7638_vm4, %v9868_v31  ;;  %13210 = vmatprep.mubr.msk.f32.mxu0 %vm13733_vm0, %v17378_v15  ;;  %v10194_v31 = vld [vmem:[%s17252_s13 + $0x80] sm:$0xff] }
 0xcbb   :  { %13206 = vmatprep.subr.mxu0 %v17378_v15 }
 0xcbc   :  { %13207 = vmatpush3.msra.mxu0 %v9863_v19  ;;  %v10178_v19 = vld [vmem:[%s17252_s13] sm:$0xff] }
 0xcbd   :  { %13208 = vmatprep.subr.mxu0 %v17378_v15 }
 0xcbe   :  { %13209 = vmatpush3.msra.mxu0 %v9860_v35  ;;  %v10213_v35 = vld [vmem:[%s17252_s13 + $0x118] sm:$0xff] }
 0xcbf   :  { %13211 = vmatmul.mubr.msk.f32.vlgmr.msra.gmra.mxu0 %vm9098_vm5, %v17129_v37  ;;  %v10193_v37 = vld [vmem:[%s17252_s13 + $0x78] sm:$0xff] }
 0xcc0   :  { %10101 = vmatprep.mubr.f32.mxu0 %v17378_v15  ;;  %12073 = vmatpush3.msra.mxu1 %v10193_v37  ;;  %v10211_v37 = vld [vmem:[%s17252_s13 + $0x108] sm:$0xff] }
 0xcc1   :  { %12074 = vmatprep.subr.mxu1 %v10208_v48  ;;  %v10210_v48 = vld [vmem:[%s17252_s13 + $0x100] sm:$0xff] }
 0xcc2   :  { %12075 = vmatpush3.msra.mxu1 %v10192_v52 }
 0xcc3   :  { %12076 = vmatprep.subr.mxu1 %v10207_v63 }
 0xcc4   :  { %12077 = vmatpush3.msra.mxu1 %v10191_v43 }
 0xcc5   :  { %12078 = vmatprep.subr.mxu1 %v10206_v18 }
 0xcc6   :  { %12079 = vmatpush3.msra.mxu1 %v10190_v24 }
 0xcc7   :  { %12080 = vmatprep.subr.mxu1 %v10205_v40 }
 0xcc8   :  { %12081 = vmatpush3.msra.mxu1 %v10189_v42  ;;  %v11513_v42 = vld [vmem:[%s10411_s21] ss:$0 sm:$0xff] }
 0xcc9   :  { %12082 = vmatprep.subr.mxu1 %v10204_v22 }
 0xcca   :  { %12083 = vmatpush3.msra.mxu1 %v10188_v6 }
 0xccb   :  { %12084 = vmatprep.subr.mxu1 %v10203_v51 }
 0xccc   :  { %12085 = vmatpush3.msra.mxu1 %v10187_v17 }
 0xccd   :  { %12086 = vmatprep.subr.mxu1 %v10202_v50 }
 0xcce   :  { %12087 = vmatpush3.msra.mxu1 %v10186_v5 }
 0xccf   :  { %12088 = vmatprep.subr.mxu1 %v10201_v47 }
 0xcd0   :  { %12089 = vmatpush3.msra.mxu1 %v10185_v49 }
 0xcd1   :  { %12090 = vmatprep.subr.mxu1 %v10200_v45 }
 0xcd2   :  { %12091 = vmatpush3.msra.mxu1 %v10184_v20 }
 0xcd3   :  { %12092 = vmatprep.subr.mxu1 %v10199_v29 }
 0xcd4   :  { %12093 = vmatpush3.msra.mxu1 %v10183_v16 }
 0xcd5   :  { %12094 = vmatprep.subr.mxu1 %v10198_v44 }
 0xcd6   :  { %12095 = vmatpush3.msra.mxu1 %v10182_v61 }
 0xcd7   :  { %12096 = vmatprep.subr.mxu1 %v10197_v9 }
 0xcd8   :  { %12097 = vmatpush3.msra.mxu1 %v10181_v54 }
 0xcd9   :  { %12098 = vmatprep.subr.mxu1 %v10196_v32 }
 0xcda   :  { %12099 = vmatpush3.msra.mxu1 %v10180_v11 }
 0xcdb   :  { %12100 = vmatprep.subr.mxu1 %v10195_v28 }
 0xcdc   :  { %12101 = vmatpush3.msra.mxu1 %v10179_v25 }
 0xcdd   :  { %12102 = vmatprep.subr.mxu1 %v10194_v31 }
 0xcde   :  { %12103 = vmatpush3.msra.mxu1 %v10178_v19 }
 0xd79   :  { %v9948_v59 = vpop.f32.mrf.mxu0 }
 0xd7a   :  { %v10023_v33 = vadd.f32 %v9948_v59, %v9391_v60 }
 0xd7b   :  { %v9950_v30 = vpop.f32.mrf.mxu0 }
 0xd7c   :  { %v10024_v53 = vadd.f32 %v9950_v30, %v9393_v4  ;;  %v10026_v57 = vmul.f32 0.1, %v10023_v33 }
 0xd7e   :  { %v10027_v23 = vmul.f32 0.1, %v10024_v53  ;;  %v10029_v27 = vmax.f32 %v10023_v33, %v10026_v57 }
 0xd7f   :  { %v10019_v41 = vpop.f32.mrf.mxu0 }
 0xd80   :  { %v10030_v7 = vmax.f32 %v10024_v53, %v10027_v23  ;;  %v10025_v13 = vadd.f32 %v10019_v41, %v17227_v0  ;;  %v10225_v0 = vld [vmem:[%s17252_s13 + $0x178] sm:$0xff] }
 0xd81   :  { %v13212_v58 = vpop.f32.mrf.mxu0 }
 0xd82   :  { %v10028_v34 = vmul.f32 0.1, %v10025_v13  ;;  %10067 = vmatprep.subr.mxu0 %v10030_v7 }
 0xd83   :  { %10068 = vmatpush1.msra.mxu0 %v10029_v27 }
 0xd84   :  { %v10031_v8 = vmax.f32 %v10025_v13, %v10028_v34  ;;  %13213 = vmatprep.subr.mxu0 %v17378_v15  ;;  %11511 = vmatmul.mubr.msk.f32.vlgmr.msra.gmra.mxu0 %vm10033_vm6, %v10032_v26 }
 0xd85   :  { %13215 = vmatprep.mubr.msk.f32.mxu0 %vm13733_vm0, %v17378_v15 }
 0xd86   :  { %13214 = vmatpush3.msra.mxu0 %v10031_v8 }
 0xd87   :  { %13218 = vmatprep.subr.mxu0 %v17378_v15 }
 0xd88   :  { %13216 = vmatmul.mubr.msk.f32.vlgmr.msra.gmra.mxu0 %vm10033_vm6, %v10032_v26 }
 0xd89   :  { %13219 = vmatpush3.msra.mxu0 %v10225_v0  ;;  %13250 = vmatprep.mubr.msk.f32.mxu0 %vm13733_vm0, %v17378_v15 }
 0xd8a   :  { %13220 = vmatprep.subr.mxu0 %v17378_v15 }
 0xd8b   :  { %13221 = vmatpush3.msra.mxu0 %v10224_v14 }
 0xd8c   :  { %13222 = vmatprep.subr.mxu0 %v17378_v15 }
 0xd8d   :  { %13223 = vmatpush3.msra.mxu0 %v10223_v12 }
 0xd8e   :  { %13224 = vmatprep.subr.mxu0 %v17378_v15 }
 0xd8f   :  { %13225 = vmatpush3.msra.mxu0 %v10222_v62 }
 0xd90   :  { %13226 = vmatprep.subr.mxu0 %v17378_v15 }
 0xd91   :  { %13227 = vmatpush3.msra.mxu0 %v10221_v55 }
 0xd92   :  { %13228 = vmatprep.subr.mxu0 %v17378_v15 }
 0xd93   :  { %13229 = vmatpush3.msra.mxu0 %v10220_v2 }
 0xd94   :  { %13230 = vmatprep.subr.mxu0 %v17378_v15 }
 0xd95   :  { %13231 = vmatpush3.msra.mxu0 %v10219_v38 }
 0xd96   :  { %13232 = vmatprep.subr.mxu0 %v17378_v15 }
 0xd97   :  { %13233 = vmatpush3.msra.mxu0 %v10218_v1 }
 0xd98   :  { %13234 = vmatprep.subr.mxu0 %v17378_v15 }
 0xd99   :  { %13235 = vmatpush3.msra.mxu0 %v10217_v39 }
 0xd9a   :  { %13236 = vmatprep.subr.mxu0 %v17378_v15 }
 0xd9b   :  { %13237 = vmatpush3.msra.mxu0 %v10216_v3 }
 0xd9c   :  { %13238 = vmatprep.subr.mxu0 %v17378_v15 }
 0xd9d   :  { %13239 = vmatpush3.msra.mxu0 %v10215_v46 }
 0xd9e   :  { %13240 = vmatprep.subr.mxu0 %v17378_v15 }
 0xd9f   :  { %13241 = vmatpush3.msra.mxu0 %v10214_v56 }
 0xda0   :  { %13242 = vmatprep.subr.mxu0 %v17378_v15 }
 0xda1   :  { %13243 = vmatpush3.msra.mxu0 %v10213_v35 }
 0xda2   :  { %13244 = vmatprep.subr.mxu0 %v17378_v15 }
 0xda3   :  { %13245 = vmatpush3.msra.mxu0 %v10212_v21 }
 0xda4   :  { %13246 = vmatprep.subr.mxu0 %v17378_v15 }
 0xda5   :  { %13247 = vmatpush3.msra.mxu0 %v10211_v37 }
 0xda6   :  { %13248 = vmatprep.subr.mxu0 %v17378_v15 }
 0xda7   :  { %13249 = vmatpush3.msra.mxu0 %v10210_v48 }
 0xe44   :  { %v10103_v52 = vpop.f32.mrf.mxu0 }
 0xe46   :  { %v10105_v63 = vpop.f32.mrf.mxu0 }
 0xe47   :  { %10297 = vmatprep.mubr.f32.mxu1 %v10105_v63 }
 0xe48   :  { %10298 = vmatmul.mubr.f32.vlgmr.msra.gmra.mxu1 %v10103_v52  ;;  %v10174_v43 = vpop.f32.mrf.mxu0 }
 0xe49   :  { %13251 = vmatmul.mubr.f32.vlgmr.msra.gmra.mxu0 %v10174_v43 }
 0xe4a   :  { %v13217_v18 = vpop.f32.mrf.mxu0 }
 0xf08   :  { %v12104_v24 = vpop.f32.mrf.mxu1 }
 0xf09   :  { %v10369_v15 = vpop.f32.mrf.mxu0 }
 0xf0a   :  { %v12105_v40 = vpop.f32.mrf.mxu1 }
 0xf0b   :  { %v12106_v22 = vadd.f32 %v12105_v40, %v12104_v24  ;;  %v13252_v6 = vpop.f32.mrf.mxu0 }
 0xf0d   :  { %v10300_v51 = vadd.f32 %v12106_v22, %v11513_v42 }
 0xf0f   :  { %v10370_v17 = vadd.f32 %v10369_v15, %v10300_v51 }
 0xf11   :  { %10373 = vst [vmem:[%s10412_s25] sm:$0xff] %v10370_v17 }

</bundles_post_ra>
